<compile_context>
chip_gen: v7x
topology: tpu7x:2x2x1
jax: 0.10.0
libtpu: 0.0.40
codegen_flags: <defaults>
</compile_context>

<pallas_src>
import math

import numpy as np
import jax
import jax.numpy as jnp
from jax.experimental import pallas as pl
from jax.experimental.pallas import tpu as pltpu

MEMORY_SIZE = 8        # stand-in for json_load['memory']
MASK_SIZE = 16         # mask_size (default 5 makes conv2 ill-posed; use 16)
N_OBJ = 16             # stand-in for len(objects) in the GCN
D_MODEL = 300
N_HEAD = 5
HEAD_DIM = D_MODEL // N_HEAD
NHID = 1024
LN_EPS = 1e-5
ATT_SCALE = 1.0 / math.sqrt(HEAD_DIM)

BF16 = jnp.bfloat16
F32 = jnp.float32


def _vmem():
    return pl.BlockSpec(memory_space=pltpu.MemorySpace.VMEM)


# ----------------------------- Pallas kernels -----------------------------

def _linear_relu_kernel(x_ref, w_ref, b_ref, o_ref):
    o_ref[...] = jnp.maximum(
        jnp.dot(x_ref[...].astype(BF16), w_ref[...],
                preferred_element_type=F32) + b_ref[...], 0.0)


def linear_relu(x, w_bf16, b2d):
    m = x.shape[0]
    n = w_bf16.shape[1]
    return pl.pallas_call(
        _linear_relu_kernel,
        out_shape=jax.ShapeDtypeStruct((m, n), F32),
        in_specs=[_vmem()] * 3,
        out_specs=_vmem(),
    )(x, w_bf16, b2d)


def _gcn_kernel(pooled_ref, sr_w, sr_b, r2g_w, r2g_b, w1i, b1, wgc1,
                a_ref, w2, b2, w3, b3, mapw, mapb, o_ref):
    # One image per grid step: ResNet surrogate -> gc1 -> gc2 -> gc3 -> mapping.
    p = pooled_ref[0].astype(BF16)                                        # (1,300)
    s = jnp.dot(p, sr_w[...], preferred_element_type=F32) + sr_b[...]     # (1,1000)
    re = jnp.dot(s.astype(BF16), r2g_w[...],
                 preferred_element_type=F32) + r2g_b[...]                 # (1,512)
    # x_cat @ gc1_w  ==  (resnet_embed @ gc1_w[:512]) broadcast over objects
    #                   + (word_embedding @ gc1_w[512:])  [precomputed]
    xw1 = jnp.dot(re.astype(BF16), w1i[...],
                  preferred_element_type=F32) + wgc1[...]                 # (16,1024)
    a = a_ref[...]                                                        # (16,16) bf16
    h = jnp.maximum(jnp.dot(a, xw1.astype(BF16),
                            preferred_element_type=F32) + b1[...], 0.0)
    h = jnp.dot(h.astype(BF16), w2[...], preferred_element_type=F32)
    h = jnp.maximum(jnp.dot(a, h.astype(BF16),
                            preferred_element_type=F32) + b2[...], 0.0)
    sc = jnp.dot(h.astype(BF16), w3[...], preferred_element_type=F32)     # (16,128) lane-padded gc3
    sc = jnp.maximum(jnp.dot(a, sc.astype(BF16),
                             preferred_element_type=F32) + b3[...], 0.0)
    s0 = sc[:, 0:1]                                                       # (16,1)
    # mapping: reshape(s,(1,N_OBJ)) @ map_w  ==  sum_j s[j] * map_w[j]
    o_ref[0] = jnp.sum(s0 * mapw[...], axis=0, keepdims=True) + mapb[...]


def gcn_embed(pooled, gp):
    m = pooled.shape[0]
    pooled3 = pooled.reshape(m, 1, 300)
    weights = (gp['sr_w'], gp['sr_b'], gp['r2g_w'], gp['r2g_b'],
               gp['gc1_w_img'], gp['gc1_b'], gp['word_gc1'], gp['A'],
               gp['gc2_w'], gp['gc2_b'], gp['gc3_w'], gp['gc3_b'],
               gp['map_w'], gp['map_b'])
    w_specs = [pl.BlockSpec(w.shape, lambda i: (0, 0)) for w in weights]
    out = pl.pallas_call(
        _gcn_kernel,
        out_shape=jax.ShapeDtypeStruct((m, 1, 512), F32),
        grid=(m,),
        in_specs=[pl.BlockSpec((1, 1, 300), lambda i: (i, 0, 0))] + w_specs,
        out_specs=pl.BlockSpec((1, 1, 512), lambda i: (i, 0, 0)),
        compiler_params=pltpu.CompilerParams(
            dimension_semantics=("parallel",),
            vmem_limit_bytes=32 * 1024 * 1024),
    )(pooled3, *weights)
    return out.reshape(m, 512)


def _trunk_kernel(j_ref, g_ref, wmj, wmg, bm, keep, pe, tgt_ref, amask,
                  W, B, LNg, LNb, z_ref, wct, wcz, bct, o_ref):
    # fc_merge + relu + padded-row zero + PositionalEncoding_Sum + transformer
    # (1 enc layer, 1 dec layer, post-LN, final norms) + fc_merge_context head.
    def mm(x, w):
        return jnp.dot(x.astype(BF16), w, preferred_element_type=F32)

    def ln(y, i):
        mu = jnp.mean(y, axis=-1, keepdims=True)
        yc = y - mu
        var = jnp.mean(yc * yc, axis=-1, keepdims=True)
        return yc * jax.lax.rsqrt(var + LN_EPS) * LNg[i] + LNb[i]

    def mha(xq, xkv, w0, mask):
        q = mm(xq, W[w0 + 0]) + B[w0 + 0]
        k = mm(xkv, W[w0 + 1]) + B[w0 + 1]
        v = mm(xkv, W[w0 + 2]) + B[w0 + 2]
        heads = []
        for h in range(N_HEAD):
            sl = slice(h * HEAD_DIM, (h + 1) * HEAD_DIM)
            s = jnp.einsum('qd,kd->qk', q[:, sl], k[:, sl],
                           preferred_element_type=F32) * ATT_SCALE + mask
            s = s - jnp.max(s, axis=-1, keepdims=True)
            p = jnp.exp(s)
            p = p * pl.reciprocal(jnp.sum(p, axis=-1, keepdims=True), approx=True)
            heads.append(jnp.dot(p, v[:, sl], preferred_element_type=F32))
        ctx = jnp.concatenate(heads, axis=-1)
        return mm(ctx, W[w0 + 3]) + B[w0 + 3]

    # fc_merge (pre-split weights avoid the in-kernel concat) + relu
    h = jnp.maximum(mm(j_ref[...], wmj[...]) + mm(g_ref[...], wmg[...]) + bm[...], 0.0)
    h = jnp.where(keep[...] > 0.5, h, 0.0)      # NaN-robust padded-row zeroing
    src = h + pe[...]                           # PositionalEncoding_Sum (spec module)
    tgt = tgt_ref[...]
    am = amask[...]
    zero_mask = jnp.zeros((1, 1), F32)

    # encoder layer + final encoder LN
    src = ln(src + mha(src, src, 0, am), 0)
    ff = mm(jnp.maximum(mm(src, W[4]) + B[4], 0.0), W[5]) + B[5]
    src = ln(src + ff, 1)
    mem = ln(src, 2)

    # decoder layer + final decoder LN
    t = ln(tgt + mha(tgt, tgt, 6, zero_mask), 3)
    t = ln(t + mha(t, mem, 10, am), 4)
    ff = mm(jnp.maximum(mm(t, W[14]) + B[14], 0.0), W[15]) + B[15]
    t = ln(t + ff, 5)
    t = ln(t, 6)

    # fc_merge_context head on [t, zflat] (pre-split weights, no concat)
    o_ref[...] = jnp.maximum(mm(t, wct[...]) + mm(z_ref[...], wcz[...]) + bct[...], 0.0)


def trunk(j, g, keep, add_mask, tgt, zflat, params):
    tr = params['tr']
    return pl.pallas_call(
        _trunk_kernel,
        out_shape=jax.ShapeDtypeStruct((1, D_MODEL), F32),
        in_specs=[_vmem()] * 17,
        out_specs=_vmem(),
        compiler_params=pltpu.CompilerParams(vmem_limit_bytes=32 * 1024 * 1024),
    )(j, g, params['mrg_w_j'], params['mrg_w_g'], params['mrg_b'],
      keep, params['pe8'], tgt, add_mask,
      tr['W'], tr['B'], tr['ln_g'], tr['ln_b'],
      zflat, params['ctx_w_t'], params['ctx_w_z'], params['ctx_b'])


# ----------------------------- XLA-side pieces -----------------------------

def conv_path(z_img, w1, b1, w2, b2):
    # Tiny context-conv path (~50 KB). Left to XLA inside the jit
    # (review-sanctioned: a Pallas kernel here is pure launch overhead).
    def conv(x, w, b):
        y = jax.lax.conv_general_dilated(
            x, w, window_strides=(1, 1), padding='VALID',
            dimension_numbers=('NCHW', 'OIHW', 'NCHW'))
        return y + b.reshape(1, -1, 1, 1)

    def relu_pool(x):
        n, c, hh, ww = x.shape
        ho, wo = hh // 2, ww // 2
        xw = x[:, :, :2 * ho, :2 * wo].reshape(n, c, ho, 2, wo, 2)
        return jnp.maximum(xw.max(axis=(3, 5)), 0.0)   # relu∘pool == pool∘relu

    y = relu_pool(conv(z_img, w1, b1))
    y = relu_pool(conv(y, w2, b2))
    return y.reshape(1, -1)


def avg_pool_images(imgs):
    # TODO(synk): the frozen pretrained ResNet50 backbone (checkpoint load) is
    # replaced by a deterministic avg-pool + linear surrogate with the same
    # (·, 1000) score shape.
    m = imgs.shape[0]
    return imgs.reshape(m, 3, 10, 30, 10, 40).mean(axis=(3, 5)).reshape(m, 300)


# ----------------------------- forward -----------------------------

def _forward(params, inp):
    (x, y, z, o, memory, mask, gcn_memory, gcn_mask, j_cache, g_cache) = inp
    x = x.reshape(1, -1)                                            # (1, 2048)
    memory = jnp.concatenate([x, memory[:-1]], axis=0)
    mask = jnp.concatenate([jnp.zeros((1,), mask.dtype), mask[:-1]], axis=0)
    mask2d = mask.reshape(1, -1)

    key_pad = mask2d[0] > 0.5
    add_mask = jnp.where(key_pad, -1e30, 0.0).astype(F32).reshape(1, MEMORY_SIZE)
    keep = jnp.where(key_pad, 0.0, 1.0).astype(F32).reshape(MEMORY_SIZE, 1)

    # fc_siemense only on the new slot; sliding-window cache for the rest.
    j_new = linear_relu(x, params['sie_w'], params['sie_b'])        # (1, 512)
    j_cache = jnp.concatenate([j_new, j_cache[:-1]], axis=0)

    zflat = conv_path(z.reshape(1, 1, MASK_SIZE, MASK_SIZE),
                      params['conv1_w'], params['conv1_b'],
                      params['conv2_w'], params['conv2_b'])          # (1, 16)

    # GCN only on the new image; sliding-window cache for the rest.
    o_img = o.reshape(1, 3, 300, 400)
    # TODO(synk): replace the shift-concatenate with a circular-buffer pointer
    # to avoid rewriting the full gcn_memory window every step.
    gcn_memory = jnp.concatenate([o_img, gcn_memory[:-1]], axis=0)
    gcn_mask = jnp.concatenate([jnp.zeros((1,), gcn_mask.dtype), gcn_mask[:-1]], axis=0)
    pooled_new = avg_pool_images(o_img)                              # (1, 300)
    g_new = gcn_embed(pooled_new, params['gcn'])                     # (1, 512)
    g_cache = jnp.concatenate([g_new, g_cache[:-1]], axis=0)

    word2vec = y.reshape(1, D_MODEL)
    xy = trunk(j_cache, g_cache, keep, add_mask, word2vec, zflat, params)  # (1, 300)
    xy = xy.reshape(1, 1, -1)
    return xy, memory, mask2d, gcn_memory, gcn_mask, j_cache, g_cache


def _init_caches(params, memory, gcn_memory):
    # One-time: fill the per-slot feature caches consistently with the initial
    # memory contents (exact — both features are per-row functions).
    j = linear_relu(memory, params['sie_w'], params['sie_b'])        # (M, 512)
    g = gcn_embed(avg_pool_images(gcn_memory), params['gcn'])        # (M, 512)
    return j, g


gcn_transformer_forward = jax.jit(_forward)
init_slot_caches = jax.jit(_init_caches)


# ----------------------------- parameters -----------------------------

def make_pe(max_len=128, d_model=D_MODEL):
    pe = np.zeros((max_len, d_model), np.float32)
    position = np.arange(max_len, dtype=np.float32)[:, None]
    div = np.exp(np.arange(0, d_model, 2, dtype=np.float32)
                 * (-math.log(10000.0) / d_model))
    pe[:, 0::2] = np.sin(position * div)
    pe[:, 1::2] = np.cos(position * div)
    return jnp.asarray(pe)


def make_normalized_adj_np(n):
    A = np.eye(n, dtype=np.float32)
    A += np.eye(n, k=1, dtype=np.float32) + np.eye(n, k=-1, dtype=np.float32)
    A += np.eye(n, k=3, dtype=np.float32) + np.eye(n, k=-3, dtype=np.float32)
    A = (A > 0).astype(np.float32)
    rowsum = A.sum(1)
    d_inv_sqrt = np.power(rowsum, -0.5)
    d_inv_sqrt[np.isinf(d_inv_sqrt)] = 0.0
    D = np.diag(d_inv_sqrt)
    return ((A @ D).T @ D).astype(np.float32)


def init_params(key):
    idx = [0]

    def nk():
        idx[0] += 1
        return jax.random.fold_in(key, idx[0])

    def W(*shape, scale=0.05):
        return (scale * jax.random.normal(nk(), shape)).astype(F32)

    def B2(n, scale=0.01):
        return (scale * jax.random.normal(nk(), (1, n))).astype(F32)

    def B1(n, scale=0.01):
        return (scale * jax.random.normal(nk(), (n,))).astype(F32)

    # --- transformer: stacked weights, order:
    # 0-3 enc.self (q,k,v,o); 4-5 enc.ffn (l1,l2); 6-9 dec.self (q,k,v,o);
    # 10-13 dec.cross (q,k,v,o); 14-15 dec.ffn (l1,l2)
    tr_W = jnp.stack([W(D_MODEL, D_MODEL) for _ in range(16)]).astype(BF16)
    tr_B = jnp.stack([B2(D_MODEL) for _ in range(16)])
    # LN order: enc.n1, enc.n2, enc.final, dec.n1, dec.n2, dec.n3, dec.final
    ln_g = jnp.ones((7, 1, D_MODEL), F32)
    ln_b = jnp.zeros((7, 1, D_MODEL), F32)

    # --- GCN
    A = make_normalized_adj_np(N_OBJ)
    all_glove = W(N_OBJ, D_MODEL, scale=1.0)
    w2g_w, w2g_b = W(D_MODEL, 512), B2(512)            # word_to_gcn
    gc1_w, gc1_b = W(1024, NHID), B2(NHID)
    gc2_w, gc2_b = W(NHID, NHID), B2(NHID)
    gc3_w, gc3_b = W(NHID, 1), B2(1)
    map_w, map_b = W(N_OBJ, 512), B2(512)
    sr_w, sr_b = W(300, 1000), B2(1000)                # ResNet50 surrogate
    r2g_w, r2g_b = W(1000, 512), B2(512)               # resnet_to_gcn

    # parameter-only precomputation (hoisted out of the forward)
    word_embedding = all_glove @ w2g_w + w2g_b          # (N_OBJ, 512)
    word_gc1 = word_embedding @ gc1_w[512:]             # (N_OBJ, NHID)
    gc3_w_pad = jnp.concatenate([gc3_w, jnp.zeros((NHID, 127), F32)], axis=1)
    gc3_b_pad = jnp.concatenate([gc3_b, jnp.zeros((1, 127), F32)], axis=1)

    gcn = dict(
        sr_w=sr_w.astype(BF16), sr_b=sr_b,
        r2g_w=r2g_w.astype(BF16), r2g_b=r2g_b,
        gc1_w_img=gc1_w[:512].astype(BF16), gc1_b=gc1_b,
        word_gc1=word_gc1,
        A=jnp.asarray(A).astype(BF16),
        gc2_w=gc2_w.astype(BF16), gc2_b=gc2_b,
        gc3_w=gc3_w_pad.astype(BF16), gc3_b=gc3_b_pad,
        map_w=map_w, map_b=map_b,
    )

    conv1_out = (MASK_SIZE - 3 + 1) // 2
    conv2_out = (conv1_out - 5 + 1) // 2
    flat_input = 16 * conv2_out * conv2_out

    mrg_w = W(1024, D_MODEL)
    ctx_w = W(D_MODEL + flat_input, D_MODEL)

    return dict(
        sie_w=W(2048, 512).astype(BF16), sie_b=B2(512),             # fc_siemense
        mrg_w_j=mrg_w[:512].astype(BF16),                            # fc_merge (split)
        mrg_w_g=mrg_w[512:].astype(BF16), mrg_b=B2(D_MODEL),
        ctx_w_t=ctx_w[:D_MODEL].astype(BF16),                        # fc_merge_context (split)
        ctx_w_z=ctx_w[D_MODEL:].astype(BF16), ctx_b=B2(D_MODEL),
        conv1_w=W(8, 1, 3, 3), conv1_b=B1(8),
        conv2_w=W(16, 8, 5, 5), conv2_b=B1(16),
        pe8=make_pe()[:MEMORY_SIZE],
        gcn=gcn,
        tr=dict(W=tr_W, B=tr_B, ln_g=ln_g, ln_b=ln_b),
    )


# ----------------------------- driver -----------------------------

if __name__ == "__main__":
    key = jax.random.PRNGKey(0)
    params = init_params(jax.random.fold_in(key, 1))

    kx, ky, kz, ko, km, kg = jax.random.split(jax.random.fold_in(key, 2), 6)
    x = jax.random.normal(kx, (2048,), F32)
    y = jax.random.normal(ky, (D_MODEL,), F32)
    z = jax.random.normal(kz, (1, 1, MASK_SIZE, MASK_SIZE), F32)
    o = jax.random.normal(ko, (3, 300, 400), F32)
    memory = jax.random.normal(km, (MEMORY_SIZE, 2048), F32)
    # two previously filled memory slots -> 3 valid rows after the new observation
    mask = jnp.array([0, 0, 1, 1, 1, 1, 1, 1], F32)
    gcn_memory = jax.random.normal(kg, (MEMORY_SIZE, 3, 300, 400), F32)
    gcn_mask = jnp.array([0, 0, 1, 1, 1, 1, 1, 1], F32)

    j_cache, g_cache = init_slot_caches(params, memory, gcn_memory)

    out = gcn_transformer_forward(
        params, (x, y, z, o, memory, mask, gcn_memory, gcn_mask, j_cache, g_cache))
    (xy, memory_out, mask_out, gcn_memory_out, gcn_mask_out,
     j_cache_out, g_cache_out) = jax.block_until_ready(out)

    assert xy.shape == (1, 1, D_MODEL)
    assert memory_out.shape == (MEMORY_SIZE, 2048)
    assert mask_out.shape == (1, MEMORY_SIZE)
    assert gcn_memory_out.shape == (MEMORY_SIZE, 3, 300, 400)
    assert gcn_mask_out.shape == (MEMORY_SIZE,)
    assert j_cache_out.shape == (MEMORY_SIZE, 512)
    assert g_cache_out.shape == (MEMORY_SIZE, 512)
    assert bool(jnp.all(jnp.isfinite(xy)))
    print("KERNEL_OK")
</pallas_src>

<mosaic_0001>
module attributes {stable_mosaic.version = 11 : i64} {
  func.func @_gcn_kernel(%arg0: i32, %arg1: memref<1x1x300xf32, #tpu.memory_space<vmem>>, %arg2: memref<300x1000xbf16, #tpu.memory_space<vmem>>, %arg3: memref<1x1000xf32, #tpu.memory_space<vmem>>, %arg4: memref<1000x512xbf16, #tpu.memory_space<vmem>>, %arg5: memref<1x512xf32, #tpu.memory_space<vmem>>, %arg6: memref<512x1024xbf16, #tpu.memory_space<vmem>>, %arg7: memref<1x1024xf32, #tpu.memory_space<vmem>>, %arg8: memref<16x1024xf32, #tpu.memory_space<vmem>>, %arg9: memref<16x16xbf16, #tpu.memory_space<vmem>>, %arg10: memref<1024x1024xbf16, #tpu.memory_space<vmem>>, %arg11: memref<1x1024xf32, #tpu.memory_space<vmem>>, %arg12: memref<1024x128xbf16, #tpu.memory_space<vmem>>, %arg13: memref<1x128xf32, #tpu.memory_space<vmem>>, %arg14: memref<16x512xf32, #tpu.memory_space<vmem>>, %arg15: memref<1x512xf32, #tpu.memory_space<vmem>>, %arg16: memref<1x1x512xf32, #tpu.memory_space<vmem>>) attributes {dimension_semantics = [#tpu.dimension_semantics<parallel>], iteration_bounds = array<i64: 8>, scalar_prefetch = 0 : i64, scratch_operands = 0 : i64, tpu.core_type = #tpu.core_type<tc>, window_params = [{transform_indices = @transform_0, window_bounds = array<i64: 1, 1, 300>}, {pipeline_mode = #tpu.pipeline_mode<synchronous>, transform_indices = @transform_1, window_bounds = array<i64: 300, 1000>}, {pipeline_mode = #tpu.pipeline_mode<synchronous>, transform_indices = @transform_2, window_bounds = array<i64: 1, 1000>}, {pipeline_mode = #tpu.pipeline_mode<synchronous>, transform_indices = @transform_3, window_bounds = array<i64: 1000, 512>}, {pipeline_mode = #tpu.pipeline_mode<synchronous>, transform_indices = @transform_4, window_bounds = array<i64: 1, 512>}, {pipeline_mode = #tpu.pipeline_mode<synchronous>, transform_indices = @transform_5, window_bounds = array<i64: 512, 1024>}, {pipeline_mode = #tpu.pipeline_mode<synchronous>, transform_indices = @transform_6, window_bounds = array<i64: 1, 1024>}, {pipeline_mode = #tpu.pipeline_mode<synchronous>, transform_indices = @transform_7, window_bounds = array<i64: 16, 1024>}, {pipeline_mode = #tpu.pipeline_mode<synchronous>, transform_indices = @transform_8, window_bounds = array<i64: 16, 16>}, {pipeline_mode = #tpu.pipeline_mode<synchronous>, transform_indices = @transform_9, window_bounds = array<i64: 1024, 1024>}, {pipeline_mode = #tpu.pipeline_mode<synchronous>, transform_indices = @transform_10, window_bounds = array<i64: 1, 1024>}, {pipeline_mode = #tpu.pipeline_mode<synchronous>, transform_indices = @transform_11, window_bounds = array<i64: 1024, 128>}, {pipeline_mode = #tpu.pipeline_mode<synchronous>, transform_indices = @transform_12, window_bounds = array<i64: 1, 128>}, {pipeline_mode = #tpu.pipeline_mode<synchronous>, transform_indices = @transform_13, window_bounds = array<i64: 16, 512>}, {pipeline_mode = #tpu.pipeline_mode<synchronous>, transform_indices = @transform_14, window_bounds = array<i64: 1, 512>}, {transform_indices = @transform_15, window_bounds = array<i64: 1, 1, 512>}]} {
    %c0 = arith.constant 0 : index
    %c0_0 = arith.constant 0 : index
    %c0_1 = arith.constant 0 : index
    %0 = vector.load %arg1[%c0, %c0_0, %c0_1] : memref<1x1x300xf32, #tpu.memory_space<vmem>>, vector<1x1x300xf32>
    %1 = vector.shape_cast %0 : vector<1x1x300xf32> to vector<1x300xf32>
    %2 = arith.truncf %1 : vector<1x300xf32> to vector<1x300xbf16>
    %c0_2 = arith.constant 0 : index
    %c0_3 = arith.constant 0 : index
    %3 = vector.load %arg2[%c0_2, %c0_3] : memref<300x1000xbf16, #tpu.memory_space<vmem>>, vector<300x1000xbf16>
    %cst = arith.constant dense<0.000000e+00> : vector<1x1000xf32>
    %4 = tpu.matmul %2, %3, %cst {dimension_numbers = #tpu.dot_dimension_numbers<[1], [0], [0], [1], [0, 0, 1, 1], [], []>} : vector<1x300xbf16>, vector<300x1000xbf16>, vector<1x1000xf32> -> vector<1x1000xf32>
    %c0_4 = arith.constant 0 : index
    %c0_5 = arith.constant 0 : index
    %5 = vector.load %arg3[%c0_4, %c0_5] : memref<1x1000xf32, #tpu.memory_space<vmem>>, vector<1x1000xf32>
    %6 = arith.addf %4, %5 : vector<1x1000xf32>
    %7 = arith.truncf %6 : vector<1x1000xf32> to vector<1x1000xbf16>
    %c0_6 = arith.constant 0 : index
    %c0_7 = arith.constant 0 : index
    %8 = vector.load %arg4[%c0_6, %c0_7] : memref<1000x512xbf16, #tpu.memory_space<vmem>>, vector<1000x512xbf16>
    %cst_8 = arith.constant dense<0.000000e+00> : vector<1x512xf32>
    %9 = tpu.matmul %7, %8, %cst_8 {dimension_numbers = #tpu.dot_dimension_numbers<[1], [0], [0], [1], [0, 0, 1, 1], [], []>} : vector<1x1000xbf16>, vector<1000x512xbf16>, vector<1x512xf32> -> vector<1x512xf32>
    %c0_9 = arith.constant 0 : index
    %c0_10 = arith.constant 0 : index
    %10 = vector.load %arg5[%c0_9, %c0_10] : memref<1x512xf32, #tpu.memory_space<vmem>>, vector<1x512xf32>
    %11 = arith.addf %9, %10 : vector<1x512xf32>
    %12 = arith.truncf %11 : vector<1x512xf32> to vector<1x512xbf16>
    %c0_11 = arith.constant 0 : index
    %c0_12 = arith.constant 0 : index
    %13 = vector.load %arg6[%c0_11, %c0_12] : memref<512x1024xbf16, #tpu.memory_space<vmem>>, vector<512x1024xbf16>
    %cst_13 = arith.constant dense<0.000000e+00> : vector<1x1024xf32>
    %14 = tpu.matmul %12, %13, %cst_13 {dimension_numbers = #tpu.dot_dimension_numbers<[1], [0], [0], [1], [0, 0, 1, 1], [], []>} : vector<1x512xbf16>, vector<512x1024xbf16>, vector<1x1024xf32> -> vector<1x1024xf32>
    %c0_14 = arith.constant 0 : index
    %c0_15 = arith.constant 0 : index
    %15 = vector.load %arg8[%c0_14, %c0_15] : memref<16x1024xf32, #tpu.memory_space<vmem>>, vector<16x1024xf32>
    %16 = vector.broadcast %14 : vector<1x1024xf32> to vector<16x1024xf32>
    %17 = arith.addf %16, %15 : vector<16x1024xf32>
    %c0_16 = arith.constant 0 : index
    %c0_17 = arith.constant 0 : index
    %18 = vector.load %arg9[%c0_16, %c0_17] : memref<16x16xbf16, #tpu.memory_space<vmem>>, vector<16x16xbf16>
    %19 = arith.truncf %17 : vector<16x1024xf32> to vector<16x1024xbf16>
    %cst_18 = arith.constant dense<0.000000e+00> : vector<16x1024xf32>
    %20 = tpu.matmul %18, %19, %cst_18 {dimension_numbers = #tpu.dot_dimension_numbers<[1], [0], [0], [1], [0, 0, 1, 1], [], []>} : vector<16x16xbf16>, vector<16x1024xbf16>, vector<16x1024xf32> -> vector<16x1024xf32>
    %c0_19 = arith.constant 0 : index
    %c0_20 = arith.constant 0 : index
    %21 = vector.load %arg7[%c0_19, %c0_20] : memref<1x1024xf32, #tpu.memory_space<vmem>>, vector<1x1024xf32>
    %22 = vector.broadcast %21 : vector<1x1024xf32> to vector<16x1024xf32>
    %23 = arith.addf %20, %22 : vector<16x1024xf32>
    %cst_21 = arith.constant 0.000000e+00 : f32
    %24 = vector.broadcast %cst_21 : f32 to vector<16x1024xf32>
    %25 = arith.maximumf %23, %24 : vector<16x1024xf32>
    %26 = arith.truncf %25 : vector<16x1024xf32> to vector<16x1024xbf16>
    %c0_22 = arith.constant 0 : index
    %c0_23 = arith.constant 0 : index
    %27 = vector.load %arg10[%c0_22, %c0_23] : memref<1024x1024xbf16, #tpu.memory_space<vmem>>, vector<1024x1024xbf16>
    %cst_24 = arith.constant dense<0.000000e+00> : vector<16x1024xf32>
    %28 = tpu.matmul %26, %27, %cst_24 {dimension_numbers = #tpu.dot_dimension_numbers<[1], [0], [0], [1], [0, 0, 1, 1], [], []>} : vector<16x1024xbf16>, vector<1024x1024xbf16>, vector<16x1024xf32> -> vector<16x1024xf32>
    %29 = arith.truncf %28 : vector<16x1024xf32> to vector<16x1024xbf16>
    %cst_25 = arith.constant dense<0.000000e+00> : vector<16x1024xf32>
    %30 = tpu.matmul %18, %29, %cst_25 {dimension_numbers = #tpu.dot_dimension_numbers<[1], [0], [0], [1], [0, 0, 1, 1], [], []>} : vector<16x16xbf16>, vector<16x1024xbf16>, vector<16x1024xf32> -> vector<16x1024xf32>
    %c0_26 = arith.constant 0 : index
    %c0_27 = arith.constant 0 : index
    %31 = vector.load %arg11[%c0_26, %c0_27] : memref<1x1024xf32, #tpu.memory_space<vmem>>, vector<1x1024xf32>
    %32 = vector.broadcast %31 : vector<1x1024xf32> to vector<16x1024xf32>
    %33 = arith.addf %30, %32 : vector<16x1024xf32>
    %cst_28 = arith.constant 0.000000e+00 : f32
    %34 = vector.broadcast %cst_28 : f32 to vector<16x1024xf32>
    %35 = arith.maximumf %33, %34 : vector<16x1024xf32>
    %36 = arith.truncf %35 : vector<16x1024xf32> to vector<16x1024xbf16>
    %c0_29 = arith.constant 0 : index
    %c0_30 = arith.constant 0 : index
    %37 = vector.load %arg12[%c0_29, %c0_30] : memref<1024x128xbf16, #tpu.memory_space<vmem>>, vector<1024x128xbf16>
    %cst_31 = arith.constant dense<0.000000e+00> : vector<16x128xf32>
    %38 = tpu.matmul %36, %37, %cst_31 {dimension_numbers = #tpu.dot_dimension_numbers<[1], [0], [0], [1], [0, 0, 1, 1], [], []>} : vector<16x1024xbf16>, vector<1024x128xbf16>, vector<16x128xf32> -> vector<16x128xf32>
    %39 = arith.truncf %38 : vector<16x128xf32> to vector<16x128xbf16>
    %cst_32 = arith.constant dense<0.000000e+00> : vector<16x128xf32>
    %40 = tpu.matmul %18, %39, %cst_32 {dimension_numbers = #tpu.dot_dimension_numbers<[1], [0], [0], [1], [0, 0, 1, 1], [], []>} : vector<16x16xbf16>, vector<16x128xbf16>, vector<16x128xf32> -> vector<16x128xf32>
    %c0_33 = arith.constant 0 : index
    %c0_34 = arith.constant 0 : index
    %41 = vector.load %arg13[%c0_33, %c0_34] : memref<1x128xf32, #tpu.memory_space<vmem>>, vector<1x128xf32>
    %42 = vector.broadcast %41 : vector<1x128xf32> to vector<16x128xf32>
    %43 = arith.addf %40, %42 : vector<16x128xf32>
    %cst_35 = arith.constant 0.000000e+00 : f32
    %44 = vector.broadcast %cst_35 : f32 to vector<16x128xf32>
    %45 = arith.maximumf %43, %44 : vector<16x128xf32>
    %46 = vector.extract_strided_slice %45 {offsets = [0, 0], sizes = [16, 1], strides = [1, 1]} : vector<16x128xf32> to vector<16x1xf32>
    %c0_36 = arith.constant 0 : index
    %c0_37 = arith.constant 0 : index
    %47 = vector.load %arg14[%c0_36, %c0_37] : memref<16x512xf32, #tpu.memory_space<vmem>>, vector<16x512xf32>
    %48 = vector.broadcast %46 : vector<16x1xf32> to vector<16x512xf32>
    %49 = arith.mulf %48, %47 : vector<16x512xf32>
    %cst_38 = arith.constant dense<0.000000e+00> : vector<512xf32>
    %50 = vector.multi_reduction <add>, %49, %cst_38 [0] : vector<16x512xf32> to vector<512xf32>
    %51 = vector.shape_cast %50 : vector<512xf32> to vector<1x512xf32>
    %c0_39 = arith.constant 0 : index
    %c0_40 = arith.constant 0 : index
    %52 = vector.load %arg15[%c0_39, %c0_40] : memref<1x512xf32, #tpu.memory_space<vmem>>, vector<1x512xf32>
    %53 = arith.addf %51, %52 : vector<1x512xf32>
    %c0_41 = arith.constant 0 : index
    %c0_42 = arith.constant 0 : index
    %c0_43 = arith.constant 0 : index
    %54 = vector.load %arg16[%c0_41, %c0_42, %c0_43] : memref<1x1x512xf32, #tpu.memory_space<vmem>>, vector<1x1x512xf32>
    %55 = vector.shape_cast %54 : vector<1x1x512xf32> to vector<1x512xf32>
    %56 = vector.shape_cast %53 : vector<1x512xf32> to vector<1x1x512xf32>
    tpu.vector_store %arg16[%c0_41, %c0_42, %c0_43], %56 {strides = array<i32>} : memref<1x1x512xf32, #tpu.memory_space<vmem>>, vector<1x1x512xf32>,
    return
  }
  func.func @transform_0(%arg0: i32) -> (i32, i32, i32) {
    %c0_i32 = arith.constant 0 : i32
    %c0_i32_0 = arith.constant 0 : i32
    %c0_i32_1 = arith.constant 0 : i32
    return %arg0, %c0_i32, %c0_i32_0 : i32, i32, i32
  }
  func.func @transform_1(%arg0: i32) -> (i32, i32) {
    %c0_i32 = arith.constant 0 : i32
    %c0_i32_0 = arith.constant 0 : i32
    %c0_i32_1 = arith.constant 0 : i32
    return %c0_i32, %c0_i32_0 : i32, i32
  }
  func.func @transform_2(%arg0: i32) -> (i32, i32) {
    %c0_i32 = arith.constant 0 : i32
    %c0_i32_0 = arith.constant 0 : i32
    %c0_i32_1 = arith.constant 0 : i32
    return %c0_i32, %c0_i32_0 : i32, i32
  }
  func.func @transform_3(%arg0: i32) -> (i32, i32) {
    %c0_i32 = arith.constant 0 : i32
    %c0_i32_0 = arith.constant 0 : i32
    %c0_i32_1 = arith.constant 0 : i32
    return %c0_i32, %c0_i32_0 : i32, i32
  }
  func.func @transform_4(%arg0: i32) -> (i32, i32) {
    %c0_i32 = arith.constant 0 : i32
    %c0_i32_0 = arith.constant 0 : i32
    %c0_i32_1 = arith.constant 0 : i32
    return %c0_i32, %c0_i32_0 : i32, i32
  }
  func.func @transform_5(%arg0: i32) -> (i32, i32) {
    %c0_i32 = arith.constant 0 : i32
    %c0_i32_0 = arith.constant 0 : i32
    %c0_i32_1 = arith.constant 0 : i32
    return %c0_i32, %c0_i32_0 : i32, i32
  }
  func.func @transform_6(%arg0: i32) -> (i32, i32) {
    %c0_i32 = arith.constant 0 : i32
    %c0_i32_0 = arith.constant 0 : i32
    %c0_i32_1 = arith.constant 0 : i32
    return %c0_i32, %c0_i32_0 : i32, i32
  }
  func.func @transform_7(%arg0: i32) -> (i32, i32) {
    %c0_i32 = arith.constant 0 : i32
    %c0_i32_0 = arith.constant 0 : i32
    %c0_i32_1 = arith.constant 0 : i32
    return %c0_i32, %c0_i32_0 : i32, i32
  }
  func.func @transform_8(%arg0: i32) -> (i32, i32) {
    %c0_i32 = arith.constant 0 : i32
    %c0_i32_0 = arith.constant 0 : i32
    %c0_i32_1 = arith.constant 0 : i32
    return %c0_i32, %c0_i32_0 : i32, i32
  }
  func.func @transform_9(%arg0: i32) -> (i32, i32) {
    %c0_i32 = arith.constant 0 : i32
    %c0_i32_0 = arith.constant 0 : i32
    %c0_i32_1 = arith.constant 0 : i32
    return %c0_i32, %c0_i32_0 : i32, i32
  }
  func.func @transform_10(%arg0: i32) -> (i32, i32) {
    %c0_i32 = arith.constant 0 : i32
    %c0_i32_0 = arith.constant 0 : i32
    %c0_i32_1 = arith.constant 0 : i32
    return %c0_i32, %c0_i32_0 : i32, i32
  }
  func.func @transform_11(%arg0: i32) -> (i32, i32) {
    %c0_i32 = arith.constant 0 : i32
    %c0_i32_0 = arith.constant 0 : i32
    %c0_i32_1 = arith.constant 0 : i32
    return %c0_i32, %c0_i32_0 : i32, i32
  }
  func.func @transform_12(%arg0: i32) -> (i32, i32) {
    %c0_i32 = arith.constant 0 : i32
    %c0_i32_0 = arith.constant 0 : i32
    %c0_i32_1 = arith.constant 0 : i32
    return %c0_i32, %c0_i32_0 : i32, i32
  }
  func.func @transform_13(%arg0: i32) -> (i32, i32) {
    %c0_i32 = arith.constant 0 : i32
    %c0_i32_0 = arith.constant 0 : i32
    %c0_i32_1 = arith.constant 0 : i32
    return %c0_i32, %c0_i32_0 : i32, i32
  }
  func.func @transform_14(%arg0: i32) -> (i32, i32) {
    %c0_i32 = arith.constant 0 : i32
    %c0_i32_0 = arith.constant 0 : i32
    %c0_i32_1 = arith.constant 0 : i32
    return %c0_i32, %c0_i32_0 : i32, i32
  }
  func.func @transform_15(%arg0: i32) -> (i32, i32, i32) {
    %c0_i32 = arith.constant 0 : i32
    %c0_i32_0 = arith.constant 0 : i32
    %c0_i32_1 = arith.constant 0 : i32
    return %arg0, %c0_i32, %c0_i32_0 : i32, i32, i32
  }
}

module attributes {stable_mosaic.version = 11 : i64} {
  func.func @_linear_relu_kernel(%arg0: memref<8x2048xf32, #tpu.memory_space<vmem>>, %arg1: memref<2048x512xbf16, #tpu.memory_space<vmem>>, %arg2: memref<1x512xf32, #tpu.memory_space<vmem>>, %arg3: memref<8x512xf32, #tpu.memory_space<vmem>>) attributes {dimension_semantics = [], scalar_prefetch = 0 : i64, scratch_operands = 0 : i64, tpu.core_type = #tpu.core_type<tc>} {
    %c0 = arith.constant 0 : index
    %c0_0 = arith.constant 0 : index
    %0 = vector.load %arg0[%c0, %c0_0] : memref<8x2048xf32, #tpu.memory_space<vmem>>, vector<8x2048xf32>
    %1 = arith.truncf %0 : vector<8x2048xf32> to vector<8x2048xbf16>
    %c0_1 = arith.constant 0 : index
    %c0_2 = arith.constant 0 : index
    %2 = vector.load %arg1[%c0_1, %c0_2] : memref<2048x512xbf16, #tpu.memory_space<vmem>>, vector<2048x512xbf16>
    %cst = arith.constant dense<0.000000e+00> : vector<8x512xf32>
    %3 = tpu.matmul %1, %2, %cst {dimension_numbers = #tpu.dot_dimension_numbers<[1], [0], [0], [1], [0, 0, 1, 1], [], []>} : vector<8x2048xbf16>, vector<2048x512xbf16>, vector<8x512xf32> -> vector<8x512xf32>
    %c0_3 = arith.constant 0 : index
    %c0_4 = arith.constant 0 : index
    %4 = vector.load %arg2[%c0_3, %c0_4] : memref<1x512xf32, #tpu.memory_space<vmem>>, vector<1x512xf32>
    %5 = vector.broadcast %4 : vector<1x512xf32> to vector<8x512xf32>
    %6 = arith.addf %3, %5 : vector<8x512xf32>
    %cst_5 = arith.constant 0.000000e+00 : f32
    %7 = vector.broadcast %cst_5 : f32 to vector<8x512xf32>
    %8 = arith.maximumf %6, %7 : vector<8x512xf32>
    %c0_6 = arith.constant 0 : index
    %c0_7 = arith.constant 0 : index
    %9 = vector.load %arg3[%c0_6, %c0_7] : memref<8x512xf32, #tpu.memory_space<vmem>>, vector<8x512xf32>
    tpu.vector_store %arg3[%c0_6, %c0_7], %8 {strides = array<i32>} : memref<8x512xf32, #tpu.memory_space<vmem>>, vector<8x512xf32>,
    return
  }
}

</mosaic_0001>

<bundles_post_ra>
// kernel: _init_caches.2
= control target key start
LH: loop header
LB: loop body
LE: loop exit
PB: predicated region body
PF: predicated region fallthrough
CT: control target
= control target key end

     0   :  { %s6804_s0 = inlined_call_operand.vmem [shape: f32[8,2048], index: 0, kind: input, shape index: {}]   ;;  %s6805_s1 = inlined_call_operand.vmem [shape: bf16[2048,512], index: 1, kind: input, shape index: {}]   ;;  %s6806_s2 = inlined_call_operand.vmem [shape: f32[1,512], index: 2, kind: input, shape index: {}]   ;;  %s6807_s3 = inlined_call_operand.hbm [shape: f32[8,512], index: 3, kind: output, shape index: {}]  }
   0x1   :  { %v4392_v0 = vld [vmem:[%s6805_s1 + $0x4] ss:$16 sps:$4 sm:$0xff]   ;;  %v4394_v1 = vld [vmem:[%s6805_s1 + $0xc] ss:$16 sps:$4 sm:$0xff]   ;;  %v4396_v2 = vld [vmem:[%s6805_s1] ss:$16 sps:$4 sm:$0xff]  }
   0x2   :  { %3141 = vmatprep.subr.bf16.mxu0 %v4392_v0  ;;  %v4397_v3 = vld [vmem:[%s6805_s1 + $0x8] ss:$16 sps:$4 sm:$0xff]   ;;  %3469 = vmatprep.subr.bf16.mxu1 %v4394_v1  ;;  %v4398_v4 = vld [vmem:[%s6805_s1 + $0x24] ss:$16 sps:$4 sm:$0xff]   ;;  %v4400_v5 = vld [vmem:[%s6805_s1 + $0x2c] ss:$16 sps:$4 sm:$0xff]  }
   0x3   :  { %3142 = vmatpush1.bf16.msra.mxu0 %v4396_v2  ;;  %3470 = vmatpush1.bf16.msra.mxu1 %v4397_v3  ;;  %v4402_v6 = vld [vmem:[%s6805_s1 + $0x20] ss:$16 sps:$4 sm:$0xff]   ;;  %v4403_v7 = vld [vmem:[%s6805_s1 + $0x28] ss:$16 sps:$4 sm:$0xff]   ;;  %v4404_v8 = vld [vmem:[%s6805_s1 + $0x44] ss:$16 sps:$4 sm:$0xff]  }
   0x4   :  { %3143 = vmatprep.subr.bf16.mxu0 %v4398_v4  ;;  %3471 = vmatprep.subr.bf16.mxu1 %v4400_v5  ;;  %v4406_v9 = vld [vmem:[%s6805_s1 + $0x4c] ss:$16 sps:$4 sm:$0xff]   ;;  %v4408_v10 = vld [vmem:[%s6805_s1 + $0x40] ss:$16 sps:$4 sm:$0xff]   ;;  %v4409_v11 = vld [vmem:[%s6805_s1 + $0x48] ss:$16 sps:$4 sm:$0xff]  }
   0x5   :  { %v4410_v12 = vld [vmem:[%s6805_s1 + $0x64] ss:$16 sps:$4 sm:$0xff]   ;;  %v4412_v13 = vld [vmem:[%s6805_s1 + $0x6c] ss:$16 sps:$4 sm:$0xff]   ;;  %v4414_v14 = vld [vmem:[%s6805_s1 + $0x60] ss:$16 sps:$4 sm:$0xff]  }
   0x6   :  { %v4415_v15 = vld [vmem:[%s6805_s1 + $0x68] ss:$16 sps:$4 sm:$0xff]   ;;  %v4416_v16 = vld [vmem:[%s6805_s1 + $0x84] ss:$16 sps:$4 sm:$0xff]   ;;  %v4418_v17 = vld [vmem:[%s6805_s1 + $0x8c] ss:$16 sps:$4 sm:$0xff]  }
   0x7   :  { %3144 = vmatpush1.bf16.msra.mxu0 %v4402_v6  ;;  %3472 = vmatpush1.bf16.msra.mxu1 %v4403_v7  ;;  %v4420_v18 = vld [vmem:[%s6805_s1 + $0x80] ss:$16 sps:$4 sm:$0xff]   ;;  %v4421_v19 = vld [vmem:[%s6805_s1 + $0x88] ss:$16 sps:$4 sm:$0xff]   ;;  %v4422_v20 = vld [vmem:[%s6805_s1 + $0xa4] ss:$16 sps:$4 sm:$0xff]  }
   0x8   :  { %3145 = vmatprep.subr.bf16.mxu0 %v4404_v8  ;;  %3473 = vmatprep.subr.bf16.mxu1 %v4406_v9  ;;  %v4424_v21 = vld [vmem:[%s6805_s1 + $0xac] ss:$16 sps:$4 sm:$0xff]   ;;  %v4426_v22 = vld [vmem:[%s6805_s1 + $0xa0] ss:$16 sps:$4 sm:$0xff]   ;;  %v4427_v23 = vld [vmem:[%s6805_s1 + $0xa8] ss:$16 sps:$4 sm:$0xff]  }
   0x9   :  { %v4428_v24 = vld [vmem:[%s6805_s1 + $0xc4] ss:$16 sps:$4 sm:$0xff]   ;;  %v4430_v25 = vld [vmem:[%s6805_s1 + $0xcc] ss:$16 sps:$4 sm:$0xff]   ;;  %v4432_v26 = vld [vmem:[%s6805_s1 + $0xc0] ss:$16 sps:$4 sm:$0xff]  }
   0xa   :  { %v4433_v27 = vld [vmem:[%s6805_s1 + $0xc8] ss:$16 sps:$4 sm:$0xff]   ;;  %v4434_v28 = vld [vmem:[%s6805_s1 + $0xe4] ss:$16 sps:$4 sm:$0xff]   ;;  %v4436_v29 = vld [vmem:[%s6805_s1 + $0xec] ss:$16 sps:$4 sm:$0xff]  }
   0xb   :  { %3146 = vmatpush1.bf16.msra.mxu0 %v4408_v10  ;;  %3474 = vmatpush1.bf16.msra.mxu1 %v4409_v11  ;;  %v4438_v30 = vld [vmem:[%s6805_s1 + $0xe0] ss:$16 sps:$4 sm:$0xff]   ;;  %v4439_v31 = vld [vmem:[%s6805_s1 + $0xe8] ss:$16 sps:$4 sm:$0xff]   ;;  %v4440_v32 = vld [vmem:[%s6805_s1 + $0x104] ss:$16 sps:$4 sm:$0xff]  }
   0xc   :  { %3147 = vmatprep.subr.bf16.mxu0 %v4410_v12  ;;  %3475 = vmatprep.subr.bf16.mxu1 %v4412_v13  ;;  %v4442_v33 = vld [vmem:[%s6805_s1 + $0x10c] ss:$16 sps:$4 sm:$0xff]   ;;  %v4444_v34 = vld [vmem:[%s6805_s1 + $0x100] ss:$16 sps:$4 sm:$0xff]   ;;  %v4445_v35 = vld [vmem:[%s6805_s1 + $0x108] ss:$16 sps:$4 sm:$0xff]  }
   0xd   :  { %v4446_v36 = vld [vmem:[%s6805_s1 + $0x124] ss:$16 sps:$4 sm:$0xff]   ;;  %v4448_v37 = vld [vmem:[%s6805_s1 + $0x12c] ss:$16 sps:$4 sm:$0xff]   ;;  %v4450_v38 = vld [vmem:[%s6805_s1 + $0x120] ss:$16 sps:$4 sm:$0xff]  }
   0xe   :  { %v4451_v39 = vld [vmem:[%s6805_s1 + $0x128] ss:$16 sps:$4 sm:$0xff]   ;;  %v4452_v40 = vld [vmem:[%s6805_s1 + $0x144] ss:$16 sps:$4 sm:$0xff]   ;;  %v4454_v41 = vld [vmem:[%s6805_s1 + $0x14c] ss:$16 sps:$4 sm:$0xff]  }
   0xf   :  { %3148 = vmatpush1.bf16.msra.mxu0 %v4414_v14  ;;  %3476 = vmatpush1.bf16.msra.mxu1 %v4415_v15  ;;  %v4456_v42 = vld [vmem:[%s6805_s1 + $0x140] ss:$16 sps:$4 sm:$0xff]   ;;  %v4457_v43 = vld [vmem:[%s6805_s1 + $0x148] ss:$16 sps:$4 sm:$0xff]   ;;  %v4458_v44 = vld [vmem:[%s6805_s1 + $0x164] ss:$16 sps:$4 sm:$0xff]  }
  0x10   :  { %3149 = vmatprep.subr.bf16.mxu0 %v4416_v16  ;;  %3477 = vmatprep.subr.bf16.mxu1 %v4418_v17  ;;  %v4460_v45 = vld [vmem:[%s6805_s1 + $0x16c] ss:$16 sps:$4 sm:$0xff]   ;;  %v4462_v47 = vld [vmem:[%s6805_s1 + $0x160] ss:$16 sps:$4 sm:$0xff]   ;;  %v4463_v49 = vld [vmem:[%s6805_s1 + $0x168] ss:$16 sps:$4 sm:$0xff]  }
  0x11   :  { %v16_v46 = vld [vmem:[%s6804_s0 + $0x8] sm:$0xff]  ;;  %v4464_v50 = vld [vmem:[%s6805_s1 + $0x184] ss:$16 sps:$4 sm:$0xff]   ;;  %v4468_v52 = vld [vmem:[%s6805_s1 + $0x180] ss:$16 sps:$4 sm:$0xff]  }
  0x12   :  { %v32_v48 = vpack.c.bf16 %v16_v46, %v16_v46  ;;  %v4466_v51 = vld [vmem:[%s6805_s1 + $0x18c] ss:$16 sps:$4 sm:$0xff]   ;;  %v4469_v53 = vld [vmem:[%s6805_s1 + $0x188] ss:$16 sps:$4 sm:$0xff]   ;;  %v4470_v54 = vld [vmem:[%s6805_s1 + $0x1a4] ss:$16 sps:$4 sm:$0xff]  }
  0x13   :  { %3150 = vmatpush1.bf16.msra.mxu0 %v4420_v18  ;;  %3478 = vmatpush1.bf16.msra.mxu1 %v4421_v19  ;;  %v4472_v55 = vld [vmem:[%s6805_s1 + $0x1ac] ss:$16 sps:$4 sm:$0xff]   ;;  %v4474_v56 = vld [vmem:[%s6805_s1 + $0x1a0] ss:$16 sps:$4 sm:$0xff]   ;;  %v4475_v57 = vld [vmem:[%s6805_s1 + $0x1a8] ss:$16 sps:$4 sm:$0xff]  }
  0x14   :  { %3151 = vmatprep.subr.bf16.mxu0 %v4422_v20  ;;  %3479 = vmatprep.subr.bf16.mxu1 %v4424_v21  ;;  %v4476_v58 = vld [vmem:[%s6805_s1 + $0x1c4] ss:$16 sps:$4 sm:$0xff]   ;;  %v4478_v59 = vld [vmem:[%s6805_s1 + $0x1cc] ss:$16 sps:$4 sm:$0xff]   ;;  %v4480_v60 = vld [vmem:[%s6805_s1 + $0x1c0] ss:$16 sps:$4 sm:$0xff]  }
  0x15   :  { %3173 = vmatprep.mubr.bf16.mxu0 %v32_v48  ;;  %3501 = vmatprep.mubr.bf16.mxu1 %v32_v48  ;;  %v4481_v61 = vld [vmem:[%s6805_s1 + $0x1c8] ss:$16 sps:$4 sm:$0xff]   ;;  %v4482_v62 = vld [vmem:[%s6805_s1 + $0x1e4] ss:$16 sps:$4 sm:$0xff]   ;;  %v4484_v63 = vld [vmem:[%s6805_s1 + $0x1ec] ss:$16 sps:$4 sm:$0xff]  }
  0x16   :  { %v4486_v0 = vld [vmem:[%s6805_s1 + $0x1e0] ss:$16 sps:$4 sm:$0xff]   ;;  %v4487_v1 = vld [vmem:[%s6805_s1 + $0x1e8] ss:$16 sps:$4 sm:$0xff]   ;;  %v4490_v3 = vld [vmem:[%s6805_s1 + $0x204] ss:$16 sps:$4 sm:$0xff]  }
  0x17   :  { %3152 = vmatpush1.bf16.msra.mxu0 %v4426_v22  ;;  %3480 = vmatpush1.bf16.msra.mxu1 %v4427_v23  ;;  %v15_v2 = vld [vmem:[%s6804_s0] sm:$0xff]  ;;  %v4493_v4 = vld [vmem:[%s6805_s1 + $0x20c] ss:$16 sps:$4 sm:$0xff]   ;;  %v4491_v7 = vld [vmem:[%s6805_s1 + $0x208] ss:$16 sps:$4 sm:$0xff]  }
  0x18   :  { %3153 = vmatprep.subr.bf16.mxu0 %v4428_v24  ;;  %3481 = vmatprep.subr.bf16.mxu1 %v4430_v25  ;;  %v31_v5 = vpack.c.bf16 %v15_v2, %v15_v2  ;;  %v4488_v6 = vld [vmem:[%s6805_s1 + $0x200] ss:$16 sps:$4 sm:$0xff]   ;;  %v4496_v8 = vld [vmem:[%s6805_s1 + $0x224] ss:$16 sps:$4 sm:$0xff]   ;;  %v4499_v9 = vld [vmem:[%s6805_s1 + $0x22c] ss:$16 sps:$4 sm:$0xff]  }
  0x19   :  { %v4494_v10 = vld [vmem:[%s6805_s1 + $0x220] ss:$16 sps:$4 sm:$0xff]   ;;  %v4497_v11 = vld [vmem:[%s6805_s1 + $0x228] ss:$16 sps:$4 sm:$0xff]   ;;  %v4502_v12 = vld [vmem:[%s6805_s1 + $0x244] ss:$16 sps:$4 sm:$0xff]  }
  0x1a   :  { %v4505_v13 = vld [vmem:[%s6805_s1 + $0x24c] ss:$16 sps:$4 sm:$0xff]   ;;  %v4500_v14 = vld [vmem:[%s6805_s1 + $0x240] ss:$16 sps:$4 sm:$0xff]   ;;  %v4503_v15 = vld [vmem:[%s6805_s1 + $0x248] ss:$16 sps:$4 sm:$0xff]  }
  0x1b   :  { %3154 = vmatpush1.bf16.msra.mxu0 %v4432_v26  ;;  %3482 = vmatpush1.bf16.msra.mxu1 %v4433_v27  ;;  %v4508_v16 = vld [vmem:[%s6805_s1 + $0x264] ss:$16 sps:$4 sm:$0xff]   ;;  %v4511_v17 = vld [vmem:[%s6805_s1 + $0x26c] ss:$16 sps:$4 sm:$0xff]   ;;  %v4506_v18 = vld [vmem:[%s6805_s1 + $0x260] ss:$16 sps:$4 sm:$0xff]  }
  0x1c   :  { %3155 = vmatprep.subr.bf16.mxu0 %v4434_v28  ;;  %3483 = vmatprep.subr.bf16.mxu1 %v4436_v29  ;;  %v4509_v19 = vld [vmem:[%s6805_s1 + $0x268] ss:$16 sps:$4 sm:$0xff]   ;;  %v4514_v20 = vld [vmem:[%s6805_s1 + $0x284] ss:$16 sps:$4 sm:$0xff]   ;;  %v4517_v21 = vld [vmem:[%s6805_s1 + $0x28c] ss:$16 sps:$4 sm:$0xff]  }
  0x1d   :  { %v4512_v22 = vld [vmem:[%s6805_s1 + $0x280] ss:$16 sps:$4 sm:$0xff]   ;;  %v4515_v23 = vld [vmem:[%s6805_s1 + $0x288] ss:$16 sps:$4 sm:$0xff]   ;;  %v4520_v24 = vld [vmem:[%s6805_s1 + $0x2a4] ss:$16 sps:$4 sm:$0xff]  }
  0x1e   :  { %v4523_v25 = vld [vmem:[%s6805_s1 + $0x2ac] ss:$16 sps:$4 sm:$0xff]   ;;  %v4518_v26 = vld [vmem:[%s6805_s1 + $0x2a0] ss:$16 sps:$4 sm:$0xff]   ;;  %v4521_v27 = vld [vmem:[%s6805_s1 + $0x2a8] ss:$16 sps:$4 sm:$0xff]  }
  0x1f   :  { %3156 = vmatpush1.bf16.msra.mxu0 %v4438_v30  ;;  %3484 = vmatpush1.bf16.msra.mxu1 %v4439_v31  ;;  %v4526_v28 = vld [vmem:[%s6805_s1 + $0x2c4] ss:$16 sps:$4 sm:$0xff]   ;;  %v4529_v29 = vld [vmem:[%s6805_s1 + $0x2cc] ss:$16 sps:$4 sm:$0xff]   ;;  %v4524_v31 = vld [vmem:[%s6805_s1 + $0x2c0] ss:$16 sps:$4 sm:$0xff]  }
  0x20   :  { %3157 = vmatprep.subr.bf16.mxu0 %v4440_v32  ;;  %3485 = vmatprep.subr.bf16.mxu1 %v4442_v33  ;;  %v18_v30 = vld [vmem:[%s6804_s0 + $0x18] sm:$0xff]  ;;  %v4550_v46 = vld [vmem:[%s6805_s1 + $0x344] ss:$16 sps:$4 sm:$0xff]   ;;  %v4548_v48 = vld [vmem:[%s6805_s1 + $0x340] ss:$16 sps:$4 sm:$0xff]  }
  0x21   :  { %v34_v32 = vpack.c.bf16 %v18_v30, %v18_v30  ;;  %v4527_v33 = vld [vmem:[%s6805_s1 + $0x2c8] ss:$16 sps:$4 sm:$0xff]   ;;  %v4580_v2 = vld [vmem:[%s6805_s1 + $0x3e4] ss:$16 sps:$4 sm:$0xff]  }
  0x22   :  { %v4616_v30 = vld [vmem:[%s6805_s1 + $0x4a4] ss:$16 sps:$4 sm:$0xff]  }
  0x23   :  { %3158 = vmatpush1.bf16.msra.mxu0 %v4444_v34  ;;  %3486 = vmatpush1.bf16.msra.mxu1 %v4445_v35  ;;  %v4532_v34 = vld [vmem:[%s6805_s1 + $0x2e4] ss:$16 sps:$4 sm:$0xff]   ;;  %v4535_v35 = vld [vmem:[%s6805_s1 + $0x2ec] ss:$16 sps:$4 sm:$0xff]  }
  0x24   :  { %3159 = vmatprep.subr.bf16.mxu0 %v4446_v36  ;;  %3487 = vmatprep.subr.bf16.mxu1 %v4448_v37  ;;  %v4530_v36 = vld [vmem:[%s6805_s1 + $0x2e0] ss:$16 sps:$4 sm:$0xff]   ;;  %v4533_v37 = vld [vmem:[%s6805_s1 + $0x2e8] ss:$16 sps:$4 sm:$0xff]  }
  0x27   :  { %3160 = vmatpush1.bf16.msra.mxu0 %v4450_v38  ;;  %3488 = vmatpush1.bf16.msra.mxu1 %v4451_v39  ;;  %v4538_v38 = vld [vmem:[%s6805_s1 + $0x304] ss:$16 sps:$4 sm:$0xff]   ;;  %v4541_v39 = vld [vmem:[%s6805_s1 + $0x30c] ss:$16 sps:$4 sm:$0xff]  }
  0x28   :  { %3161 = vmatprep.subr.bf16.mxu0 %v4452_v40  ;;  %3489 = vmatprep.subr.bf16.mxu1 %v4454_v41  ;;  %v4536_v40 = vld [vmem:[%s6805_s1 + $0x300] ss:$16 sps:$4 sm:$0xff]   ;;  %v4539_v41 = vld [vmem:[%s6805_s1 + $0x308] ss:$16 sps:$4 sm:$0xff]  }
  0x2b   :  { %3162 = vmatpush1.bf16.msra.mxu0 %v4456_v42  ;;  %3490 = vmatpush1.bf16.msra.mxu1 %v4457_v43  ;;  %v4544_v42 = vld [vmem:[%s6805_s1 + $0x324] ss:$16 sps:$4 sm:$0xff]   ;;  %v4547_v43 = vld [vmem:[%s6805_s1 + $0x32c] ss:$16 sps:$4 sm:$0xff]  }
  0x2c   :  { %3163 = vmatprep.subr.bf16.mxu0 %v4458_v44  ;;  %3491 = vmatprep.subr.bf16.mxu1 %v4460_v45  ;;  %v4542_v44 = vld [vmem:[%s6805_s1 + $0x320] ss:$16 sps:$4 sm:$0xff]   ;;  %v4545_v45 = vld [vmem:[%s6805_s1 + $0x328] ss:$16 sps:$4 sm:$0xff]  }
  0x2f   :  { %3164 = vmatpush1.bf16.msra.mxu0 %v4462_v47  ;;  %3492 = vmatpush1.bf16.msra.mxu1 %v4463_v49  ;;  %v4553_v47 = vld [vmem:[%s6805_s1 + $0x34c] ss:$16 sps:$4 sm:$0xff]   ;;  %v4551_v49 = vld [vmem:[%s6805_s1 + $0x348] ss:$16 sps:$4 sm:$0xff]  }
  0x30   :  { %3165 = vmatprep.subr.bf16.mxu0 %v4464_v50  ;;  %3493 = vmatprep.subr.bf16.mxu1 %v4466_v51  ;;  %v4556_v50 = vld [vmem:[%s6805_s1 + $0x364] ss:$16 sps:$4 sm:$0xff]   ;;  %v4559_v51 = vld [vmem:[%s6805_s1 + $0x36c] ss:$16 sps:$4 sm:$0xff]  }
  0x33   :  { %3166 = vmatpush1.bf16.msra.mxu0 %v4468_v52  ;;  %3494 = vmatpush1.bf16.msra.mxu1 %v4469_v53  ;;  %v4554_v52 = vld [vmem:[%s6805_s1 + $0x360] ss:$16 sps:$4 sm:$0xff]   ;;  %v4557_v53 = vld [vmem:[%s6805_s1 + $0x368] ss:$16 sps:$4 sm:$0xff]  }
  0x34   :  { %3167 = vmatprep.subr.bf16.mxu0 %v4470_v54  ;;  %3495 = vmatprep.subr.bf16.mxu1 %v4472_v55  ;;  %v4562_v54 = vld [vmem:[%s6805_s1 + $0x384] ss:$16 sps:$4 sm:$0xff]   ;;  %v4565_v55 = vld [vmem:[%s6805_s1 + $0x38c] ss:$16 sps:$4 sm:$0xff]  }
  0x37   :  { %3168 = vmatpush1.bf16.msra.mxu0 %v4474_v56  ;;  %3496 = vmatpush1.bf16.msra.mxu1 %v4475_v57  ;;  %v4560_v56 = vld [vmem:[%s6805_s1 + $0x380] ss:$16 sps:$4 sm:$0xff]   ;;  %v4563_v57 = vld [vmem:[%s6805_s1 + $0x388] ss:$16 sps:$4 sm:$0xff]  }
  0x38   :  { %3169 = vmatprep.subr.bf16.mxu0 %v4476_v58  ;;  %3497 = vmatprep.subr.bf16.mxu1 %v4478_v59  ;;  %v4568_v58 = vld [vmem:[%s6805_s1 + $0x3a4] ss:$16 sps:$4 sm:$0xff]   ;;  %v4571_v59 = vld [vmem:[%s6805_s1 + $0x3ac] ss:$16 sps:$4 sm:$0xff]  }
  0x3b   :  { %3170 = vmatpush1.bf16.msra.mxu0 %v4480_v60  ;;  %3498 = vmatpush1.bf16.msra.mxu1 %v4481_v61  ;;  %v4566_v60 = vld [vmem:[%s6805_s1 + $0x3a0] ss:$16 sps:$4 sm:$0xff]   ;;  %v4569_v61 = vld [vmem:[%s6805_s1 + $0x3a8] ss:$16 sps:$4 sm:$0xff]  }
  0x3c   :  { %3171 = vmatprep.subr.bf16.mxu0 %v4482_v62  ;;  %3499 = vmatprep.subr.bf16.mxu1 %v4484_v63  ;;  %v4574_v62 = vld [vmem:[%s6805_s1 + $0x3c4] ss:$16 sps:$4 sm:$0xff]   ;;  %v4577_v63 = vld [vmem:[%s6805_s1 + $0x3cc] ss:$16 sps:$4 sm:$0xff]  }
  0x3f   :  { %3172 = vmatpush1.bf16.msra.mxu0 %v4486_v0  ;;  %3500 = vmatpush1.bf16.msra.mxu1 %v4487_v1  ;;  %v4572_v0 = vld [vmem:[%s6805_s1 + $0x3c0] ss:$16 sps:$4 sm:$0xff]   ;;  %v4575_v1 = vld [vmem:[%s6805_s1 + $0x3c8] ss:$16 sps:$4 sm:$0xff]  }
  0x40   :  { %3182 = vmatprep.subr.bf16.mxu0 %v4490_v3  ;;  %3510 = vmatprep.subr.bf16.mxu1 %v4493_v4  ;;  %v4583_v3 = vld [vmem:[%s6805_s1 + $0x3ec] ss:$16 sps:$4 sm:$0xff]   ;;  %v4578_v4 = vld [vmem:[%s6805_s1 + $0x3e0] ss:$16 sps:$4 sm:$0xff]  }
  0x42   :  { %3174 = vmatmul.mubr.bf16.vlgmr.msra.gmra.mrb[0].mxu0 %v31_v5  ;;  %3502 = vmatmul.mubr.bf16.vlgmr.msra.gmra.mrb[0].mxu1 %v31_v5  ;;  %v4581_v5 = vld [vmem:[%s6805_s1 + $0x3e8] ss:$16 sps:$4 sm:$0xff]  }
  0x43   :  { %3183 = vmatpush1.bf16.msra.mxu0 %v4488_v6  ;;  %3511 = vmatpush1.bf16.msra.mxu1 %v4491_v7  ;;  %v4586_v6 = vld [vmem:[%s6805_s1 + $0x404] ss:$16 sps:$4 sm:$0xff]  }
  0x44   :  { %3184 = vmatprep.subr.bf16.mxu0 %v4496_v8  ;;  %3512 = vmatprep.subr.bf16.mxu1 %v4499_v9  ;;  %v17_v7 = vld [vmem:[%s6804_s0 + $0x10] sm:$0xff]  ;;  %v4589_v8 = vld [vmem:[%s6805_s1 + $0x40c] ss:$16 sps:$4 sm:$0xff]  }
  0x45   :  { %3214 = vmatprep.mubr.bf16.mxu0 %v34_v32  ;;  %3542 = vmatprep.mubr.bf16.mxu1 %v34_v32  ;;  %v4584_v9 = vld [vmem:[%s6805_s1 + $0x400] ss:$16 sps:$4 sm:$0xff]  }
  0x46   :  { %v4614_v32 = vld [vmem:[%s6805_s1 + $0x4a0] ss:$16 sps:$4 sm:$0xff]  }
  0x47   :  { %3185 = vmatpush1.bf16.msra.mxu0 %v4494_v10  ;;  %3513 = vmatpush1.bf16.msra.mxu1 %v4497_v11  ;;  %v4587_v10 = vld [vmem:[%s6805_s1 + $0x408] ss:$16 sps:$4 sm:$0xff]   ;;  %v33_v11 = vpack.c.bf16 %v17_v7, %v17_v7  ;;  %v4679_v7 = vld [vmem:[%s6805_s1 + $0x5ec] ss:$16 sps:$4 sm:$0xff]  }
  0x48   :  { %3186 = vmatprep.subr.bf16.mxu0 %v4502_v12  ;;  %3514 = vmatprep.subr.bf16.mxu1 %v4505_v13  ;;  %v4592_v12 = vld [vmem:[%s6805_s1 + $0x424] ss:$16 sps:$4 sm:$0xff]   ;;  %v4595_v13 = vld [vmem:[%s6805_s1 + $0x42c] ss:$16 sps:$4 sm:$0xff]  }
  0x4b   :  { %3187 = vmatpush1.bf16.msra.mxu0 %v4500_v14  ;;  %3515 = vmatpush1.bf16.msra.mxu1 %v4503_v15  ;;  %v20_v14 = vld [vmem:[%s6804_s0 + $0x28] sm:$0xff] }
  0x4c   :  { %3188 = vmatprep.subr.bf16.mxu0 %v4508_v16  ;;  %3516 = vmatprep.subr.bf16.mxu1 %v4511_v17  ;;  %v36_v15 = vpack.c.bf16 %v20_v14, %v20_v14  ;;  %v4590_v16 = vld [vmem:[%s6805_s1 + $0x420] ss:$16 sps:$4 sm:$0xff]   ;;  %v4593_v17 = vld [vmem:[%s6805_s1 + $0x428] ss:$16 sps:$4 sm:$0xff]  }
  0x4d   :  { %v4683_v14 = vld [vmem:[%s6805_s1 + $0x608] ss:$16 sps:$4 sm:$0xff]  }
  0x4f   :  { %3189 = vmatpush1.bf16.msra.mxu0 %v4506_v18  ;;  %3517 = vmatpush1.bf16.msra.mxu1 %v4509_v19  ;;  %v4598_v18 = vld [vmem:[%s6805_s1 + $0x444] ss:$16 sps:$4 sm:$0xff]   ;;  %v4601_v19 = vld [vmem:[%s6805_s1 + $0x44c] ss:$16 sps:$4 sm:$0xff]  }
  0x50   :  { %3190 = vmatprep.subr.bf16.mxu0 %v4514_v20  ;;  %3518 = vmatprep.subr.bf16.mxu1 %v4517_v21  ;;  %v4596_v20 = vld [vmem:[%s6805_s1 + $0x440] ss:$16 sps:$4 sm:$0xff]   ;;  %v4599_v21 = vld [vmem:[%s6805_s1 + $0x448] ss:$16 sps:$4 sm:$0xff]  }
  0x53   :  { %3191 = vmatpush1.bf16.msra.mxu0 %v4512_v22  ;;  %3519 = vmatpush1.bf16.msra.mxu1 %v4515_v23  ;;  %v4604_v22 = vld [vmem:[%s6805_s1 + $0x464] ss:$16 sps:$4 sm:$0xff]   ;;  %v4607_v23 = vld [vmem:[%s6805_s1 + $0x46c] ss:$16 sps:$4 sm:$0xff]  }
  0x54   :  { %3192 = vmatprep.subr.bf16.mxu0 %v4520_v24  ;;  %3520 = vmatprep.subr.bf16.mxu1 %v4523_v25  ;;  %v4602_v24 = vld [vmem:[%s6805_s1 + $0x460] ss:$16 sps:$4 sm:$0xff]   ;;  %v4605_v25 = vld [vmem:[%s6805_s1 + $0x468] ss:$16 sps:$4 sm:$0xff]  }
  0x57   :  { %3193 = vmatpush1.bf16.msra.mxu0 %v4518_v26  ;;  %3521 = vmatpush1.bf16.msra.mxu1 %v4521_v27  ;;  %v4610_v26 = vld [vmem:[%s6805_s1 + $0x484] ss:$16 sps:$4 sm:$0xff]   ;;  %v4613_v27 = vld [vmem:[%s6805_s1 + $0x48c] ss:$16 sps:$4 sm:$0xff]  }
  0x58   :  { %3194 = vmatprep.subr.bf16.mxu0 %v4526_v28  ;;  %3522 = vmatprep.subr.bf16.mxu1 %v4529_v29  ;;  %v4608_v28 = vld [vmem:[%s6805_s1 + $0x480] ss:$16 sps:$4 sm:$0xff]   ;;  %v4611_v29 = vld [vmem:[%s6805_s1 + $0x488] ss:$16 sps:$4 sm:$0xff]  }
  0x5b   :  { %3195 = vmatpush1.bf16.msra.mxu0 %v4524_v31  ;;  %3523 = vmatpush1.bf16.msra.mxu1 %v4527_v33  ;;  %v4619_v31 = vld [vmem:[%s6805_s1 + $0x4ac] ss:$16 sps:$4 sm:$0xff]   ;;  %v4617_v33 = vld [vmem:[%s6805_s1 + $0x4a8] ss:$16 sps:$4 sm:$0xff]  }
  0x5c   :  { %3196 = vmatprep.subr.bf16.mxu0 %v4532_v34  ;;  %3524 = vmatprep.subr.bf16.mxu1 %v4535_v35  ;;  %v4622_v34 = vld [vmem:[%s6805_s1 + $0x4c4] ss:$16 sps:$4 sm:$0xff]   ;;  %v4625_v35 = vld [vmem:[%s6805_s1 + $0x4cc] ss:$16 sps:$4 sm:$0xff]  }
  0x5f   :  { %3197 = vmatpush1.bf16.msra.mxu0 %v4530_v36  ;;  %3525 = vmatpush1.bf16.msra.mxu1 %v4533_v37  ;;  %v4620_v36 = vld [vmem:[%s6805_s1 + $0x4c0] ss:$16 sps:$4 sm:$0xff]   ;;  %v4623_v37 = vld [vmem:[%s6805_s1 + $0x4c8] ss:$16 sps:$4 sm:$0xff]  }
  0x60   :  { %3198 = vmatprep.subr.bf16.mxu0 %v4538_v38  ;;  %3526 = vmatprep.subr.bf16.mxu1 %v4541_v39  ;;  %v4628_v38 = vld [vmem:[%s6805_s1 + $0x4e4] ss:$16 sps:$4 sm:$0xff]   ;;  %v4631_v39 = vld [vmem:[%s6805_s1 + $0x4ec] ss:$16 sps:$4 sm:$0xff]  }
  0x63   :  { %3199 = vmatpush1.bf16.msra.mxu0 %v4536_v40  ;;  %3527 = vmatpush1.bf16.msra.mxu1 %v4539_v41  ;;  %v4626_v40 = vld [vmem:[%s6805_s1 + $0x4e0] ss:$16 sps:$4 sm:$0xff]   ;;  %v4629_v41 = vld [vmem:[%s6805_s1 + $0x4e8] ss:$16 sps:$4 sm:$0xff]  }
  0x64   :  { %3200 = vmatprep.subr.bf16.mxu0 %v4544_v42  ;;  %3528 = vmatprep.subr.bf16.mxu1 %v4547_v43  ;;  %v4634_v42 = vld [vmem:[%s6805_s1 + $0x504] ss:$16 sps:$4 sm:$0xff]   ;;  %v4637_v43 = vld [vmem:[%s6805_s1 + $0x50c] ss:$16 sps:$4 sm:$0xff]  }
  0x67   :  { %3201 = vmatpush1.bf16.msra.mxu0 %v4542_v44  ;;  %3529 = vmatpush1.bf16.msra.mxu1 %v4545_v45  ;;  %v4632_v44 = vld [vmem:[%s6805_s1 + $0x500] ss:$16 sps:$4 sm:$0xff]   ;;  %v4635_v45 = vld [vmem:[%s6805_s1 + $0x508] ss:$16 sps:$4 sm:$0xff]  }
  0x68   :  { %3202 = vmatprep.subr.bf16.mxu0 %v4550_v46  ;;  %3530 = vmatprep.subr.bf16.mxu1 %v4553_v47  ;;  %v4640_v46 = vld [vmem:[%s6805_s1 + $0x524] ss:$16 sps:$4 sm:$0xff]   ;;  %v4643_v47 = vld [vmem:[%s6805_s1 + $0x52c] ss:$16 sps:$4 sm:$0xff]  }
  0x6b   :  { %3203 = vmatpush1.bf16.msra.mxu0 %v4548_v48  ;;  %3531 = vmatpush1.bf16.msra.mxu1 %v4551_v49  ;;  %v4638_v48 = vld [vmem:[%s6805_s1 + $0x520] ss:$16 sps:$4 sm:$0xff]   ;;  %v4641_v49 = vld [vmem:[%s6805_s1 + $0x528] ss:$16 sps:$4 sm:$0xff]  }
  0x6c   :  { %3204 = vmatprep.subr.bf16.mxu0 %v4556_v50  ;;  %3532 = vmatprep.subr.bf16.mxu1 %v4559_v51  ;;  %v4646_v50 = vld [vmem:[%s6805_s1 + $0x544] ss:$16 sps:$4 sm:$0xff]   ;;  %v4649_v51 = vld [vmem:[%s6805_s1 + $0x54c] ss:$16 sps:$4 sm:$0xff]  }
  0x6f   :  { %3205 = vmatpush1.bf16.msra.mxu0 %v4554_v52  ;;  %3533 = vmatpush1.bf16.msra.mxu1 %v4557_v53  ;;  %v4644_v52 = vld [vmem:[%s6805_s1 + $0x540] ss:$16 sps:$4 sm:$0xff]   ;;  %v4647_v53 = vld [vmem:[%s6805_s1 + $0x548] ss:$16 sps:$4 sm:$0xff]  }
  0x70   :  { %3206 = vmatprep.subr.bf16.mxu0 %v4562_v54  ;;  %3534 = vmatprep.subr.bf16.mxu1 %v4565_v55  ;;  %v4652_v54 = vld [vmem:[%s6805_s1 + $0x564] ss:$16 sps:$4 sm:$0xff]   ;;  %v4655_v55 = vld [vmem:[%s6805_s1 + $0x56c] ss:$16 sps:$4 sm:$0xff]  }
  0x73   :  { %3207 = vmatpush1.bf16.msra.mxu0 %v4560_v56  ;;  %3535 = vmatpush1.bf16.msra.mxu1 %v4563_v57  ;;  %v4650_v56 = vld [vmem:[%s6805_s1 + $0x560] ss:$16 sps:$4 sm:$0xff]   ;;  %v4653_v57 = vld [vmem:[%s6805_s1 + $0x568] ss:$16 sps:$4 sm:$0xff]  }
  0x74   :  { %3208 = vmatprep.subr.bf16.mxu0 %v4568_v58  ;;  %3536 = vmatprep.subr.bf16.mxu1 %v4571_v59  ;;  %v4658_v58 = vld [vmem:[%s6805_s1 + $0x584] ss:$16 sps:$4 sm:$0xff]   ;;  %v4661_v59 = vld [vmem:[%s6805_s1 + $0x58c] ss:$16 sps:$4 sm:$0xff]  }
  0x77   :  { %3209 = vmatpush1.bf16.msra.mxu0 %v4566_v60  ;;  %3537 = vmatpush1.bf16.msra.mxu1 %v4569_v61  ;;  %v4656_v60 = vld [vmem:[%s6805_s1 + $0x580] ss:$16 sps:$4 sm:$0xff]   ;;  %v4659_v61 = vld [vmem:[%s6805_s1 + $0x588] ss:$16 sps:$4 sm:$0xff]  }
  0x78   :  { %3210 = vmatprep.subr.bf16.mxu0 %v4574_v62  ;;  %3538 = vmatprep.subr.bf16.mxu1 %v4577_v63  ;;  %v4664_v62 = vld [vmem:[%s6805_s1 + $0x5a4] ss:$16 sps:$4 sm:$0xff]   ;;  %v4667_v63 = vld [vmem:[%s6805_s1 + $0x5ac] ss:$16 sps:$4 sm:$0xff]  }
  0x7b   :  { %3211 = vmatpush1.bf16.msra.mxu0 %v4572_v0  ;;  %3539 = vmatpush1.bf16.msra.mxu1 %v4575_v1  ;;  %v4662_v0 = vld [vmem:[%s6805_s1 + $0x5a0] ss:$16 sps:$4 sm:$0xff]   ;;  %v4665_v1 = vld [vmem:[%s6805_s1 + $0x5a8] ss:$16 sps:$4 sm:$0xff]  }
  0x7c   :  { %3212 = vmatprep.subr.bf16.mxu0 %v4580_v2  ;;  %3540 = vmatprep.subr.bf16.mxu1 %v4583_v3  ;;  %v4670_v2 = vld [vmem:[%s6805_s1 + $0x5c4] ss:$16 sps:$4 sm:$0xff]   ;;  %v4673_v3 = vld [vmem:[%s6805_s1 + $0x5cc] ss:$16 sps:$4 sm:$0xff]  }
  0x7f   :  { %3213 = vmatpush1.bf16.msra.mxu0 %v4578_v4  ;;  %3541 = vmatpush1.bf16.msra.mxu1 %v4581_v5  ;;  %v4668_v4 = vld [vmem:[%s6805_s1 + $0x5c0] ss:$16 sps:$4 sm:$0xff]   ;;  %v4671_v5 = vld [vmem:[%s6805_s1 + $0x5c8] ss:$16 sps:$4 sm:$0xff]  }
  0x80   :  { %3223 = vmatprep.subr.bf16.mxu0 %v4586_v6  ;;  %3551 = vmatprep.subr.bf16.mxu1 %v4589_v8  ;;  %v4676_v6 = vld [vmem:[%s6805_s1 + $0x5e4] ss:$16 sps:$4 sm:$0xff]   ;;  %v4674_v8 = vld [vmem:[%s6805_s1 + $0x5e0] ss:$16 sps:$4 sm:$0xff]  }
  0x82   :  { %3215 = vmatmul.mubr.bf16.vlgmr.msra.gmra.mrb[0].mxu0 %v33_v11  ;;  %3543 = vmatmul.mubr.bf16.vlgmr.msra.gmra.mrb[0].mxu1 %v33_v11  ;;  %v19_v11 = vld [vmem:[%s6804_s0 + $0x20] sm:$0xff] }
  0x83   :  { %3224 = vmatpush1.bf16.msra.mxu0 %v4584_v9  ;;  %3552 = vmatpush1.bf16.msra.mxu1 %v4587_v10  ;;  %v4677_v9 = vld [vmem:[%s6805_s1 + $0x5e8] ss:$16 sps:$4 sm:$0xff]   ;;  %v4682_v10 = vld [vmem:[%s6805_s1 + $0x604] ss:$16 sps:$4 sm:$0xff]  }
  0x84   :  { %3225 = vmatprep.subr.bf16.mxu0 %v4592_v12  ;;  %3553 = vmatprep.subr.bf16.mxu1 %v4595_v13  ;;  %v4685_v12 = vld [vmem:[%s6805_s1 + $0x60c] ss:$16 sps:$4 sm:$0xff]   ;;  %v4680_v13 = vld [vmem:[%s6805_s1 + $0x600] ss:$16 sps:$4 sm:$0xff]  }
  0x85   :  { %3255 = vmatprep.mubr.bf16.mxu0 %v36_v15  ;;  %3583 = vmatprep.mubr.bf16.mxu1 %v36_v15  ;;  %v35_v15 = vpack.c.bf16 %v19_v11, %v19_v11  ;;  %v4775_v11 = vld [vmem:[%s6805_s1 + $0x7ec] ss:$16 sps:$4 sm:$0xff]  }
  0x87   :  { %3226 = vmatpush1.bf16.msra.mxu0 %v4590_v16  ;;  %3554 = vmatpush1.bf16.msra.mxu1 %v4593_v17  ;;  %v22_v16 = vld [vmem:[%s6804_s0 + $0x38] sm:$0xff]  ;;  %v4688_v17 = vld [vmem:[%s6805_s1 + $0x624] ss:$16 sps:$4 sm:$0xff]  }
  0x88   :  { %3227 = vmatprep.subr.bf16.mxu0 %v4598_v18  ;;  %3555 = vmatprep.subr.bf16.mxu1 %v4601_v19  ;;  %v4691_v18 = vld [vmem:[%s6805_s1 + $0x62c] ss:$16 sps:$4 sm:$0xff]   ;;  %v38_v19 = vpack.c.bf16 %v22_v16, %v22_v16 }
  0x89   :  { %v4781_v16 = vld [vmem:[%s6805_s1 + $0x80c] ss:$16 sps:$4 sm:$0xff]  }
  0x8b   :  { %3228 = vmatpush1.bf16.msra.mxu0 %v4596_v20  ;;  %3556 = vmatpush1.bf16.msra.mxu1 %v4599_v21  ;;  %v4686_v20 = vld [vmem:[%s6805_s1 + $0x620] ss:$16 sps:$4 sm:$0xff]   ;;  %v4689_v21 = vld [vmem:[%s6805_s1 + $0x628] ss:$16 sps:$4 sm:$0xff]  }
  0x8c   :  { %3229 = vmatprep.subr.bf16.mxu0 %v4604_v22  ;;  %3557 = vmatprep.subr.bf16.mxu1 %v4607_v23  ;;  %v4694_v22 = vld [vmem:[%s6805_s1 + $0x644] ss:$16 sps:$4 sm:$0xff]   ;;  %v4697_v23 = vld [vmem:[%s6805_s1 + $0x64c] ss:$16 sps:$4 sm:$0xff]  }
  0x8f   :  { %3230 = vmatpush1.bf16.msra.mxu0 %v4602_v24  ;;  %3558 = vmatpush1.bf16.msra.mxu1 %v4605_v25  ;;  %v4692_v24 = vld [vmem:[%s6805_s1 + $0x640] ss:$16 sps:$4 sm:$0xff]   ;;  %v4695_v25 = vld [vmem:[%s6805_s1 + $0x648] ss:$16 sps:$4 sm:$0xff]  }
  0x90   :  { %3231 = vmatprep.subr.bf16.mxu0 %v4610_v26  ;;  %3559 = vmatprep.subr.bf16.mxu1 %v4613_v27  ;;  %v4700_v26 = vld [vmem:[%s6805_s1 + $0x664] ss:$16 sps:$4 sm:$0xff]   ;;  %v4703_v27 = vld [vmem:[%s6805_s1 + $0x66c] ss:$16 sps:$4 sm:$0xff]  }
  0x93   :  { %3232 = vmatpush1.bf16.msra.mxu0 %v4608_v28  ;;  %3560 = vmatpush1.bf16.msra.mxu1 %v4611_v29  ;;  %v4698_v28 = vld [vmem:[%s6805_s1 + $0x660] ss:$16 sps:$4 sm:$0xff]   ;;  %v4701_v29 = vld [vmem:[%s6805_s1 + $0x668] ss:$16 sps:$4 sm:$0xff]  }
  0x94   :  { %3233 = vmatprep.subr.bf16.mxu0 %v4616_v30  ;;  %3561 = vmatprep.subr.bf16.mxu1 %v4619_v31  ;;  %v4706_v30 = vld [vmem:[%s6805_s1 + $0x684] ss:$16 sps:$4 sm:$0xff]   ;;  %v4709_v31 = vld [vmem:[%s6805_s1 + $0x68c] ss:$16 sps:$4 sm:$0xff]  }
  0x97   :  { %3234 = vmatpush1.bf16.msra.mxu0 %v4614_v32  ;;  %3562 = vmatpush1.bf16.msra.mxu1 %v4617_v33  ;;  %v4704_v32 = vld [vmem:[%s6805_s1 + $0x680] ss:$16 sps:$4 sm:$0xff]   ;;  %v4707_v33 = vld [vmem:[%s6805_s1 + $0x688] ss:$16 sps:$4 sm:$0xff]  }
  0x98   :  { %3235 = vmatprep.subr.bf16.mxu0 %v4622_v34  ;;  %3563 = vmatprep.subr.bf16.mxu1 %v4625_v35  ;;  %v4712_v34 = vld [vmem:[%s6805_s1 + $0x6a4] ss:$16 sps:$4 sm:$0xff]   ;;  %v4715_v35 = vld [vmem:[%s6805_s1 + $0x6ac] ss:$16 sps:$4 sm:$0xff]  }
  0x9b   :  { %3236 = vmatpush1.bf16.msra.mxu0 %v4620_v36  ;;  %3564 = vmatpush1.bf16.msra.mxu1 %v4623_v37  ;;  %v4710_v36 = vld [vmem:[%s6805_s1 + $0x6a0] ss:$16 sps:$4 sm:$0xff]   ;;  %v4713_v37 = vld [vmem:[%s6805_s1 + $0x6a8] ss:$16 sps:$4 sm:$0xff]  }
  0x9c   :  { %3237 = vmatprep.subr.bf16.mxu0 %v4628_v38  ;;  %3565 = vmatprep.subr.bf16.mxu1 %v4631_v39  ;;  %v4718_v38 = vld [vmem:[%s6805_s1 + $0x6c4] ss:$16 sps:$4 sm:$0xff]   ;;  %v4721_v39 = vld [vmem:[%s6805_s1 + $0x6cc] ss:$16 sps:$4 sm:$0xff]  }
  0x9f   :  { %3238 = vmatpush1.bf16.msra.mxu0 %v4626_v40  ;;  %3566 = vmatpush1.bf16.msra.mxu1 %v4629_v41  ;;  %v4716_v40 = vld [vmem:[%s6805_s1 + $0x6c0] ss:$16 sps:$4 sm:$0xff]   ;;  %v4719_v41 = vld [vmem:[%s6805_s1 + $0x6c8] ss:$16 sps:$4 sm:$0xff]  }
  0xa0   :  { %3239 = vmatprep.subr.bf16.mxu0 %v4634_v42  ;;  %3567 = vmatprep.subr.bf16.mxu1 %v4637_v43  ;;  %v4724_v42 = vld [vmem:[%s6805_s1 + $0x6e4] ss:$16 sps:$4 sm:$0xff]   ;;  %v4727_v43 = vld [vmem:[%s6805_s1 + $0x6ec] ss:$16 sps:$4 sm:$0xff]  }
  0xa3   :  { %3240 = vmatpush1.bf16.msra.mxu0 %v4632_v44  ;;  %3568 = vmatpush1.bf16.msra.mxu1 %v4635_v45  ;;  %v4722_v44 = vld [vmem:[%s6805_s1 + $0x6e0] ss:$16 sps:$4 sm:$0xff]   ;;  %v4725_v45 = vld [vmem:[%s6805_s1 + $0x6e8] ss:$16 sps:$4 sm:$0xff]  }
  0xa4   :  { %3241 = vmatprep.subr.bf16.mxu0 %v4640_v46  ;;  %3569 = vmatprep.subr.bf16.mxu1 %v4643_v47  ;;  %v4730_v46 = vld [vmem:[%s6805_s1 + $0x704] ss:$16 sps:$4 sm:$0xff]   ;;  %v4733_v47 = vld [vmem:[%s6805_s1 + $0x70c] ss:$16 sps:$4 sm:$0xff]  }
  0xa7   :  { %3242 = vmatpush1.bf16.msra.mxu0 %v4638_v48  ;;  %3570 = vmatpush1.bf16.msra.mxu1 %v4641_v49  ;;  %v4728_v48 = vld [vmem:[%s6805_s1 + $0x700] ss:$16 sps:$4 sm:$0xff]   ;;  %v4731_v49 = vld [vmem:[%s6805_s1 + $0x708] ss:$16 sps:$4 sm:$0xff]  }
  0xa8   :  { %3243 = vmatprep.subr.bf16.mxu0 %v4646_v50  ;;  %3571 = vmatprep.subr.bf16.mxu1 %v4649_v51  ;;  %v4736_v50 = vld [vmem:[%s6805_s1 + $0x724] ss:$16 sps:$4 sm:$0xff]   ;;  %v4739_v51 = vld [vmem:[%s6805_s1 + $0x72c] ss:$16 sps:$4 sm:$0xff]  }
  0xab   :  { %3244 = vmatpush1.bf16.msra.mxu0 %v4644_v52  ;;  %3572 = vmatpush1.bf16.msra.mxu1 %v4647_v53  ;;  %v4734_v52 = vld [vmem:[%s6805_s1 + $0x720] ss:$16 sps:$4 sm:$0xff]   ;;  %v4737_v53 = vld [vmem:[%s6805_s1 + $0x728] ss:$16 sps:$4 sm:$0xff]  }
  0xac   :  { %3245 = vmatprep.subr.bf16.mxu0 %v4652_v54  ;;  %3573 = vmatprep.subr.bf16.mxu1 %v4655_v55  ;;  %v4742_v54 = vld [vmem:[%s6805_s1 + $0x744] ss:$16 sps:$4 sm:$0xff]   ;;  %v4745_v55 = vld [vmem:[%s6805_s1 + $0x74c] ss:$16 sps:$4 sm:$0xff]  }
  0xaf   :  { %3246 = vmatpush1.bf16.msra.mxu0 %v4650_v56  ;;  %3574 = vmatpush1.bf16.msra.mxu1 %v4653_v57  ;;  %v4740_v56 = vld [vmem:[%s6805_s1 + $0x740] ss:$16 sps:$4 sm:$0xff]   ;;  %v4743_v57 = vld [vmem:[%s6805_s1 + $0x748] ss:$16 sps:$4 sm:$0xff]  }
  0xb0   :  { %3247 = vmatprep.subr.bf16.mxu0 %v4658_v58  ;;  %3575 = vmatprep.subr.bf16.mxu1 %v4661_v59  ;;  %v4748_v58 = vld [vmem:[%s6805_s1 + $0x764] ss:$16 sps:$4 sm:$0xff]   ;;  %v4751_v59 = vld [vmem:[%s6805_s1 + $0x76c] ss:$16 sps:$4 sm:$0xff]  }
  0xb3   :  { %3248 = vmatpush1.bf16.msra.mxu0 %v4656_v60  ;;  %3576 = vmatpush1.bf16.msra.mxu1 %v4659_v61  ;;  %v4746_v60 = vld [vmem:[%s6805_s1 + $0x760] ss:$16 sps:$4 sm:$0xff]   ;;  %v4749_v61 = vld [vmem:[%s6805_s1 + $0x768] ss:$16 sps:$4 sm:$0xff]  }
  0xb4   :  { %3249 = vmatprep.subr.bf16.mxu0 %v4664_v62  ;;  %3577 = vmatprep.subr.bf16.mxu1 %v4667_v63  ;;  %v4754_v62 = vld [vmem:[%s6805_s1 + $0x784] ss:$16 sps:$4 sm:$0xff]   ;;  %v4757_v63 = vld [vmem:[%s6805_s1 + $0x78c] ss:$16 sps:$4 sm:$0xff]  }
  0xb7   :  { %3250 = vmatpush1.bf16.msra.mxu0 %v4662_v0  ;;  %3578 = vmatpush1.bf16.msra.mxu1 %v4665_v1  ;;  %v4752_v0 = vld [vmem:[%s6805_s1 + $0x780] ss:$16 sps:$4 sm:$0xff]   ;;  %v4755_v1 = vld [vmem:[%s6805_s1 + $0x788] ss:$16 sps:$4 sm:$0xff]  }
  0xb8   :  { %3251 = vmatprep.subr.bf16.mxu0 %v4670_v2  ;;  %3579 = vmatprep.subr.bf16.mxu1 %v4673_v3  ;;  %v4760_v2 = vld [vmem:[%s6805_s1 + $0x7a4] ss:$16 sps:$4 sm:$0xff]   ;;  %v4763_v3 = vld [vmem:[%s6805_s1 + $0x7ac] ss:$16 sps:$4 sm:$0xff]  }
  0xbb   :  { %3252 = vmatpush1.bf16.msra.mxu0 %v4668_v4  ;;  %3580 = vmatpush1.bf16.msra.mxu1 %v4671_v5  ;;  %v4758_v4 = vld [vmem:[%s6805_s1 + $0x7a0] ss:$16 sps:$4 sm:$0xff]   ;;  %v4761_v5 = vld [vmem:[%s6805_s1 + $0x7a8] ss:$16 sps:$4 sm:$0xff]  }
  0xbc   :  { %3253 = vmatprep.subr.bf16.mxu0 %v4676_v6  ;;  %3581 = vmatprep.subr.bf16.mxu1 %v4679_v7  ;;  %v4766_v6 = vld [vmem:[%s6805_s1 + $0x7c4] ss:$16 sps:$4 sm:$0xff]   ;;  %v4769_v7 = vld [vmem:[%s6805_s1 + $0x7cc] ss:$16 sps:$4 sm:$0xff]  }
  0xbf   :  { %3254 = vmatpush1.bf16.msra.mxu0 %v4674_v8  ;;  %3582 = vmatpush1.bf16.msra.mxu1 %v4677_v9  ;;  %v4764_v8 = vld [vmem:[%s6805_s1 + $0x7c0] ss:$16 sps:$4 sm:$0xff]   ;;  %v4767_v9 = vld [vmem:[%s6805_s1 + $0x7c8] ss:$16 sps:$4 sm:$0xff]  }
  0xc0   :  { %3264 = vmatprep.subr.bf16.mxu0 %v4682_v10  ;;  %3592 = vmatprep.subr.bf16.mxu1 %v4685_v12  ;;  %v4772_v10 = vld [vmem:[%s6805_s1 + $0x7e4] ss:$16 sps:$4 sm:$0xff]   ;;  %v4770_v12 = vld [vmem:[%s6805_s1 + $0x7e0] ss:$16 sps:$4 sm:$0xff]  }
  0xc2   :  { %3256 = vmatmul.mubr.bf16.vlgmr.msra.gmra.mrb[0].mxu0 %v35_v15  ;;  %3584 = vmatmul.mubr.bf16.vlgmr.msra.gmra.mrb[0].mxu1 %v35_v15  ;;  %v4778_v15 = vld [vmem:[%s6805_s1 + $0x804] ss:$16 sps:$4 sm:$0xff]  }
  0xc3   :  { %3265 = vmatpush1.bf16.msra.mxu0 %v4680_v13  ;;  %3593 = vmatpush1.bf16.msra.mxu1 %v4683_v14  ;;  %v4773_v13 = vld [vmem:[%s6805_s1 + $0x7e8] ss:$16 sps:$4 sm:$0xff]   ;;  %v21_v14 = vld [vmem:[%s6804_s0 + $0x30] sm:$0xff] }
  0xc4   :  { %3266 = vmatprep.subr.bf16.mxu0 %v4688_v17  ;;  %3594 = vmatprep.subr.bf16.mxu1 %v4691_v18  ;;  %v37_v17 = vpack.c.bf16 %v21_v14, %v21_v14  ;;  %v24_v18 = vld [vmem:[%s6804_s0 + $0x48] sm:$0xff]  ;;  %v4868_v14 = vld [vmem:[%s6805_s1 + $0x9e4] ss:$16 sps:$4 sm:$0xff]  }
  0xc5   :  { %3296 = vmatprep.mubr.bf16.mxu0 %v38_v19  ;;  %3624 = vmatprep.mubr.bf16.mxu1 %v38_v19  ;;  %v4776_v19 = vld [vmem:[%s6805_s1 + $0x800] ss:$16 sps:$4 sm:$0xff]  }
  0xc7   :  { %3267 = vmatpush1.bf16.msra.mxu0 %v4686_v20  ;;  %3595 = vmatpush1.bf16.msra.mxu1 %v4689_v21  ;;  %v4779_v20 = vld [vmem:[%s6805_s1 + $0x808] ss:$16 sps:$4 sm:$0xff]   ;;  %v4784_v21 = vld [vmem:[%s6805_s1 + $0x824] ss:$16 sps:$4 sm:$0xff]  }
  0xc8   :  { %3268 = vmatprep.subr.bf16.mxu0 %v4694_v22  ;;  %3596 = vmatprep.subr.bf16.mxu1 %v4697_v23  ;;  %v4787_v22 = vld [vmem:[%s6805_s1 + $0x82c] ss:$16 sps:$4 sm:$0xff]   ;;  %v40_v23 = vpack.c.bf16 %v24_v18, %v24_v18  ;;  %v4874_v18 = vld [vmem:[%s6805_s1 + $0xa04] ss:$16 sps:$4 sm:$0xff]  }
  0xcb   :  { %3269 = vmatpush1.bf16.msra.mxu0 %v4692_v24  ;;  %3597 = vmatpush1.bf16.msra.mxu1 %v4695_v25  ;;  %v4782_v24 = vld [vmem:[%s6805_s1 + $0x820] ss:$16 sps:$4 sm:$0xff]   ;;  %v4785_v25 = vld [vmem:[%s6805_s1 + $0x828] ss:$16 sps:$4 sm:$0xff]  }
  0xcc   :  { %3270 = vmatprep.subr.bf16.mxu0 %v4700_v26  ;;  %3598 = vmatprep.subr.bf16.mxu1 %v4703_v27  ;;  %v4790_v26 = vld [vmem:[%s6805_s1 + $0x844] ss:$16 sps:$4 sm:$0xff]   ;;  %v4793_v27 = vld [vmem:[%s6805_s1 + $0x84c] ss:$16 sps:$4 sm:$0xff]  }
  0xcf   :  { %3271 = vmatpush1.bf16.msra.mxu0 %v4698_v28  ;;  %3599 = vmatpush1.bf16.msra.mxu1 %v4701_v29  ;;  %v4788_v28 = vld [vmem:[%s6805_s1 + $0x840] ss:$16 sps:$4 sm:$0xff]   ;;  %v4791_v29 = vld [vmem:[%s6805_s1 + $0x848] ss:$16 sps:$4 sm:$0xff]  }
  0xd0   :  { %3272 = vmatprep.subr.bf16.mxu0 %v4706_v30  ;;  %3600 = vmatprep.subr.bf16.mxu1 %v4709_v31  ;;  %v4796_v30 = vld [vmem:[%s6805_s1 + $0x864] ss:$16 sps:$4 sm:$0xff]   ;;  %v4799_v31 = vld [vmem:[%s6805_s1 + $0x86c] ss:$16 sps:$4 sm:$0xff]  }
  0xd3   :  { %3273 = vmatpush1.bf16.msra.mxu0 %v4704_v32  ;;  %3601 = vmatpush1.bf16.msra.mxu1 %v4707_v33  ;;  %v4794_v32 = vld [vmem:[%s6805_s1 + $0x860] ss:$16 sps:$4 sm:$0xff]   ;;  %v4797_v33 = vld [vmem:[%s6805_s1 + $0x868] ss:$16 sps:$4 sm:$0xff]  }
  0xd4   :  { %3274 = vmatprep.subr.bf16.mxu0 %v4712_v34  ;;  %3602 = vmatprep.subr.bf16.mxu1 %v4715_v35  ;;  %v4802_v34 = vld [vmem:[%s6805_s1 + $0x884] ss:$16 sps:$4 sm:$0xff]   ;;  %v4805_v35 = vld [vmem:[%s6805_s1 + $0x88c] ss:$16 sps:$4 sm:$0xff]  }
  0xd7   :  { %3275 = vmatpush1.bf16.msra.mxu0 %v4710_v36  ;;  %3603 = vmatpush1.bf16.msra.mxu1 %v4713_v37  ;;  %v4800_v36 = vld [vmem:[%s6805_s1 + $0x880] ss:$16 sps:$4 sm:$0xff]   ;;  %v4803_v37 = vld [vmem:[%s6805_s1 + $0x888] ss:$16 sps:$4 sm:$0xff]  }
  0xd8   :  { %3276 = vmatprep.subr.bf16.mxu0 %v4718_v38  ;;  %3604 = vmatprep.subr.bf16.mxu1 %v4721_v39  ;;  %v4808_v38 = vld [vmem:[%s6805_s1 + $0x8a4] ss:$16 sps:$4 sm:$0xff]   ;;  %v4811_v39 = vld [vmem:[%s6805_s1 + $0x8ac] ss:$16 sps:$4 sm:$0xff]  }
  0xdb   :  { %3277 = vmatpush1.bf16.msra.mxu0 %v4716_v40  ;;  %3605 = vmatpush1.bf16.msra.mxu1 %v4719_v41  ;;  %v4806_v40 = vld [vmem:[%s6805_s1 + $0x8a0] ss:$16 sps:$4 sm:$0xff]   ;;  %v4809_v41 = vld [vmem:[%s6805_s1 + $0x8a8] ss:$16 sps:$4 sm:$0xff]  }
  0xdc   :  { %3278 = vmatprep.subr.bf16.mxu0 %v4724_v42  ;;  %3606 = vmatprep.subr.bf16.mxu1 %v4727_v43  ;;  %v4814_v42 = vld [vmem:[%s6805_s1 + $0x8c4] ss:$16 sps:$4 sm:$0xff]   ;;  %v4817_v43 = vld [vmem:[%s6805_s1 + $0x8cc] ss:$16 sps:$4 sm:$0xff]  }
  0xdf   :  { %3279 = vmatpush1.bf16.msra.mxu0 %v4722_v44  ;;  %3607 = vmatpush1.bf16.msra.mxu1 %v4725_v45  ;;  %v4812_v44 = vld [vmem:[%s6805_s1 + $0x8c0] ss:$16 sps:$4 sm:$0xff]   ;;  %v4815_v45 = vld [vmem:[%s6805_s1 + $0x8c8] ss:$16 sps:$4 sm:$0xff]  }
  0xe0   :  { %3280 = vmatprep.subr.bf16.mxu0 %v4730_v46  ;;  %3608 = vmatprep.subr.bf16.mxu1 %v4733_v47  ;;  %v4820_v46 = vld [vmem:[%s6805_s1 + $0x8e4] ss:$16 sps:$4 sm:$0xff]   ;;  %v4823_v47 = vld [vmem:[%s6805_s1 + $0x8ec] ss:$16 sps:$4 sm:$0xff]  }
  0xe3   :  { %3281 = vmatpush1.bf16.msra.mxu0 %v4728_v48  ;;  %3609 = vmatpush1.bf16.msra.mxu1 %v4731_v49  ;;  %v4818_v48 = vld [vmem:[%s6805_s1 + $0x8e0] ss:$16 sps:$4 sm:$0xff]   ;;  %v4821_v49 = vld [vmem:[%s6805_s1 + $0x8e8] ss:$16 sps:$4 sm:$0xff]  }
  0xe4   :  { %3282 = vmatprep.subr.bf16.mxu0 %v4736_v50  ;;  %3610 = vmatprep.subr.bf16.mxu1 %v4739_v51  ;;  %v4826_v50 = vld [vmem:[%s6805_s1 + $0x904] ss:$16 sps:$4 sm:$0xff]   ;;  %v4829_v51 = vld [vmem:[%s6805_s1 + $0x90c] ss:$16 sps:$4 sm:$0xff]  }
  0xe7   :  { %3283 = vmatpush1.bf16.msra.mxu0 %v4734_v52  ;;  %3611 = vmatpush1.bf16.msra.mxu1 %v4737_v53  ;;  %v4824_v52 = vld [vmem:[%s6805_s1 + $0x900] ss:$16 sps:$4 sm:$0xff]   ;;  %v4827_v53 = vld [vmem:[%s6805_s1 + $0x908] ss:$16 sps:$4 sm:$0xff]  }
  0xe8   :  { %3284 = vmatprep.subr.bf16.mxu0 %v4742_v54  ;;  %3612 = vmatprep.subr.bf16.mxu1 %v4745_v55  ;;  %v4832_v54 = vld [vmem:[%s6805_s1 + $0x924] ss:$16 sps:$4 sm:$0xff]   ;;  %v4835_v55 = vld [vmem:[%s6805_s1 + $0x92c] ss:$16 sps:$4 sm:$0xff]  }
  0xeb   :  { %3285 = vmatpush1.bf16.msra.mxu0 %v4740_v56  ;;  %3613 = vmatpush1.bf16.msra.mxu1 %v4743_v57  ;;  %v4830_v56 = vld [vmem:[%s6805_s1 + $0x920] ss:$16 sps:$4 sm:$0xff]   ;;  %v4833_v57 = vld [vmem:[%s6805_s1 + $0x928] ss:$16 sps:$4 sm:$0xff]  }
  0xec   :  { %3286 = vmatprep.subr.bf16.mxu0 %v4748_v58  ;;  %3614 = vmatprep.subr.bf16.mxu1 %v4751_v59  ;;  %v4838_v58 = vld [vmem:[%s6805_s1 + $0x944] ss:$16 sps:$4 sm:$0xff]   ;;  %v4841_v59 = vld [vmem:[%s6805_s1 + $0x94c] ss:$16 sps:$4 sm:$0xff]  }
  0xef   :  { %3287 = vmatpush1.bf16.msra.mxu0 %v4746_v60  ;;  %3615 = vmatpush1.bf16.msra.mxu1 %v4749_v61  ;;  %v4836_v60 = vld [vmem:[%s6805_s1 + $0x940] ss:$16 sps:$4 sm:$0xff]   ;;  %v4839_v61 = vld [vmem:[%s6805_s1 + $0x948] ss:$16 sps:$4 sm:$0xff]  }
  0xf0   :  { %3288 = vmatprep.subr.bf16.mxu0 %v4754_v62  ;;  %3616 = vmatprep.subr.bf16.mxu1 %v4757_v63  ;;  %v4844_v62 = vld [vmem:[%s6805_s1 + $0x964] ss:$16 sps:$4 sm:$0xff]   ;;  %v4847_v63 = vld [vmem:[%s6805_s1 + $0x96c] ss:$16 sps:$4 sm:$0xff]  }
  0xf3   :  { %3289 = vmatpush1.bf16.msra.mxu0 %v4752_v0  ;;  %3617 = vmatpush1.bf16.msra.mxu1 %v4755_v1  ;;  %v4842_v0 = vld [vmem:[%s6805_s1 + $0x960] ss:$16 sps:$4 sm:$0xff]   ;;  %v4845_v1 = vld [vmem:[%s6805_s1 + $0x968] ss:$16 sps:$4 sm:$0xff]  }
  0xf4   :  { %3290 = vmatprep.subr.bf16.mxu0 %v4760_v2  ;;  %3618 = vmatprep.subr.bf16.mxu1 %v4763_v3  ;;  %v4850_v2 = vld [vmem:[%s6805_s1 + $0x984] ss:$16 sps:$4 sm:$0xff]   ;;  %v4853_v3 = vld [vmem:[%s6805_s1 + $0x98c] ss:$16 sps:$4 sm:$0xff]  }
  0xf7   :  { %3291 = vmatpush1.bf16.msra.mxu0 %v4758_v4  ;;  %3619 = vmatpush1.bf16.msra.mxu1 %v4761_v5  ;;  %v4848_v4 = vld [vmem:[%s6805_s1 + $0x980] ss:$16 sps:$4 sm:$0xff]   ;;  %v4851_v5 = vld [vmem:[%s6805_s1 + $0x988] ss:$16 sps:$4 sm:$0xff]  }
  0xf8   :  { %3292 = vmatprep.subr.bf16.mxu0 %v4766_v6  ;;  %3620 = vmatprep.subr.bf16.mxu1 %v4769_v7  ;;  %v4856_v6 = vld [vmem:[%s6805_s1 + $0x9a4] ss:$16 sps:$4 sm:$0xff]   ;;  %v4859_v7 = vld [vmem:[%s6805_s1 + $0x9ac] ss:$16 sps:$4 sm:$0xff]  }
  0xfb   :  { %3293 = vmatpush1.bf16.msra.mxu0 %v4764_v8  ;;  %3621 = vmatpush1.bf16.msra.mxu1 %v4767_v9  ;;  %v4854_v8 = vld [vmem:[%s6805_s1 + $0x9a0] ss:$16 sps:$4 sm:$0xff]   ;;  %v4857_v9 = vld [vmem:[%s6805_s1 + $0x9a8] ss:$16 sps:$4 sm:$0xff]  }
  0xfc   :  { %3294 = vmatprep.subr.bf16.mxu0 %v4772_v10  ;;  %3622 = vmatprep.subr.bf16.mxu1 %v4775_v11  ;;  %v4862_v10 = vld [vmem:[%s6805_s1 + $0x9c4] ss:$16 sps:$4 sm:$0xff]   ;;  %v4865_v11 = vld [vmem:[%s6805_s1 + $0x9cc] ss:$16 sps:$4 sm:$0xff]  }
  0xff   :  { %3295 = vmatpush1.bf16.msra.mxu0 %v4770_v12  ;;  %3623 = vmatpush1.bf16.msra.mxu1 %v4773_v13  ;;  %v4860_v12 = vld [vmem:[%s6805_s1 + $0x9c0] ss:$16 sps:$4 sm:$0xff]   ;;  %v4863_v13 = vld [vmem:[%s6805_s1 + $0x9c8] ss:$16 sps:$4 sm:$0xff]  }
 0x100   :  { %3305 = vmatprep.subr.bf16.mxu0 %v4778_v15  ;;  %3633 = vmatprep.subr.bf16.mxu1 %v4781_v16  ;;  %v4871_v15 = vld [vmem:[%s6805_s1 + $0x9ec] ss:$16 sps:$4 sm:$0xff]   ;;  %v4866_v16 = vld [vmem:[%s6805_s1 + $0x9e0] ss:$16 sps:$4 sm:$0xff]  }
 0x102   :  { %3297 = vmatmul.mubr.bf16.vlgmr.msra.gmra.mrb[0].mxu0 %v37_v17  ;;  %3625 = vmatmul.mubr.bf16.vlgmr.msra.gmra.mrb[0].mxu1 %v37_v17  ;;  %v4869_v17 = vld [vmem:[%s6805_s1 + $0x9e8] ss:$16 sps:$4 sm:$0xff]  }
 0x103   :  { %3306 = vmatpush1.bf16.msra.mxu0 %v4776_v19  ;;  %3634 = vmatpush1.bf16.msra.mxu1 %v4779_v20  ;;  %v23_v19 = vld [vmem:[%s6804_s0 + $0x40] sm:$0xff]  ;;  %v4877_v20 = vld [vmem:[%s6805_s1 + $0xa0c] ss:$16 sps:$4 sm:$0xff]  }
 0x104   :  { %3307 = vmatprep.subr.bf16.mxu0 %v4784_v21  ;;  %3635 = vmatprep.subr.bf16.mxu1 %v4787_v22  ;;  %v26_v21 = vld [vmem:[%s6804_s0 + $0x58] sm:$0xff]  ;;  %v39_v22 = vpack.c.bf16 %v23_v19, %v23_v19 }
 0x105   :  { %3337 = vmatprep.mubr.bf16.mxu0 %v40_v23  ;;  %3665 = vmatprep.mubr.bf16.mxu1 %v40_v23  ;;  %v4872_v23 = vld [vmem:[%s6805_s1 + $0xa00] ss:$16 sps:$4 sm:$0xff]  }
 0x107   :  { %3308 = vmatpush1.bf16.msra.mxu0 %v4782_v24  ;;  %3636 = vmatpush1.bf16.msra.mxu1 %v4785_v25  ;;  %v4875_v24 = vld [vmem:[%s6805_s1 + $0xa08] ss:$16 sps:$4 sm:$0xff]   ;;  %v4880_v25 = vld [vmem:[%s6805_s1 + $0xa24] ss:$16 sps:$4 sm:$0xff]  }
 0x108   :  { %3309 = vmatprep.subr.bf16.mxu0 %v4790_v26  ;;  %3637 = vmatprep.subr.bf16.mxu1 %v4793_v27  ;;  %v4883_v26 = vld [vmem:[%s6805_s1 + $0xa2c] ss:$16 sps:$4 sm:$0xff]   ;;  %v42_v27 = vpack.c.bf16 %v26_v21, %v26_v21 }
 0x10b   :  { %3310 = vmatpush1.bf16.msra.mxu0 %v4788_v28  ;;  %3638 = vmatpush1.bf16.msra.mxu1 %v4791_v29  ;;  %v4878_v28 = vld [vmem:[%s6805_s1 + $0xa20] ss:$16 sps:$4 sm:$0xff]   ;;  %v4881_v29 = vld [vmem:[%s6805_s1 + $0xa28] ss:$16 sps:$4 sm:$0xff]  }
 0x10c   :  { %3311 = vmatprep.subr.bf16.mxu0 %v4796_v30  ;;  %3639 = vmatprep.subr.bf16.mxu1 %v4799_v31  ;;  %v4886_v30 = vld [vmem:[%s6805_s1 + $0xa44] ss:$16 sps:$4 sm:$0xff]   ;;  %v4889_v31 = vld [vmem:[%s6805_s1 + $0xa4c] ss:$16 sps:$4 sm:$0xff]  }
 0x10f   :  { %3312 = vmatpush1.bf16.msra.mxu0 %v4794_v32  ;;  %3640 = vmatpush1.bf16.msra.mxu1 %v4797_v33 }
 0x110   :  { %3313 = vmatprep.subr.bf16.mxu0 %v4802_v34  ;;  %3641 = vmatprep.subr.bf16.mxu1 %v4805_v35 }
 0x113   :  { %3314 = vmatpush1.bf16.msra.mxu0 %v4800_v36  ;;  %3642 = vmatpush1.bf16.msra.mxu1 %v4803_v37 }
 0x114   :  { %3315 = vmatprep.subr.bf16.mxu0 %v4808_v38  ;;  %3643 = vmatprep.subr.bf16.mxu1 %v4811_v39 }
 0x117   :  { %3316 = vmatpush1.bf16.msra.mxu0 %v4806_v40  ;;  %3644 = vmatpush1.bf16.msra.mxu1 %v4809_v41 }
 0x118   :  { %3317 = vmatprep.subr.bf16.mxu0 %v4814_v42  ;;  %3645 = vmatprep.subr.bf16.mxu1 %v4817_v43 }
 0x11b   :  { %3318 = vmatpush1.bf16.msra.mxu0 %v4812_v44  ;;  %3646 = vmatpush1.bf16.msra.mxu1 %v4815_v45 }
 0x11c   :  { %3319 = vmatprep.subr.bf16.mxu0 %v4820_v46  ;;  %3647 = vmatprep.subr.bf16.mxu1 %v4823_v47 }
 0x11f   :  { %3320 = vmatpush1.bf16.msra.mxu0 %v4818_v48  ;;  %3648 = vmatpush1.bf16.msra.mxu1 %v4821_v49 }
 0x120   :  { %3321 = vmatprep.subr.bf16.mxu0 %v4826_v50  ;;  %3649 = vmatprep.subr.bf16.mxu1 %v4829_v51 }
 0x123   :  { %3322 = vmatpush1.bf16.msra.mxu0 %v4824_v52  ;;  %3650 = vmatpush1.bf16.msra.mxu1 %v4827_v53 }
 0x124   :  { %3323 = vmatprep.subr.bf16.mxu0 %v4832_v54  ;;  %3651 = vmatprep.subr.bf16.mxu1 %v4835_v55 }
 0x127   :  { %3324 = vmatpush1.bf16.msra.mxu0 %v4830_v56  ;;  %3652 = vmatpush1.bf16.msra.mxu1 %v4833_v57 }
 0x128   :  { %3325 = vmatprep.subr.bf16.mxu0 %v4838_v58  ;;  %3653 = vmatprep.subr.bf16.mxu1 %v4841_v59 }
 0x12b   :  { %3326 = vmatpush1.bf16.msra.mxu0 %v4836_v60  ;;  %3654 = vmatpush1.bf16.msra.mxu1 %v4839_v61 }
 0x12c   :  { %3327 = vmatprep.subr.bf16.mxu0 %v4844_v62  ;;  %3655 = vmatprep.subr.bf16.mxu1 %v4847_v63 }
 0x12f   :  { %3328 = vmatpush1.bf16.msra.mxu0 %v4842_v0  ;;  %3656 = vmatpush1.bf16.msra.mxu1 %v4845_v1 }
 0x130   :  { %3329 = vmatprep.subr.bf16.mxu0 %v4850_v2  ;;  %3657 = vmatprep.subr.bf16.mxu1 %v4853_v3 }
 0x133   :  { %3330 = vmatpush1.bf16.msra.mxu0 %v4848_v4  ;;  %3658 = vmatpush1.bf16.msra.mxu1 %v4851_v5 }
 0x134   :  { %3331 = vmatprep.subr.bf16.mxu0 %v4856_v6  ;;  %3659 = vmatprep.subr.bf16.mxu1 %v4859_v7 }
 0x137   :  { %3332 = vmatpush1.bf16.msra.mxu0 %v4854_v8  ;;  %3660 = vmatpush1.bf16.msra.mxu1 %v4857_v9 }
 0x138   :  { %3333 = vmatprep.subr.bf16.mxu0 %v4862_v10  ;;  %3661 = vmatprep.subr.bf16.mxu1 %v4865_v11 }
 0x13b   :  { %3334 = vmatpush1.bf16.msra.mxu0 %v4860_v12  ;;  %3662 = vmatpush1.bf16.msra.mxu1 %v4863_v13 }
 0x13c   :  { %3335 = vmatprep.subr.bf16.mxu0 %v4868_v14  ;;  %3663 = vmatprep.subr.bf16.mxu1 %v4871_v15 }
 0x13f   :  { %3336 = vmatpush1.bf16.msra.mxu0 %v4866_v16  ;;  %3664 = vmatpush1.bf16.msra.mxu1 %v4869_v17 }
 0x140   :  { %3346 = vmatprep.subr.bf16.mxu0 %v4874_v18  ;;  %3674 = vmatprep.subr.bf16.mxu1 %v4877_v20 }
 0x142   :  { %3338 = vmatmul.mubr.bf16.vlgmr.msra.gmra.mrb[0].mxu0 %v39_v22  ;;  %3666 = vmatmul.mubr.bf16.vlgmr.msra.gmra.mrb[0].mxu1 %v39_v22 }
 0x143   :  { %3347 = vmatpush1.bf16.msra.mxu0 %v4872_v23  ;;  %3675 = vmatpush1.bf16.msra.mxu1 %v4875_v24 }
 0x144   :  { %3348 = vmatprep.subr.bf16.mxu0 %v4880_v25  ;;  %3676 = vmatprep.subr.bf16.mxu1 %v4883_v26 }
 0x145   :  { %3378 = vmatprep.mubr.bf16.mxu0 %v42_v27  ;;  %3706 = vmatprep.mubr.bf16.mxu1 %v42_v27 }
 0x146   :  { %8 = vsyncpa [#allocation3], 0  ;;  %v4884_v32 = vld [vmem:[%s6805_s1 + $0xa40] ss:$16 sps:$4 sm:$0xff]   ;;  %v4887_v33 = vld [vmem:[%s6805_s1 + $0xa48] ss:$16 sps:$4 sm:$0xff]  }
 0x147   :  { %3349 = vmatpush1.bf16.msra.mxu0 %v4878_v28  ;;  %3677 = vmatpush1.bf16.msra.mxu1 %v4881_v29  ;;  %v4892_v34 = vld [vmem:[%s6805_s1 + $0xa64] ss:$16 sps:$4 sm:$0xff]   ;;  %v4895_v35 = vld [vmem:[%s6805_s1 + $0xa6c] ss:$16 sps:$4 sm:$0xff]   ;;  %v4890_v36 = vld [vmem:[%s6805_s1 + $0xa60] ss:$16 sps:$4 sm:$0xff]  }
 0x148   :  { %3350 = vmatprep.subr.bf16.mxu0 %v4886_v30  ;;  %3678 = vmatprep.subr.bf16.mxu1 %v4889_v31  ;;  %v4893_v37 = vld [vmem:[%s6805_s1 + $0xa68] ss:$16 sps:$4 sm:$0xff]   ;;  %v4898_v38 = vld [vmem:[%s6805_s1 + $0xa84] ss:$16 sps:$4 sm:$0xff]   ;;  %v4901_v39 = vld [vmem:[%s6805_s1 + $0xa8c] ss:$16 sps:$4 sm:$0xff]  }
 0x149   :  { %v4896_v40 = vld [vmem:[%s6805_s1 + $0xa80] ss:$16 sps:$4 sm:$0xff]   ;;  %v4899_v41 = vld [vmem:[%s6805_s1 + $0xa88] ss:$16 sps:$4 sm:$0xff]   ;;  %v4904_v42 = vld [vmem:[%s6805_s1 + $0xaa4] ss:$16 sps:$4 sm:$0xff]  }
 0x14a   :  { %v4907_v43 = vld [vmem:[%s6805_s1 + $0xaac] ss:$16 sps:$4 sm:$0xff]   ;;  %v4902_v44 = vld [vmem:[%s6805_s1 + $0xaa0] ss:$16 sps:$4 sm:$0xff]   ;;  %v4905_v45 = vld [vmem:[%s6805_s1 + $0xaa8] ss:$16 sps:$4 sm:$0xff]  }
 0x14b   :  { %3351 = vmatpush1.bf16.msra.mxu0 %v4884_v32  ;;  %3679 = vmatpush1.bf16.msra.mxu1 %v4887_v33  ;;  %v4910_v46 = vld [vmem:[%s6805_s1 + $0xac4] ss:$16 sps:$4 sm:$0xff]   ;;  %v4913_v47 = vld [vmem:[%s6805_s1 + $0xacc] ss:$16 sps:$4 sm:$0xff]   ;;  %v4908_v48 = vld [vmem:[%s6805_s1 + $0xac0] ss:$16 sps:$4 sm:$0xff]  }
 0x14c   :  { %3352 = vmatprep.subr.bf16.mxu0 %v4892_v34  ;;  %3680 = vmatprep.subr.bf16.mxu1 %v4895_v35  ;;  %v4911_v49 = vld [vmem:[%s6805_s1 + $0xac8] ss:$16 sps:$4 sm:$0xff]   ;;  %v4916_v50 = vld [vmem:[%s6805_s1 + $0xae4] ss:$16 sps:$4 sm:$0xff]   ;;  %v4919_v51 = vld [vmem:[%s6805_s1 + $0xaec] ss:$16 sps:$4 sm:$0xff]  }
 0x14d   :  { %v4914_v52 = vld [vmem:[%s6805_s1 + $0xae0] ss:$16 sps:$4 sm:$0xff]   ;;  %v4917_v53 = vld [vmem:[%s6805_s1 + $0xae8] ss:$16 sps:$4 sm:$0xff]   ;;  %v4922_v54 = vld [vmem:[%s6805_s1 + $0xb04] ss:$16 sps:$4 sm:$0xff]  }
 0x14e   :  { %v4925_v55 = vld [vmem:[%s6805_s1 + $0xb0c] ss:$16 sps:$4 sm:$0xff]   ;;  %v4920_v56 = vld [vmem:[%s6805_s1 + $0xb00] ss:$16 sps:$4 sm:$0xff]   ;;  %v4923_v57 = vld [vmem:[%s6805_s1 + $0xb08] ss:$16 sps:$4 sm:$0xff]  }
 0x14f   :  { %3353 = vmatpush1.bf16.msra.mxu0 %v4890_v36  ;;  %3681 = vmatpush1.bf16.msra.mxu1 %v4893_v37  ;;  %v4928_v58 = vld [vmem:[%s6805_s1 + $0xb24] ss:$16 sps:$4 sm:$0xff]   ;;  %v4931_v59 = vld [vmem:[%s6805_s1 + $0xb2c] ss:$16 sps:$4 sm:$0xff]   ;;  %v4926_v60 = vld [vmem:[%s6805_s1 + $0xb20] ss:$16 sps:$4 sm:$0xff]  }
 0x150   :  { %3354 = vmatprep.subr.bf16.mxu0 %v4898_v38  ;;  %3682 = vmatprep.subr.bf16.mxu1 %v4901_v39  ;;  %v4929_v61 = vld [vmem:[%s6805_s1 + $0xb28] ss:$16 sps:$4 sm:$0xff]   ;;  %v4934_v62 = vld [vmem:[%s6805_s1 + $0xb44] ss:$16 sps:$4 sm:$0xff]   ;;  %v4937_v63 = vld [vmem:[%s6805_s1 + $0xb4c] ss:$16 sps:$4 sm:$0xff]  }
 0x151   :  { %v4932_v0 = vld [vmem:[%s6805_s1 + $0xb40] ss:$16 sps:$4 sm:$0xff]   ;;  %v4935_v1 = vld [vmem:[%s6805_s1 + $0xb48] ss:$16 sps:$4 sm:$0xff]   ;;  %v4940_v2 = vld [vmem:[%s6805_s1 + $0xb64] ss:$16 sps:$4 sm:$0xff]  }
 0x152   :  { %v4943_v3 = vld [vmem:[%s6805_s1 + $0xb6c] ss:$16 sps:$4 sm:$0xff]   ;;  %v4938_v4 = vld [vmem:[%s6805_s1 + $0xb60] ss:$16 sps:$4 sm:$0xff]   ;;  %v4941_v5 = vld [vmem:[%s6805_s1 + $0xb68] ss:$16 sps:$4 sm:$0xff]  }
 0x153   :  { %3355 = vmatpush1.bf16.msra.mxu0 %v4896_v40  ;;  %3683 = vmatpush1.bf16.msra.mxu1 %v4899_v41  ;;  %v4946_v6 = vld [vmem:[%s6805_s1 + $0xb84] ss:$16 sps:$4 sm:$0xff]   ;;  %v4949_v7 = vld [vmem:[%s6805_s1 + $0xb8c] ss:$16 sps:$4 sm:$0xff]   ;;  %v4944_v8 = vld [vmem:[%s6805_s1 + $0xb80] ss:$16 sps:$4 sm:$0xff]  }
 0x154   :  { %3356 = vmatprep.subr.bf16.mxu0 %v4904_v42  ;;  %3684 = vmatprep.subr.bf16.mxu1 %v4907_v43  ;;  %v4947_v9 = vld [vmem:[%s6805_s1 + $0xb88] ss:$16 sps:$4 sm:$0xff]   ;;  %v4952_v10 = vld [vmem:[%s6805_s1 + $0xba4] ss:$16 sps:$4 sm:$0xff]   ;;  %v4955_v11 = vld [vmem:[%s6805_s1 + $0xbac] ss:$16 sps:$4 sm:$0xff]  }
 0x155   :  { %v4950_v12 = vld [vmem:[%s6805_s1 + $0xba0] ss:$16 sps:$4 sm:$0xff]   ;;  %v4953_v13 = vld [vmem:[%s6805_s1 + $0xba8] ss:$16 sps:$4 sm:$0xff]   ;;  %v4958_v14 = vld [vmem:[%s6805_s1 + $0xbc4] ss:$16 sps:$4 sm:$0xff]  }
 0x156   :  { %v4961_v15 = vld [vmem:[%s6805_s1 + $0xbcc] ss:$16 sps:$4 sm:$0xff]   ;;  %v4956_v16 = vld [vmem:[%s6805_s1 + $0xbc0] ss:$16 sps:$4 sm:$0xff]   ;;  %v4959_v17 = vld [vmem:[%s6805_s1 + $0xbc8] ss:$16 sps:$4 sm:$0xff]  }
 0x157   :  { %3357 = vmatpush1.bf16.msra.mxu0 %v4902_v44  ;;  %3685 = vmatpush1.bf16.msra.mxu1 %v4905_v45  ;;  %v4964_v18 = vld [vmem:[%s6805_s1 + $0xbe4] ss:$16 sps:$4 sm:$0xff]   ;;  %v4967_v19 = vld [vmem:[%s6805_s1 + $0xbec] ss:$16 sps:$4 sm:$0xff]   ;;  %v4962_v20 = vld [vmem:[%s6805_s1 + $0xbe0] ss:$16 sps:$4 sm:$0xff]  }
 0x158   :  { %3358 = vmatprep.subr.bf16.mxu0 %v4910_v46  ;;  %3686 = vmatprep.subr.bf16.mxu1 %v4913_v47  ;;  %v4965_v21 = vld [vmem:[%s6805_s1 + $0xbe8] ss:$16 sps:$4 sm:$0xff]   ;;  %v25_v22 = vld [vmem:[%s6804_s0 + $0x50] sm:$0xff]  ;;  %v4973_v24 = vld [vmem:[%s6805_s1 + $0xc0c] ss:$16 sps:$4 sm:$0xff]  }
 0x159   :  { %v4970_v23 = vld [vmem:[%s6805_s1 + $0xc04] ss:$16 sps:$4 sm:$0xff]   ;;  %v41_v25 = vpack.c.bf16 %v25_v22, %v25_v22  ;;  %v28_v26 = vld [vmem:[%s6804_s0 + $0x68] sm:$0xff]  ;;  %v4968_v27 = vld [vmem:[%s6805_s1 + $0xc00] ss:$16 sps:$4 sm:$0xff]  }
 0x15a   :  { %v4971_v28 = vld [vmem:[%s6805_s1 + $0xc08] ss:$16 sps:$4 sm:$0xff]   ;;  %v4976_v29 = vld [vmem:[%s6805_s1 + $0xc24] ss:$16 sps:$4 sm:$0xff]   ;;  %v4979_v30 = vld [vmem:[%s6805_s1 + $0xc2c] ss:$16 sps:$4 sm:$0xff]   ;;  %v44_v31 = vpack.c.bf16 %v28_v26, %v28_v26 }
 0x15b   :  { %3359 = vmatpush1.bf16.msra.mxu0 %v4908_v48  ;;  %3687 = vmatpush1.bf16.msra.mxu1 %v4911_v49  ;;  %v4974_v32 = vld [vmem:[%s6805_s1 + $0xc20] ss:$16 sps:$4 sm:$0xff]   ;;  %v4977_v33 = vld [vmem:[%s6805_s1 + $0xc28] ss:$16 sps:$4 sm:$0xff]   ;;  %v4982_v34 = vld [vmem:[%s6805_s1 + $0xc44] ss:$16 sps:$4 sm:$0xff]  }
 0x15c   :  { %3360 = vmatprep.subr.bf16.mxu0 %v4916_v50  ;;  %3688 = vmatprep.subr.bf16.mxu1 %v4919_v51  ;;  %v4985_v35 = vld [vmem:[%s6805_s1 + $0xc4c] ss:$16 sps:$4 sm:$0xff]   ;;  %v4980_v36 = vld [vmem:[%s6805_s1 + $0xc40] ss:$16 sps:$4 sm:$0xff]   ;;  %v4983_v37 = vld [vmem:[%s6805_s1 + $0xc48] ss:$16 sps:$4 sm:$0xff]  }
 0x15d   :  { %v4988_v38 = vld [vmem:[%s6805_s1 + $0xc64] ss:$16 sps:$4 sm:$0xff]   ;;  %v4991_v39 = vld [vmem:[%s6805_s1 + $0xc6c] ss:$16 sps:$4 sm:$0xff]   ;;  %v4986_v40 = vld [vmem:[%s6805_s1 + $0xc60] ss:$16 sps:$4 sm:$0xff]  }
 0x15e   :  { %v4989_v41 = vld [vmem:[%s6805_s1 + $0xc68] ss:$16 sps:$4 sm:$0xff]   ;;  %v4994_v42 = vld [vmem:[%s6805_s1 + $0xc84] ss:$16 sps:$4 sm:$0xff]   ;;  %v4997_v43 = vld [vmem:[%s6805_s1 + $0xc8c] ss:$16 sps:$4 sm:$0xff]  }
 0x15f   :  { %3361 = vmatpush1.bf16.msra.mxu0 %v4914_v52  ;;  %3689 = vmatpush1.bf16.msra.mxu1 %v4917_v53  ;;  %v4992_v44 = vld [vmem:[%s6805_s1 + $0xc80] ss:$16 sps:$4 sm:$0xff]   ;;  %v4995_v45 = vld [vmem:[%s6805_s1 + $0xc88] ss:$16 sps:$4 sm:$0xff]   ;;  %v5000_v46 = vld [vmem:[%s6805_s1 + $0xca4] ss:$16 sps:$4 sm:$0xff]  }
 0x160   :  { %3362 = vmatprep.subr.bf16.mxu0 %v4922_v54  ;;  %3690 = vmatprep.subr.bf16.mxu1 %v4925_v55  ;;  %v5003_v47 = vld [vmem:[%s6805_s1 + $0xcac] ss:$16 sps:$4 sm:$0xff]   ;;  %v4998_v48 = vld [vmem:[%s6805_s1 + $0xca0] ss:$16 sps:$4 sm:$0xff]   ;;  %v5001_v49 = vld [vmem:[%s6805_s1 + $0xca8] ss:$16 sps:$4 sm:$0xff]  }
 0x161   :  { %v5006_v50 = vld [vmem:[%s6805_s1 + $0xcc4] ss:$16 sps:$4 sm:$0xff]   ;;  %v5009_v51 = vld [vmem:[%s6805_s1 + $0xccc] ss:$16 sps:$4 sm:$0xff]   ;;  %v5004_v52 = vld [vmem:[%s6805_s1 + $0xcc0] ss:$16 sps:$4 sm:$0xff]  }
 0x162   :  { %v5007_v53 = vld [vmem:[%s6805_s1 + $0xcc8] ss:$16 sps:$4 sm:$0xff]   ;;  %v5012_v54 = vld [vmem:[%s6805_s1 + $0xce4] ss:$16 sps:$4 sm:$0xff]   ;;  %v5015_v55 = vld [vmem:[%s6805_s1 + $0xcec] ss:$16 sps:$4 sm:$0xff]  }
 0x163   :  { %3363 = vmatpush1.bf16.msra.mxu0 %v4920_v56  ;;  %3691 = vmatpush1.bf16.msra.mxu1 %v4923_v57  ;;  %v5010_v56 = vld [vmem:[%s6805_s1 + $0xce0] ss:$16 sps:$4 sm:$0xff]   ;;  %v5013_v57 = vld [vmem:[%s6805_s1 + $0xce8] ss:$16 sps:$4 sm:$0xff]   ;;  %v5060_v22 = vld [vmem:[%s6805_s1 + $0xde4] ss:$16 sps:$4 sm:$0xff]  }
 0x164   :  { %3364 = vmatprep.subr.bf16.mxu0 %v4928_v58  ;;  %3692 = vmatprep.subr.bf16.mxu1 %v4931_v59  ;;  %v5018_v58 = vld [vmem:[%s6805_s1 + $0xd04] ss:$16 sps:$4 sm:$0xff]   ;;  %v5021_v59 = vld [vmem:[%s6805_s1 + $0xd0c] ss:$16 sps:$4 sm:$0xff]  }
 0x165   :  { %v27_v26 = vld [vmem:[%s6804_s0 + $0x60] sm:$0xff] }
 0x167   :  { %3365 = vmatpush1.bf16.msra.mxu0 %v4926_v60  ;;  %3693 = vmatpush1.bf16.msra.mxu1 %v4929_v61  ;;  %v5016_v60 = vld [vmem:[%s6805_s1 + $0xd00] ss:$16 sps:$4 sm:$0xff]   ;;  %v5019_v61 = vld [vmem:[%s6805_s1 + $0xd08] ss:$16 sps:$4 sm:$0xff]  }
 0x168   :  { %3366 = vmatprep.subr.bf16.mxu0 %v4934_v62  ;;  %3694 = vmatprep.subr.bf16.mxu1 %v4937_v63  ;;  %v5024_v62 = vld [vmem:[%s6805_s1 + $0xd24] ss:$16 sps:$4 sm:$0xff]   ;;  %v5027_v63 = vld [vmem:[%s6805_s1 + $0xd2c] ss:$16 sps:$4 sm:$0xff]  }
 0x16b   :  { %3367 = vmatpush1.bf16.msra.mxu0 %v4932_v0  ;;  %3695 = vmatpush1.bf16.msra.mxu1 %v4935_v1  ;;  %v5022_v0 = vld [vmem:[%s6805_s1 + $0xd20] ss:$16 sps:$4 sm:$0xff]   ;;  %v5025_v1 = vld [vmem:[%s6805_s1 + $0xd28] ss:$16 sps:$4 sm:$0xff]  }
 0x16c   :  { %3368 = vmatprep.subr.bf16.mxu0 %v4940_v2  ;;  %3696 = vmatprep.subr.bf16.mxu1 %v4943_v3  ;;  %v5030_v2 = vld [vmem:[%s6805_s1 + $0xd44] ss:$16 sps:$4 sm:$0xff]   ;;  %v5033_v3 = vld [vmem:[%s6805_s1 + $0xd4c] ss:$16 sps:$4 sm:$0xff]  }
 0x16f   :  { %3369 = vmatpush1.bf16.msra.mxu0 %v4938_v4  ;;  %3697 = vmatpush1.bf16.msra.mxu1 %v4941_v5  ;;  %v5028_v4 = vld [vmem:[%s6805_s1 + $0xd40] ss:$16 sps:$4 sm:$0xff]   ;;  %v5031_v5 = vld [vmem:[%s6805_s1 + $0xd48] ss:$16 sps:$4 sm:$0xff]  }
 0x170   :  { %3370 = vmatprep.subr.bf16.mxu0 %v4946_v6  ;;  %3698 = vmatprep.subr.bf16.mxu1 %v4949_v7  ;;  %v5036_v6 = vld [vmem:[%s6805_s1 + $0xd64] ss:$16 sps:$4 sm:$0xff]   ;;  %v5039_v7 = vld [vmem:[%s6805_s1 + $0xd6c] ss:$16 sps:$4 sm:$0xff]  }
 0x173   :  { %3371 = vmatpush1.bf16.msra.mxu0 %v4944_v8  ;;  %3699 = vmatpush1.bf16.msra.mxu1 %v4947_v9  ;;  %v5034_v8 = vld [vmem:[%s6805_s1 + $0xd60] ss:$16 sps:$4 sm:$0xff]   ;;  %v5037_v9 = vld [vmem:[%s6805_s1 + $0xd68] ss:$16 sps:$4 sm:$0xff]  }
 0x174   :  { %3372 = vmatprep.subr.bf16.mxu0 %v4952_v10  ;;  %3700 = vmatprep.subr.bf16.mxu1 %v4955_v11  ;;  %v5042_v10 = vld [vmem:[%s6805_s1 + $0xd84] ss:$16 sps:$4 sm:$0xff]   ;;  %v5045_v11 = vld [vmem:[%s6805_s1 + $0xd8c] ss:$16 sps:$4 sm:$0xff]  }
 0x177   :  { %3373 = vmatpush1.bf16.msra.mxu0 %v4950_v12  ;;  %3701 = vmatpush1.bf16.msra.mxu1 %v4953_v13  ;;  %v5040_v12 = vld [vmem:[%s6805_s1 + $0xd80] ss:$16 sps:$4 sm:$0xff]   ;;  %v5043_v13 = vld [vmem:[%s6805_s1 + $0xd88] ss:$16 sps:$4 sm:$0xff]  }
 0x178   :  { %3374 = vmatprep.subr.bf16.mxu0 %v4958_v14  ;;  %3702 = vmatprep.subr.bf16.mxu1 %v4961_v15  ;;  %v5048_v14 = vld [vmem:[%s6805_s1 + $0xda4] ss:$16 sps:$4 sm:$0xff]   ;;  %v5051_v15 = vld [vmem:[%s6805_s1 + $0xdac] ss:$16 sps:$4 sm:$0xff]  }
 0x17b   :  { %3375 = vmatpush1.bf16.msra.mxu0 %v4956_v16  ;;  %3703 = vmatpush1.bf16.msra.mxu1 %v4959_v17  ;;  %v5046_v16 = vld [vmem:[%s6805_s1 + $0xda0] ss:$16 sps:$4 sm:$0xff]   ;;  %v5049_v17 = vld [vmem:[%s6805_s1 + $0xda8] ss:$16 sps:$4 sm:$0xff]  }
 0x17c   :  { %3376 = vmatprep.subr.bf16.mxu0 %v4964_v18  ;;  %3704 = vmatprep.subr.bf16.mxu1 %v4967_v19  ;;  %v5054_v18 = vld [vmem:[%s6805_s1 + $0xdc4] ss:$16 sps:$4 sm:$0xff]   ;;  %v5057_v19 = vld [vmem:[%s6805_s1 + $0xdcc] ss:$16 sps:$4 sm:$0xff]  }
 0x17f   :  { %3377 = vmatpush1.bf16.msra.mxu0 %v4962_v20  ;;  %3705 = vmatpush1.bf16.msra.mxu1 %v4965_v21  ;;  %v5052_v20 = vld [vmem:[%s6805_s1 + $0xdc0] ss:$16 sps:$4 sm:$0xff]   ;;  %v5055_v21 = vld [vmem:[%s6805_s1 + $0xdc8] ss:$16 sps:$4 sm:$0xff]  }
 0x180   :  { %3387 = vmatprep.subr.bf16.mxu0 %v4970_v23  ;;  %3715 = vmatprep.subr.bf16.mxu1 %v4973_v24  ;;  %v5063_v23 = vld [vmem:[%s6805_s1 + $0xdec] ss:$16 sps:$4 sm:$0xff]   ;;  %v5058_v24 = vld [vmem:[%s6805_s1 + $0xde0] ss:$16 sps:$4 sm:$0xff]  }
 0x182   :  { %3379 = vmatmul.mubr.bf16.vlgmr.msra.gmra.mrb[0].mxu0 %v41_v25  ;;  %3707 = vmatmul.mubr.bf16.vlgmr.msra.gmra.mrb[0].mxu1 %v41_v25  ;;  %v5061_v25 = vld [vmem:[%s6805_s1 + $0xde8] ss:$16 sps:$4 sm:$0xff]  }
 0x183   :  { %3388 = vmatpush1.bf16.msra.mxu0 %v4968_v27  ;;  %3716 = vmatpush1.bf16.msra.mxu1 %v4971_v28  ;;  %v5066_v27 = vld [vmem:[%s6805_s1 + $0xe04] ss:$16 sps:$4 sm:$0xff]   ;;  %v5069_v28 = vld [vmem:[%s6805_s1 + $0xe0c] ss:$16 sps:$4 sm:$0xff]  }
 0x184   :  { %3389 = vmatprep.subr.bf16.mxu0 %v4976_v29  ;;  %3717 = vmatprep.subr.bf16.mxu1 %v4979_v30  ;;  %v43_v29 = vpack.c.bf16 %v27_v26, %v27_v26  ;;  %v30_v30 = vld [vmem:[%s6804_s0 + $0x78] sm:$0xff]  ;;  %v5156_v26 = vld [vmem:[%s6805_s1 + $0xfe4] ss:$16 sps:$4 sm:$0xff]  }
 0x185   :  { %3419 = vmatprep.mubr.bf16.mxu0 %v44_v31  ;;  %3747 = vmatprep.mubr.bf16.mxu1 %v44_v31  ;;  %v5064_v31 = vld [vmem:[%s6805_s1 + $0xe00] ss:$16 sps:$4 sm:$0xff]  }
 0x187   :  { %3390 = vmatpush1.bf16.msra.mxu0 %v4974_v32  ;;  %3718 = vmatpush1.bf16.msra.mxu1 %v4977_v33  ;;  %v5067_v32 = vld [vmem:[%s6805_s1 + $0xe08] ss:$16 sps:$4 sm:$0xff]   ;;  %v5072_v33 = vld [vmem:[%s6805_s1 + $0xe24] ss:$16 sps:$4 sm:$0xff]  }
 0x188   :  { %3391 = vmatprep.subr.bf16.mxu0 %v4982_v34  ;;  %3719 = vmatprep.subr.bf16.mxu1 %v4985_v35  ;;  %v5075_v34 = vld [vmem:[%s6805_s1 + $0xe2c] ss:$16 sps:$4 sm:$0xff]   ;;  %v46_v35 = vpack.c.bf16 %v30_v30, %v30_v30  ;;  %v29_v30 = vld [vmem:[%s6804_s0 + $0x70] sm:$0xff]  ;;  %s5184_s0 = smov [#allocation2]  }
 0x18b   :  { %3392 = vmatpush1.bf16.msra.mxu0 %v4980_v36  ;;  %3720 = vmatpush1.bf16.msra.mxu1 %v4983_v37  ;;  %v5070_v36 = vld [vmem:[%s6805_s1 + $0xe20] ss:$16 sps:$4 sm:$0xff]   ;;  %v5073_v37 = vld [vmem:[%s6805_s1 + $0xe28] ss:$16 sps:$4 sm:$0xff]  }
 0x18c   :  { %3393 = vmatprep.subr.bf16.mxu0 %v4988_v38  ;;  %3721 = vmatprep.subr.bf16.mxu1 %v4991_v39  ;;  %v5078_v38 = vld [vmem:[%s6805_s1 + $0xe44] ss:$16 sps:$4 sm:$0xff]   ;;  %v5081_v39 = vld [vmem:[%s6805_s1 + $0xe4c] ss:$16 sps:$4 sm:$0xff]  }
 0x18f   :  { %3394 = vmatpush1.bf16.msra.mxu0 %v4986_v40  ;;  %3722 = vmatpush1.bf16.msra.mxu1 %v4989_v41  ;;  %v5076_v40 = vld [vmem:[%s6805_s1 + $0xe40] ss:$16 sps:$4 sm:$0xff]   ;;  %v5079_v41 = vld [vmem:[%s6805_s1 + $0xe48] ss:$16 sps:$4 sm:$0xff]  }
 0x190   :  { %3395 = vmatprep.subr.bf16.mxu0 %v4994_v42  ;;  %3723 = vmatprep.subr.bf16.mxu1 %v4997_v43  ;;  %v5084_v42 = vld [vmem:[%s6805_s1 + $0xe64] ss:$16 sps:$4 sm:$0xff]   ;;  %v5087_v43 = vld [vmem:[%s6805_s1 + $0xe6c] ss:$16 sps:$4 sm:$0xff]  }
 0x193   :  { %3396 = vmatpush1.bf16.msra.mxu0 %v4992_v44  ;;  %3724 = vmatpush1.bf16.msra.mxu1 %v4995_v45  ;;  %v5082_v44 = vld [vmem:[%s6805_s1 + $0xe60] ss:$16 sps:$4 sm:$0xff]   ;;  %v5085_v45 = vld [vmem:[%s6805_s1 + $0xe68] ss:$16 sps:$4 sm:$0xff]  }
 0x194   :  { %3397 = vmatprep.subr.bf16.mxu0 %v5000_v46  ;;  %3725 = vmatprep.subr.bf16.mxu1 %v5003_v47  ;;  %v5090_v46 = vld [vmem:[%s6805_s1 + $0xe84] ss:$16 sps:$4 sm:$0xff]   ;;  %v5093_v47 = vld [vmem:[%s6805_s1 + $0xe8c] ss:$16 sps:$4 sm:$0xff]  }
 0x197   :  { %3398 = vmatpush1.bf16.msra.mxu0 %v4998_v48  ;;  %3726 = vmatpush1.bf16.msra.mxu1 %v5001_v49  ;;  %v5088_v48 = vld [vmem:[%s6805_s1 + $0xe80] ss:$16 sps:$4 sm:$0xff]   ;;  %v5091_v49 = vld [vmem:[%s6805_s1 + $0xe88] ss:$16 sps:$4 sm:$0xff]  }
 0x198   :  { %3399 = vmatprep.subr.bf16.mxu0 %v5006_v50  ;;  %3727 = vmatprep.subr.bf16.mxu1 %v5009_v51  ;;  %v5096_v50 = vld [vmem:[%s6805_s1 + $0xea4] ss:$16 sps:$4 sm:$0xff]   ;;  %v5099_v51 = vld [vmem:[%s6805_s1 + $0xeac] ss:$16 sps:$4 sm:$0xff]  }
 0x19b   :  { %3400 = vmatpush1.bf16.msra.mxu0 %v5004_v52  ;;  %3728 = vmatpush1.bf16.msra.mxu1 %v5007_v53  ;;  %v5094_v52 = vld [vmem:[%s6805_s1 + $0xea0] ss:$16 sps:$4 sm:$0xff]   ;;  %v5097_v53 = vld [vmem:[%s6805_s1 + $0xea8] ss:$16 sps:$4 sm:$0xff]  }
 0x19c   :  { %3401 = vmatprep.subr.bf16.mxu0 %v5012_v54  ;;  %3729 = vmatprep.subr.bf16.mxu1 %v5015_v55  ;;  %v5102_v54 = vld [vmem:[%s6805_s1 + $0xec4] ss:$16 sps:$4 sm:$0xff]   ;;  %v5105_v55 = vld [vmem:[%s6805_s1 + $0xecc] ss:$16 sps:$4 sm:$0xff]  }
 0x19f   :  { %3402 = vmatpush1.bf16.msra.mxu0 %v5010_v56  ;;  %3730 = vmatpush1.bf16.msra.mxu1 %v5013_v57  ;;  %v5100_v56 = vld [vmem:[%s6805_s1 + $0xec0] ss:$16 sps:$4 sm:$0xff]   ;;  %v5103_v57 = vld [vmem:[%s6805_s1 + $0xec8] ss:$16 sps:$4 sm:$0xff]  }
 0x1a0   :  { %3403 = vmatprep.subr.bf16.mxu0 %v5018_v58  ;;  %3731 = vmatprep.subr.bf16.mxu1 %v5021_v59  ;;  %v5108_v58 = vld [vmem:[%s6805_s1 + $0xee4] ss:$16 sps:$4 sm:$0xff]   ;;  %v5111_v59 = vld [vmem:[%s6805_s1 + $0xeec] ss:$16 sps:$4 sm:$0xff]  }
 0x1a3   :  { %3404 = vmatpush1.bf16.msra.mxu0 %v5016_v60  ;;  %3732 = vmatpush1.bf16.msra.mxu1 %v5019_v61  ;;  %v5106_v60 = vld [vmem:[%s6805_s1 + $0xee0] ss:$16 sps:$4 sm:$0xff]   ;;  %v5109_v61 = vld [vmem:[%s6805_s1 + $0xee8] ss:$16 sps:$4 sm:$0xff]  }
 0x1a4   :  { %3405 = vmatprep.subr.bf16.mxu0 %v5024_v62  ;;  %3733 = vmatprep.subr.bf16.mxu1 %v5027_v63  ;;  %v5114_v62 = vld [vmem:[%s6805_s1 + $0xf04] ss:$16 sps:$4 sm:$0xff]   ;;  %v5117_v63 = vld [vmem:[%s6805_s1 + $0xf0c] ss:$16 sps:$4 sm:$0xff]  }
 0x1a7   :  { %3406 = vmatpush1.bf16.msra.mxu0 %v5022_v0  ;;  %3734 = vmatpush1.bf16.msra.mxu1 %v5025_v1  ;;  %v5112_v0 = vld [vmem:[%s6805_s1 + $0xf00] ss:$16 sps:$4 sm:$0xff]   ;;  %v5115_v1 = vld [vmem:[%s6805_s1 + $0xf08] ss:$16 sps:$4 sm:$0xff]  }
 0x1a8   :  { %3407 = vmatprep.subr.bf16.mxu0 %v5030_v2  ;;  %3735 = vmatprep.subr.bf16.mxu1 %v5033_v3  ;;  %v5120_v2 = vld [vmem:[%s6805_s1 + $0xf24] ss:$16 sps:$4 sm:$0xff]   ;;  %v5123_v3 = vld [vmem:[%s6805_s1 + $0xf2c] ss:$16 sps:$4 sm:$0xff]  }
 0x1ab   :  { %3408 = vmatpush1.bf16.msra.mxu0 %v5028_v4  ;;  %3736 = vmatpush1.bf16.msra.mxu1 %v5031_v5  ;;  %v5118_v4 = vld [vmem:[%s6805_s1 + $0xf20] ss:$16 sps:$4 sm:$0xff]   ;;  %v5121_v5 = vld [vmem:[%s6805_s1 + $0xf28] ss:$16 sps:$4 sm:$0xff]  }
 0x1ac   :  { %3409 = vmatprep.subr.bf16.mxu0 %v5036_v6  ;;  %3737 = vmatprep.subr.bf16.mxu1 %v5039_v7  ;;  %v5126_v6 = vld [vmem:[%s6805_s1 + $0xf44] ss:$16 sps:$4 sm:$0xff]   ;;  %v5129_v7 = vld [vmem:[%s6805_s1 + $0xf4c] ss:$16 sps:$4 sm:$0xff]  }
 0x1af   :  { %3410 = vmatpush1.bf16.msra.mxu0 %v5034_v8  ;;  %3738 = vmatpush1.bf16.msra.mxu1 %v5037_v9  ;;  %v5124_v8 = vld [vmem:[%s6805_s1 + $0xf40] ss:$16 sps:$4 sm:$0xff]   ;;  %v5127_v9 = vld [vmem:[%s6805_s1 + $0xf48] ss:$16 sps:$4 sm:$0xff]  }
 0x1b0   :  { %3411 = vmatprep.subr.bf16.mxu0 %v5042_v10  ;;  %3739 = vmatprep.subr.bf16.mxu1 %v5045_v11  ;;  %v5132_v10 = vld [vmem:[%s6805_s1 + $0xf64] ss:$16 sps:$4 sm:$0xff]   ;;  %v5135_v11 = vld [vmem:[%s6805_s1 + $0xf6c] ss:$16 sps:$4 sm:$0xff]  }
 0x1b3   :  { %3412 = vmatpush1.bf16.msra.mxu0 %v5040_v12  ;;  %3740 = vmatpush1.bf16.msra.mxu1 %v5043_v13  ;;  %v5130_v12 = vld [vmem:[%s6805_s1 + $0xf60] ss:$16 sps:$4 sm:$0xff]   ;;  %v5133_v13 = vld [vmem:[%s6805_s1 + $0xf68] ss:$16 sps:$4 sm:$0xff]  }
 0x1b4   :  { %3413 = vmatprep.subr.bf16.mxu0 %v5048_v14  ;;  %3741 = vmatprep.subr.bf16.mxu1 %v5051_v15  ;;  %v5138_v14 = vld [vmem:[%s6805_s1 + $0xf84] ss:$16 sps:$4 sm:$0xff]   ;;  %v5141_v15 = vld [vmem:[%s6805_s1 + $0xf8c] ss:$16 sps:$4 sm:$0xff]  }
 0x1b7   :  { %3414 = vmatpush1.bf16.msra.mxu0 %v5046_v16  ;;  %3742 = vmatpush1.bf16.msra.mxu1 %v5049_v17  ;;  %v5136_v16 = vld [vmem:[%s6805_s1 + $0xf80] ss:$16 sps:$4 sm:$0xff]   ;;  %v5139_v17 = vld [vmem:[%s6805_s1 + $0xf88] ss:$16 sps:$4 sm:$0xff]  }
 0x1b8   :  { %3415 = vmatprep.subr.bf16.mxu0 %v5054_v18  ;;  %3743 = vmatprep.subr.bf16.mxu1 %v5057_v19  ;;  %v5144_v18 = vld [vmem:[%s6805_s1 + $0xfa4] ss:$16 sps:$4 sm:$0xff]   ;;  %v5147_v19 = vld [vmem:[%s6805_s1 + $0xfac] ss:$16 sps:$4 sm:$0xff]  }
 0x1bb   :  { %3416 = vmatpush1.bf16.msra.mxu0 %v5052_v20  ;;  %3744 = vmatpush1.bf16.msra.mxu1 %v5055_v21  ;;  %v5142_v20 = vld [vmem:[%s6805_s1 + $0xfa0] ss:$16 sps:$4 sm:$0xff]   ;;  %v5145_v21 = vld [vmem:[%s6805_s1 + $0xfa8] ss:$16 sps:$4 sm:$0xff]  }
 0x1bc   :  { %3417 = vmatprep.subr.bf16.mxu0 %v5060_v22  ;;  %3745 = vmatprep.subr.bf16.mxu1 %v5063_v23  ;;  %v5150_v22 = vld [vmem:[%s6805_s1 + $0xfc4] ss:$16 sps:$4 sm:$0xff]   ;;  %v5153_v23 = vld [vmem:[%s6805_s1 + $0xfcc] ss:$16 sps:$4 sm:$0xff]  }
 0x1bf   :  { %3418 = vmatpush1.bf16.msra.mxu0 %v5058_v24  ;;  %3746 = vmatpush1.bf16.msra.mxu1 %v5061_v25  ;;  %v5148_v24 = vld [vmem:[%s6805_s1 + $0xfc0] ss:$16 sps:$4 sm:$0xff]   ;;  %v5151_v25 = vld [vmem:[%s6805_s1 + $0xfc8] ss:$16 sps:$4 sm:$0xff]  }
 0x1c0   :  { %3428 = vmatprep.subr.bf16.mxu0 %v5066_v27  ;;  %3756 = vmatprep.subr.bf16.mxu1 %v5069_v28  ;;  %v5159_v27 = vld [vmem:[%s6805_s1 + $0xfec] ss:$16 sps:$4 sm:$0xff]   ;;  %v5154_v28 = vld [vmem:[%s6805_s1 + $0xfe0] ss:$16 sps:$4 sm:$0xff]  }
 0x1c2   :  { %3420 = vmatmul.mubr.bf16.vlgmr.msra.gmra.mrb[0].mxu0 %v43_v29  ;;  %3748 = vmatmul.mubr.bf16.vlgmr.msra.gmra.mrb[0].mxu1 %v43_v29  ;;  %v5157_v29 = vld [vmem:[%s6805_s1 + $0xfe8] ss:$16 sps:$4 sm:$0xff]   ;;  %s3811_s1 = sshll.u32 %s5184_s0, 4  ;;  %s3812_s1 = int_to_ptr.vmem [resolvable:$true] %s3811_s1 }
 0x1c3   :  { %3429 = vmatpush1.bf16.msra.mxu0 %v5064_v31  ;;  %3757 = vmatpush1.bf16.msra.mxu1 %v5067_v32  ;;  %v45_v31 = vpack.c.bf16 %v29_v30, %v29_v30  ;;  %v561_v32 = vlaneseq  ;;  %p5165_p1 = scmp.lt.s32.totalorder %s3812_s1, %s3812_s1 }
 0x1c4   :  { %3430 = vmatprep.subr.bf16.mxu0 %v5072_v33  ;;  %3758 = vmatprep.subr.bf16.mxu1 %v5075_v34 }
 0x1c5   :  { %3460 = vmatprep.mubr.bf16.mxu0 %v46_v35  ;;  %3788 = vmatprep.mubr.bf16.mxu1 %v46_v35  ;;  %v562_v33 = vshrl.u32 %v561_v32, 7 }
 0x1c7   :  { %3431 = vmatpush1.bf16.msra.mxu0 %v5070_v36  ;;  %3759 = vmatpush1.bf16.msra.mxu1 %v5073_v37  ;;  %v563_v34 = vsub.s32 0, %v562_v33  ;;  %v571_v35 = vsub.s32 2, %v562_v33  ;;  %v559_v36 = vld [vmem:[%s6806_s2] sm:$0xf]  ;;  %v567_v37 = vsub.s32 1, %v562_v33  ;;  %s5160_s2 = scalar_lea.vmem %s3812_s1, 512 }
 0x1c8   :  { %3432 = vmatprep.subr.bf16.mxu0 %v5078_v38  ;;  %3760 = vmatprep.subr.bf16.mxu1 %v5081_v39  ;;  %v575_v38 = vsub.s32 3, %v562_v33  ;;  %p5161_p0 = scmp.ne.s32.totalorder %s3812_s1, %s5160_s2  ;;  %p5166_p2 = scmp.lt.s32.totalorder %s5160_s2, %s5160_s2 }
 0x1c9   :  { %v564_v39 = vrot.slane %v559_v36, %v563_v34 }
 0x1ca   :  { %p5167_p3 = por %p5166_p2, %p5165_p1 }
 0x1cb   :  { %3433 = vmatpush1.bf16.msra.mxu0 %v5076_v40  ;;  %3761 = vmatpush1.bf16.msra.mxu1 %v5079_v41  ;;  %v572_v40 = vrot.slane %v559_v36, %v571_v35  ;;  %v568_v41 = vrot.slane %v559_v36, %v567_v37 }
 0x1cc   :  { %3434 = vmatprep.subr.bf16.mxu0 %v5084_v42  ;;  %3762 = vmatprep.subr.bf16.mxu1 %v5087_v43  ;;  %v576_v42 = vrot.slane %v559_v36, %v575_v38  ;;  %p5168_p4 = pnand %p5167_p3, %p5161_p0 }
 0x1cf   :  { %3435 = vmatpush1.bf16.msra.mxu0 %v5082_v44  ;;  %3763 = vmatpush1.bf16.msra.mxu1 %v5085_v45 }
 0x1d0   :  { %3436 = vmatprep.subr.bf16.mxu0 %v5090_v46  ;;  %3764 = vmatprep.subr.bf16.mxu1 %v5093_v47 }
 0x1d3   :  { %3437 = vmatpush1.bf16.msra.mxu0 %v5088_v48  ;;  %3765 = vmatpush1.bf16.msra.mxu1 %v5091_v49 }
 0x1d4   :  { %3438 = vmatprep.subr.bf16.mxu0 %v5096_v50  ;;  %3766 = vmatprep.subr.bf16.mxu1 %v5099_v51 }
 0x1d7   :  { %3439 = vmatpush1.bf16.msra.mxu0 %v5094_v52  ;;  %3767 = vmatpush1.bf16.msra.mxu1 %v5097_v53 }
 0x1d8   :  { %3440 = vmatprep.subr.bf16.mxu0 %v5102_v54  ;;  %3768 = vmatprep.subr.bf16.mxu1 %v5105_v55 }
 0x1db   :  { %3441 = vmatpush1.bf16.msra.mxu0 %v5100_v56  ;;  %3769 = vmatpush1.bf16.msra.mxu1 %v5103_v57 }
 0x1dc   :  { %3442 = vmatprep.subr.bf16.mxu0 %v5108_v58  ;;  %3770 = vmatprep.subr.bf16.mxu1 %v5111_v59 }
 0x1df   :  { %3443 = vmatpush1.bf16.msra.mxu0 %v5106_v60  ;;  %3771 = vmatpush1.bf16.msra.mxu1 %v5109_v61 }
 0x1e0   :  { %3444 = vmatprep.subr.bf16.mxu0 %v5114_v62  ;;  %3772 = vmatprep.subr.bf16.mxu1 %v5117_v63 }
 0x1e3   :  { %3445 = vmatpush1.bf16.msra.mxu0 %v5112_v0  ;;  %3773 = vmatpush1.bf16.msra.mxu1 %v5115_v1 }
 0x1e4   :  { %3446 = vmatprep.subr.bf16.mxu0 %v5120_v2  ;;  %3774 = vmatprep.subr.bf16.mxu1 %v5123_v3 }
 0x1e7   :  { %3447 = vmatpush1.bf16.msra.mxu0 %v5118_v4  ;;  %3775 = vmatpush1.bf16.msra.mxu1 %v5121_v5 }
 0x1e8   :  { %3448 = vmatprep.subr.bf16.mxu0 %v5126_v6  ;;  %3776 = vmatprep.subr.bf16.mxu1 %v5129_v7 }
 0x1eb   :  { %3449 = vmatpush1.bf16.msra.mxu0 %v5124_v8  ;;  %3777 = vmatpush1.bf16.msra.mxu1 %v5127_v9 }
 0x1ec   :  { %3450 = vmatprep.subr.bf16.mxu0 %v5132_v10  ;;  %3778 = vmatprep.subr.bf16.mxu1 %v5135_v11 }
 0x1ef   :  { %3451 = vmatpush1.bf16.msra.mxu0 %v5130_v12  ;;  %3779 = vmatpush1.bf16.msra.mxu1 %v5133_v13 }
 0x1f0   :  { %3452 = vmatprep.subr.bf16.mxu0 %v5138_v14  ;;  %3780 = vmatprep.subr.bf16.mxu1 %v5141_v15 }
 0x1f3   :  { %3453 = vmatpush1.bf16.msra.mxu0 %v5136_v16  ;;  %3781 = vmatpush1.bf16.msra.mxu1 %v5139_v17 }
 0x1f4   :  { %3454 = vmatprep.subr.bf16.mxu0 %v5144_v18  ;;  %3782 = vmatprep.subr.bf16.mxu1 %v5147_v19 }
 0x1f7   :  { %3455 = vmatpush1.bf16.msra.mxu0 %v5142_v20  ;;  %3783 = vmatpush1.bf16.msra.mxu1 %v5145_v21 }
 0x1f8   :  { %3456 = vmatprep.subr.bf16.mxu0 %v5150_v22  ;;  %3784 = vmatprep.subr.bf16.mxu1 %v5153_v23 }
 0x1fb   :  { %3457 = vmatpush1.bf16.msra.mxu0 %v5148_v24  ;;  %3785 = vmatpush1.bf16.msra.mxu1 %v5151_v25 }
 0x1fc   :  { %3458 = vmatprep.subr.bf16.mxu0 %v5156_v26  ;;  %3786 = vmatprep.subr.bf16.mxu1 %v5159_v27 }
 0x1ff   :  { %3459 = vmatpush1.bf16.msra.mxu0 %v5154_v28  ;;  %3787 = vmatpush1.bf16.msra.mxu1 %v5157_v29 }
 0x202   :  { %3461 = vmatmul.mubr.bf16.vlgmr.msra.gmra.mrb[0].mxu0 %v45_v31  ;;  %3789 = vmatmul.mubr.bf16.vlgmr.msra.gmra.mrb[0].mxu1 %v45_v31 }
 0x2d5   :  { %v3462_v43 = vpop.f32.mrb[0].mxu0  ;;  %v3790_v44 = vpop.f32.mrb[0].mxu1 }
 0x2d6   :  { %v4331_v45 = vadd.f32 %v3462_v43, %v564_v39  ;;  %v4333_v46 = vadd.f32 %v3790_v44, %v572_v40  ;;  %v3464_v47 = vpop.f32.mrb[1].mxu0  ;;  %v3792_v48 = vpop.f32.mrb[1].mxu1 }
 0x2d7   :  { %v4332_v49 = vadd.f32 %v3464_v47, %v568_v41  ;;  %v4334_v50 = vadd.f32 %v3792_v48, %v576_v42  ;;  %v3466_v51 = vpop.f32.mrb[2].mxu0  ;;  %v3794_v52 = vpop.f32.mrb[2].mxu1 }
 0x2d8   :  { %v3797_v53 = vmax.f32 %v4331_v45, 0.0  ;;  %v3799_v54 = vmax.f32 %v4333_v46, 0.0  ;;  %v3467_v55 = vpop.f32.mrb[3].mxu0  ;;  %v3795_v56 = vpop.f32.mrb[3].mxu1 }
 0x2d9   :  { %v3798_v57 = vmax.f32 %v4332_v49, 0.0  ;;  %v3800_v58 = vmax.f32 %v4334_v50, 0.0 }
 0x2da   :  { %3801 = vst [vmem:[#allocation2] sm:$0xff] %v3797_v53  ;;  %3803 = vst [vmem:[#allocation2 + $0x10] sm:$0xff] %v3799_v54 }
 0x2db   :  { %3802 = vst [vmem:[#allocation2 + $0x8] sm:$0xff] %v3798_v57  ;;  %3804 = vst [vmem:[#allocation2 + $0x18] sm:$0xff] %v3800_v58 }
 0x2dc   :  { %5171 = shalt.err (!%p5168_p4)
}
 0x2dd   :  { %s5172_s19 = scalar_lea.hbm %s6807_s3, 512 }
 0x2de   :  { %p5173_p5 = scmp.ne.s32.totalorder %s6807_s3, %s5172_s19  ;;  %p5176_p6 = scmp.lt.u32.totalorder %s5172_s19, %s6807_s3 }
 0x2e0   :  { %p5178_p7 = pnand %p5176_p6, %p5173_p5 }
 0x2e2   :  { %5181 = shalt.err (!%p5178_p7)
}
 0x2e3   :  { %3814 = dma.vmem_to_hbm [thread:$0]  %s3812_s1, 512, %s6807_s3, [#allocation3]  }
 0x2e4   :  { %5182 = dma.done.wait [#allocation3], 512  }
 0x2e5   :  { %5183 = vsyncadd [#allocation3], 4294966784 }
 0x2e6   :  { %3818 = vsyncpa [#allocation3], 1 }

// kernel: _init_caches.3
= control target key start
LH: loop header
LB: loop body
LE: loop exit
PB: predicated region body
PF: predicated region fallthrough
CT: control target
= control target key end

     0   :  { %s12805_s18 = smov 0   ;;  %s16945_s0 = inlined_call_operand.vmem [shape: f32[8,1,300], index: 0, kind: input, shape index: {}]   ;;  %s16946_s1 = inlined_call_operand.vmem [shape: bf16[300,1000], index: 1, kind: input, shape index: {}]   ;;  %s16947_s2 = inlined_call_operand.vmem [shape: f32[1,1000], index: 2, kind: input, shape index: {}]   ;;  %s16948_s3 = inlined_call_operand.vmem [shape: bf16[1000,512], index: 3, kind: input, shape index: {}]   ;;  %s16949_s4 = inlined_call_operand.vmem [shape: f32[1,512], index: 4, kind: input, shape index: {}]   ;;  %s16950_s5 = inlined_call_operand.vmem [shape: bf16[512,1024], index: 5, kind: input, shape index: {}]   ;;  %s16951_s6 = inlined_call_operand.vmem [shape: f32[1,1024], index: 6, kind: input, shape index: {}]   ;;  %s16952_s7 = inlined_call_operand.vmem [shape: f32[16,1024], index: 7, kind: input, shape index: {}]   ;;  %s16953_s8 = inlined_call_operand.vmem [shape: bf16[16,16], index: 8, kind: input, shape index: {}]   ;;  %s16954_s9 = inlined_call_operand.vmem [shape: bf16[1024,1024], index: 9, kind: input, shape index: {}]   ;;  %s16955_s10 = inlined_call_operand.vmem [shape: f32[1,1024], index: 10, kind: input, shape index: {}]   ;;  %s16956_s11 = inlined_call_operand.vmem [shape: bf16[1024,128], index: 11, kind: input, shape index: {}]   ;;  %s16957_s12 = inlined_call_operand.vmem [shape: f32[1,128], index: 12, kind: input, shape index: {}]   ;;  %s16958_s13 = inlined_call_operand.vmem [shape: f32[16,512], index: 13, kind: input, shape index: {}]   ;;  %s16959_s14 = inlined_call_operand.vmem [shape: f32[1,512], index: 14, kind: input, shape index: {}]   ;;  %s16960_s15 = inlined_call_operand.vmem [shape: f32[8,1,512], index: 15, kind: output, shape index: {}]  }
   0x1 LB: > { %s10778_s19 = sadd.s32 4294967295, %s12719_s18   ;;  %p10782_p0 = scmp.ge.s32.totalorder %s12719_s18, 1  ;;  %s12719_s18 = sphi %s12805_s18, %s25_s18  }
   0x2   : > { %p436_p1 = scmp.lt.s32.totalorder %s12719_s18, 9 }
   0x4   : > { %p437_p2 = pnand %p10782_p0, %p436_p1 }
   0x5   : > { %v511_v0 = vld [vmem:[%s16946_s1] sm:$0xff] (!%p437_p2)  ;;  %p482_p3 = scmp.lt.s32.totalorder (!%p437_p2), %s10778_s19, 7  ;;  %v12721_v6 = vmov (!%p437_p2), 0   ;;  %v493_v10 = vlaneseq (!%p437_p2)  ;;  %v512_v17 = vld [vmem:[%s16946_s1 + $0x8] sm:$0xff] (!%p437_p2)  ;;  %vm1461_vm0 = vcmask (!%p437_p2), 1045504   ;;  %vm1457_vm1 = vcmask (!%p437_p2), 359424  }
   0x6   : > { %440 = sbr.rel (%p437_p2) target bundleno = 2710 (0xa96), region = 80  ;;  %v515_v1 = vld [vmem:[%s16946_s1 + $0x20] sm:$0xff] (!%p437_p2)  ;;  %12270 = vset.pattern.permute.xlu0 (!%p437_p2), %v12721_v6  ;;  %v516_v20 = vld [vmem:[%s16946_s1 + $0x28] sm:$0xff] (!%p437_p2)  ;;  %vm3344_vm2 = vcmask (!%p437_p2), 850944   ;;  %vm3348_vm3 = vcmask (!%p437_p2), 1043456   ;;  %vm5678_vm4 = vcmask (!%p437_p2), 130048  }
   0x7   : > { %v519_v2 = vld [vmem:[%s16946_s1 + $0x40] sm:$0xff] (!%p437_p2)  ;;  %v10785_v3 = vcombine.high (!%p437_p2), %v511_v0, %v515_v1  ;;  %v10784_v4 = vcombine.low (!%p437_p2), %v511_v0, %v515_v1  ;;  %v12842_v15 = vshrl.u32 (!%p437_p2), %v493_v10, 7  ;;  %v10787_v22 = vcombine.high (!%p437_p2), %v512_v17, %v516_v20  ;;  %v520_v24 = vld [vmem:[%s16946_s1 + $0x48] sm:$0xff] (!%p437_p2) }
   0x8   : > { %v523_v5 = vld [vmem:[%s16946_s1 + $0x60] sm:$0xff] (!%p437_p2)  ;;  %v10786_v23 = vcombine.low (!%p437_p2), %v512_v17, %v516_v20  ;;  %v524_v25 = vld [vmem:[%s16946_s1 + $0x68] sm:$0xff] (!%p437_p2)  ;;  %vm12723_vm5 = vmmov (!%p437_p2), 0   ;;  %vm10722_vm6 = vcmp.lt.s32.totalorder (!%p437_p2), %v493_v10, 512 }
   0x9   : > { %v10793_v7 = vcombine.high (!%p437_p2), %v519_v2, %v523_v5  ;;  %v527_v8 = vld [vmem:[%s16946_s1 + $0x80] sm:$0xff] (!%p437_p2)  ;;  %1486 = vmatprep.subr.bf16.mxu0 (!%p437_p2), %v10785_v3  ;;  %v10792_v11 = vcombine.low (!%p437_p2), %v519_v2, %v523_v5  ;;  %v12866_v26 = vsub.s32 (!%p437_p2), 1, %v12842_v15  ;;  %v10795_v27 = vcombine.high (!%p437_p2), %v520_v24, %v524_v25  ;;  %v528_v28 = vld [vmem:[%s16946_s1 + $0x88] sm:$0xff] (!%p437_p2)  ;;  %1568 = vmatprep.subr.bf16.mxu1 (!%p437_p2), %v10787_v22 }
   0xa   : > { %v531_v9 = vld [vmem:[%s16946_s1 + $0xa0] sm:$0xff] (!%p437_p2)  ;;  %1487 = vmatpush1.bf16.msra.mxu0 (!%p437_p2), %v10784_v4  ;;  %v532_v29 = vld [vmem:[%s16946_s1 + $0xa8] sm:$0xff] (!%p437_p2)  ;;  %1569 = vmatpush1.bf16.msra.mxu1 (!%p437_p2), %v10786_v23  ;;  %v10794_v32 = vcombine.low (!%p437_p2), %v520_v24, %v524_v25 }
   0xb   : > { %1488 = vmatprep.subr.bf16.mxu0 (!%p437_p2), %v10793_v7  ;;  %v10801_v12 = vcombine.high (!%p437_p2), %v527_v8, %v531_v9  ;;  %v535_v13 = vld [vmem:[%s16946_s1 + $0xc0] sm:$0xff] (!%p437_p2)  ;;  %v10800_v16 = vcombine.low (!%p437_p2), %v527_v8, %v531_v9  ;;  %1570 = vmatprep.subr.bf16.mxu1 (!%p437_p2), %v10795_v27  ;;  %v10803_v36 = vcombine.high (!%p437_p2), %v528_v28, %v532_v29  ;;  %v536_v38 = vld [vmem:[%s16946_s1 + $0xc8] sm:$0xff] (!%p437_p2) }
   0xc   : > { %v539_v14 = vld [vmem:[%s16946_s1 + $0xe0] sm:$0xff] (!%p437_p2)  ;;  %v540_v39 = vld [vmem:[%s16946_s1 + $0xe8] sm:$0xff] (!%p437_p2)  ;;  %v10802_v43 = vcombine.low (!%p437_p2), %v528_v28, %v532_v29 }
   0xd   : > { %s16962_s19 = smov (!%p482_p3, %s10778_s19), 7  ;;  %v10809_v18 = vcombine.high %v535_v13, %v539_v14  ;;  %v543_v19 = vld [vmem:[%s16946_s1 + $0x100] sm:$0xff]  ;;  %v10808_v30 = vcombine.low %v535_v13, %v539_v14  ;;  %v10811_v46 = vcombine.high %v536_v38, %v540_v39  ;;  %v544_v47 = vld [vmem:[%s16946_s1 + $0x108] sm:$0xff]  ;;  %v10810_v51 = vcombine.low %v536_v38, %v540_v39 }
   0xe   : > { %s12257_s23 = smul.u32 3, %s16962_s19  ;;  %1489 = vmatpush1.bf16.msra.mxu0 %v10792_v11  ;;  %v547_v21 = vld [vmem:[%s16946_s1 + $0x120] sm:$0xff]  ;;  %1571 = vmatpush1.bf16.msra.mxu1 %v10794_v32  ;;  %v548_v48 = vld [vmem:[%s16946_s1 + $0x128] sm:$0xff]  ;;  %s10783_s21 = sshll.u32 %s16962_s19, 2 }
   0xf   : > { %1490 = vmatprep.subr.bf16.mxu0 %v10801_v12  ;;  %v10817_v31 = vcombine.high %v543_v19, %v547_v21  ;;  %v551_v34 = vld [vmem:[%s16946_s1 + $0x140] sm:$0xff]  ;;  %v10816_v40 = vcombine.low %v543_v19, %v547_v21  ;;  %1572 = vmatprep.subr.bf16.mxu1 %v10803_v36  ;;  %v10819_v54 = vcombine.high %v544_v47, %v548_v48  ;;  %v552_v55 = vld [vmem:[%s16946_s1 + $0x148] sm:$0xff]  ;;  %s489_s25 = scalar_lea.vmem %s16960_s15, %s10783_s21 }
  0x10   : > { %s485_s26 = scalar_lea.vmem %s16945_s0, %s12257_s23  ;;  %v555_v35 = vld [vmem:[%s16946_s1 + $0x160] sm:$0xff]  ;;  %v556_v56 = vld [vmem:[%s16946_s1 + $0x168] sm:$0xff]  ;;  %v10818_v59 = vcombine.low %v544_v47, %v548_v48 }
  0x11   : > { %v12874_v33 = vld [vmem:[%s485_s26] sm:$0x7]  ;;  %v10825_v42 = vcombine.high %v551_v34, %v555_v35  ;;  %v10824_v49 = vcombine.low %v551_v34, %v555_v35  ;;  %v10827_v62 = vcombine.high %v552_v55, %v556_v56  ;;  %v560_v63 = vld [vmem:[%s16946_s1 + $0x188] sm:$0xff]  ;;  %v10826_v3 = vcombine.low %v552_v55, %v556_v56 }
  0x12   : > { %1491 = vmatpush1.bf16.msra.mxu0 %v10800_v16  ;;  %v500_v37 = vrot.slane %v12874_v33, %v12866_v26  ;;  %v559_v44 = vld [vmem:[%s16946_s1 + $0x180] sm:$0xff]  ;;  %1573 = vmatpush1.bf16.msra.mxu1 %v10802_v43  ;;  %v564_v0 = vld [vmem:[%s16946_s1 + $0x1a8] sm:$0xff] }
  0x13   : > { %1492 = vmatprep.subr.bf16.mxu0 %v10809_v18  ;;  %v563_v45 = vld [vmem:[%s16946_s1 + $0x1a0] sm:$0xff]  ;;  %1574 = vmatprep.subr.bf16.mxu1 %v10811_v46  ;;  %v10835_v7 = vcombine.high %v560_v63, %v564_v0  ;;  %v568_v8 = vld [vmem:[%s16946_s1 + $0x1c8] sm:$0xff]  ;;  %v10834_v13 = vcombine.low %v560_v63, %v564_v0 }
  0x14   : > { %v12890_v41 = vpack.c.bf16 %v500_v37, %v500_v37  ;;  %v10833_v50 = vcombine.high %v559_v44, %v563_v45  ;;  %v567_v52 = vld [vmem:[%s16946_s1 + $0x1c0] sm:$0xff]  ;;  %v10832_v57 = vcombine.low %v559_v44, %v563_v45  ;;  %v572_v9 = vld [vmem:[%s16946_s1 + $0x1e8] sm:$0xff] }
  0x15   : > { %v571_v53 = vld [vmem:[%s16946_s1 + $0x1e0] sm:$0xff]  ;;  %v10843_v17 = vcombine.high %v568_v8, %v572_v9  ;;  %v576_v18 = vld [vmem:[%s16946_s1 + $0x208] sm:$0xff]  ;;  %v10842_v22 = vcombine.low %v568_v8, %v572_v9 }
  0x16   : > { %1493 = vmatpush1.bf16.msra.mxu0 %v10808_v30  ;;  %1518 = vmatprep.mubr.bf16.mxu0 %v12890_v41  ;;  %v10841_v58 = vcombine.high %v567_v52, %v571_v53  ;;  %v575_v60 = vld [vmem:[%s16946_s1 + $0x200] sm:$0xff]  ;;  %v10840_v1 = vcombine.low %v567_v52, %v571_v53  ;;  %v580_v19 = vld [vmem:[%s16946_s1 + $0x228] sm:$0xff] }
  0x17   : > { %1494 = vmatprep.subr.bf16.mxu0 %v10817_v31  ;;  %1600 = vmatprep.mubr.bf16.mxu1 %v12890_v41  ;;  %v579_v61 = vld [vmem:[%s16946_s1 + $0x220] sm:$0xff]  ;;  %v10851_v25 = vcombine.high %v576_v18, %v580_v19  ;;  %v584_v27 = vld [vmem:[%s16946_s1 + $0x248] sm:$0xff]  ;;  %v10850_v31 = vcombine.low %v576_v18, %v580_v19 }
  0x18   : > { %1575 = vmatpush1.bf16.msra.mxu1 %v10810_v51  ;;  %v10849_v2 = vcombine.high %v575_v60, %v579_v61  ;;  %v583_v4 = vld [vmem:[%s16946_s1 + $0x240] sm:$0xff]  ;;  %v10848_v11 = vcombine.low %v575_v60, %v579_v61  ;;  %v588_v28 = vld [vmem:[%s16946_s1 + $0x268] sm:$0xff] }
  0x19   : > { %1576 = vmatprep.subr.bf16.mxu1 %v10819_v54  ;;  %v587_v5 = vld [vmem:[%s16946_s1 + $0x260] sm:$0xff]  ;;  %v10859_v35 = vcombine.high %v584_v27, %v588_v28  ;;  %v592_v36 = vld [vmem:[%s16946_s1 + $0x288] sm:$0xff] }
  0x1a   : > { %1495 = vmatpush1.bf16.msra.mxu0 %v10816_v40  ;;  %v10857_v12 = vcombine.high %v583_v4, %v587_v5  ;;  %v591_v14 = vld [vmem:[%s16946_s1 + $0x280] sm:$0xff]  ;;  %v10856_v20 = vcombine.low %v583_v4, %v587_v5  ;;  %v596_v37 = vld [vmem:[%s16946_s1 + $0x2a8] sm:$0xff]  ;;  %v10858_v40 = vcombine.low %v584_v27, %v588_v28 }
  0x1b   : > { %1496 = vmatprep.subr.bf16.mxu0 %v10825_v42  ;;  %v595_v16 = vld [vmem:[%s16946_s1 + $0x2a0] sm:$0xff]  ;;  %v10867_v44 = vcombine.high %v592_v36, %v596_v37  ;;  %v600_v45 = vld [vmem:[%s16946_s1 + $0x2c8] sm:$0xff] }
  0x1c   : > { %1577 = vmatpush1.bf16.msra.mxu1 %v10818_v59  ;;  %v10865_v21 = vcombine.high %v591_v14, %v595_v16  ;;  %v599_v23 = vld [vmem:[%s16946_s1 + $0x2c0] sm:$0xff]  ;;  %v10864_v29 = vcombine.low %v591_v14, %v595_v16  ;;  %v604_v46 = vld [vmem:[%s16946_s1 + $0x2e8] sm:$0xff] }
  0x1d   : > { %1578 = vmatprep.subr.bf16.mxu1 %v10827_v62  ;;  %v603_v24 = vld [vmem:[%s16946_s1 + $0x2e0] sm:$0xff]  ;;  %v10875_v52 = vcombine.high %v600_v45, %v604_v46  ;;  %v608_v53 = vld [vmem:[%s16946_s1 + $0x308] sm:$0xff]  ;;  %v13012_v62 = vsub.s32 0, %v12842_v15 }
  0x1e   : > { %1497 = vmatpush1.bf16.msra.mxu0 %v10824_v49  ;;  %v10873_v30 = vcombine.high %v599_v23, %v603_v24  ;;  %v607_v32 = vld [vmem:[%s16946_s1 + $0x300] sm:$0xff]  ;;  %v10872_v38 = vcombine.low %v599_v23, %v603_v24  ;;  %v10866_v49 = vcombine.low %v592_v36, %v596_v37  ;;  %v612_v54 = vld [vmem:[%s16946_s1 + $0x328] sm:$0xff]  ;;  %v513_v36 = vld [vmem:[%s16946_s1 + $0x10] sm:$0xff] }
  0x1f   : > { %1498 = vmatprep.subr.bf16.mxu0 %v10833_v50  ;;  %v611_v34 = vld [vmem:[%s16946_s1 + $0x320] sm:$0xff]  ;;  %v10883_v60 = vcombine.high %v608_v53, %v612_v54  ;;  %v616_v61 = vld [vmem:[%s16946_s1 + $0x348] sm:$0xff]  ;;  %v496_v8 = vrot.slane %v12874_v33, %v13012_v62 }
  0x20   : > { %1579 = vmatpush1.bf16.msra.mxu1 %v10826_v3  ;;  %v10881_v39 = vcombine.high %v607_v32, %v611_v34  ;;  %v615_v42 = vld [vmem:[%s16946_s1 + $0x340] sm:$0xff]  ;;  %v10880_v47 = vcombine.low %v607_v32, %v611_v34  ;;  %v620_v63 = vld [vmem:[%s16946_s1 + $0x368] sm:$0xff]  ;;  %v10882_v3 = vcombine.low %v608_v53, %v612_v54  ;;  %v529_v54 = vld [vmem:[%s16946_s1 + $0x90] sm:$0xff] }
  0x21   : > { %1580 = vmatprep.subr.bf16.mxu1 %v10835_v7  ;;  %v619_v43 = vld [vmem:[%s16946_s1 + $0x360] sm:$0xff]  ;;  %v10891_v5 = vcombine.high %v616_v61, %v620_v63  ;;  %v624_v7 = vld [vmem:[%s16946_s1 + $0x388] sm:$0xff]  ;;  %v10890_v14 = vcombine.low %v616_v61, %v620_v63  ;;  %v13040_v19 = vpack.c.bf16 %v496_v8, %v496_v8  ;;  %v537_v63 = vld [vmem:[%s16946_s1 + $0xd0] sm:$0xff] }
  0x22   : > { %1499 = vmatpush1.bf16.msra.mxu0 %v10832_v57  ;;  %v10889_v48 = vcombine.high %v615_v42, %v619_v43  ;;  %v623_v50 = vld [vmem:[%s16946_s1 + $0x380] sm:$0xff]  ;;  %v10888_v55 = vcombine.low %v615_v42, %v619_v43  ;;  %v628_v9 = vld [vmem:[%s16946_s1 + $0x3a8] sm:$0xff]  ;;  %v545_v8 = vld [vmem:[%s16946_s1 + $0x110] sm:$0xff] }
  0x23   : > { %1500 = vmatprep.subr.bf16.mxu0 %v10841_v58  ;;  %v627_v51 = vld [vmem:[%s16946_s1 + $0x3a0] sm:$0xff]  ;;  %v10874_v58 = vcombine.low %v600_v45, %v604_v46  ;;  %v632_v18 = vld [vmem:[%s16946_s1 + $0x3c8] sm:$0xff]  ;;  %v10898_v24 = vcombine.low %v624_v7, %v628_v9  ;;  %v521_v46 = vld [vmem:[%s16946_s1 + $0x50] sm:$0xff] }
  0x24   : > { %1581 = vmatpush1.bf16.msra.mxu1 %v10834_v13  ;;  %v10897_v56 = vcombine.high %v623_v50, %v627_v51  ;;  %v631_v57 = vld [vmem:[%s16946_s1 + $0x3c0] sm:$0xff]  ;;  %v10896_v0 = vcombine.low %v623_v50, %v627_v51  ;;  %v640_v28 = vld [vmem:[%s16946_s1 + $0x408] sm:$0xff] }
  0x25   : > { %1582 = vmatprep.subr.bf16.mxu1 %v10843_v17  ;;  %v635_v59 = vld [vmem:[%s16946_s1 + $0x3e0] sm:$0xff]  ;;  %v10899_v17 = vcombine.high %v624_v7, %v628_v9  ;;  %v652_v42 = vld [vmem:[%s16946_s1 + $0x468] sm:$0xff] }
  0x26   : > { %1501 = vmatpush1.bf16.msra.mxu0 %v10840_v1  ;;  %v10905_v1 = vcombine.high %v631_v57, %v635_v59  ;;  %v643_v4 = vld [vmem:[%s16946_s1 + $0x420] sm:$0xff]  ;;  %v660_v50 = vld [vmem:[%s16946_s1 + $0x4a8] sm:$0x33] }
  0x27   : > { %1502 = vmatprep.subr.bf16.mxu0 %v10849_v2  ;;  %v639_v2 = vld [vmem:[%s16946_s1 + $0x400] sm:$0xff] }
  0x28   : > { %1583 = vmatpush1.bf16.msra.mxu1 %v10842_v22  ;;  %v647_v13 = vld [vmem:[%s16946_s1 + $0x440] sm:$0xff] }
  0x29   : > { %1584 = vmatprep.subr.bf16.mxu1 %v10851_v25  ;;  %v651_v16 = vld [vmem:[%s16946_s1 + $0x460] sm:$0xff] }
  0x2a   : > { %1503 = vmatpush1.bf16.msra.mxu0 %v10848_v11  ;;  %v10904_v11 = vcombine.low %v631_v57, %v635_v59  ;;  %v10921_v22 = vcombine.high %v647_v13, %v651_v16  ;;  %v655_v23 = vld [vmem:[%s16946_s1 + $0x480] sm:$0xff]  ;;  %v518_v59 = vld [vmem:[%s16946_s1 + $0x38] sm:$0xff] }
  0x2b   : > { %1504 = vmatprep.subr.bf16.mxu0 %v10857_v12  ;;  %v10913_v12 = vcombine.high %v639_v2, %v643_v4  ;;  %v659_v25 = vld [vmem:[%s16946_s1 + $0x4a0] sm:$0x33] }
  0x2c   : > { %1585 = vmatpush1.bf16.msra.mxu1 %v10850_v31  ;;  %v10920_v31 = vcombine.low %v647_v13, %v651_v16  ;;  %v10929_v32 = vcombine.high %v655_v23, %v659_v25  ;;  %v10928_v34 = vcombine.low %v655_v23, %v659_v25  ;;  %v530_v13 = vld [vmem:[%s16946_s1 + $0x98] sm:$0xff] }
  0x2d   : > { %1586 = vmatprep.subr.bf16.mxu1 %v10859_v35  ;;  %v538_v23 = vld [vmem:[%s16946_s1 + $0xd8] sm:$0xff] }
  0x2e   : > { %1505 = vmatpush1.bf16.msra.mxu0 %v10856_v20  ;;  %v636_v20 = vld [vmem:[%s16946_s1 + $0x3e8] sm:$0xff]  ;;  %v1463_v43 = vsel %vm1461_vm0, %v10928_v34, 0 }
  0x2f   : > { %1506 = vmatprep.subr.bf16.mxu0 %v10865_v21  ;;  %v10912_v21 = vcombine.low %v639_v2, %v643_v4  ;;  %v10907_v27 = vcombine.high %v632_v18, %v636_v20  ;;  %v10906_v35 = vcombine.low %v632_v18, %v636_v20  ;;  %v526_v4 = vld [vmem:[%s16946_s1 + $0x78] sm:$0xff]  ;;  %v553_v18 = vld [vmem:[%s16946_s1 + $0x150] sm:$0xff] }
  0x30   : > { %1587 = vmatpush1.bf16.msra.mxu1 %v10858_v40  ;;  %v557_v20 = vld [vmem:[%s16946_s1 + $0x170] sm:$0xff] }
  0x31   : > { %1588 = vmatprep.subr.bf16.mxu1 %v10867_v44 }
  0x32   : > { %1507 = vmatpush1.bf16.msra.mxu0 %v10864_v29  ;;  %v13056_v29 = vsub.s32 2, %v12842_v15 }
  0x33   : > { %1508 = vmatprep.subr.bf16.mxu0 %v10873_v30  ;;  %v644_v30 = vld [vmem:[%s16946_s1 + $0x428] sm:$0xff] }
  0x34   : > { %1589 = vmatpush1.bf16.msra.mxu1 %v10866_v49  ;;  %v10915_v37 = vcombine.high %v640_v28, %v644_v30  ;;  %v504_v40 = vrot.slane %v12874_v33, %v13056_v29  ;;  %v10914_v44 = vcombine.low %v640_v28, %v644_v30  ;;  %v525_v33 = vld [vmem:[%s16946_s1 + $0x70] sm:$0xff]  ;;  %v10829_v30 = vcombine.high %v553_v18, %v557_v20 }
  0x35   : > { %1590 = vmatprep.subr.bf16.mxu1 %v10875_v52  ;;  %v10797_v53 = vcombine.high %v521_v46, %v525_v33  ;;  %v565_v28 = vld [vmem:[%s16946_s1 + $0x1b0] sm:$0xff] }
  0x36   : > { %1509 = vmatpush1.bf16.msra.mxu0 %v10872_v38  ;;  %v517_v38 = vld [vmem:[%s16946_s1 + $0x30] sm:$0xff]  ;;  %v13087_v49 = vpack.c.bf16 %v504_v40, %v504_v40  ;;  %v554_v40 = vld [vmem:[%s16946_s1 + $0x158] sm:$0xff] }
  0x37   : > { %1510 = vmatprep.subr.bf16.mxu0 %v10881_v39  ;;  %v648_v39 = vld [vmem:[%s16946_s1 + $0x448] sm:$0xff]  ;;  %v10789_v45 = vcombine.high %v513_v36, %v517_v38  ;;  %v10788_v51 = vcombine.low %v513_v36, %v517_v38  ;;  %v569_v36 = vld [vmem:[%s16946_s1 + $0x1d0] sm:$0xff] }
  0x38   : > { %1591 = vmatpush1.bf16.msra.mxu1 %v10874_v58  ;;  %v10922_v52 = vcombine.low %v648_v39, %v652_v42  ;;  %v514_v58 = vld [vmem:[%s16946_s1 + $0x18] sm:$0xff] }
  0x39   : > { %1592 = vmatprep.subr.bf16.mxu1 %v10883_v60  ;;  %v10796_v60 = vcombine.low %v521_v46, %v525_v33  ;;  %v10791_v2 = vcombine.high %v514_v58, %v518_v59  ;;  %v10790_v9 = vcombine.low %v514_v58, %v518_v59  ;;  %v581_v46 = vld [vmem:[%s16946_s1 + $0x230] sm:$0xff]  ;;  %v574_v58 = vld [vmem:[%s16946_s1 + $0x1f8] sm:$0xff] }
  0x3a   : > { %1511 = vmatpush1.bf16.msra.mxu0 %v10880_v47  ;;  %v10923_v47 = vcombine.high %v648_v39, %v652_v42  ;;  %v558_v42 = vld [vmem:[%s16946_s1 + $0x178] sm:$0xff] }
  0x3b   : > { %1512 = vmatprep.subr.bf16.mxu0 %v10889_v48  ;;  %v656_v48 = vld [vmem:[%s16946_s1 + $0x488] sm:$0xff] }
  0x3c   : > { %1593 = vmatpush1.bf16.msra.mxu1 %v10882_v3  ;;  %v10930_v57 = vcombine.low %v656_v48, %v660_v50  ;;  %v522_v3 = vld [vmem:[%s16946_s1 + $0x58] sm:$0xff] }
  0x3d   : > { %1594 = vmatprep.subr.bf16.mxu1 %v10891_v5 }
  0x3e   : > { %1513 = vmatpush1.bf16.msra.mxu0 %v10888_v55  ;;  %v10931_v55 = vcombine.high %v656_v48, %v660_v50  ;;  %v562_v48 = vld [vmem:[%s16946_s1 + $0x198] sm:$0xff] }
  0x3f   : > { %1514 = vmatprep.subr.bf16.mxu0 %v10897_v56  ;;  %v533_v56 = vld [vmem:[%s16946_s1 + $0xb0] sm:$0xff]  ;;  %v566_v50 = vld [vmem:[%s16946_s1 + $0x1b8] sm:$0xff] }
  0x40   : > { %1595 = vmatpush1.bf16.msra.mxu1 %v10890_v14  ;;  %v10805_v61 = vcombine.high %v529_v54, %v533_v56  ;;  %v10804_v5 = vcombine.low %v529_v54, %v533_v56  ;;  %v534_v14 = vld [vmem:[%s16946_s1 + $0xb8] sm:$0xff]  ;;  %v589_v54 = vld [vmem:[%s16946_s1 + $0x270] sm:$0xff]  ;;  %v10830_v56 = vcombine.low %v554_v40, %v558_v42  ;;  %v10839_v59 = vcombine.high %v562_v48, %v566_v50 }
  0x41   : > { %1596 = vmatprep.subr.bf16.mxu1 %v10899_v17 }
  0x42   : > { %1515 = vmatpush1.bf16.msra.mxu0 %v10896_v0  ;;  %v1469_v0 = vsel %vm1461_vm0, %v10930_v57, 0  ;;  %v570_v57 = vld [vmem:[%s16946_s1 + $0x1d8] sm:$0xff] }
  0x43   : > { %1516 = vmatprep.subr.bf16.mxu0 %v10905_v1  ;;  %v541_v1 = vld [vmem:[%s16946_s1 + $0xf0] sm:$0xff] }
  0x44   : > { %1597 = vmatpush1.bf16.msra.mxu1 %v10898_v24  ;;  %v10813_v7 = vcombine.high %v537_v63, %v541_v1  ;;  %v10812_v16 = vcombine.low %v537_v63, %v541_v1  ;;  %v542_v24 = vld [vmem:[%s16946_s1 + $0xf8] sm:$0xff]  ;;  %v597_v63 = vld [vmem:[%s16946_s1 + $0x2b0] sm:$0xff]  ;;  %v10838_v1 = vcombine.low %v562_v48, %v566_v50 }
  0x45   : > { %1598 = vmatprep.subr.bf16.mxu1 %v10907_v27  ;;  %v561_v27 = vld [vmem:[%s16946_s1 + $0x190] sm:$0xff]  ;;  %v10815_v34 = vcombine.high %v538_v23, %v542_v24  ;;  %v10814_v39 = vcombine.low %v538_v23, %v542_v24  ;;  %v598_v23 = vld [vmem:[%s16946_s1 + $0x2b8] sm:$0xff] }
  0x46   : > { %1517 = vmatpush1.bf16.msra.mxu0 %v10904_v11  ;;  %v549_v11 = vld [vmem:[%s16946_s1 + $0x130] sm:$0xff]  ;;  %v10837_v38 = vcombine.high %v561_v27, %v565_v28  ;;  %v618_v48 = vld [vmem:[%s16946_s1 + $0x358] sm:$0xff] }
  0x47   : > { %1527 = vmatprep.subr.bf16.mxu0 %v10913_v12  ;;  %v10799_v12 = vcombine.high %v522_v3, %v526_v4  ;;  %v10821_v17 = vcombine.high %v545_v8, %v549_v11  ;;  %v10820_v25 = vcombine.low %v545_v8, %v549_v11  ;;  %v605_v8 = vld [vmem:[%s16946_s1 + $0x2f0] sm:$0xff]  ;;  %v10846_v11 = vcombine.low %v570_v57, %v574_v58  ;;  %v622_v50 = vld [vmem:[%s16946_s1 + $0x378] sm:$0xff] }
  0x48   : > { %1599 = vmatpush1.bf16.msra.mxu1 %v10906_v35  ;;  %v10828_v35 = vcombine.low %v553_v18, %v557_v20  ;;  %v613_v18 = vld [vmem:[%s16946_s1 + $0x330] sm:$0xff] }
  0x49   : > { %1519 = vmatmul.mubr.bf16.vlgmr.msra.gmra.mrb[0].mxu0 %v13040_v19  ;;  %1609 = vmatprep.subr.bf16.mxu1 %v10915_v37  ;;  %v573_v37 = vld [vmem:[%s16946_s1 + $0x1f0] sm:$0xff] }
  0x4a   : > { %1528 = vmatpush1.bf16.msra.mxu0 %v10912_v21  ;;  %1559 = vmatprep.mubr.bf16.mxu0 %v12721_v6  ;;  %v10798_v21 = vcombine.low %v522_v3, %v526_v4  ;;  %v582_v3 = vld [vmem:[%s16946_s1 + $0x238] sm:$0xff]  ;;  %v10847_v4 = vcombine.high %v570_v57, %v574_v58 }
  0x4b   : > { %1529 = vmatprep.subr.bf16.mxu0 %v10921_v22  ;;  %1601 = vmatmul.mubr.bf16.vlgmr.msra.gmra.mrb[0].mxu1 %v13040_v19  ;;  %v10807_v22 = vcombine.high %v530_v13, %v534_v14  ;;  %v626_v57 = vld [vmem:[%s16946_s1 + $0x398] sm:$0xff] }
  0x4c   : > { %1610 = vmatpush1.bf16.msra.mxu1 %v10914_v44  ;;  %1641 = vmatprep.mubr.bf16.mxu1 %v12721_v6  ;;  %v10836_v44 = vcombine.low %v561_v27, %v565_v28  ;;  %v617_v27 = vld [vmem:[%s16946_s1 + $0x350] sm:$0xff]  ;;  %v630_v58 = vld [vmem:[%s16946_s1 + $0x3b8] sm:$0xff] }
  0x4d   : > { %1611 = vmatprep.subr.bf16.mxu1 %v10923_v47  ;;  %v10845_v47 = vcombine.high %v569_v36, %v573_v37  ;;  %v621_v28 = vld [vmem:[%s16946_s1 + $0x370] sm:$0xff] }
  0x4e   : > { %1530 = vmatpush1.bf16.msra.mxu0 %v10920_v31  ;;  %v10806_v31 = vcombine.low %v530_v13, %v534_v14  ;;  %v590_v13 = vld [vmem:[%s16946_s1 + $0x278] sm:$0xff] }
  0x4f   : > { %10936 = vmatprep.subr.msk.bf16.mxu0 %vm1461_vm0, %v10929_v32  ;;  %v546_v32 = vld [vmem:[%s16946_s1 + $0x118] sm:$0xff] }
  0x50   : > { %1612 = vmatpush1.bf16.msra.mxu1 %v10922_v52  ;;  %v10844_v52 = vcombine.low %v569_v36, %v573_v37  ;;  %v625_v36 = vld [vmem:[%s16946_s1 + $0x390] sm:$0xff] }
  0x51   : > { %10938 = vmatprep.subr.msk.bf16.mxu1 %vm1461_vm0, %v10931_v55  ;;  %v629_v37 = vld [vmem:[%s16946_s1 + $0x3b0] sm:$0xff] }
  0x52   : > { %1532 = vmatpush1.bf16.msra.mxu0 %v1463_v43 }
  0x53   : > { %1650 = vmatprep.subr.bf16.mxu0 %v10789_v45  ;;  %v577_v45 = vld [vmem:[%s16946_s1 + $0x210] sm:$0xff] }
  0x54   : > { %1614 = vmatpush1.bf16.msra.mxu1 %v1469_v0  ;;  %v10853_v55 = vcombine.high %v577_v45, %v581_v46 }
  0x55   : > { %10937 = vmatmul.mubr.msk.bf16.vlgmr.msra.gmra.mrb[0].mxu0 %vm1457_vm1, %v13087_v49  ;;  %1732 = vmatprep.subr.bf16.mxu1 %v10791_v2  ;;  %v578_v2 = vld [vmem:[%s16946_s1 + $0x218] sm:$0xff] }
  0x56   : > { %1651 = vmatpush1.bf16.msra.mxu0 %v10788_v51  ;;  %1682 = vmatprep.mubr.bf16.mxu0 %v12890_v41  ;;  %v10831_v51 = vcombine.high %v554_v40, %v558_v42  ;;  %v10855_v14 = vcombine.high %v578_v2, %v582_v3  ;;  %v610_v40 = vld [vmem:[%s16946_s1 + $0x318] sm:$0xff] }
  0x57   : > { %1652 = vmatprep.subr.bf16.mxu0 %v10797_v53  ;;  %10939 = vmatmul.mubr.msk.bf16.vlgmr.msra.gmra.mrb[0].mxu1 %vm1457_vm1, %v13087_v49  ;;  %v585_v53 = vld [vmem:[%s16946_s1 + $0x250] sm:$0xff]  ;;  %v614_v42 = vld [vmem:[%s16946_s1 + $0x338] sm:$0xff] }
  0x58   : > { %1733 = vmatpush1.bf16.msra.mxu1 %v10790_v9  ;;  %1764 = vmatprep.mubr.bf16.mxu1 %v12890_v41  ;;  %v550_v41 = vld [vmem:[%s16946_s1 + $0x138] sm:$0xff]  ;;  %v10861_v0 = vcombine.high %v585_v53, %v589_v54 }
  0x59   : > { %1734 = vmatprep.subr.bf16.mxu1 %v10799_v12  ;;  %v10823_v43 = vcombine.high %v546_v32, %v550_v41  ;;  %v10822_v33 = vcombine.low %v546_v32, %v550_v41  ;;  %v586_v12 = vld [vmem:[%s16946_s1 + $0x258] sm:$0xff] }
  0x5a   : > { %1653 = vmatpush1.bf16.msra.mxu0 %v10796_v60  ;;  %v10852_v60 = vcombine.low %v577_v45, %v581_v46  ;;  %v10863_v24 = vcombine.high %v586_v12, %v590_v13  ;;  %v602_v32 = vld [vmem:[%s16946_s1 + $0x2d8] sm:$0xff]  ;;  %v633_v45 = vld [vmem:[%s16946_s1 + $0x3d0] sm:$0xff] }
  0x5b   : > { %1654 = vmatprep.subr.bf16.mxu0 %v10805_v61  ;;  %v593_v61 = vld [vmem:[%s16946_s1 + $0x290] sm:$0xff]  ;;  %v606_v41 = vld [vmem:[%s16946_s1 + $0x2f8] sm:$0xff] }
  0x5c   : > { %1735 = vmatpush1.bf16.msra.mxu1 %v10798_v21  ;;  %v10869_v9 = vcombine.high %v593_v61, %v597_v63  ;;  %v10854_v21 = vcombine.low %v578_v2, %v582_v3  ;;  %v637_v46 = vld [vmem:[%s16946_s1 + $0x3f0] sm:$0xff]  ;;  %v634_v2 = vld [vmem:[%s16946_s1 + $0x3d8] sm:$0xff] }
  0x5d   : > { %1736 = vmatprep.subr.bf16.mxu1 %v10807_v22  ;;  %v594_v22 = vld [vmem:[%s16946_s1 + $0x298] sm:$0xff] }
  0x5e   : > { %1655 = vmatpush1.bf16.msra.mxu0 %v10804_v5  ;;  %v10860_v5 = vcombine.low %v585_v53, %v589_v54  ;;  %v641_v53 = vld [vmem:[%s16946_s1 + $0x410] sm:$0xff]  ;;  %v638_v3 = vld [vmem:[%s16946_s1 + $0x3f8] sm:$0xff] }
  0x5f   : > { %1656 = vmatprep.subr.bf16.mxu0 %v10813_v7  ;;  %v601_v7 = vld [vmem:[%s16946_s1 + $0x2d0] sm:$0xff] }
  0x60   : > { %1737 = vmatpush1.bf16.msra.mxu1 %v10806_v31  ;;  %v10877_v20 = vcombine.high %v601_v7, %v605_v8  ;;  %v10862_v31 = vcombine.low %v586_v12, %v590_v13  ;;  %v645_v54 = vld [vmem:[%s16946_s1 + $0x430] sm:$0xff]  ;;  %v642_v12 = vld [vmem:[%s16946_s1 + $0x418] sm:$0xff] }
  0x61   : > { %1738 = vmatprep.subr.bf16.mxu1 %v10815_v34  ;;  %v10871_v34 = vcombine.high %v594_v22, %v598_v23  ;;  %v646_v13 = vld [vmem:[%s16946_s1 + $0x438] sm:$0xff] }
  0x62   : > { %1657 = vmatpush1.bf16.msra.mxu0 %v10812_v16  ;;  %v10868_v16 = vcombine.low %v593_v61, %v597_v63  ;;  %v649_v61 = vld [vmem:[%s16946_s1 + $0x450] sm:$0xff] }
  0x63   : > { %1658 = vmatprep.subr.bf16.mxu0 %v10821_v17  ;;  %v609_v17 = vld [vmem:[%s16946_s1 + $0x310] sm:$0xff] }
  0x64   : > { %1739 = vmatpush1.bf16.msra.mxu1 %v10814_v39  ;;  %v10870_v39 = vcombine.low %v594_v22, %v598_v23  ;;  %v653_v63 = vld [vmem:[%s16946_s1 + $0x470] sm:$0xff]  ;;  %v10910_v22 = vcombine.low %v634_v2, %v638_v3  ;;  %v650_v23 = vld [vmem:[%s16946_s1 + $0x458] sm:$0xff] }
  0x65   : > { %1740 = vmatprep.subr.bf16.mxu1 %v10823_v43  ;;  %v10879_v43 = vcombine.high %v602_v32, %v606_v41 }
  0x66   : > { %1659 = vmatpush1.bf16.msra.mxu0 %v10820_v25  ;;  %v10876_v25 = vcombine.low %v601_v7, %v605_v8  ;;  %v657_v7 = vld [vmem:[%s16946_s1 + $0x490] sm:$0xff] }
  0x67   : > { %1660 = vmatprep.subr.bf16.mxu0 %v10829_v30  ;;  %v10885_v30 = vcombine.high %v609_v17, %v613_v18  ;;  %v661_v8 = vld [vmem:[%s16946_s1 + $0x4b0] sm:$0x33] }
  0x68   : > { %1741 = vmatpush1.bf16.msra.mxu1 %v10822_v33  ;;  %v10878_v33 = vcombine.low %v602_v32, %v606_v41  ;;  %v12271_v41 = vld [vmem:[%s16948_s3] ss:$16 sps:$4 sm:$0xff]  }
  0x69   : > { %1742 = vmatprep.subr.bf16.mxu1 %v10831_v51  ;;  %v10887_v51 = vcombine.high %v610_v40, %v614_v42 }
  0x6a   : > { %1661 = vmatpush1.bf16.msra.mxu0 %v10828_v35  ;;  %v10884_v35 = vcombine.low %v609_v17, %v613_v18  ;;  %v658_v17 = vld [vmem:[%s16946_s1 + $0x498] sm:$0xff] }
  0x6b   : > { %1662 = vmatprep.subr.bf16.mxu0 %v10837_v38  ;;  %v10893_v38 = vcombine.high %v617_v27, %v621_v28  ;;  %v662_v18 = vld [vmem:[%s16946_s1 + $0x4b8] sm:$0x33] }
  0x6c   : > { %1743 = vmatpush1.bf16.msra.mxu1 %v10830_v56  ;;  %v10886_v56 = vcombine.low %v610_v40, %v614_v42  ;;  %v12283_v40 = vld [vmem:[%s16948_s3 + $0x40] ss:$16 sps:$4 sm:$0xff]   ;;  %v12274_v42 = vld [vmem:[%s16948_s3 + $0x8] ss:$16 sps:$4 sm:$0xff]  }
  0x6d   : > { %1744 = vmatprep.subr.bf16.mxu1 %v10839_v59  ;;  %v10895_v59 = vcombine.high %v618_v48, %v622_v50 }
  0x6e   : > { %1663 = vmatpush1.bf16.msra.mxu0 %v10836_v44  ;;  %v10892_v44 = vcombine.low %v617_v27, %v621_v28  ;;  %v12273_v27 = vld [vmem:[%s16948_s3 + $0x4] ss:$16 sps:$4 sm:$0xff]  }
  0x6f   : > { %1664 = vmatprep.subr.bf16.mxu0 %v10845_v47  ;;  %v10901_v47 = vcombine.high %v625_v36, %v629_v37 }
  0x70   : > { %1745 = vmatpush1.bf16.msra.mxu1 %v10838_v1  ;;  %v10894_v1 = vcombine.low %v618_v48, %v622_v50  ;;  %v12286_v48 = vld [vmem:[%s16948_s3 + $0x48] ss:$16 sps:$4 sm:$0xff]   ;;  %v12295_v50 = vld [vmem:[%s16948_s3 + $0x80] ss:$16 sps:$4 sm:$0xff]  }
  0x71   : > { %1746 = vmatprep.subr.bf16.mxu1 %v10847_v4  ;;  %v10903_v4 = vcombine.high %v626_v57, %v630_v58 }
  0x72   : > { %1665 = vmatpush1.bf16.msra.mxu0 %v10844_v52  ;;  %v10900_v52 = vcombine.low %v625_v36, %v629_v37  ;;  %v10935_v37 = vcombine.high %v658_v17, %v662_v18 }
  0x73   : > { %1666 = vmatprep.subr.bf16.mxu0 %v10853_v55  ;;  %v10909_v55 = vcombine.high %v633_v45, %v637_v46 }
  0x74   : > { %1747 = vmatpush1.bf16.msra.mxu1 %v10846_v11  ;;  %v10902_v11 = vcombine.low %v626_v57, %v630_v58  ;;  %v12307_v57 = vld [vmem:[%s16948_s3 + $0xc0] ss:$16 sps:$4 sm:$0xff]   ;;  %v12315_v58 = vld [vmem:[%s16948_s3 + $0xe4] ss:$16 sps:$4 sm:$0xff]  }
  0x75   : > { %1748 = vmatprep.subr.bf16.mxu1 %v10855_v14  ;;  %v10911_v14 = vcombine.high %v634_v2, %v638_v3  ;;  %v12319_v2 = vld [vmem:[%s16948_s3 + $0x100] ss:$16 sps:$4 sm:$0xff]   ;;  %v12327_v3 = vld [vmem:[%s16948_s3 + $0x124] ss:$16 sps:$4 sm:$0xff]  }
  0x76   : > { %1667 = vmatpush1.bf16.msra.mxu0 %v10852_v60  ;;  %v10908_v60 = vcombine.low %v633_v45, %v637_v46  ;;  %v12280_v45 = vld [vmem:[%s16948_s3 + $0x28] ss:$16 sps:$4 sm:$0xff]   ;;  %v12289_v46 = vld [vmem:[%s16948_s3 + $0x60] ss:$16 sps:$4 sm:$0xff]  }
  0x77   : > { %1668 = vmatprep.subr.bf16.mxu0 %v10861_v0  ;;  %v10917_v0 = vcombine.high %v641_v53, %v645_v54 }
  0x78   : > { %1749 = vmatpush1.bf16.msra.mxu1 %v10854_v21  ;;  %v10932_v21 = vcombine.low %v657_v7, %v661_v8 }
  0x79   : > { %1750 = vmatprep.subr.bf16.mxu1 %v10863_v24  ;;  %v654_v24 = vld [vmem:[%s16946_s1 + $0x478] sm:$0xff] }
  0x7a   : > { %1669 = vmatpush1.bf16.msra.mxu0 %v10860_v5  ;;  %v10916_v5 = vcombine.low %v641_v53, %v645_v54  ;;  %v1475_v28 = vsel %vm1461_vm0, %v10932_v21, 0  ;;  %v10927_v32 = vcombine.high %v650_v23, %v654_v24  ;;  %v12301_v53 = vld [vmem:[%s16948_s3 + $0xa0] ss:$16 sps:$4 sm:$0xff]   ;;  %v12309_v54 = vld [vmem:[%s16948_s3 + $0xc4] ss:$16 sps:$4 sm:$0xff]  }
  0x7b   : > { %1670 = vmatprep.subr.bf16.mxu0 %v10869_v9  ;;  %v10925_v9 = vcombine.high %v649_v61, %v653_v63  ;;  %v12334_v21 = vld [vmem:[%s16948_s3 + $0x148] ss:$16 sps:$4 sm:$0xff]  }
  0x7c   : > { %1751 = vmatpush1.bf16.msra.mxu1 %v10862_v31  ;;  %v10934_v31 = vcombine.low %v658_v17, %v662_v18  ;;  %v12337_v17 = vld [vmem:[%s16948_s3 + $0x160] ss:$16 sps:$4 sm:$0xff]   ;;  %v12345_v18 = vld [vmem:[%s16948_s3 + $0x184] ss:$16 sps:$4 sm:$0xff]  }
  0x7d   : > { %1752 = vmatprep.subr.bf16.mxu1 %v10871_v34  ;;  %v12279_v34 = vld [vmem:[%s16948_s3 + $0x24] ss:$16 sps:$4 sm:$0xff]  }
  0x7e   : > { %1671 = vmatpush1.bf16.msra.mxu0 %v10868_v16  ;;  %v10924_v16 = vcombine.low %v649_v61, %v653_v63  ;;  %v1481_v36 = vsel %vm1461_vm0, %v10934_v31, 0  ;;  %v12313_v61 = vld [vmem:[%s16948_s3 + $0xe0] ss:$16 sps:$4 sm:$0xff]   ;;  %v12321_v63 = vld [vmem:[%s16948_s3 + $0x104] ss:$16 sps:$4 sm:$0xff]  }
  0x7f   : > { %1672 = vmatprep.subr.bf16.mxu0 %v10877_v20  ;;  %v10933_v20 = vcombine.high %v657_v7, %v661_v8  ;;  %v12325_v7 = vld [vmem:[%s16948_s3 + $0x120] ss:$16 sps:$4 sm:$0xff]   ;;  %v12333_v8 = vld [vmem:[%s16948_s3 + $0x144] ss:$16 sps:$4 sm:$0xff]   ;;  %v12346_v31 = vld [vmem:[%s16948_s3 + $0x188] ss:$16 sps:$4 sm:$0xff]  }
  0x80   : > { %1753 = vmatpush1.bf16.msra.mxu1 %v10870_v39  ;;  %v12276_v39 = vld [vmem:[%s16948_s3 + $0xc] ss:$16 sps:$4 sm:$0xff]  }
  0x81   : > { %1754 = vmatprep.subr.bf16.mxu1 %v10879_v43  ;;  %v12291_v43 = vld [vmem:[%s16948_s3 + $0x64] ss:$16 sps:$4 sm:$0xff]  }
  0x82   : > { %1673 = vmatpush1.bf16.msra.mxu0 %v10876_v25  ;;  %v10919_v25 = vcombine.high %v642_v12, %v646_v13 }
  0x83   : > { %1674 = vmatprep.subr.bf16.mxu0 %v10885_v30  ;;  %v10918_v30 = vcombine.low %v642_v12, %v646_v13  ;;  %v12331_v12 = vld [vmem:[%s16948_s3 + $0x140] ss:$16 sps:$4 sm:$0xff]   ;;  %v12339_v13 = vld [vmem:[%s16948_s3 + $0x164] ss:$16 sps:$4 sm:$0xff]  }
  0x84   : > { %1755 = vmatpush1.bf16.msra.mxu1 %v10878_v33  ;;  %v12288_v33 = vld [vmem:[%s16948_s3 + $0x4c] ss:$16 sps:$4 sm:$0xff]  }
  0x85   : > { %1756 = vmatprep.subr.bf16.mxu1 %v10887_v51  ;;  %v12294_v51 = vld [vmem:[%s16948_s3 + $0x6c] ss:$16 sps:$4 sm:$0xff]  }
  0x86   : > { %1675 = vmatpush1.bf16.msra.mxu0 %v10884_v35  ;;  %v10926_v35 = vcombine.low %v650_v23, %v654_v24  ;;  %v12351_v23 = vld [vmem:[%s16948_s3 + $0x1a4] ss:$16 sps:$4 sm:$0xff]   ;;  %v12342_v24 = vld [vmem:[%s16948_s3 + $0x16c] ss:$16 sps:$4 sm:$0xff]  }
  0x87   : > { %1676 = vmatprep.subr.bf16.mxu0 %v10893_v38  ;;  %v12277_v38 = vld [vmem:[%s16948_s3 + $0x20] ss:$16 sps:$4 sm:$0xff]  }
  0x88   : > { %1757 = vmatpush1.bf16.msra.mxu1 %v10886_v56  ;;  %v12298_v56 = vld [vmem:[%s16948_s3 + $0x88] ss:$16 sps:$4 sm:$0xff]  }
  0x89   : > { %1758 = vmatprep.subr.bf16.mxu1 %v10895_v59  ;;  %v12306_v59 = vld [vmem:[%s16948_s3 + $0xac] ss:$16 sps:$4 sm:$0xff]  }
  0x8a   : > { %1677 = vmatpush1.bf16.msra.mxu0 %v10892_v44  ;;  %v12282_v44 = vld [vmem:[%s16948_s3 + $0x2c] ss:$16 sps:$4 sm:$0xff]  }
  0x8b   : > { %1678 = vmatprep.subr.bf16.mxu0 %v10901_v47  ;;  %v12297_v47 = vld [vmem:[%s16948_s3 + $0x84] ss:$16 sps:$4 sm:$0xff]  }
  0x8c   : > { %1759 = vmatpush1.bf16.msra.mxu1 %v10894_v1  ;;  %v12310_v1 = vld [vmem:[%s16948_s3 + $0xc8] ss:$16 sps:$4 sm:$0xff]  }
  0x8d   : > { %1760 = vmatprep.subr.bf16.mxu1 %v10903_v4  ;;  %v12318_v4 = vld [vmem:[%s16948_s3 + $0xec] ss:$16 sps:$4 sm:$0xff]  }
  0x8e   : > { %1679 = vmatpush1.bf16.msra.mxu0 %v10900_v52  ;;  %v12292_v52 = vld [vmem:[%s16948_s3 + $0x68] ss:$16 sps:$4 sm:$0xff]  }
  0x8f   : > { %1680 = vmatprep.subr.bf16.mxu0 %v10909_v55  ;;  %v12300_v55 = vld [vmem:[%s16948_s3 + $0x8c] ss:$16 sps:$4 sm:$0xff]  }
  0x90   : > { %1761 = vmatpush1.bf16.msra.mxu1 %v10902_v11  ;;  %v12322_v11 = vld [vmem:[%s16948_s3 + $0x108] ss:$16 sps:$4 sm:$0xff]  }
  0x91   : > { %1762 = vmatprep.subr.bf16.mxu1 %v10911_v14  ;;  %v12330_v14 = vld [vmem:[%s16948_s3 + $0x12c] ss:$16 sps:$4 sm:$0xff]  }
  0x92   : > { %1681 = vmatpush1.bf16.msra.mxu0 %v10908_v60  ;;  %v12304_v60 = vld [vmem:[%s16948_s3 + $0xa8] ss:$16 sps:$4 sm:$0xff]  }
  0x93   : > { %1691 = vmatprep.subr.bf16.mxu0 %v10917_v0  ;;  %v12312_v0 = vld [vmem:[%s16948_s3 + $0xcc] ss:$16 sps:$4 sm:$0xff]  }
  0x94   : > { %1763 = vmatpush1.bf16.msra.mxu1 %v10910_v22  ;;  %v12343_v22 = vld [vmem:[%s16948_s3 + $0x180] ss:$16 sps:$4 sm:$0xff]  }
  0x95   : > { %1683 = vmatmul.mubr.bf16.vlgmr.msra.gmra.mrb[4].mxu0 %v13040_v19  ;;  %1773 = vmatprep.subr.bf16.mxu1 %v10919_v25  ;;  %v12340_v25 = vld [vmem:[%s16948_s3 + $0x168] ss:$16 sps:$4 sm:$0xff]  }
  0x96   : > { %1692 = vmatpush1.bf16.msra.mxu0 %v10916_v5  ;;  %1723 = vmatprep.mubr.bf16.mxu0 %v12721_v6  ;;  %v12316_v5 = vld [vmem:[%s16948_s3 + $0xe8] ss:$16 sps:$4 sm:$0xff]  }
  0x97   : > { %1693 = vmatprep.subr.bf16.mxu0 %v10925_v9  ;;  %1765 = vmatmul.mubr.bf16.vlgmr.msra.gmra.mrb[4].mxu1 %v13040_v19  ;;  %v12285_v19 = vld [vmem:[%s16948_s3 + $0x44] ss:$16 sps:$4 sm:$0xff]   ;;  %v12324_v9 = vld [vmem:[%s16948_s3 + $0x10c] ss:$16 sps:$4 sm:$0xff]  }
  0x98   : > { %1774 = vmatpush1.bf16.msra.mxu1 %v10918_v30  ;;  %1805 = vmatprep.mubr.bf16.mxu1 %v12721_v6  ;;  %v12348_v30 = vld [vmem:[%s16948_s3 + $0x18c] ss:$16 sps:$4 sm:$0xff]  }
  0x99   : > { %1775 = vmatprep.subr.bf16.mxu1 %v10927_v32  ;;  %v12355_v32 = vld [vmem:[%s16948_s3 + $0x1c0] ss:$16 sps:$4 sm:$0xff]  }
  0x9a   : > { %1694 = vmatpush1.bf16.msra.mxu0 %v10924_v16  ;;  %v12328_v16 = vld [vmem:[%s16948_s3 + $0x128] ss:$16 sps:$4 sm:$0xff]  }
  0x9b   : > { %10940 = vmatprep.subr.msk.bf16.mxu0 %vm1461_vm0, %v10933_v20  ;;  %v12336_v20 = vld [vmem:[%s16948_s3 + $0x14c] ss:$16 sps:$4 sm:$0xff]  }
  0x9c   : > { %1776 = vmatpush1.bf16.msra.mxu1 %v10926_v35  ;;  %v12352_v35 = vld [vmem:[%s16948_s3 + $0x1a8] ss:$16 sps:$4 sm:$0xff]  }
  0x9d   : > { %10942 = vmatprep.subr.msk.bf16.mxu1 %vm1461_vm0, %v10935_v37  ;;  %v12369_v37 = vld [vmem:[%s16948_s3 + $0x204] ss:$16 sps:$4 sm:$0xff]  }
  0x9e   : > { %1696 = vmatpush1.bf16.msra.mxu0 %v1475_v28  ;;  %v12357_v28 = vld [vmem:[%s16948_s3 + $0x1c4] ss:$16 sps:$4 sm:$0xff]  }
  0x9f   : > { %3361 = vmatprep.subr.bf16.mxu0 %v12273_v27  ;;  %v12349_v27 = vld [vmem:[%s16948_s3 + $0x1a0] ss:$16 sps:$4 sm:$0xff]  }
  0xa0   : > { %1778 = vmatpush1.bf16.msra.mxu1 %v1481_v36  ;;  %v12361_v36 = vld [vmem:[%s16948_s3 + $0x1e0] ss:$16 sps:$4 sm:$0xff]  }
  0xa1   : > { %10941 = vmatmul.mubr.msk.bf16.vlgmr.msra.gmra.mrb[4].mxu0 %vm1457_vm1, %v13087_v49  ;;  %3525 = vmatprep.subr.bf16.mxu1 %v12276_v39  ;;  %v12366_v39 = vld [vmem:[%s16948_s3 + $0x1ec] ss:$16 sps:$4 sm:$0xff]  }
  0xa2   : > { %3362 = vmatpush1.bf16.msra.mxu0 %v12271_v41  ;;  %v12363_v41 = vld [vmem:[%s16948_s3 + $0x1e4] ss:$16 sps:$4 sm:$0xff]  }
  0xa3   : > { %3363 = vmatprep.subr.bf16.mxu0 %v12279_v34  ;;  %10943 = vmatmul.mubr.msk.bf16.vlgmr.msra.gmra.mrb[4].mxu1 %vm1457_vm1, %v13087_v49  ;;  %v12303_v49 = vld [vmem:[%s16948_s3 + $0xa4] ss:$16 sps:$4 sm:$0xff]   ;;  %v12354_v34 = vld [vmem:[%s16948_s3 + $0x1ac] ss:$16 sps:$4 sm:$0xff]  }
  0xa4   : > { %3526 = vmatpush1.bf16.msra.mxu1 %v12274_v42  ;;  %v12372_v42 = vld [vmem:[%s16948_s3 + $0x20c] ss:$16 sps:$4 sm:$0xff]  }
  0xa5   : > { %3527 = vmatprep.subr.bf16.mxu1 %v12282_v44 }
  0xa6   : > { %3364 = vmatpush1.bf16.msra.mxu0 %v12277_v38  ;;  %v12360_v38 = vld [vmem:[%s16948_s3 + $0x1cc] ss:$16 sps:$4 sm:$0xff]  }
  0xa7   : > { %3365 = vmatprep.subr.bf16.mxu0 %v12285_v19  ;;  %v12358_v19 = vld [vmem:[%s16948_s3 + $0x1c8] ss:$16 sps:$4 sm:$0xff]  }
  0xa8   : > { %3528 = vmatpush1.bf16.msra.mxu1 %v12280_v45 }
  0xa9   : > { %3529 = vmatprep.subr.bf16.mxu1 %v12288_v33 }
  0xaa   : > { %3366 = vmatpush1.bf16.msra.mxu0 %v12283_v40  ;;  %v12364_v40 = vld [vmem:[%s16948_s3 + $0x1e8] ss:$16 sps:$4 sm:$0xff]  }
  0xab   : > { %3367 = vmatprep.subr.bf16.mxu0 %v12291_v43  ;;  %v13531_v43 = vld [vmem:[%s16947_s2] sm:$0xff] }
  0xac   : > { %3530 = vmatpush1.bf16.msra.mxu1 %v12286_v48  ;;  %v1420_v44 = vrot.slane %v13531_v43, %v13012_v62  ;;  %v1424_v45 = vrot.slane %v13531_v43, %v12866_v26 }
  0xad   : > { %3531 = vmatprep.subr.bf16.mxu1 %v12294_v51  ;;  %v13538_v51 = vsub.s32 3, %v12842_v15 }
  0xae   : > { %3368 = vmatpush1.bf16.msra.mxu0 %v12289_v46 }
  0xaf   : > { %3369 = vmatprep.subr.bf16.mxu0 %v12297_v47 }
  0xb0   : > { %3532 = vmatpush1.bf16.msra.mxu1 %v12292_v52 }
  0xb1   : > { %3533 = vmatprep.subr.bf16.mxu1 %v12300_v55 }
  0xb2   : > { %3370 = vmatpush1.bf16.msra.mxu0 %v12295_v50 }
  0xb3   : > { %3371 = vmatprep.subr.bf16.mxu0 %v12303_v49 }
  0xb4   : > { %3534 = vmatpush1.bf16.msra.mxu1 %v12298_v56  ;;  %v12375_v56 = vld [vmem:[%s16948_s3 + $0x224] ss:$16 sps:$4 sm:$0xff]  }
  0xb5   : > { %3535 = vmatprep.subr.bf16.mxu1 %v12306_v59  ;;  %v12373_v59 = vld [vmem:[%s16948_s3 + $0x220] ss:$16 sps:$4 sm:$0xff]  }
  0xb6   : > { %3372 = vmatpush1.bf16.msra.mxu0 %v12301_v53  ;;  %v12367_v53 = vld [vmem:[%s16948_s3 + $0x200] ss:$16 sps:$4 sm:$0xff]  }
  0xb7   : > { %3373 = vmatprep.subr.bf16.mxu0 %v12309_v54  ;;  %v12370_v54 = vld [vmem:[%s16948_s3 + $0x208] ss:$16 sps:$4 sm:$0xff]  }
  0xb8   : > { %3536 = vmatpush1.bf16.msra.mxu1 %v12304_v60  ;;  %v12376_v60 = vld [vmem:[%s16948_s3 + $0x228] ss:$16 sps:$4 sm:$0xff]  }
  0xb9   : > { %3537 = vmatprep.subr.bf16.mxu1 %v12312_v0 }
  0xba   : > { %3374 = vmatpush1.bf16.msra.mxu0 %v12307_v57  ;;  %v12378_v57 = vld [vmem:[%s16948_s3 + $0x22c] ss:$16 sps:$4 sm:$0xff]  }
  0xbb   : > { %3375 = vmatprep.subr.bf16.mxu0 %v12315_v58  ;;  %v1432_v58 = vrot.slane %v13531_v43, %v13538_v51 }
  0xbc   : > { %3538 = vmatpush1.bf16.msra.mxu1 %v12310_v1 }
  0xbd   : > { %3539 = vmatprep.subr.bf16.mxu1 %v12318_v4  ;;  %v12379_v4 = vld [vmem:[%s16948_s3 + $0x240] ss:$16 sps:$4 sm:$0xff]  }
  0xbe   : > { %3376 = vmatpush1.bf16.msra.mxu0 %v12313_v61  ;;  %v12381_v61 = vld [vmem:[%s16948_s3 + $0x244] ss:$16 sps:$4 sm:$0xff]  }
  0xbf   : > { %3377 = vmatprep.subr.bf16.mxu0 %v12321_v63  ;;  %v12384_v63 = vld [vmem:[%s16948_s3 + $0x24c] ss:$16 sps:$4 sm:$0xff]  }
  0xc0   : > { %3540 = vmatpush1.bf16.msra.mxu1 %v12316_v5  ;;  %v12382_v5 = vld [vmem:[%s16948_s3 + $0x248] ss:$16 sps:$4 sm:$0xff]  }
  0xc1   : > { %3541 = vmatprep.subr.bf16.mxu1 %v12324_v9  ;;  %v12390_v9 = vld [vmem:[%s16948_s3 + $0x26c] ss:$16 sps:$4 sm:$0xff]  }
  0xc2   : > { %3378 = vmatpush1.bf16.msra.mxu0 %v12319_v2 }
  0xc3   : > { %3379 = vmatprep.subr.bf16.mxu0 %v12327_v3 }
  0xc4   : > { %3542 = vmatpush1.bf16.msra.mxu1 %v12322_v11 }
  0xc5   : > { %3543 = vmatprep.subr.bf16.mxu1 %v12330_v14  ;;  %v12393_v14 = vld [vmem:[%s16948_s3 + $0x284] ss:$16 sps:$4 sm:$0xff]  }
  0xc6   : > { %3380 = vmatpush1.bf16.msra.mxu0 %v12325_v7 }
  0xc7   : > { %3381 = vmatprep.subr.bf16.mxu0 %v12333_v8  ;;  %v12387_v8 = vld [vmem:[%s16948_s3 + $0x264] ss:$16 sps:$4 sm:$0xff]  }
  0xc8   : > { %3544 = vmatpush1.bf16.msra.mxu1 %v12328_v16  ;;  %v12396_v16 = vld [vmem:[%s16948_s3 + $0x28c] ss:$16 sps:$4 sm:$0xff]  }
  0xc9   : > { %3545 = vmatprep.subr.bf16.mxu1 %v12336_v20  ;;  %v12399_v20 = vld [vmem:[%s16948_s3 + $0x2a4] ss:$16 sps:$4 sm:$0xff]  }
  0xca   : > { %3382 = vmatpush1.bf16.msra.mxu0 %v12331_v12  ;;  %v12385_v12 = vld [vmem:[%s16948_s3 + $0x260] ss:$16 sps:$4 sm:$0xff]  }
  0xcb   : > { %3383 = vmatprep.subr.bf16.mxu0 %v12339_v13  ;;  %v12388_v13 = vld [vmem:[%s16948_s3 + $0x268] ss:$16 sps:$4 sm:$0xff]  }
  0xcc   : > { %3546 = vmatpush1.bf16.msra.mxu1 %v12334_v21  ;;  %v12402_v21 = vld [vmem:[%s16948_s3 + $0x2ac] ss:$16 sps:$4 sm:$0xff]  }
  0xcd   : > { %3547 = vmatprep.subr.bf16.mxu1 %v12342_v24  ;;  %v12405_v24 = vld [vmem:[%s16948_s3 + $0x2c4] ss:$16 sps:$4 sm:$0xff]  }
  0xce   : > { %3384 = vmatpush1.bf16.msra.mxu0 %v12337_v17  ;;  %v12391_v17 = vld [vmem:[%s16948_s3 + $0x280] ss:$16 sps:$4 sm:$0xff]  }
  0xcf   : > { %3385 = vmatprep.subr.bf16.mxu0 %v12345_v18  ;;  %v12394_v18 = vld [vmem:[%s16948_s3 + $0x288] ss:$16 sps:$4 sm:$0xff]  }
  0xd0   : > { %3548 = vmatpush1.bf16.msra.mxu1 %v12340_v25  ;;  %v12408_v25 = vld [vmem:[%s16948_s3 + $0x2cc] ss:$16 sps:$4 sm:$0xff]  }
  0xd1   : > { %3549 = vmatprep.subr.bf16.mxu1 %v12348_v30  ;;  %v12411_v30 = vld [vmem:[%s16948_s3 + $0x2e4] ss:$16 sps:$4 sm:$0xff]  }
  0xd2   : > { %3386 = vmatpush1.bf16.msra.mxu0 %v12343_v22  ;;  %v12397_v22 = vld [vmem:[%s16948_s3 + $0x2a0] ss:$16 sps:$4 sm:$0xff]  }
  0xd3   : > { %3387 = vmatprep.subr.bf16.mxu0 %v12351_v23  ;;  %v12400_v23 = vld [vmem:[%s16948_s3 + $0x2a8] ss:$16 sps:$4 sm:$0xff]  }
  0xd4   : > { %3550 = vmatpush1.bf16.msra.mxu1 %v12346_v31  ;;  %v12414_v31 = vld [vmem:[%s16948_s3 + $0x2ec] ss:$16 sps:$4 sm:$0xff]  }
  0xd5   : > { %3551 = vmatprep.subr.bf16.mxu1 %v12354_v34  ;;  %v12417_v34 = vld [vmem:[%s16948_s3 + $0x304] ss:$16 sps:$4 sm:$0xff]  }
  0xd6   : > { %3388 = vmatpush1.bf16.msra.mxu0 %v12349_v27  ;;  %v12403_v27 = vld [vmem:[%s16948_s3 + $0x2c0] ss:$16 sps:$4 sm:$0xff]  }
  0xd7   : > { %3389 = vmatprep.subr.bf16.mxu0 %v12357_v28  ;;  %v12406_v28 = vld [vmem:[%s16948_s3 + $0x2c8] ss:$16 sps:$4 sm:$0xff]  }
  0xd8   : > { %3552 = vmatpush1.bf16.msra.mxu1 %v12352_v35  ;;  %v12420_v35 = vld [vmem:[%s16948_s3 + $0x30c] ss:$16 sps:$4 sm:$0xff]  }
  0xd9   : > { %3553 = vmatprep.subr.bf16.mxu1 %v12360_v38  ;;  %v12423_v38 = vld [vmem:[%s16948_s3 + $0x324] ss:$16 sps:$4 sm:$0xff]  }
  0xda   : > { %3390 = vmatpush1.bf16.msra.mxu0 %v12355_v32  ;;  %v12409_v32 = vld [vmem:[%s16948_s3 + $0x2e0] ss:$16 sps:$4 sm:$0xff]  }
  0xdb   : > { %3391 = vmatprep.subr.bf16.mxu0 %v12363_v41  ;;  %v12412_v41 = vld [vmem:[%s16948_s3 + $0x2e8] ss:$16 sps:$4 sm:$0xff]  }
  0xdc   : > { %3554 = vmatpush1.bf16.msra.mxu1 %v12358_v19  ;;  %v12426_v19 = vld [vmem:[%s16948_s3 + $0x32c] ss:$16 sps:$4 sm:$0xff]  }
  0xdd   : > { %3555 = vmatprep.subr.bf16.mxu1 %v12366_v39  ;;  %v12421_v39 = vld [vmem:[%s16948_s3 + $0x320] ss:$16 sps:$4 sm:$0xff]  }
  0xde   : > { %3392 = vmatpush1.bf16.msra.mxu0 %v12361_v36  ;;  %v12415_v36 = vld [vmem:[%s16948_s3 + $0x300] ss:$16 sps:$4 sm:$0xff]  }
  0xdf   : > { %3402 = vmatprep.subr.bf16.mxu0 %v12369_v37  ;;  %v12418_v37 = vld [vmem:[%s16948_s3 + $0x308] ss:$16 sps:$4 sm:$0xff]  }
  0xe0   : > { %3556 = vmatpush1.bf16.msra.mxu1 %v12364_v40  ;;  %v12424_v40 = vld [vmem:[%s16948_s3 + $0x328] ss:$16 sps:$4 sm:$0xff]  }
  0xe1   : > { %3566 = vmatprep.subr.bf16.mxu1 %v12372_v42  ;;  %v12429_v42 = vld [vmem:[%s16948_s3 + $0x344] ss:$16 sps:$4 sm:$0xff]  }
 0x128   : > { %v1561_v46 = vpop.f32.mrb[0].mxu0 }
 0x129   : > { %v12141_v47 = vadd.f32 %v1561_v46, %v1420_v44  ;;  %v1563_v33 = vpop.f32.mrb[1].mxu0  ;;  %v12432_v44 = vld [vmem:[%s16948_s3 + $0x34c] ss:$16 sps:$4 sm:$0xff]   ;;  %v12430_v46 = vld [vmem:[%s16948_s3 + $0x348] ss:$16 sps:$4 sm:$0xff]  }
 0x12a   : > { %v12142_v48 = vadd.f32 %v1563_v33, %v1424_v45  ;;  %v1565_v50 = vpop.f32.mrb[2].mxu0  ;;  %v13566_v0 = vpop.f32.mrb[0].mxu1  ;;  %v12427_v45 = vld [vmem:[%s16948_s3 + $0x340] ss:$16 sps:$4 sm:$0xff]   ;;  %v12438_v33 = vld [vmem:[%s16948_s3 + $0x36c] ss:$16 sps:$4 sm:$0xff]  }
 0x12b   : > { %v1566_v49 = vpop.f32.mrb[3].mxu0  ;;  %v1814_v55 = vpack.c.bf16 %v12141_v47, %v12141_v47  ;;  %v1645_v1 = vpop.f32.mrb[1].mxu1  ;;  %v12435_v47 = vld [vmem:[%s16948_s3 + $0x364] ss:$16 sps:$4 sm:$0xff]   ;;  %v12436_v50 = vld [vmem:[%s16948_s3 + $0x368] ss:$16 sps:$4 sm:$0xff]  }
 0x12c   : > { %v1815_v52 = vpack.c.bf16 %v12142_v48, %v12142_v48  ;;  %v12144_v2 = vadd.f32 %v1645_v1, %v1432_v58  ;;  %v1647_v3 = vpop.f32.mrb[2].mxu1  ;;  %v12433_v48 = vld [vmem:[%s16948_s3 + $0x360] ss:$16 sps:$4 sm:$0xff]   ;;  %v12441_v49 = vld [vmem:[%s16948_s3 + $0x384] ss:$16 sps:$4 sm:$0xff]   ;;  %v1428_v1 = vrot.slane %v13531_v43, %v13056_v29 }
 0x12d   : > { %v1648_v7 = vpop.f32.mrb[3].mxu1  ;;  %v12448_v58 = vld [vmem:[%s16948_s3 + $0x3a8] ss:$16 sps:$4 sm:$0xff]   ;;  %v12462_v3 = vld [vmem:[%s16948_s3 + $0x3ec] ss:$16 sps:$4 sm:$0xff]  }
 0x12e   : > { %3393 = vmatprep.mubr.bf16.mxu0 %v1815_v52  ;;  %3557 = vmatprep.mubr.bf16.mxu1 %v1815_v52  ;;  %v1817_v11 = vpack.c.bf16 %v12144_v2, %v12144_v2  ;;  %v12444_v52 = vld [vmem:[%s16948_s3 + $0x38c] ss:$16 sps:$4 sm:$0xff]   ;;  %v12459_v2 = vld [vmem:[%s16948_s3 + $0x3e4] ss:$16 sps:$4 sm:$0xff]   ;;  %v12143_v7 = vadd.f32 %v13566_v0, %v1428_v1  ;;  %v12466_v0 = vld [vmem:[%s16948_s3 + $0x408] ss:$16 sps:$4 sm:$0xff]  }
 0x12f   : > { %3394 = vmatmul.mubr.bf16.vlgmr.msra.gmra.mrb[8].mxu0 %v1814_v55  ;;  %3558 = vmatmul.mubr.bf16.vlgmr.msra.gmra.mrb[8].mxu1 %v1814_v55  ;;  %v12447_v55 = vld [vmem:[%s16948_s3 + $0x3a4] ss:$16 sps:$4 sm:$0xff]   ;;  %v12522_v1 = vld [vmem:[%s16948_s3 + $0x52c] ss:$16 sps:$4 sm:$0xff]  }
 0x130   : > { %3403 = vmatpush1.bf16.msra.mxu0 %v12367_v53  ;;  %3567 = vmatpush1.bf16.msra.mxu1 %v12370_v54  ;;  %v12439_v53 = vld [vmem:[%s16948_s3 + $0x380] ss:$16 sps:$4 sm:$0xff]   ;;  %v12442_v54 = vld [vmem:[%s16948_s3 + $0x388] ss:$16 sps:$4 sm:$0xff]  }
 0x131   : > { %3404 = vmatprep.subr.bf16.mxu0 %v12375_v56  ;;  %3568 = vmatprep.subr.bf16.mxu1 %v12378_v57  ;;  %v12450_v56 = vld [vmem:[%s16948_s3 + $0x3ac] ss:$16 sps:$4 sm:$0xff]   ;;  %v12445_v57 = vld [vmem:[%s16948_s3 + $0x3a0] ss:$16 sps:$4 sm:$0xff]  }
 0x132   : > { %3434 = vmatprep.mubr.bf16.mxu0 %v1817_v11  ;;  %3598 = vmatprep.mubr.bf16.mxu1 %v1817_v11  ;;  %v12463_v11 = vld [vmem:[%s16948_s3 + $0x400] ss:$16 sps:$4 sm:$0xff]  }
 0x134   : > { %3405 = vmatpush1.bf16.msra.mxu0 %v12373_v59  ;;  %3569 = vmatpush1.bf16.msra.mxu1 %v12376_v60  ;;  %v12453_v59 = vld [vmem:[%s16948_s3 + $0x3c4] ss:$16 sps:$4 sm:$0xff]   ;;  %v12456_v60 = vld [vmem:[%s16948_s3 + $0x3cc] ss:$16 sps:$4 sm:$0xff]  }
 0x135   : > { %3406 = vmatprep.subr.bf16.mxu0 %v12381_v61  ;;  %3570 = vmatprep.subr.bf16.mxu1 %v12384_v63  ;;  %v12451_v61 = vld [vmem:[%s16948_s3 + $0x3c0] ss:$16 sps:$4 sm:$0xff]   ;;  %v12454_v63 = vld [vmem:[%s16948_s3 + $0x3c8] ss:$16 sps:$4 sm:$0xff]  }
 0x138   : > { %3407 = vmatpush1.bf16.msra.mxu0 %v12379_v4  ;;  %3571 = vmatpush1.bf16.msra.mxu1 %v12382_v5  ;;  %v12457_v4 = vld [vmem:[%s16948_s3 + $0x3e0] ss:$16 sps:$4 sm:$0xff]   ;;  %v12460_v5 = vld [vmem:[%s16948_s3 + $0x3e8] ss:$16 sps:$4 sm:$0xff]  }
 0x139   : > { %3408 = vmatprep.subr.bf16.mxu0 %v12387_v8  ;;  %3572 = vmatprep.subr.bf16.mxu1 %v12390_v9  ;;  %v12465_v8 = vld [vmem:[%s16948_s3 + $0x404] ss:$16 sps:$4 sm:$0xff]   ;;  %v12468_v9 = vld [vmem:[%s16948_s3 + $0x40c] ss:$16 sps:$4 sm:$0xff]  }
 0x13c   : > { %3409 = vmatpush1.bf16.msra.mxu0 %v12385_v12  ;;  %3573 = vmatpush1.bf16.msra.mxu1 %v12388_v13  ;;  %v1816_v12 = vpack.c.bf16 %v12143_v7, %v12143_v7  ;;  %v12471_v13 = vld [vmem:[%s16948_s3 + $0x424] ss:$16 sps:$4 sm:$0xff]   ;;  %v12523_v7 = vld [vmem:[%s16948_s3 + $0x540] ss:$16 sps:$4 sm:$0xff]  }
 0x13d   : > { %3410 = vmatprep.subr.bf16.mxu0 %v12393_v14  ;;  %3574 = vmatprep.subr.bf16.mxu1 %v12396_v16  ;;  %v12474_v14 = vld [vmem:[%s16948_s3 + $0x42c] ss:$16 sps:$4 sm:$0xff]   ;;  %v13752_v16 = vsub.s32 5, %v12842_v15 }
 0x140   : > { %3411 = vmatpush1.bf16.msra.mxu0 %v12391_v17  ;;  %3575 = vmatpush1.bf16.msra.mxu1 %v12394_v18  ;;  %v12469_v17 = vld [vmem:[%s16948_s3 + $0x420] ss:$16 sps:$4 sm:$0xff]   ;;  %v12472_v18 = vld [vmem:[%s16948_s3 + $0x428] ss:$16 sps:$4 sm:$0xff]  }
 0x141   : > { %3412 = vmatprep.subr.bf16.mxu0 %v12399_v20  ;;  %3576 = vmatprep.subr.bf16.mxu1 %v12402_v21  ;;  %v12477_v20 = vld [vmem:[%s16948_s3 + $0x444] ss:$16 sps:$4 sm:$0xff]   ;;  %v12480_v21 = vld [vmem:[%s16948_s3 + $0x44c] ss:$16 sps:$4 sm:$0xff]  }
 0x144   : > { %3413 = vmatpush1.bf16.msra.mxu0 %v12397_v22  ;;  %3577 = vmatpush1.bf16.msra.mxu1 %v12400_v23  ;;  %v1440_v22 = vrot.slane %v13531_v43, %v13752_v16  ;;  %v12475_v23 = vld [vmem:[%s16948_s3 + $0x440] ss:$16 sps:$4 sm:$0xff]  }
 0x145   : > { %3414 = vmatprep.subr.bf16.mxu0 %v12405_v24  ;;  %3578 = vmatprep.subr.bf16.mxu1 %v12408_v25  ;;  %v12478_v24 = vld [vmem:[%s16948_s3 + $0x448] ss:$16 sps:$4 sm:$0xff]  }
 0x148   : > { %3415 = vmatpush1.bf16.msra.mxu0 %v12403_v27  ;;  %3579 = vmatpush1.bf16.msra.mxu1 %v12406_v28  ;;  %v12483_v27 = vld [vmem:[%s16948_s3 + $0x464] ss:$16 sps:$4 sm:$0xff]   ;;  %v12486_v28 = vld [vmem:[%s16948_s3 + $0x46c] ss:$16 sps:$4 sm:$0xff]  }
 0x149   : > { %3416 = vmatprep.subr.bf16.mxu0 %v12411_v30  ;;  %3580 = vmatprep.subr.bf16.mxu1 %v12414_v31 }
 0x14c   : > { %3417 = vmatpush1.bf16.msra.mxu0 %v12409_v32  ;;  %3581 = vmatpush1.bf16.msra.mxu1 %v12412_v41 }
 0x14d   : > { %3418 = vmatprep.subr.bf16.mxu0 %v12417_v34  ;;  %3582 = vmatprep.subr.bf16.mxu1 %v12420_v35  ;;  %v12481_v34 = vld [vmem:[%s16948_s3 + $0x460] ss:$16 sps:$4 sm:$0xff]   ;;  %v12484_v35 = vld [vmem:[%s16948_s3 + $0x468] ss:$16 sps:$4 sm:$0xff]  }
 0x150   : > { %3419 = vmatpush1.bf16.msra.mxu0 %v12415_v36  ;;  %3583 = vmatpush1.bf16.msra.mxu1 %v12418_v37  ;;  %v12489_v37 = vld [vmem:[%s16948_s3 + $0x484] ss:$16 sps:$4 sm:$0xff]  }
 0x151   : > { %3420 = vmatprep.subr.bf16.mxu0 %v12423_v38  ;;  %3584 = vmatprep.subr.bf16.mxu1 %v12426_v19  ;;  %v12492_v38 = vld [vmem:[%s16948_s3 + $0x48c] ss:$16 sps:$4 sm:$0xff]   ;;  %v12487_v19 = vld [vmem:[%s16948_s3 + $0x480] ss:$16 sps:$4 sm:$0xff]  }
 0x154   : > { %3421 = vmatpush1.bf16.msra.mxu0 %v12421_v39  ;;  %3585 = vmatpush1.bf16.msra.mxu1 %v12424_v40  ;;  %v12490_v39 = vld [vmem:[%s16948_s3 + $0x488] ss:$16 sps:$4 sm:$0xff]   ;;  %v12495_v40 = vld [vmem:[%s16948_s3 + $0x4a4] ss:$16 sps:$4 sm:$0xff]  }
 0x155   : > { %3422 = vmatprep.subr.bf16.mxu0 %v12429_v42  ;;  %3586 = vmatprep.subr.bf16.mxu1 %v12432_v44  ;;  %v12498_v42 = vld [vmem:[%s16948_s3 + $0x4ac] ss:$16 sps:$4 sm:$0xff]  }
 0x158   : > { %3423 = vmatpush1.bf16.msra.mxu0 %v12427_v45  ;;  %3587 = vmatpush1.bf16.msra.mxu1 %v12430_v46 }
 0x159   : > { %3424 = vmatprep.subr.bf16.mxu0 %v12435_v47  ;;  %3588 = vmatprep.subr.bf16.mxu1 %v12438_v33  ;;  %v12493_v47 = vld [vmem:[%s16948_s3 + $0x4a0] ss:$16 sps:$4 sm:$0xff]   ;;  %v12496_v33 = vld [vmem:[%s16948_s3 + $0x4a8] ss:$16 sps:$4 sm:$0xff]  }
 0x15c   : > { %3425 = vmatpush1.bf16.msra.mxu0 %v12433_v48  ;;  %3589 = vmatpush1.bf16.msra.mxu1 %v12436_v50  ;;  %v12501_v50 = vld [vmem:[%s16948_s3 + $0x4c4] ss:$16 sps:$4 sm:$0xff]  }
 0x15d   : > { %3426 = vmatprep.subr.bf16.mxu0 %v12441_v49  ;;  %3590 = vmatprep.subr.bf16.mxu1 %v12444_v52  ;;  %v12504_v49 = vld [vmem:[%s16948_s3 + $0x4cc] ss:$16 sps:$4 sm:$0xff]   ;;  %v12499_v52 = vld [vmem:[%s16948_s3 + $0x4c0] ss:$16 sps:$4 sm:$0xff]  }
 0x160   : > { %3427 = vmatpush1.bf16.msra.mxu0 %v12439_v53  ;;  %3591 = vmatpush1.bf16.msra.mxu1 %v12442_v54  ;;  %v12502_v53 = vld [vmem:[%s16948_s3 + $0x4c8] ss:$16 sps:$4 sm:$0xff]   ;;  %v12507_v54 = vld [vmem:[%s16948_s3 + $0x4e4] ss:$16 sps:$4 sm:$0xff]  }
 0x161   : > { %3428 = vmatprep.subr.bf16.mxu0 %v12447_v55  ;;  %3592 = vmatprep.subr.bf16.mxu1 %v12450_v56  ;;  %v12510_v55 = vld [vmem:[%s16948_s3 + $0x4ec] ss:$16 sps:$4 sm:$0xff]   ;;  %v12505_v56 = vld [vmem:[%s16948_s3 + $0x4e0] ss:$16 sps:$4 sm:$0xff]  }
 0x164   : > { %3429 = vmatpush1.bf16.msra.mxu0 %v12445_v57  ;;  %3593 = vmatpush1.bf16.msra.mxu1 %v12448_v58  ;;  %v12508_v57 = vld [vmem:[%s16948_s3 + $0x4e8] ss:$16 sps:$4 sm:$0xff]   ;;  %v12513_v58 = vld [vmem:[%s16948_s3 + $0x504] ss:$16 sps:$4 sm:$0xff]  }
 0x165   : > { %3430 = vmatprep.subr.bf16.mxu0 %v12453_v59  ;;  %3594 = vmatprep.subr.bf16.mxu1 %v12456_v60  ;;  %v12516_v59 = vld [vmem:[%s16948_s3 + $0x50c] ss:$16 sps:$4 sm:$0xff]   ;;  %v12511_v60 = vld [vmem:[%s16948_s3 + $0x500] ss:$16 sps:$4 sm:$0xff]  }
 0x168   : > { %3431 = vmatpush1.bf16.msra.mxu0 %v12451_v61  ;;  %3595 = vmatpush1.bf16.msra.mxu1 %v12454_v63  ;;  %v12514_v61 = vld [vmem:[%s16948_s3 + $0x508] ss:$16 sps:$4 sm:$0xff]   ;;  %v12519_v63 = vld [vmem:[%s16948_s3 + $0x524] ss:$16 sps:$4 sm:$0xff]  }
 0x169   : > { %3432 = vmatprep.subr.bf16.mxu0 %v12459_v2  ;;  %3596 = vmatprep.subr.bf16.mxu1 %v12462_v3  ;;  %v12517_v2 = vld [vmem:[%s16948_s3 + $0x520] ss:$16 sps:$4 sm:$0xff]   ;;  %v12520_v3 = vld [vmem:[%s16948_s3 + $0x528] ss:$16 sps:$4 sm:$0xff]  }
 0x16c   : > { %3433 = vmatpush1.bf16.msra.mxu0 %v12457_v4  ;;  %3597 = vmatpush1.bf16.msra.mxu1 %v12460_v5  ;;  %v12525_v4 = vld [vmem:[%s16948_s3 + $0x544] ss:$16 sps:$4 sm:$0xff]   ;;  %v12528_v5 = vld [vmem:[%s16948_s3 + $0x54c] ss:$16 sps:$4 sm:$0xff]  }
 0x16d   : > { %3443 = vmatprep.subr.bf16.mxu0 %v12465_v8  ;;  %3607 = vmatprep.subr.bf16.mxu1 %v12468_v9  ;;  %v12526_v8 = vld [vmem:[%s16948_s3 + $0x548] ss:$16 sps:$4 sm:$0xff]   ;;  %v12531_v9 = vld [vmem:[%s16948_s3 + $0x564] ss:$16 sps:$4 sm:$0xff]  }
 0x16f   : > { %3435 = vmatmul.mubr.bf16.vlgmr.msra.gmra.mrb[8].mxu0 %v1816_v12  ;;  %3599 = vmatmul.mubr.bf16.vlgmr.msra.gmra.mrb[8].mxu1 %v1816_v12  ;;  %v12532_v12 = vld [vmem:[%s16948_s3 + $0x568] ss:$16 sps:$4 sm:$0xff]  }
 0x170   : > { %3444 = vmatpush1.bf16.msra.mxu0 %v12463_v11  ;;  %3608 = vmatpush1.bf16.msra.mxu1 %v12466_v0  ;;  %v12534_v11 = vld [vmem:[%s16948_s3 + $0x56c] ss:$16 sps:$4 sm:$0xff]   ;;  %v12529_v0 = vld [vmem:[%s16948_s3 + $0x560] ss:$16 sps:$4 sm:$0xff]  }
 0x171   : > { %3445 = vmatprep.subr.bf16.mxu0 %v12471_v13  ;;  %3609 = vmatprep.subr.bf16.mxu1 %v12474_v14  ;;  %v12537_v13 = vld [vmem:[%s16948_s3 + $0x584] ss:$16 sps:$4 sm:$0xff]   ;;  %v12540_v14 = vld [vmem:[%s16948_s3 + $0x58c] ss:$16 sps:$4 sm:$0xff]  }
 0x174   : > { %3446 = vmatpush1.bf16.msra.mxu0 %v12469_v17  ;;  %3610 = vmatpush1.bf16.msra.mxu1 %v12472_v18  ;;  %v13774_v25 = vpop.f32.mrb[4].mxu0  ;;  %v12535_v17 = vld [vmem:[%s16948_s3 + $0x580] ss:$16 sps:$4 sm:$0xff]   ;;  %v12538_v18 = vld [vmem:[%s16948_s3 + $0x588] ss:$16 sps:$4 sm:$0xff]  }
 0x175   : > { %3447 = vmatprep.subr.bf16.mxu0 %v12477_v20  ;;  %3611 = vmatprep.subr.bf16.mxu1 %v12480_v21  ;;  %v1727_v30 = vpop.f32.mrb[5].mxu0  ;;  %v12543_v20 = vld [vmem:[%s16948_s3 + $0x5a4] ss:$16 sps:$4 sm:$0xff]   ;;  %v12546_v21 = vld [vmem:[%s16948_s3 + $0x5ac] ss:$16 sps:$4 sm:$0xff]  }
 0x176   : > { %v12146_v31 = vadd.f32 %v1727_v30, %v1440_v22  ;;  %v1729_v32 = vpop.f32.mrb[6].mxu0  ;;  %v13806_v44 = vpop.f32.mrb[4].mxu1  ;;  %v12541_v22 = vld [vmem:[%s16948_s3 + $0x5a0] ss:$16 sps:$4 sm:$0xff]   ;;  %v13922_v30 = vsub.s32 7, %v12842_v15 }
 0x177   : > { %v1730_v41 = vpop.f32.mrb[7].mxu0  ;;  %v13808_v45 = vpop.f32.mrb[5].mxu1  ;;  %v12550_v32 = vld [vmem:[%s16948_s3 + $0x5c8] ss:$16 sps:$4 sm:$0xff]  }
 0x178   : > { %3448 = vmatpush1.bf16.msra.mxu0 %v12475_v23  ;;  %3612 = vmatpush1.bf16.msra.mxu1 %v12478_v24  ;;  %v1819_v36 = vpack.c.bf16 %v12146_v31, %v12146_v31  ;;  %v1811_v46 = vpop.f32.mrb[6].mxu1  ;;  %v12544_v23 = vld [vmem:[%s16948_s3 + $0x5a8] ss:$16 sps:$4 sm:$0xff]   ;;  %v13913_v24 = vsub.s32 4, %v12842_v15  ;;  %v12547_v31 = vld [vmem:[%s16948_s3 + $0x5c0] ss:$16 sps:$4 sm:$0xff]  }
 0x179   : > { %3449 = vmatprep.subr.bf16.mxu0 %v12483_v27  ;;  %3613 = vmatprep.subr.bf16.mxu1 %v12486_v28  ;;  %v1812_v48 = vpop.f32.mrb[7].mxu1  ;;  %v12549_v27 = vld [vmem:[%s16948_s3 + $0x5c4] ss:$16 sps:$4 sm:$0xff]   ;;  %v12552_v28 = vld [vmem:[%s16948_s3 + $0x5cc] ss:$16 sps:$4 sm:$0xff]  }
 0x17a   : > { %3475 = vmatprep.mubr.bf16.mxu0 %v1819_v36  ;;  %3639 = vmatprep.mubr.bf16.mxu1 %v1819_v36  ;;  %v1436_v41 = vrot.slane %v13531_v43, %v13913_v24  ;;  %v1448_v36 = vrot.slane %v13531_v43, %v13922_v30  ;;  %v12559_v46 = vld [vmem:[%s16948_s3 + $0x600] ss:$16 sps:$4 sm:$0xff]  }
 0x17c   : > { %3450 = vmatpush1.bf16.msra.mxu0 %v12481_v34  ;;  %3614 = vmatpush1.bf16.msra.mxu1 %v12484_v35  ;;  %v12555_v34 = vld [vmem:[%s16948_s3 + $0x5e4] ss:$16 sps:$4 sm:$0xff]   ;;  %v12558_v35 = vld [vmem:[%s16948_s3 + $0x5ec] ss:$16 sps:$4 sm:$0xff]  }
 0x17d   : > { %3451 = vmatprep.subr.bf16.mxu0 %v12489_v37  ;;  %3615 = vmatprep.subr.bf16.mxu1 %v12492_v38  ;;  %v12553_v37 = vld [vmem:[%s16948_s3 + $0x5e0] ss:$16 sps:$4 sm:$0xff]   ;;  %v12556_v38 = vld [vmem:[%s16948_s3 + $0x5e8] ss:$16 sps:$4 sm:$0xff]  }
 0x180   : > { %3452 = vmatpush1.bf16.msra.mxu0 %v12487_v19  ;;  %3616 = vmatpush1.bf16.msra.mxu1 %v12490_v39  ;;  %v12145_v19 = vadd.f32 %v13774_v25, %v1436_v41  ;;  %v12561_v39 = vld [vmem:[%s16948_s3 + $0x604] ss:$16 sps:$4 sm:$0xff]   ;;  %v12562_v25 = vld [vmem:[%s16948_s3 + $0x608] ss:$16 sps:$4 sm:$0xff]   ;;  %v12619_v41 = vld [vmem:[%s16948_s3 + $0x740] ss:$16 sps:$4 sm:$0xff]  }
 0x181   : > { %3453 = vmatprep.subr.bf16.mxu0 %v12495_v40  ;;  %3617 = vmatprep.subr.bf16.mxu1 %v12498_v42  ;;  %v12564_v40 = vld [vmem:[%s16948_s3 + $0x60c] ss:$16 sps:$4 sm:$0xff]   ;;  %v12148_v42 = vadd.f32 %v13808_v45, %v1448_v36 }
 0x182   : > { %v12570_v45 = vld [vmem:[%s16948_s3 + $0x62c] ss:$16 sps:$4 sm:$0xff]  }
 0x183   : > { %v1821_v48 = vpack.c.bf16 %v12148_v42, %v12148_v42  ;;  %v12630_v36 = vld [vmem:[%s16948_s3 + $0x76c] ss:$16 sps:$4 sm:$0xff]   ;;  %v12631_v42 = vld [vmem:[%s16948_s3 + $0x780] ss:$16 sps:$4 sm:$0xff]  }
 0x184   : > { %3454 = vmatpush1.bf16.msra.mxu0 %v12493_v47  ;;  %3618 = vmatpush1.bf16.msra.mxu1 %v12496_v33  ;;  %v1818_v47 = vpack.c.bf16 %v12145_v19, %v12145_v19  ;;  %v12567_v33 = vld [vmem:[%s16948_s3 + $0x624] ss:$16 sps:$4 sm:$0xff]  }
 0x185   : > { %3455 = vmatprep.subr.bf16.mxu0 %v12501_v50  ;;  %3619 = vmatprep.subr.bf16.mxu1 %v12504_v49  ;;  %v12565_v50 = vld [vmem:[%s16948_s3 + $0x620] ss:$16 sps:$4 sm:$0xff]   ;;  %v12568_v49 = vld [vmem:[%s16948_s3 + $0x628] ss:$16 sps:$4 sm:$0xff]   ;;  %v12633_v19 = vld [vmem:[%s16948_s3 + $0x784] ss:$16 sps:$4 sm:$0xff]  }
 0x188   : > { %3456 = vmatpush1.bf16.msra.mxu0 %v12499_v52  ;;  %3620 = vmatpush1.bf16.msra.mxu1 %v12502_v53  ;;  %v12573_v52 = vld [vmem:[%s16948_s3 + $0x644] ss:$16 sps:$4 sm:$0xff]   ;;  %v12576_v53 = vld [vmem:[%s16948_s3 + $0x64c] ss:$16 sps:$4 sm:$0xff]  }
 0x189   : > { %3457 = vmatprep.subr.bf16.mxu0 %v12507_v54  ;;  %3621 = vmatprep.subr.bf16.mxu1 %v12510_v55  ;;  %v12571_v54 = vld [vmem:[%s16948_s3 + $0x640] ss:$16 sps:$4 sm:$0xff]   ;;  %v12574_v55 = vld [vmem:[%s16948_s3 + $0x648] ss:$16 sps:$4 sm:$0xff]  }
 0x18c   : > { %3458 = vmatpush1.bf16.msra.mxu0 %v12505_v56  ;;  %3622 = vmatpush1.bf16.msra.mxu1 %v12508_v57  ;;  %v12579_v56 = vld [vmem:[%s16948_s3 + $0x664] ss:$16 sps:$4 sm:$0xff]   ;;  %v12582_v57 = vld [vmem:[%s16948_s3 + $0x66c] ss:$16 sps:$4 sm:$0xff]  }
 0x18d   : > { %3459 = vmatprep.subr.bf16.mxu0 %v12513_v58  ;;  %3623 = vmatprep.subr.bf16.mxu1 %v12516_v59  ;;  %v12577_v58 = vld [vmem:[%s16948_s3 + $0x660] ss:$16 sps:$4 sm:$0xff]   ;;  %v12580_v59 = vld [vmem:[%s16948_s3 + $0x668] ss:$16 sps:$4 sm:$0xff]  }
 0x190   : > { %3460 = vmatpush1.bf16.msra.mxu0 %v12511_v60  ;;  %3624 = vmatpush1.bf16.msra.mxu1 %v12514_v61  ;;  %v12585_v60 = vld [vmem:[%s16948_s3 + $0x684] ss:$16 sps:$4 sm:$0xff]   ;;  %v12588_v61 = vld [vmem:[%s16948_s3 + $0x68c] ss:$16 sps:$4 sm:$0xff]  }
 0x191   : > { %3461 = vmatprep.subr.bf16.mxu0 %v12519_v63  ;;  %3625 = vmatprep.subr.bf16.mxu1 %v12522_v1  ;;  %v12583_v63 = vld [vmem:[%s16948_s3 + $0x680] ss:$16 sps:$4 sm:$0xff]   ;;  %v12586_v1 = vld [vmem:[%s16948_s3 + $0x688] ss:$16 sps:$4 sm:$0xff]  }
 0x194   : > { %3462 = vmatpush1.bf16.msra.mxu0 %v12517_v2  ;;  %3626 = vmatpush1.bf16.msra.mxu1 %v12520_v3  ;;  %v12591_v2 = vld [vmem:[%s16948_s3 + $0x6a4] ss:$16 sps:$4 sm:$0xff]   ;;  %v12594_v3 = vld [vmem:[%s16948_s3 + $0x6ac] ss:$16 sps:$4 sm:$0xff]  }
 0x195   : > { %3463 = vmatprep.subr.bf16.mxu0 %v12525_v4  ;;  %3627 = vmatprep.subr.bf16.mxu1 %v12528_v5  ;;  %v12589_v4 = vld [vmem:[%s16948_s3 + $0x6a0] ss:$16 sps:$4 sm:$0xff]   ;;  %v12592_v5 = vld [vmem:[%s16948_s3 + $0x6a8] ss:$16 sps:$4 sm:$0xff]  }
 0x198   : > { %3464 = vmatpush1.bf16.msra.mxu0 %v12523_v7  ;;  %3628 = vmatpush1.bf16.msra.mxu1 %v12526_v8  ;;  %v12597_v7 = vld [vmem:[%s16948_s3 + $0x6c4] ss:$16 sps:$4 sm:$0xff]   ;;  %v12600_v8 = vld [vmem:[%s16948_s3 + $0x6cc] ss:$16 sps:$4 sm:$0xff]  }
 0x199   : > { %3465 = vmatprep.subr.bf16.mxu0 %v12531_v9  ;;  %3629 = vmatprep.subr.bf16.mxu1 %v12534_v11  ;;  %v12595_v9 = vld [vmem:[%s16948_s3 + $0x6c0] ss:$16 sps:$4 sm:$0xff]   ;;  %v12598_v11 = vld [vmem:[%s16948_s3 + $0x6c8] ss:$16 sps:$4 sm:$0xff]  }
 0x19c   : > { %3466 = vmatpush1.bf16.msra.mxu0 %v12529_v0  ;;  %3630 = vmatpush1.bf16.msra.mxu1 %v12532_v12  ;;  %v12603_v0 = vld [vmem:[%s16948_s3 + $0x6e4] ss:$16 sps:$4 sm:$0xff]   ;;  %v12606_v12 = vld [vmem:[%s16948_s3 + $0x6ec] ss:$16 sps:$4 sm:$0xff]  }
 0x19d   : > { %3467 = vmatprep.subr.bf16.mxu0 %v12537_v13  ;;  %3631 = vmatprep.subr.bf16.mxu1 %v12540_v14  ;;  %v12601_v13 = vld [vmem:[%s16948_s3 + $0x6e0] ss:$16 sps:$4 sm:$0xff]   ;;  %v12604_v14 = vld [vmem:[%s16948_s3 + $0x6e8] ss:$16 sps:$4 sm:$0xff]  }
 0x1a0   : > { %3468 = vmatpush1.bf16.msra.mxu0 %v12535_v17  ;;  %3632 = vmatpush1.bf16.msra.mxu1 %v12538_v18  ;;  %v12609_v17 = vld [vmem:[%s16948_s3 + $0x704] ss:$16 sps:$4 sm:$0xff]   ;;  %v12612_v18 = vld [vmem:[%s16948_s3 + $0x70c] ss:$16 sps:$4 sm:$0xff]  }
 0x1a1   : > { %3469 = vmatprep.subr.bf16.mxu0 %v12543_v20  ;;  %3633 = vmatprep.subr.bf16.mxu1 %v12546_v21  ;;  %v12607_v20 = vld [vmem:[%s16948_s3 + $0x700] ss:$16 sps:$4 sm:$0xff]   ;;  %v12610_v21 = vld [vmem:[%s16948_s3 + $0x708] ss:$16 sps:$4 sm:$0xff]  }
 0x1a4   : > { %3470 = vmatpush1.bf16.msra.mxu0 %v12541_v22  ;;  %3634 = vmatpush1.bf16.msra.mxu1 %v12544_v23  ;;  %v12615_v22 = vld [vmem:[%s16948_s3 + $0x724] ss:$16 sps:$4 sm:$0xff]   ;;  %v12618_v23 = vld [vmem:[%s16948_s3 + $0x72c] ss:$16 sps:$4 sm:$0xff]  }
 0x1a5   : > { %3471 = vmatprep.subr.bf16.mxu0 %v12549_v27  ;;  %3635 = vmatprep.subr.bf16.mxu1 %v12552_v28  ;;  %v12613_v27 = vld [vmem:[%s16948_s3 + $0x720] ss:$16 sps:$4 sm:$0xff]   ;;  %v12616_v28 = vld [vmem:[%s16948_s3 + $0x728] ss:$16 sps:$4 sm:$0xff]  }
 0x1a8   : > { %3472 = vmatpush1.bf16.msra.mxu0 %v12547_v31  ;;  %3636 = vmatpush1.bf16.msra.mxu1 %v12550_v32  ;;  %v12621_v31 = vld [vmem:[%s16948_s3 + $0x744] ss:$16 sps:$4 sm:$0xff]   ;;  %v12624_v32 = vld [vmem:[%s16948_s3 + $0x74c] ss:$16 sps:$4 sm:$0xff]  }
 0x1a9   : > { %3473 = vmatprep.subr.bf16.mxu0 %v12555_v34  ;;  %3637 = vmatprep.subr.bf16.mxu1 %v12558_v35  ;;  %v12622_v34 = vld [vmem:[%s16948_s3 + $0x748] ss:$16 sps:$4 sm:$0xff]   ;;  %v12627_v35 = vld [vmem:[%s16948_s3 + $0x764] ss:$16 sps:$4 sm:$0xff]  }
 0x1ac   : > { %3474 = vmatpush1.bf16.msra.mxu0 %v12553_v37  ;;  %3638 = vmatpush1.bf16.msra.mxu1 %v12556_v38  ;;  %v12625_v37 = vld [vmem:[%s16948_s3 + $0x760] ss:$16 sps:$4 sm:$0xff]   ;;  %v12628_v38 = vld [vmem:[%s16948_s3 + $0x768] ss:$16 sps:$4 sm:$0xff]  }
 0x1ad   : > { %3484 = vmatprep.subr.bf16.mxu0 %v12561_v39  ;;  %3648 = vmatprep.subr.bf16.mxu1 %v12564_v40  ;;  %v12636_v39 = vld [vmem:[%s16948_s3 + $0x78c] ss:$16 sps:$4 sm:$0xff]   ;;  %v14099_v40 = vsub.s32 6, %v12842_v15 }
 0x1af   : > { %3476 = vmatmul.mubr.bf16.vlgmr.msra.gmra.mrb[8].mxu0 %v1818_v47  ;;  %3640 = vmatmul.mubr.bf16.vlgmr.msra.gmra.mrb[8].mxu1 %v1818_v47  ;;  %v12642_v47 = vld [vmem:[%s16948_s3 + $0x7ac] ss:$16 sps:$4 sm:$0xff]  }
 0x1b0   : > { %3485 = vmatpush1.bf16.msra.mxu0 %v12559_v46  ;;  %3649 = vmatpush1.bf16.msra.mxu1 %v12562_v25  ;;  %v12634_v46 = vld [vmem:[%s16948_s3 + $0x788] ss:$16 sps:$4 sm:$0xff]   ;;  %v12639_v25 = vld [vmem:[%s16948_s3 + $0x7a4] ss:$16 sps:$4 sm:$0xff]  }
 0x1b1   : > { %3486 = vmatprep.subr.bf16.mxu0 %v12567_v33  ;;  %3650 = vmatprep.subr.bf16.mxu1 %v12570_v45  ;;  %v2070_v33 = vld [vmem:[%s16948_s3 + $0x7c0] sm:$0xff]  ;;  %v2071_v45 = vld [vmem:[%s16948_s3 + $0x7c8] sm:$0xff] }
 0x1b2   : > { %11197 = vmatprep.mubr.msk.bf16.mxu0 %vm3344_vm2, %v1821_v48  ;;  %11199 = vmatprep.mubr.msk.bf16.mxu1 %vm3344_vm2, %v1821_v48  ;;  %v1444_v48 = vrot.slane %v13531_v43, %v14099_v40  ;;  %v3693_v43 = vld [vmem:[%s16950_s5] sm:$0xff] }
 0x1b4   : > { %3487 = vmatpush1.bf16.msra.mxu0 %v12565_v50  ;;  %3651 = vmatpush1.bf16.msra.mxu1 %v12568_v49  ;;  %v12637_v50 = vld [vmem:[%s16948_s3 + $0x7a0] ss:$16 sps:$4 sm:$0xff]   ;;  %v12640_v49 = vld [vmem:[%s16948_s3 + $0x7a8] ss:$16 sps:$4 sm:$0xff]  }
 0x1b5   : > { %3488 = vmatprep.subr.bf16.mxu0 %v12573_v52  ;;  %3652 = vmatprep.subr.bf16.mxu1 %v12576_v53  ;;  %v11192_v52 = vcombine.low %v2070_v33, %v2070_v33  ;;  %v11193_v53 = vcombine.high %v2070_v33, %v2070_v33  ;;  %v3734_v33 = vld [vmem:[%s16950_s5 + $0x148] sm:$0xff] }
 0x1b8   : > { %3489 = vmatpush1.bf16.msra.mxu0 %v12571_v54  ;;  %3653 = vmatpush1.bf16.msra.mxu1 %v12574_v55  ;;  %v11195_v54 = vcombine.high %v2071_v45, %v2071_v45  ;;  %v11194_v55 = vcombine.low %v2071_v45, %v2071_v45  ;;  %v3738_v45 = vld [vmem:[%s16950_s5 + $0x168] sm:$0xff] }
 0x1b9   : > { %3490 = vmatprep.subr.bf16.mxu0 %v12579_v56  ;;  %3654 = vmatprep.subr.bf16.mxu1 %v12582_v57  ;;  %v3697_v56 = vld [vmem:[%s16950_s5 + $0x20] sm:$0xff]  ;;  %v3694_v57 = vld [vmem:[%s16950_s5 + $0x8] sm:$0xff] }
 0x1bc   : > { %3491 = vmatpush1.bf16.msra.mxu0 %v12577_v58  ;;  %3655 = vmatpush1.bf16.msra.mxu1 %v12580_v59  ;;  %v3698_v58 = vld [vmem:[%s16950_s5 + $0x28] sm:$0xff]  ;;  %v3350_v59 = vsel %vm3348_vm3, %v11192_v52, 0  ;;  %v11243_v52 = vcombine.high %v3734_v33, %v3738_v45 }
 0x1bd   : > { %3492 = vmatprep.subr.bf16.mxu0 %v12585_v60  ;;  %3656 = vmatprep.subr.bf16.mxu1 %v12588_v61  ;;  %v12147_v60 = vadd.f32 %v13806_v44, %v1444_v48  ;;  %v3356_v61 = vsel %vm3348_vm3, %v11194_v55, 0  ;;  %v3706_v44 = vld [vmem:[%s16950_s5 + $0x68] sm:$0xff] }
 0x1be   : > { %v3742_v55 = vld [vmem:[%s16950_s5 + $0x188] sm:$0xff] }
 0x1c0   : > { %3493 = vmatpush1.bf16.msra.mxu0 %v12583_v63  ;;  %3657 = vmatpush1.bf16.msra.mxu1 %v12586_v1  ;;  %v11201_v63 = vcombine.high %v3693_v43, %v3697_v56  ;;  %v11203_v1 = vcombine.high %v3694_v57, %v3698_v58 }
 0x1c1   : > { %3494 = vmatprep.subr.bf16.mxu0 %v12591_v2  ;;  %3658 = vmatprep.subr.bf16.mxu1 %v12594_v3  ;;  %v3701_v2 = vld [vmem:[%s16950_s5 + $0x40] sm:$0xff] }
 0x1c2   : > { %v3705_v3 = vld [vmem:[%s16950_s5 + $0x60] sm:$0xff] }
 0x1c4   : > { %3495 = vmatpush1.bf16.msra.mxu0 %v12589_v4  ;;  %3659 = vmatpush1.bf16.msra.mxu1 %v12592_v5  ;;  %v3702_v4 = vld [vmem:[%s16950_s5 + $0x48] sm:$0xff]  ;;  %v11200_v5 = vcombine.low %v3693_v43, %v3697_v56 }
 0x1c5   : > { %3496 = vmatprep.subr.bf16.mxu0 %v12597_v7  ;;  %3660 = vmatprep.subr.bf16.mxu1 %v12600_v8  ;;  %v11202_v7 = vcombine.low %v3694_v57, %v3698_v58  ;;  %v1820_v8 = vpack.c.bf16 %v12147_v60, %v12147_v60  ;;  %v3746_v43 = vld [vmem:[%s16950_s5 + $0x1a8] sm:$0xff]  ;;  %v11242_v57 = vcombine.low %v3734_v33, %v3738_v45  ;;  %v3749_v60 = vld [vmem:[%s16950_s5 + $0x1c0] sm:$0xff] }
 0x1c6   : > { %v3789_v45 = vld [vmem:[%s16950_s5 + $0x300] sm:$0xff] }
 0x1c8   : > { %3497 = vmatpush1.bf16.msra.mxu0 %v12595_v9  ;;  %3661 = vmatpush1.bf16.msra.mxu1 %v12598_v11  ;;  %v11209_v9 = vcombine.high %v3701_v2, %v3705_v3  ;;  %v11211_v11 = vcombine.high %v3702_v4, %v3706_v44 }
 0x1c9   : > { %3498 = vmatprep.subr.bf16.mxu0 %v12603_v0  ;;  %3662 = vmatprep.subr.bf16.mxu1 %v12606_v12  ;;  %v3709_v0 = vld [vmem:[%s16950_s5 + $0x80] sm:$0xff] }
 0x1ca   : > { %v3713_v12 = vld [vmem:[%s16950_s5 + $0xa0] sm:$0xff] }
 0x1cc   : > { %3499 = vmatpush1.bf16.msra.mxu0 %v12601_v13  ;;  %3663 = vmatpush1.bf16.msra.mxu1 %v12604_v14  ;;  %v3710_v13 = vld [vmem:[%s16950_s5 + $0x88] sm:$0xff] }
 0x1cd   : > { %3500 = vmatprep.subr.bf16.mxu0 %v12609_v17  ;;  %3664 = vmatprep.subr.bf16.mxu1 %v12612_v18  ;;  %v3714_v14 = vld [vmem:[%s16950_s5 + $0xa8] sm:$0xff]  ;;  %v11208_v17 = vcombine.low %v3701_v2, %v3705_v3  ;;  %v11210_v18 = vcombine.low %v3702_v4, %v3706_v44  ;;  %v11250_v3 = vcombine.low %v3742_v55, %v3746_v43 }
 0x1d0   : > { %3501 = vmatpush1.bf16.msra.mxu0 %v12607_v20  ;;  %3665 = vmatpush1.bf16.msra.mxu1 %v12610_v21  ;;  %v11217_v20 = vcombine.high %v3709_v0, %v3713_v12  ;;  %v11219_v21 = vcombine.high %v3710_v13, %v3714_v14 }
 0x1d1   : > { %3502 = vmatprep.subr.bf16.mxu0 %v12615_v22  ;;  %3666 = vmatprep.subr.bf16.mxu1 %v12618_v23  ;;  %v3717_v22 = vld [vmem:[%s16950_s5 + $0xc0] sm:$0xff] }
 0x1d2   : > { %v3721_v23 = vld [vmem:[%s16950_s5 + $0xe0] sm:$0xff] }
 0x1d4   : > { %3503 = vmatpush1.bf16.msra.mxu0 %v12613_v27  ;;  %3667 = vmatpush1.bf16.msra.mxu1 %v12616_v28  ;;  %v3718_v27 = vld [vmem:[%s16950_s5 + $0xc8] sm:$0xff] }
 0x1d5   : > { %3504 = vmatprep.subr.bf16.mxu0 %v12621_v31  ;;  %3668 = vmatprep.subr.bf16.mxu1 %v12624_v32  ;;  %v3722_v28 = vld [vmem:[%s16950_s5 + $0xe8] sm:$0xff]  ;;  %v11216_v31 = vcombine.low %v3709_v0, %v3713_v12  ;;  %v11218_v32 = vcombine.low %v3710_v13, %v3714_v14  ;;  %v3765_v14 = vld [vmem:[%s16950_s5 + $0x240] sm:$0xff] }
 0x1d8   : > { %3505 = vmatpush1.bf16.msra.mxu0 %v12619_v41  ;;  %3669 = vmatpush1.bf16.msra.mxu1 %v12622_v34  ;;  %v11225_v41 = vcombine.high %v3717_v22, %v3721_v23  ;;  %v11227_v34 = vcombine.high %v3718_v27, %v3722_v28 }
 0x1d9   : > { %3506 = vmatprep.subr.bf16.mxu0 %v12627_v35  ;;  %3670 = vmatprep.subr.bf16.mxu1 %v12630_v36  ;;  %v3725_v35 = vld [vmem:[%s16950_s5 + $0x100] sm:$0xff] }
 0x1da   : > { %v3729_v36 = vld [vmem:[%s16950_s5 + $0x120] sm:$0xff] }
 0x1db   : > { %v11232_v48 = vcombine.low %v3725_v35, %v3729_v36 }
 0x1dc   : > { %3507 = vmatpush1.bf16.msra.mxu0 %v12625_v37  ;;  %3671 = vmatpush1.bf16.msra.mxu1 %v12628_v38  ;;  %v3726_v37 = vld [vmem:[%s16950_s5 + $0x108] sm:$0xff] }
 0x1dd   : > { %3508 = vmatprep.subr.bf16.mxu0 %v12633_v19  ;;  %3672 = vmatprep.subr.bf16.mxu1 %v12636_v39  ;;  %v3730_v38 = vld [vmem:[%s16950_s5 + $0x128] sm:$0xff]  ;;  %v11224_v19 = vcombine.low %v3717_v22, %v3721_v23  ;;  %v11226_v39 = vcombine.low %v3718_v27, %v3722_v28  ;;  %v3773_v28 = vld [vmem:[%s16950_s5 + $0x280] sm:$0xff] }
 0x1e0   : > { %3509 = vmatpush1.bf16.msra.mxu0 %v12631_v42  ;;  %3673 = vmatpush1.bf16.msra.mxu1 %v12634_v46  ;;  %v11233_v42 = vcombine.high %v3725_v35, %v3729_v36  ;;  %v11235_v46 = vcombine.high %v3726_v37, %v3730_v38 }
 0x1e1   : > { %3510 = vmatprep.subr.bf16.mxu0 %v12639_v25  ;;  %3674 = vmatprep.subr.bf16.mxu1 %v12642_v47  ;;  %v3733_v25 = vld [vmem:[%s16950_s5 + $0x140] sm:$0xff] }
 0x1e2   : > { %v3737_v47 = vld [vmem:[%s16950_s5 + $0x160] sm:$0xff] }
 0x1e3   : > { %v11240_v56 = vcombine.low %v3733_v25, %v3737_v47 }
 0x1e4   : > { %3511 = vmatpush1.bf16.msra.mxu0 %v12637_v50  ;;  %3675 = vmatpush1.bf16.msra.mxu1 %v12640_v49  ;;  %v11234_v50 = vcombine.low %v3726_v37, %v3730_v38  ;;  %v11241_v49 = vcombine.high %v3733_v25, %v3737_v47  ;;  %v3781_v38 = vld [vmem:[%s16950_s5 + $0x2c0] sm:$0xff] }
 0x1e5   : > { %11196 = vmatprep.subr.msk.bf16.mxu0 %vm3348_vm3, %v11193_v53  ;;  %11198 = vmatprep.subr.msk.bf16.mxu1 %vm3348_vm3, %v11195_v54  ;;  %v3741_v53 = vld [vmem:[%s16950_s5 + $0x180] sm:$0xff] }
 0x1e6   : > { %v3745_v54 = vld [vmem:[%s16950_s5 + $0x1a0] sm:$0xff] }
 0x1e7   : > { %v11249_v58 = vcombine.high %v3741_v53, %v3745_v54  ;;  %v11248_v2 = vcombine.low %v3741_v53, %v3745_v54 }
 0x1e8   : > { %3513 = vmatpush1.bf16.msra.mxu0 %v3350_v59  ;;  %3677 = vmatpush1.bf16.msra.mxu1 %v3356_v61  ;;  %v11251_v59 = vcombine.high %v3742_v55, %v3746_v43  ;;  %v3753_v61 = vld [vmem:[%s16950_s5 + $0x1e0] sm:$0xff] }
 0x1e9   : > { %5229 = vmatprep.subr.bf16.mxu0 %v11201_v63  ;;  %5311 = vmatprep.subr.bf16.mxu1 %v11203_v1  ;;  %v3750_v63 = vld [vmem:[%s16950_s5 + $0x1c8] sm:$0xff]  ;;  %v11257_v4 = vcombine.high %v3749_v60, %v3753_v61  ;;  %v3797_v43 = vld [vmem:[%s16950_s5 + $0x340] sm:$0xff] }
 0x1ea   : > { %v3754_v1 = vld [vmem:[%s16950_s5 + $0x1e8] sm:$0xff] }
 0x1eb   : > { %3517 = vmatmul.mubr.bf16.vlgmr.msra.gmra.mrb[8].mxu0 %v1820_v8  ;;  %3681 = vmatmul.mubr.bf16.vlgmr.msra.gmra.mrb[8].mxu1 %v1820_v8  ;;  %v11259_v44 = vcombine.high %v3750_v63, %v3754_v1  ;;  %v3758_v8 = vld [vmem:[%s16950_s5 + $0x208] sm:$0xff]  ;;  %v11258_v0 = vcombine.low %v3750_v63, %v3754_v1  ;;  %v3805_v1 = vld [vmem:[%s16950_s5 + $0x380] sm:$0xff] }
 0x1ec   : > { %5230 = vmatpush1.bf16.msra.mxu0 %v11200_v5  ;;  %5312 = vmatpush1.bf16.msra.mxu1 %v11202_v7  ;;  %v3757_v5 = vld [vmem:[%s16950_s5 + $0x200] sm:$0xff] }
 0x1ed   : > { %5231 = vmatprep.subr.bf16.mxu0 %v11209_v9  ;;  %5313 = vmatprep.subr.bf16.mxu1 %v11211_v11  ;;  %v3761_v7 = vld [vmem:[%s16950_s5 + $0x220] sm:$0xff]  ;;  %v3762_v9 = vld [vmem:[%s16950_s5 + $0x228] sm:$0xff]  ;;  %v11256_v11 = vcombine.low %v3749_v60, %v3753_v61 }
 0x1ee   : > { %v11265_v12 = vcombine.high %v3757_v5, %v3761_v7  ;;  %v11267_v13 = vcombine.high %v3758_v8, %v3762_v9  ;;  %v11266_v22 = vcombine.low %v3758_v8, %v3762_v9 }
 0x1f0   : > { %5232 = vmatpush1.bf16.msra.mxu0 %v11208_v17  ;;  %5314 = vmatpush1.bf16.msra.mxu1 %v11210_v18  ;;  %v3769_v17 = vld [vmem:[%s16950_s5 + $0x260] sm:$0xff]  ;;  %v3766_v18 = vld [vmem:[%s16950_s5 + $0x248] sm:$0xff] }
 0x1f1   : > { %5233 = vmatprep.subr.bf16.mxu0 %v11217_v20  ;;  %5315 = vmatprep.subr.bf16.mxu1 %v11219_v21  ;;  %v3770_v20 = vld [vmem:[%s16950_s5 + $0x268] sm:$0xff]  ;;  %v11264_v21 = vcombine.low %v3757_v5, %v3761_v7  ;;  %v11273_v23 = vcombine.high %v3765_v14, %v3769_v17 }
 0x1f2   : > { %v11275_v27 = vcombine.high %v3766_v18, %v3770_v20  ;;  %v11274_v35 = vcombine.low %v3766_v18, %v3770_v20 }
 0x1f4   : > { %5234 = vmatpush1.bf16.msra.mxu0 %v11216_v31  ;;  %5316 = vmatpush1.bf16.msra.mxu1 %v11218_v32  ;;  %v3777_v31 = vld [vmem:[%s16950_s5 + $0x2a0] sm:$0xff]  ;;  %v3774_v32 = vld [vmem:[%s16950_s5 + $0x288] sm:$0xff] }
 0x1f5   : > { %5235 = vmatprep.subr.bf16.mxu0 %v11225_v41  ;;  %5317 = vmatprep.subr.bf16.mxu1 %v11227_v34  ;;  %v3778_v41 = vld [vmem:[%s16950_s5 + $0x2a8] sm:$0xff]  ;;  %v11272_v34 = vcombine.low %v3765_v14, %v3769_v17  ;;  %v11281_v36 = vcombine.high %v3773_v28, %v3777_v31 }
 0x1f6   : > { %v11283_v37 = vcombine.high %v3774_v32, %v3778_v41  ;;  %v11282_v25 = vcombine.low %v3774_v32, %v3778_v41  ;;  %v3818_v17 = vld [vmem:[%s16950_s5 + $0x3e8] sm:$0xff] }
 0x1f8   : > { %5236 = vmatpush1.bf16.msra.mxu0 %v11224_v19  ;;  %5318 = vmatpush1.bf16.msra.mxu1 %v11226_v39  ;;  %v3785_v19 = vld [vmem:[%s16950_s5 + $0x2e0] sm:$0xff]  ;;  %v3782_v39 = vld [vmem:[%s16950_s5 + $0x2c8] sm:$0xff] }
 0x1f9   : > { %5237 = vmatprep.subr.bf16.mxu0 %v11233_v42  ;;  %5319 = vmatprep.subr.bf16.mxu1 %v11235_v46  ;;  %v3786_v42 = vld [vmem:[%s16950_s5 + $0x2e8] sm:$0xff]  ;;  %v11280_v46 = vcombine.low %v3773_v28, %v3777_v31  ;;  %v11289_v47 = vcombine.high %v3781_v38, %v3785_v19 }
 0x1fa   : > { %v11291_v33 = vcombine.high %v3782_v39, %v3786_v42  ;;  %v11290_v53 = vcombine.low %v3782_v39, %v3786_v42  ;;  %v3826_v31 = vld [vmem:[%s16950_s5 + $0x428] sm:$0xff] }
 0x1fc   : > { %5238 = vmatpush1.bf16.msra.mxu0 %v11232_v48  ;;  %5320 = vmatpush1.bf16.msra.mxu1 %v11234_v50  ;;  %v3793_v48 = vld [vmem:[%s16950_s5 + $0x320] sm:$0xff]  ;;  %v3790_v50 = vld [vmem:[%s16950_s5 + $0x308] sm:$0xff] }
 0x1fd   : > { %5239 = vmatprep.subr.bf16.mxu0 %v11241_v49  ;;  %5321 = vmatprep.subr.bf16.mxu1 %v11243_v52  ;;  %v3794_v49 = vld [vmem:[%s16950_s5 + $0x328] sm:$0xff]  ;;  %v11288_v52 = vcombine.low %v3781_v38, %v3785_v19  ;;  %v11297_v54 = vcombine.high %v3789_v45, %v3793_v48 }
 0x1fe   : > { %v11299_v55 = vcombine.high %v3790_v50, %v3794_v49  ;;  %v11298_v60 = vcombine.low %v3790_v50, %v3794_v49 }
 0x200   : > { %5240 = vmatpush1.bf16.msra.mxu0 %v11240_v56  ;;  %5322 = vmatpush1.bf16.msra.mxu1 %v11242_v57  ;;  %v3801_v56 = vld [vmem:[%s16950_s5 + $0x360] sm:$0xff]  ;;  %v3798_v57 = vld [vmem:[%s16950_s5 + $0x348] sm:$0xff] }
 0x201   : > { %5241 = vmatprep.subr.bf16.mxu0 %v11249_v58  ;;  %5323 = vmatprep.subr.bf16.mxu1 %v11251_v59  ;;  %v3802_v58 = vld [vmem:[%s16950_s5 + $0x368] sm:$0xff]  ;;  %v11296_v59 = vcombine.low %v3789_v45, %v3793_v48  ;;  %v11305_v61 = vcombine.high %v3797_v43, %v3801_v56  ;;  %v3829_v48 = vld [vmem:[%s16950_s5 + $0x440] sm:$0xff] }
 0x202   : > { %v11307_v63 = vcombine.high %v3798_v57, %v3802_v58  ;;  %v11306_v5 = vcombine.low %v3798_v57, %v3802_v58  ;;  %v3837_v57 = vld [vmem:[%s16950_s5 + $0x480] sm:$0xff] }
 0x204   : > { %5242 = vmatpush1.bf16.msra.mxu0 %v11248_v2  ;;  %5324 = vmatpush1.bf16.msra.mxu1 %v11250_v3  ;;  %v3809_v2 = vld [vmem:[%s16950_s5 + $0x3a0] sm:$0xff]  ;;  %v3806_v3 = vld [vmem:[%s16950_s5 + $0x388] sm:$0xff] }
 0x205   : > { %5243 = vmatprep.subr.bf16.mxu0 %v11257_v4  ;;  %5325 = vmatprep.subr.bf16.mxu1 %v11259_v44  ;;  %v3810_v4 = vld [vmem:[%s16950_s5 + $0x3a8] sm:$0xff]  ;;  %v11304_v44 = vcombine.low %v3797_v43, %v3801_v56  ;;  %v11313_v7 = vcombine.high %v3805_v1, %v3809_v2  ;;  %v11312_v9 = vcombine.low %v3805_v1, %v3809_v2 }
 0x206   : > { %v11315_v8 = vcombine.high %v3806_v3, %v3810_v4 }
 0x208   : > { %5244 = vmatpush1.bf16.msra.mxu0 %v11256_v11  ;;  %5326 = vmatpush1.bf16.msra.mxu1 %v11258_v0  ;;  %v11314_v11 = vcombine.low %v3806_v3, %v3810_v4  ;;  %v3813_v0 = vld [vmem:[%s16950_s5 + $0x3c0] sm:$0xff] }
 0x209   : > { %5245 = vmatprep.subr.bf16.mxu0 %v11265_v12  ;;  %5327 = vmatprep.subr.bf16.mxu1 %v11267_v13  ;;  %v3817_v12 = vld [vmem:[%s16950_s5 + $0x3e0] sm:$0xff]  ;;  %v3814_v13 = vld [vmem:[%s16950_s5 + $0x3c8] sm:$0xff] }
 0x20a   : > { %v11321_v14 = vcombine.high %v3813_v0, %v3817_v12  ;;  %v11320_v18 = vcombine.low %v3813_v0, %v3817_v12  ;;  %v11322_v20 = vcombine.low %v3814_v13, %v3818_v17 }
 0x20c   : > { %5246 = vmatpush1.bf16.msra.mxu0 %v11264_v21  ;;  %5328 = vmatpush1.bf16.msra.mxu1 %v11266_v22  ;;  %v11323_v21 = vcombine.high %v3814_v13, %v3818_v17  ;;  %v3821_v22 = vld [vmem:[%s16950_s5 + $0x400] sm:$0xff] }
 0x20d   : > { %5247 = vmatprep.subr.bf16.mxu0 %v11273_v23  ;;  %5329 = vmatprep.subr.bf16.mxu1 %v11275_v27  ;;  %v3825_v23 = vld [vmem:[%s16950_s5 + $0x420] sm:$0xff]  ;;  %v3822_v27 = vld [vmem:[%s16950_s5 + $0x408] sm:$0xff] }
 0x20e   : > { %v11329_v28 = vcombine.high %v3821_v22, %v3825_v23  ;;  %v11328_v32 = vcombine.low %v3821_v22, %v3825_v23  ;;  %v11330_v41 = vcombine.low %v3822_v27, %v3826_v31  ;;  %v3857_v17 = vld [vmem:[%s16950_s5 + $0x520] sm:$0xff] }
 0x210   : > { %5248 = vmatpush1.bf16.msra.mxu0 %v11272_v34  ;;  %5330 = vmatpush1.bf16.msra.mxu1 %v11274_v35  ;;  %v11331_v34 = vcombine.high %v3822_v27, %v3826_v31  ;;  %v14335_v35 = vld [vmem:[%s16949_s4] sm:$0xf] }
 0x211   : > { %5249 = vmatprep.subr.bf16.mxu0 %v11281_v36  ;;  %5331 = vmatprep.subr.bf16.mxu1 %v11283_v37  ;;  %v3327_v36 = vrot.slane %v14335_v35, %v13012_v62  ;;  %v3331_v37 = vrot.slane %v14335_v35, %v12866_v26  ;;  %v3339_v38 = vrot.slane %v14335_v35, %v13538_v51  ;;  %v3865_v31 = vld [vmem:[%s16950_s5 + $0x560] sm:$0xff] }
 0x214   : > { %5250 = vmatpush1.bf16.msra.mxu0 %v11280_v46  ;;  %5332 = vmatpush1.bf16.msra.mxu1 %v11282_v25 }
 0x215   : > { %5251 = vmatprep.subr.bf16.mxu0 %v11289_v47  ;;  %5333 = vmatprep.subr.bf16.mxu1 %v11291_v33 }
 0x218   : > { %5252 = vmatpush1.bf16.msra.mxu0 %v11288_v52  ;;  %5334 = vmatpush1.bf16.msra.mxu1 %v11290_v53  ;;  %v3833_v53 = vld [vmem:[%s16950_s5 + $0x460] sm:$0xff] }
 0x219   : > { %5253 = vmatprep.subr.bf16.mxu0 %v11297_v54  ;;  %5335 = vmatprep.subr.bf16.mxu1 %v11299_v55  ;;  %v3830_v54 = vld [vmem:[%s16950_s5 + $0x448] sm:$0xff]  ;;  %v11337_v58 = vcombine.high %v3829_v48, %v3833_v53  ;;  %v11336_v2 = vcombine.low %v3829_v48, %v3833_v53 }
 0x21a   : > { %v3834_v55 = vld [vmem:[%s16950_s5 + $0x468] sm:$0xff] }
 0x21b   : > { %v11338_v3 = vcombine.low %v3830_v54, %v3834_v55  ;;  %v3882_v53 = vld [vmem:[%s16950_s5 + $0x5e8] sm:$0xff] }
 0x21c   : > { %5254 = vmatpush1.bf16.msra.mxu0 %v11296_v59  ;;  %5336 = vmatpush1.bf16.msra.mxu1 %v11298_v60  ;;  %v11339_v59 = vcombine.high %v3830_v54, %v3834_v55  ;;  %v3841_v60 = vld [vmem:[%s16950_s5 + $0x4a0] sm:$0xff] }
 0x21d   : > { %5255 = vmatprep.subr.bf16.mxu0 %v11305_v61  ;;  %5337 = vmatprep.subr.bf16.mxu1 %v11307_v63  ;;  %v3838_v61 = vld [vmem:[%s16950_s5 + $0x488] sm:$0xff]  ;;  %v11345_v4 = vcombine.high %v3837_v57, %v3841_v60 }
 0x21e   : > { %v3842_v63 = vld [vmem:[%s16950_s5 + $0x4a8] sm:$0xff] }
 0x21f   : > { %v11346_v0 = vcombine.low %v3838_v61, %v3842_v63 }
 0x220   : > { %5256 = vmatpush1.bf16.msra.mxu0 %v11304_v44  ;;  %5338 = vmatpush1.bf16.msra.mxu1 %v11306_v5  ;;  %v11347_v44 = vcombine.high %v3838_v61, %v3842_v63  ;;  %v3845_v5 = vld [vmem:[%s16950_s5 + $0x4c0] sm:$0xff]  ;;  %v3886_v61 = vld [vmem:[%s16950_s5 + $0x608] sm:$0xff] }
 0x221   : > { %5257 = vmatprep.subr.bf16.mxu0 %v11313_v7  ;;  %5339 = vmatprep.subr.bf16.mxu1 %v11315_v8  ;;  %v3849_v7 = vld [vmem:[%s16950_s5 + $0x4e0] sm:$0xff]  ;;  %v3846_v8 = vld [vmem:[%s16950_s5 + $0x4c8] sm:$0xff] }
 0x222   : > { %v11353_v12 = vcombine.high %v3845_v5, %v3849_v7  ;;  %v3890_v63 = vld [vmem:[%s16950_s5 + $0x628] sm:$0xff] }
 0x224   : > { %5258 = vmatpush1.bf16.msra.mxu0 %v11312_v9  ;;  %5340 = vmatpush1.bf16.msra.mxu1 %v11314_v11  ;;  %v3850_v9 = vld [vmem:[%s16950_s5 + $0x4e8] sm:$0xff]  ;;  %v11344_v11 = vcombine.low %v3837_v57, %v3841_v60  ;;  %v3889_v60 = vld [vmem:[%s16950_s5 + $0x620] sm:$0xff] }
 0x225   : > { %5259 = vmatprep.subr.bf16.mxu0 %v11321_v14  ;;  %5341 = vmatprep.subr.bf16.mxu1 %v11323_v21  ;;  %v11355_v13 = vcombine.high %v3846_v8, %v3850_v9  ;;  %v3853_v14 = vld [vmem:[%s16950_s5 + $0x500] sm:$0xff]  ;;  %v11352_v21 = vcombine.low %v3845_v5, %v3849_v7  ;;  %v11354_v22 = vcombine.low %v3846_v8, %v3850_v9  ;;  %v3894_v8 = vld [vmem:[%s16950_s5 + $0x648] sm:$0xff] }
 0x226   : > { %v11361_v23 = vcombine.high %v3853_v14, %v3857_v17  ;;  %v3893_v5 = vld [vmem:[%s16950_s5 + $0x640] sm:$0xff]  ;;  %v3898_v9 = vld [vmem:[%s16950_s5 + $0x668] sm:$0xff] }
 0x227   : > { %v3897_v7 = vld [vmem:[%s16950_s5 + $0x660] sm:$0xff] }
 0x228   : > { %5260 = vmatpush1.bf16.msra.mxu0 %v11320_v18  ;;  %5342 = vmatpush1.bf16.msra.mxu1 %v11322_v20  ;;  %v3854_v18 = vld [vmem:[%s16950_s5 + $0x508] sm:$0xff] }
 0x229   : > { %5270 = vmatprep.subr.bf16.mxu0 %v11329_v28  ;;  %5352 = vmatprep.subr.bf16.mxu1 %v11331_v34  ;;  %v3858_v20 = vld [vmem:[%s16950_s5 + $0x528] sm:$0xff]  ;;  %v3861_v28 = vld [vmem:[%s16950_s5 + $0x540] sm:$0xff]  ;;  %v11360_v34 = vcombine.low %v3853_v14, %v3857_v17 }
 0x22a   : > { %v11363_v27 = vcombine.high %v3854_v18, %v3858_v20  ;;  %v3901_v14 = vld [vmem:[%s16950_s5 + $0x680] sm:$0xff] }
 0x22b   : > { %v3905_v17 = vld [vmem:[%s16950_s5 + $0x6a0] sm:$0xff] }
 0x2be   : > { %v3518_v19 = vpop.f32.mrb[8].mxu0  ;;  %v14343_v39 = vpop.f32.mrb[8].mxu1 }
 0x2bf   : > { %v12149_v42 = vadd.f32 %v3518_v19, %v3327_v36  ;;  %v3520_v46 = vpop.f32.mrb[9].mxu0  ;;  %v3684_v25 = vpop.f32.mrb[9].mxu1  ;;  %v11362_v36 = vcombine.low %v3854_v18, %v3858_v20  ;;  %v3869_v19 = vld [vmem:[%s16950_s5 + $0x580] sm:$0xff]  ;;  %v3902_v18 = vld [vmem:[%s16950_s5 + $0x688] sm:$0xff] }
 0x2c0   : > { %v12150_v47 = vadd.f32 %v3520_v46, %v3331_v37  ;;  %v3522_v33 = vpop.f32.mrb[10].mxu0  ;;  %v3686_v45 = vpop.f32.mrb[10].mxu1  ;;  %v12152_v50 = vadd.f32 %v3684_v25, %v3339_v38  ;;  %v11369_v37 = vcombine.high %v3861_v28, %v3865_v31  ;;  %v3870_v46 = vld [vmem:[%s16950_s5 + $0x588] sm:$0xff] }
 0x2c1   : > { %v3523_v49 = vpop.f32.mrb[11].mxu0  ;;  %v3687_v52 = vpop.f32.mrb[11].mxu1  ;;  %v14359_v56 = vpack.c.bf16 %v12149_v42, %v12149_v42  ;;  %v3873_v42 = vld [vmem:[%s16950_s5 + $0x5a0] sm:$0xff]  ;;  %v3874_v25 = vld [vmem:[%s16950_s5 + $0x5a8] sm:$0xff] }
 0x2c2   : > { %v14357_v43 = vpack.c.bf16 %v12150_v47, %v12150_v47  ;;  %v14375_v1 = vpack.c.bf16 %v12152_v50, %v12152_v50  ;;  %v11368_v47 = vcombine.low %v3861_v28, %v3865_v31  ;;  %v11377_v45 = vcombine.high %v3869_v19, %v3873_v42  ;;  %v3877_v50 = vld [vmem:[%s16950_s5 + $0x5c0] sm:$0xff]  ;;  %v3878_v52 = vld [vmem:[%s16950_s5 + $0x5c8] sm:$0xff] }
 0x2c3   : > { %v11379_v48 = vcombine.high %v3870_v46, %v3874_v25  ;;  %v3881_v49 = vld [vmem:[%s16950_s5 + $0x5e0] sm:$0xff]  ;;  %v11376_v54 = vcombine.low %v3869_v19, %v3873_v42  ;;  %v11378_v55 = vcombine.low %v3870_v46, %v3874_v25  ;;  %v3906_v20 = vld [vmem:[%s16950_s5 + $0x6a8] sm:$0xff] }
 0x2c4   : > { %5261 = vmatprep.mubr.bf16.mxu0 %v14357_v43  ;;  %5343 = vmatprep.mubr.bf16.mxu1 %v14357_v43  ;;  %v11385_v57 = vcombine.high %v3877_v50, %v3881_v49  ;;  %v3909_v28 = vld [vmem:[%s16950_s5 + $0x6c0] sm:$0xff]  ;;  %v3918_v46 = vld [vmem:[%s16950_s5 + $0x708] sm:$0xff] }
 0x2c5   : > { %5262 = vmatmul.mubr.bf16.vlgmr.msra.gmra.mrb[12].mxu0 %v14359_v56  ;;  %5344 = vmatmul.mubr.bf16.vlgmr.msra.gmra.mrb[12].mxu1 %v14359_v56  ;;  %v3913_v31 = vld [vmem:[%s16950_s5 + $0x6e0] sm:$0xff]  ;;  %v3922_v25 = vld [vmem:[%s16950_s5 + $0x728] sm:$0xff] }
 0x2c6   : > { %5271 = vmatpush1.bf16.msra.mxu0 %v11328_v32  ;;  %5353 = vmatpush1.bf16.msra.mxu1 %v11330_v41  ;;  %v3862_v32 = vld [vmem:[%s16950_s5 + $0x548] sm:$0xff]  ;;  %v3917_v19 = vld [vmem:[%s16950_s5 + $0x700] sm:$0xff] }
 0x2c7   : > { %5302 = vmatprep.mubr.bf16.mxu0 %v14375_v1  ;;  %5384 = vmatprep.mubr.bf16.mxu1 %v14375_v1  ;;  %v3866_v41 = vld [vmem:[%s16950_s5 + $0x568] sm:$0xff]  ;;  %v3921_v42 = vld [vmem:[%s16950_s5 + $0x720] sm:$0xff] }
 0x2c8   : > { %5272 = vmatprep.subr.bf16.mxu0 %v11337_v58  ;;  %5354 = vmatprep.subr.bf16.mxu1 %v11339_v59  ;;  %v11371_v38 = vcombine.high %v3862_v32, %v3866_v41  ;;  %v11370_v33 = vcombine.low %v3862_v32, %v3866_v41  ;;  %v11387_v58 = vcombine.high %v3878_v52, %v3882_v53  ;;  %v3885_v59 = vld [vmem:[%s16950_s5 + $0x600] sm:$0xff]  ;;  %v3910_v32 = vld [vmem:[%s16950_s5 + $0x6c8] sm:$0xff] }
 0x2c9   : > { %v3914_v41 = vld [vmem:[%s16950_s5 + $0x6e8] sm:$0xff] }
 0x2ca   : > { %5273 = vmatpush1.bf16.msra.mxu0 %v11336_v2  ;;  %5355 = vmatpush1.bf16.msra.mxu1 %v11338_v3  ;;  %v11384_v2 = vcombine.low %v3877_v50, %v3881_v49  ;;  %v11386_v3 = vcombine.low %v3878_v52, %v3882_v53  ;;  %v3925_v50 = vld [vmem:[%s16950_s5 + $0x740] sm:$0xff]  ;;  %v3926_v52 = vld [vmem:[%s16950_s5 + $0x748] sm:$0xff] }
 0x2cb   : > { %5274 = vmatprep.subr.bf16.mxu0 %v11345_v4  ;;  %5356 = vmatprep.subr.bf16.mxu1 %v11347_v44  ;;  %v11393_v4 = vcombine.high %v3885_v59, %v3889_v60  ;;  %v11395_v44 = vcombine.high %v3886_v61, %v3890_v63  ;;  %v3929_v49 = vld [vmem:[%s16950_s5 + $0x760] sm:$0xff]  ;;  %v3930_v53 = vld [vmem:[%s16950_s5 + $0x768] sm:$0xff] }
 0x2ce   : > { %5275 = vmatpush1.bf16.msra.mxu0 %v11344_v11  ;;  %5357 = vmatpush1.bf16.msra.mxu1 %v11346_v0  ;;  %v11392_v11 = vcombine.low %v3885_v59, %v3889_v60  ;;  %v11394_v0 = vcombine.low %v3886_v61, %v3890_v63  ;;  %v3933_v59 = vld [vmem:[%s16950_s5 + $0x780] sm:$0xff]  ;;  %v3934_v61 = vld [vmem:[%s16950_s5 + $0x788] sm:$0xff] }
 0x2cf   : > { %5276 = vmatprep.subr.bf16.mxu0 %v11353_v12  ;;  %5358 = vmatprep.subr.bf16.mxu1 %v11355_v13  ;;  %v11401_v12 = vcombine.high %v3893_v5, %v3897_v7  ;;  %v11403_v13 = vcombine.high %v3894_v8, %v3898_v9  ;;  %v3937_v60 = vld [vmem:[%s16950_s5 + $0x7a0] sm:$0xff]  ;;  %v3938_v63 = vld [vmem:[%s16950_s5 + $0x7a8] sm:$0xff] }
 0x2d2   : > { %5277 = vmatpush1.bf16.msra.mxu0 %v11352_v21  ;;  %5359 = vmatpush1.bf16.msra.mxu1 %v11354_v22  ;;  %v11400_v21 = vcombine.low %v3893_v5, %v3897_v7  ;;  %v11402_v22 = vcombine.low %v3894_v8, %v3898_v9  ;;  %v3941_v5 = vld [vmem:[%s16950_s5 + $0x7c0] sm:$0xff]  ;;  %v3942_v8 = vld [vmem:[%s16950_s5 + $0x7c8] sm:$0xff] }
 0x2d3   : > { %5278 = vmatprep.subr.bf16.mxu0 %v11361_v23  ;;  %5360 = vmatprep.subr.bf16.mxu1 %v11363_v27  ;;  %v11409_v23 = vcombine.high %v3901_v14, %v3905_v17  ;;  %v11411_v27 = vcombine.high %v3902_v18, %v3906_v20  ;;  %v3945_v7 = vld [vmem:[%s16950_s5 + $0x7e0] sm:$0xff]  ;;  %v3946_v9 = vld [vmem:[%s16950_s5 + $0x7e8] sm:$0xff] }
 0x2d6   : > { %5279 = vmatpush1.bf16.msra.mxu0 %v11360_v34  ;;  %5361 = vmatpush1.bf16.msra.mxu1 %v11362_v36  ;;  %v11408_v34 = vcombine.low %v3901_v14, %v3905_v17  ;;  %v11410_v36 = vcombine.low %v3902_v18, %v3906_v20  ;;  %v11451_v14 = vcombine.high %v3942_v8, %v3946_v9  ;;  %v3695_v17 = vld [vmem:[%s16950_s5 + $0x10] sm:$0xff]  ;;  %v3696_v20 = vld [vmem:[%s16950_s5 + $0x18] sm:$0xff] }
 0x2d7   : > { %5280 = vmatprep.subr.bf16.mxu0 %v11369_v37  ;;  %5362 = vmatprep.subr.bf16.mxu1 %v11371_v38  ;;  %v11417_v37 = vcombine.high %v3909_v28, %v3913_v31  ;;  %v11419_v38 = vcombine.high %v3910_v32, %v3914_v41  ;;  %v3699_v18 = vld [vmem:[%s16950_s5 + $0x30] sm:$0xff] }
 0x2da   : > { %5281 = vmatpush1.bf16.msra.mxu0 %v11368_v47  ;;  %5363 = vmatpush1.bf16.msra.mxu1 %v11370_v33  ;;  %v11416_v47 = vcombine.low %v3909_v28, %v3913_v31  ;;  %v11418_v33 = vcombine.low %v3910_v32, %v3914_v41  ;;  %v3703_v31 = vld [vmem:[%s16950_s5 + $0x50] sm:$0xff]  ;;  %v3704_v41 = vld [vmem:[%s16950_s5 + $0x58] sm:$0xff] }
 0x2db   : > { %5282 = vmatprep.subr.bf16.mxu0 %v11377_v45  ;;  %5364 = vmatprep.subr.bf16.mxu1 %v11379_v48  ;;  %v11425_v45 = vcombine.high %v3917_v19, %v3921_v42  ;;  %v11427_v48 = vcombine.high %v3918_v46, %v3922_v25  ;;  %v3707_v32 = vld [vmem:[%s16950_s5 + $0x70] sm:$0xff] }
 0x2de   : > { %5283 = vmatpush1.bf16.msra.mxu0 %v11376_v54  ;;  %5365 = vmatpush1.bf16.msra.mxu1 %v11378_v55  ;;  %v11424_v54 = vcombine.low %v3917_v19, %v3921_v42  ;;  %v11426_v55 = vcombine.low %v3918_v46, %v3922_v25  ;;  %v3711_v42 = vld [vmem:[%s16950_s5 + $0x90] sm:$0xff]  ;;  %v3712_v25 = vld [vmem:[%s16950_s5 + $0x98] sm:$0xff] }
 0x2df   : > { %5284 = vmatprep.subr.bf16.mxu0 %v11385_v57  ;;  %5366 = vmatprep.subr.bf16.mxu1 %v11387_v58  ;;  %v11433_v57 = vcombine.high %v3925_v50, %v3929_v49  ;;  %v11435_v58 = vcombine.high %v3926_v52, %v3930_v53  ;;  %v3715_v46 = vld [vmem:[%s16950_s5 + $0xb0] sm:$0xff] }
 0x2e2   : > { %5285 = vmatpush1.bf16.msra.mxu0 %v11384_v2  ;;  %5367 = vmatpush1.bf16.msra.mxu1 %v11386_v3  ;;  %v11432_v2 = vcombine.low %v3925_v50, %v3929_v49  ;;  %v11434_v3 = vcombine.low %v3926_v52, %v3930_v53  ;;  %v3719_v49 = vld [vmem:[%s16950_s5 + $0xd0] sm:$0xff]  ;;  %v3720_v53 = vld [vmem:[%s16950_s5 + $0xd8] sm:$0xff] }
 0x2e3   : > { %5286 = vmatprep.subr.bf16.mxu0 %v11393_v4  ;;  %5368 = vmatprep.subr.bf16.mxu1 %v11395_v44  ;;  %v11441_v4 = vcombine.high %v3933_v59, %v3937_v60  ;;  %v11443_v44 = vcombine.high %v3934_v61, %v3938_v63  ;;  %v3723_v52 = vld [vmem:[%s16950_s5 + $0xf0] sm:$0xff] }
 0x2e6   : > { %5287 = vmatpush1.bf16.msra.mxu0 %v11392_v11  ;;  %5369 = vmatpush1.bf16.msra.mxu1 %v11394_v0  ;;  %v11440_v11 = vcombine.low %v3933_v59, %v3937_v60  ;;  %v11442_v0 = vcombine.low %v3934_v61, %v3938_v63  ;;  %v3727_v59 = vld [vmem:[%s16950_s5 + $0x110] sm:$0xff]  ;;  %v3728_v61 = vld [vmem:[%s16950_s5 + $0x118] sm:$0xff] }
 0x2e7   : > { %5288 = vmatprep.subr.bf16.mxu0 %v11401_v12  ;;  %5370 = vmatprep.subr.bf16.mxu1 %v11403_v13  ;;  %v3335_v12 = vrot.slane %v14335_v35, %v13056_v29  ;;  %v11449_v13 = vcombine.high %v3941_v5, %v3945_v7  ;;  %v3700_v35 = vld [vmem:[%s16950_s5 + $0x38] sm:$0xff]  ;;  %v3731_v60 = vld [vmem:[%s16950_s5 + $0x130] sm:$0xff] }
 0x2e8   : > { %v11207_v28 = vcombine.high %v3696_v20, %v3700_v35  ;;  %v3732_v63 = vld [vmem:[%s16950_s5 + $0x138] sm:$0xff] }
 0x2ea   : > { %5289 = vmatpush1.bf16.msra.mxu0 %v11400_v21  ;;  %5371 = vmatpush1.bf16.msra.mxu1 %v11402_v22  ;;  %v11448_v21 = vcombine.low %v3941_v5, %v3945_v7  ;;  %v11450_v22 = vcombine.low %v3942_v8, %v3946_v9  ;;  %v3735_v5 = vld [vmem:[%s16950_s5 + $0x150] sm:$0xff]  ;;  %v3736_v8 = vld [vmem:[%s16950_s5 + $0x158] sm:$0xff] }
 0x2eb   : > { %5290 = vmatprep.subr.bf16.mxu0 %v11409_v23  ;;  %5372 = vmatprep.subr.bf16.mxu1 %v11411_v27  ;;  %v12151_v23 = vadd.f32 %v14343_v39, %v3335_v12  ;;  %v11205_v27 = vcombine.high %v3695_v17, %v3699_v18  ;;  %v3708_v39 = vld [vmem:[%s16950_s5 + $0x78] sm:$0xff]  ;;  %v3739_v7 = vld [vmem:[%s16950_s5 + $0x170] sm:$0xff] }
 0x2ec   : > { %v11215_v19 = vcombine.high %v3704_v41, %v3708_v39  ;;  %v3740_v9 = vld [vmem:[%s16950_s5 + $0x178] sm:$0xff]  ;;  %v11245_v12 = vcombine.high %v3735_v5, %v3739_v7 }
 0x2ee   : > { %5291 = vmatpush1.bf16.msra.mxu0 %v11408_v34  ;;  %5373 = vmatpush1.bf16.msra.mxu1 %v11410_v36  ;;  %v11204_v34 = vcombine.low %v3695_v17, %v3699_v18  ;;  %v14564_v36 = vpack.c.bf16 %v12151_v23, %v12151_v23  ;;  %v3747_v17 = vld [vmem:[%s16950_s5 + $0x1b0] sm:$0xff]  ;;  %v3744_v18 = vld [vmem:[%s16950_s5 + $0x198] sm:$0xff] }
 0x2ef   : > { %5292 = vmatprep.subr.bf16.mxu0 %v11417_v37  ;;  %5374 = vmatprep.subr.bf16.mxu1 %v11419_v38  ;;  %v11206_v37 = vcombine.low %v3696_v20, %v3700_v35  ;;  %v11213_v38 = vcombine.high %v3703_v31, %v3707_v32  ;;  %v3748_v20 = vld [vmem:[%s16950_s5 + $0x1b8] sm:$0xff]  ;;  %v11244_v35 = vcombine.low %v3735_v5, %v3739_v7 }
 0x2f0   : > { %v11255_v23 = vcombine.high %v3744_v18, %v3748_v20  ;;  %v3784_v5 = vld [vmem:[%s16950_s5 + $0x2d8] sm:$0xff] }
 0x2f1   : > { %v3788_v7 = vld [vmem:[%s16950_s5 + $0x2f8] sm:$0xff] }
 0x2f2   : > { %5293 = vmatpush1.bf16.msra.mxu0 %v11416_v47  ;;  %5375 = vmatpush1.bf16.msra.mxu1 %v11418_v33  ;;  %v3716_v47 = vld [vmem:[%s16950_s5 + $0xb8] sm:$0xff]  ;;  %v11212_v33 = vcombine.low %v3703_v31, %v3707_v32 }
 0x2f3   : > { %5294 = vmatprep.subr.bf16.mxu0 %v11425_v45  ;;  %5376 = vmatprep.subr.bf16.mxu1 %v11427_v48  ;;  %v11214_v45 = vcombine.low %v3704_v41, %v3708_v39  ;;  %v11221_v48 = vcombine.high %v3711_v42, %v3715_v46  ;;  %v11223_v50 = vcombine.high %v3712_v25, %v3716_v47  ;;  %v3752_v31 = vld [vmem:[%s16950_s5 + $0x1d8] sm:$0xff] }
 0x2f4   : > { %v3756_v32 = vld [vmem:[%s16950_s5 + $0x1f8] sm:$0xff]  ;;  %v11254_v39 = vcombine.low %v3744_v18, %v3748_v20  ;;  %v11294_v20 = vcombine.low %v3784_v5, %v3788_v7 }
 0x2f6   : > { %5295 = vmatpush1.bf16.msra.mxu0 %v11424_v54  ;;  %5377 = vmatpush1.bf16.msra.mxu1 %v11426_v55  ;;  %v11220_v54 = vcombine.low %v3711_v42, %v3715_v46  ;;  %v11222_v55 = vcombine.low %v3712_v25, %v3716_v47  ;;  %v3760_v42 = vld [vmem:[%s16950_s5 + $0x218] sm:$0xff]  ;;  %v11262_v47 = vcombine.low %v3752_v31, %v3756_v32 }
 0x2f7   : > { %5296 = vmatprep.subr.bf16.mxu0 %v11433_v57  ;;  %5378 = vmatprep.subr.bf16.mxu1 %v11435_v58  ;;  %v11229_v57 = vcombine.high %v3719_v49, %v3723_v52  ;;  %v3764_v46 = vld [vmem:[%s16950_s5 + $0x238] sm:$0xff] }
 0x2fa   : > { %5297 = vmatpush1.bf16.msra.mxu0 %v11432_v2  ;;  %5379 = vmatpush1.bf16.msra.mxu1 %v11434_v3  ;;  %v11228_v2 = vcombine.low %v3719_v49, %v3723_v52  ;;  %v3768_v49 = vld [vmem:[%s16950_s5 + $0x258] sm:$0xff] }
 0x2fb   : > { %5298 = vmatprep.subr.bf16.mxu0 %v11441_v4  ;;  %5380 = vmatprep.subr.bf16.mxu1 %v11443_v44  ;;  %v11237_v4 = vcombine.high %v3727_v59, %v3731_v60  ;;  %v11239_v44 = vcombine.high %v3728_v61, %v3732_v63  ;;  %v3772_v52 = vld [vmem:[%s16950_s5 + $0x278] sm:$0xff] }
 0x2fe   : > { %5299 = vmatpush1.bf16.msra.mxu0 %v11440_v11  ;;  %5381 = vmatpush1.bf16.msra.mxu1 %v11442_v0  ;;  %v11236_v11 = vcombine.low %v3727_v59, %v3731_v60  ;;  %v11238_v0 = vcombine.low %v3728_v61, %v3732_v63  ;;  %v3776_v59 = vld [vmem:[%s16950_s5 + $0x298] sm:$0xff]  ;;  %v11278_v63 = vcombine.low %v3768_v49, %v3772_v52 }
 0x2ff   : > { %5300 = vmatprep.subr.bf16.mxu0 %v11449_v13  ;;  %5382 = vmatprep.subr.bf16.mxu1 %v11451_v14  ;;  %v11247_v13 = vcombine.high %v3736_v8, %v3740_v9  ;;  %v3743_v14 = vld [vmem:[%s16950_s5 + $0x190] sm:$0xff]  ;;  %v3780_v60 = vld [vmem:[%s16950_s5 + $0x2b8] sm:$0xff] }
 0x300   : > { %v11252_v41 = vcombine.low %v3743_v14, %v3747_v17 }
 0x302   : > { %5301 = vmatpush1.bf16.msra.mxu0 %v11448_v21  ;;  %5383 = vmatpush1.bf16.msra.mxu1 %v11450_v22  ;;  %v11246_v21 = vcombine.low %v3736_v8, %v3740_v9  ;;  %v11253_v22 = vcombine.high %v3743_v14, %v3747_v17  ;;  %v11286_v9 = vcombine.low %v3776_v59, %v3780_v60  ;;  %v3792_v14 = vld [vmem:[%s16950_s5 + $0x318] sm:$0xff] }
 0x303   : > { %5393 = vmatprep.subr.bf16.mxu0 %v11205_v27  ;;  %5475 = vmatprep.subr.bf16.mxu1 %v11207_v28  ;;  %v3751_v27 = vld [vmem:[%s16950_s5 + $0x1d0] sm:$0xff]  ;;  %v3796_v17 = vld [vmem:[%s16950_s5 + $0x338] sm:$0xff] }
 0x304   : > { %v3755_v28 = vld [vmem:[%s16950_s5 + $0x1f0] sm:$0xff] }
 0x305   : > { %5303 = vmatmul.mubr.bf16.vlgmr.msra.gmra.mrb[12].mxu0 %v14564_v36  ;;  %5385 = vmatmul.mubr.bf16.vlgmr.msra.gmra.mrb[12].mxu1 %v14564_v36  ;;  %v11260_v25 = vcombine.low %v3751_v27, %v3755_v28 }
 0x306   : > { %5394 = vmatpush1.bf16.msra.mxu0 %v11204_v34  ;;  %5425 = vmatprep.mubr.bf16.mxu0 %v14357_v43  ;;  %v11261_v34 = vcombine.high %v3751_v27, %v3755_v28  ;;  %v3800_v27 = vld [vmem:[%s16950_s5 + $0x358] sm:$0xff] }
 0x307   : > { %5476 = vmatpush1.bf16.msra.mxu1 %v11206_v37  ;;  %5507 = vmatprep.mubr.bf16.mxu1 %v14357_v43  ;;  %v3724_v43 = vld [vmem:[%s16950_s5 + $0xf8] sm:$0xff]  ;;  %v11263_v37 = vcombine.high %v3752_v31, %v3756_v32  ;;  %v11302_v32 = vcombine.low %v3792_v14, %v3796_v17 }
 0x308   : > { %5395 = vmatprep.subr.bf16.mxu0 %v11213_v38  ;;  %5477 = vmatprep.subr.bf16.mxu1 %v11215_v19  ;;  %v11231_v58 = vcombine.high %v3720_v53, %v3724_v43  ;;  %v11230_v3 = vcombine.low %v3720_v53, %v3724_v43  ;;  %v3759_v38 = vld [vmem:[%s16950_s5 + $0x210] sm:$0xff]  ;;  %v11270_v43 = vcombine.low %v3760_v42, %v3764_v46  ;;  %v3804_v28 = vld [vmem:[%s16950_s5 + $0x378] sm:$0xff] }
 0x309   : > { %v3763_v19 = vld [vmem:[%s16950_s5 + $0x230] sm:$0xff] }
 0x30a   : > { %5396 = vmatpush1.bf16.msra.mxu0 %v11212_v33  ;;  %v11269_v33 = vcombine.high %v3759_v38, %v3763_v19  ;;  %v11268_v53 = vcombine.low %v3759_v38, %v3763_v19  ;;  %v3808_v38 = vld [vmem:[%s16950_s5 + $0x398] sm:$0xff] }
 0x30b   : > { %5478 = vmatpush1.bf16.msra.mxu1 %v11214_v45  ;;  %5397 = vmatprep.subr.bf16.mxu0 %v11221_v48  ;;  %v11271_v45 = vcombine.high %v3760_v42, %v3764_v46  ;;  %v3767_v48 = vld [vmem:[%s16950_s5 + $0x250] sm:$0xff]  ;;  %v3812_v19 = vld [vmem:[%s16950_s5 + $0x3b8] sm:$0xff]  ;;  %v11310_v46 = vcombine.low %v3800_v27, %v3804_v28 }
 0x30c   : > { %5479 = vmatprep.subr.bf16.mxu1 %v11223_v50  ;;  %v3771_v50 = vld [vmem:[%s16950_s5 + $0x270] sm:$0xff] }
 0x30d   : > { %v11276_v61 = vcombine.low %v3767_v48, %v3771_v50 }
 0x30e   : > { %5398 = vmatpush1.bf16.msra.mxu0 %v11220_v54  ;;  %v11277_v54 = vcombine.high %v3767_v48, %v3771_v50  ;;  %v3816_v48 = vld [vmem:[%s16950_s5 + $0x3d8] sm:$0xff] }
 0x30f   : > { %5480 = vmatpush1.bf16.msra.mxu1 %v11222_v55  ;;  %5399 = vmatprep.subr.bf16.mxu0 %v11229_v57  ;;  %v11279_v55 = vcombine.high %v3768_v49, %v3772_v52  ;;  %v3775_v57 = vld [vmem:[%s16950_s5 + $0x290] sm:$0xff]  ;;  %v3820_v50 = vld [vmem:[%s16950_s5 + $0x3f8] sm:$0xff]  ;;  %v11318_v52 = vcombine.low %v3808_v38, %v3812_v19 }
 0x310   : > { %5481 = vmatprep.subr.bf16.mxu1 %v11231_v58  ;;  %v3779_v58 = vld [vmem:[%s16950_s5 + $0x2b0] sm:$0xff] }
 0x311   : > { %v11284_v8 = vcombine.low %v3775_v57, %v3779_v58 }
 0x312   : > { %5400 = vmatpush1.bf16.msra.mxu0 %v11228_v2  ;;  %v11285_v2 = vcombine.high %v3775_v57, %v3779_v58  ;;  %v3824_v57 = vld [vmem:[%s16950_s5 + $0x418] sm:$0xff] }
 0x313   : > { %5482 = vmatpush1.bf16.msra.mxu1 %v11230_v3  ;;  %5401 = vmatprep.subr.bf16.mxu0 %v11237_v4  ;;  %v11287_v3 = vcombine.high %v3776_v59, %v3780_v60  ;;  %v3783_v4 = vld [vmem:[%s16950_s5 + $0x2d0] sm:$0xff]  ;;  %v3828_v58 = vld [vmem:[%s16950_s5 + $0x438] sm:$0xff]  ;;  %v11326_v60 = vcombine.low %v3816_v48, %v3820_v50 }
 0x314   : > { %5483 = vmatprep.subr.bf16.mxu1 %v11239_v44  ;;  %v3787_v44 = vld [vmem:[%s16950_s5 + $0x2f0] sm:$0xff] }
 0x315   : > { %v11292_v18 = vcombine.low %v3783_v4, %v3787_v44 }
 0x316   : > { %5402 = vmatpush1.bf16.msra.mxu0 %v11236_v11  ;;  %v11293_v11 = vcombine.high %v3783_v4, %v3787_v44  ;;  %v3832_v44 = vld [vmem:[%s16950_s5 + $0x458] sm:$0xff] }
 0x317   : > { %5484 = vmatpush1.bf16.msra.mxu1 %v11238_v0  ;;  %5403 = vmatprep.subr.bf16.mxu0 %v11245_v12  ;;  %v11295_v0 = vcombine.high %v3784_v5, %v3788_v7  ;;  %v3791_v12 = vld [vmem:[%s16950_s5 + $0x310] sm:$0xff]  ;;  %v3836_v5 = vld [vmem:[%s16950_s5 + $0x478] sm:$0xff]  ;;  %v11334_v7 = vcombine.low %v3824_v57, %v3828_v58 }
 0x318   : > { %5485 = vmatprep.subr.bf16.mxu1 %v11247_v13  ;;  %v3795_v13 = vld [vmem:[%s16950_s5 + $0x330] sm:$0xff] }
 0x319   : > { %v11300_v31 = vcombine.low %v3791_v12, %v3795_v13 }
 0x31a   : > { %5404 = vmatpush1.bf16.msra.mxu0 %v11244_v35  ;;  %v11301_v35 = vcombine.high %v3791_v12, %v3795_v13  ;;  %v3840_v12 = vld [vmem:[%s16950_s5 + $0x498] sm:$0xff] }
 0x31b   : > { %5486 = vmatpush1.bf16.msra.mxu1 %v11246_v21  ;;  %5405 = vmatprep.subr.bf16.mxu0 %v11253_v22  ;;  %v11303_v21 = vcombine.high %v3792_v14, %v3796_v17  ;;  %v3799_v22 = vld [vmem:[%s16950_s5 + $0x350] sm:$0xff]  ;;  %v3844_v13 = vld [vmem:[%s16950_s5 + $0x4b8] sm:$0xff]  ;;  %v11342_v17 = vcombine.low %v3832_v44, %v3836_v5 }
 0x31c   : > { %5487 = vmatprep.subr.bf16.mxu1 %v11255_v23  ;;  %v3803_v23 = vld [vmem:[%s16950_s5 + $0x370] sm:$0xff] }
 0x31d   : > { %v11308_v42 = vcombine.low %v3799_v22, %v3803_v23 }
 0x31e   : > { %5406 = vmatpush1.bf16.msra.mxu0 %v11252_v41  ;;  %v11309_v41 = vcombine.high %v3799_v22, %v3803_v23  ;;  %v3852_v22 = vld [vmem:[%s16950_s5 + $0x4f8] sm:$0xff]  ;;  %v11350_v23 = vcombine.low %v3840_v12, %v3844_v13 }
 0x31f   : > { %5488 = vmatpush1.bf16.msra.mxu1 %v11254_v39  ;;  %5407 = vmatprep.subr.bf16.mxu0 %v11261_v34  ;;  %v11311_v39 = vcombine.high %v3800_v27, %v3804_v28  ;;  %v3807_v34 = vld [vmem:[%s16950_s5 + $0x390] sm:$0xff] }
 0x320   : > { %5489 = vmatprep.subr.bf16.mxu1 %v11263_v37  ;;  %v3811_v37 = vld [vmem:[%s16950_s5 + $0x3b0] sm:$0xff] }
 0x321   : > { %v11316_v49 = vcombine.low %v3807_v34, %v3811_v37 }
 0x322   : > { %5408 = vmatpush1.bf16.msra.mxu0 %v11260_v25  ;;  %v11317_v25 = vcombine.high %v3807_v34, %v3811_v37 }
 0x323   : > { %5490 = vmatpush1.bf16.msra.mxu1 %v11262_v47  ;;  %5409 = vmatprep.subr.bf16.mxu0 %v11269_v33  ;;  %v11319_v47 = vcombine.high %v3808_v38, %v3812_v19  ;;  %v3815_v33 = vld [vmem:[%s16950_s5 + $0x3d0] sm:$0xff] }
 0x324   : > { %5491 = vmatprep.subr.bf16.mxu1 %v11271_v45  ;;  %v3819_v45 = vld [vmem:[%s16950_s5 + $0x3f0] sm:$0xff] }
 0x325   : > { %v11324_v59 = vcombine.low %v3815_v33, %v3819_v45 }
 0x326   : > { %5410 = vmatpush1.bf16.msra.mxu0 %v11268_v53  ;;  %v11325_v53 = vcombine.high %v3815_v33, %v3819_v45 }
 0x327   : > { %5492 = vmatpush1.bf16.msra.mxu1 %v11270_v43  ;;  %5411 = vmatprep.subr.bf16.mxu0 %v11277_v54  ;;  %v11327_v43 = vcombine.high %v3816_v48, %v3820_v50  ;;  %v3823_v54 = vld [vmem:[%s16950_s5 + $0x410] sm:$0xff] }
 0x328   : > { %5493 = vmatprep.subr.bf16.mxu1 %v11279_v55  ;;  %v3827_v55 = vld [vmem:[%s16950_s5 + $0x430] sm:$0xff] }
 0x329   : > { %v11332_v4 = vcombine.low %v3823_v54, %v3827_v55 }
 0x32a   : > { %5412 = vmatpush1.bf16.msra.mxu0 %v11276_v61  ;;  %v11333_v61 = vcombine.high %v3823_v54, %v3827_v55 }
 0x32b   : > { %5494 = vmatpush1.bf16.msra.mxu1 %v11278_v63  ;;  %5413 = vmatprep.subr.bf16.mxu0 %v11285_v2  ;;  %v11335_v63 = vcombine.high %v3824_v57, %v3828_v58  ;;  %v3831_v2 = vld [vmem:[%s16950_s5 + $0x450] sm:$0xff] }
 0x32c   : > { %5495 = vmatprep.subr.bf16.mxu1 %v11287_v3  ;;  %v3835_v3 = vld [vmem:[%s16950_s5 + $0x470] sm:$0xff] }
 0x32d   : > { %v11340_v14 = vcombine.low %v3831_v2, %v3835_v3 }
 0x32e   : > { %5414 = vmatpush1.bf16.msra.mxu0 %v11284_v8  ;;  %v11341_v8 = vcombine.high %v3831_v2, %v3835_v3 }
 0x32f   : > { %5496 = vmatpush1.bf16.msra.mxu1 %v11286_v9  ;;  %5415 = vmatprep.subr.bf16.mxu0 %v11293_v11  ;;  %v3839_v9 = vld [vmem:[%s16950_s5 + $0x490] sm:$0xff] }
 0x330   : > { %5497 = vmatprep.subr.bf16.mxu1 %v11295_v0  ;;  %v3843_v11 = vld [vmem:[%s16950_s5 + $0x4b0] sm:$0xff]  ;;  %v11343_v0 = vcombine.high %v3832_v44, %v3836_v5 }
 0x331   : > { %v3887_v5 = vld [vmem:[%s16950_s5 + $0x610] sm:$0xff] }
 0x332   : > { %5416 = vmatpush1.bf16.msra.mxu0 %v11292_v18  ;;  %v11349_v18 = vcombine.high %v3839_v9, %v3843_v11 }
 0x333   : > { %5498 = vmatpush1.bf16.msra.mxu1 %v11294_v20  ;;  %5417 = vmatprep.subr.bf16.mxu0 %v11301_v35  ;;  %v11351_v20 = vcombine.high %v3840_v12, %v3844_v13  ;;  %v3847_v35 = vld [vmem:[%s16950_s5 + $0x4d0] sm:$0xff] }
 0x334   : > { %5499 = vmatprep.subr.bf16.mxu1 %v11303_v21  ;;  %v3851_v21 = vld [vmem:[%s16950_s5 + $0x4f0] sm:$0xff] }
 0x335   : > { %v11357_v27 = vcombine.high %v3847_v35, %v3851_v21  ;;  %v11356_v34 = vcombine.low %v3847_v35, %v3851_v21 }
 0x336   : > { %5418 = vmatpush1.bf16.msra.mxu0 %v11300_v31  ;;  %v3855_v31 = vld [vmem:[%s16950_s5 + $0x510] sm:$0xff] }
 0x337   : > { %5500 = vmatpush1.bf16.msra.mxu1 %v11302_v32  ;;  %5419 = vmatprep.subr.bf16.mxu0 %v11309_v41  ;;  %v3859_v32 = vld [vmem:[%s16950_s5 + $0x530] sm:$0xff]  ;;  %v3856_v41 = vld [vmem:[%s16950_s5 + $0x518] sm:$0xff] }
 0x338   : > { %5501 = vmatprep.subr.bf16.mxu1 %v11311_v39  ;;  %v3860_v39 = vld [vmem:[%s16950_s5 + $0x538] sm:$0xff]  ;;  %v11365_v38 = vcombine.high %v3855_v31, %v3859_v32  ;;  %v11364_v33 = vcombine.low %v3855_v31, %v3859_v32 }
 0x339   : > { %v11367_v19 = vcombine.high %v3856_v41, %v3860_v39  ;;  %v11366_v45 = vcombine.low %v3856_v41, %v3860_v39 }
 0x33a   : > { %5420 = vmatpush1.bf16.msra.mxu0 %v11308_v42  ;;  %v3863_v42 = vld [vmem:[%s16950_s5 + $0x550] sm:$0xff] }
 0x33b   : > { %5502 = vmatpush1.bf16.msra.mxu1 %v11310_v46  ;;  %5421 = vmatprep.subr.bf16.mxu0 %v11317_v25  ;;  %v3867_v46 = vld [vmem:[%s16950_s5 + $0x570] sm:$0xff]  ;;  %v3864_v25 = vld [vmem:[%s16950_s5 + $0x558] sm:$0xff] }
 0x33c   : > { %5503 = vmatprep.subr.bf16.mxu1 %v11319_v47  ;;  %v3868_v47 = vld [vmem:[%s16950_s5 + $0x578] sm:$0xff]  ;;  %v11373_v48 = vcombine.high %v3863_v42, %v3867_v46  ;;  %v11372_v54 = vcombine.low %v3863_v42, %v3867_v46 }
 0x33d   : > { %v11375_v50 = vcombine.high %v3864_v25, %v3868_v47  ;;  %v11374_v55 = vcombine.low %v3864_v25, %v3868_v47 }
 0x33e   : > { %5422 = vmatpush1.bf16.msra.mxu0 %v11316_v49  ;;  %v3871_v49 = vld [vmem:[%s16950_s5 + $0x590] sm:$0xff] }
 0x33f   : > { %5504 = vmatpush1.bf16.msra.mxu1 %v11318_v52  ;;  %5423 = vmatprep.subr.bf16.mxu0 %v11325_v53  ;;  %v3875_v52 = vld [vmem:[%s16950_s5 + $0x5b0] sm:$0xff]  ;;  %v3872_v53 = vld [vmem:[%s16950_s5 + $0x598] sm:$0xff] }
 0x340   : > { %5505 = vmatprep.subr.bf16.mxu1 %v11327_v43  ;;  %v3876_v43 = vld [vmem:[%s16950_s5 + $0x5b8] sm:$0xff]  ;;  %v11381_v57 = vcombine.high %v3871_v49, %v3875_v52  ;;  %v11380_v2 = vcombine.low %v3871_v49, %v3875_v52 }
 0x341   : > { %v11383_v58 = vcombine.high %v3872_v53, %v3876_v43  ;;  %v11382_v3 = vcombine.low %v3872_v53, %v3876_v43 }
 0x342   : > { %5424 = vmatpush1.bf16.msra.mxu0 %v11324_v59  ;;  %v3879_v59 = vld [vmem:[%s16950_s5 + $0x5d0] sm:$0xff] }
 0x343   : > { %5506 = vmatpush1.bf16.msra.mxu1 %v11326_v60  ;;  %5434 = vmatprep.subr.bf16.mxu0 %v11333_v61  ;;  %v3883_v60 = vld [vmem:[%s16950_s5 + $0x5f0] sm:$0xff]  ;;  %v3880_v61 = vld [vmem:[%s16950_s5 + $0x5d8] sm:$0xff] }
 0x344   : > { %5516 = vmatprep.subr.bf16.mxu1 %v11335_v63  ;;  %v3884_v63 = vld [vmem:[%s16950_s5 + $0x5f8] sm:$0xff] }
 0x345   : > { %5426 = vmatmul.mubr.bf16.vlgmr.msra.gmra.mrb[16].mxu0 %v14359_v56  ;;  %v11391_v44 = vcombine.high %v3880_v61, %v3884_v63 }
 0x346   : > { %5508 = vmatmul.mubr.bf16.vlgmr.msra.gmra.mrb[16].mxu1 %v14359_v56  ;;  %5435 = vmatpush1.bf16.msra.mxu0 %v11332_v4  ;;  %v3848_v56 = vld [vmem:[%s16950_s5 + $0x4d8] sm:$0xff]  ;;  %v11389_v4 = vcombine.high %v3879_v59, %v3883_v60 }
 0x347   : > { %5466 = vmatprep.mubr.bf16.mxu0 %v14375_v1  ;;  %5517 = vmatpush1.bf16.msra.mxu1 %v11334_v7  ;;  %v11359_v28 = vcombine.high %v3848_v56, %v3852_v22  ;;  %v11358_v37 = vcombine.low %v3848_v56, %v3852_v22  ;;  %v3891_v7 = vld [vmem:[%s16950_s5 + $0x630] sm:$0xff] }
 0x348   : > { %5548 = vmatprep.mubr.bf16.mxu1 %v14375_v1  ;;  %5436 = vmatprep.subr.bf16.mxu0 %v11341_v8  ;;  %v11348_v1 = vcombine.low %v3839_v9, %v3843_v11  ;;  %v3888_v8 = vld [vmem:[%s16950_s5 + $0x618] sm:$0xff]  ;;  %v11388_v11 = vcombine.low %v3879_v59, %v3883_v60  ;;  %v11397_v12 = vcombine.high %v3887_v5, %v3891_v7 }
 0x349   : > { %5518 = vmatprep.subr.bf16.mxu1 %v11343_v0  ;;  %v3892_v9 = vld [vmem:[%s16950_s5 + $0x638] sm:$0xff]  ;;  %v11390_v0 = vcombine.low %v3880_v61, %v3884_v63  ;;  %v11396_v35 = vcombine.low %v3887_v5, %v3891_v7 }
 0x34a   : > { %5437 = vmatpush1.bf16.msra.mxu0 %v11340_v14  ;;  %v11399_v13 = vcombine.high %v3888_v8, %v3892_v9  ;;  %v3895_v14 = vld [vmem:[%s16950_s5 + $0x650] sm:$0xff]  ;;  %v11398_v21 = vcombine.low %v3888_v8, %v3892_v9 }
 0x34b   : > { %5519 = vmatpush1.bf16.msra.mxu1 %v11342_v17  ;;  %5438 = vmatprep.subr.bf16.mxu0 %v11349_v18  ;;  %v3899_v17 = vld [vmem:[%s16950_s5 + $0x670] sm:$0xff]  ;;  %v3896_v18 = vld [vmem:[%s16950_s5 + $0x658] sm:$0xff] }
 0x34c   : > { %5520 = vmatprep.subr.bf16.mxu1 %v11351_v20  ;;  %v3900_v20 = vld [vmem:[%s16950_s5 + $0x678] sm:$0xff]  ;;  %v11405_v56 = vcombine.high %v3895_v14, %v3899_v17  ;;  %v11404_v31 = vcombine.low %v3895_v14, %v3899_v17 }
 0x34d   : > { %v11407_v22 = vcombine.high %v3896_v18, %v3900_v20  ;;  %v11406_v32 = vcombine.low %v3896_v18, %v3900_v20 }
 0x34e   : > { %5439 = vmatpush1.bf16.msra.mxu0 %v11348_v1  ;;  %v3903_v1 = vld [vmem:[%s16950_s5 + $0x690] sm:$0xff] }
 0x34f   : > { %5521 = vmatpush1.bf16.msra.mxu1 %v11350_v23  ;;  %5440 = vmatprep.subr.bf16.mxu0 %v11357_v27  ;;  %v3907_v23 = vld [vmem:[%s16950_s5 + $0x6b0] sm:$0xff]  ;;  %v3904_v27 = vld [vmem:[%s16950_s5 + $0x698] sm:$0xff] }
 0x350   : > { %5522 = vmatprep.subr.bf16.mxu1 %v11359_v28  ;;  %v3908_v28 = vld [vmem:[%s16950_s5 + $0x6b8] sm:$0xff]  ;;  %v11413_v41 = vcombine.high %v3903_v1, %v3907_v23  ;;  %v11412_v42 = vcombine.low %v3903_v1, %v3907_v23 }
 0x351   : > { %v11415_v39 = vcombine.high %v3904_v27, %v3908_v28  ;;  %v11414_v46 = vcombine.low %v3904_v27, %v3908_v28  ;;  %v5559_v27 = vld [vmem:[%s16952_s7 + $0x10] sm:$0xff]  ;;  %v5558_v28 = vld [vmem:[%s16952_s7 + $0x8] sm:$0xff] }
 0x352   : > { %5441 = vmatpush1.bf16.msra.mxu0 %v11356_v34  ;;  %v3911_v34 = vld [vmem:[%s16950_s5 + $0x6d0] sm:$0xff] }
 0x353   : > { %5523 = vmatpush1.bf16.msra.mxu1 %v11358_v37  ;;  %5442 = vmatprep.subr.bf16.mxu0 %v11365_v38  ;;  %v3915_v37 = vld [vmem:[%s16950_s5 + $0x6f0] sm:$0xff]  ;;  %v3912_v38 = vld [vmem:[%s16950_s5 + $0x6d8] sm:$0xff] }
 0x354   : > { %5524 = vmatprep.subr.bf16.mxu1 %v11367_v19  ;;  %v3916_v19 = vld [vmem:[%s16950_s5 + $0x6f8] sm:$0xff]  ;;  %v11421_v25 = vcombine.high %v3911_v34, %v3915_v37  ;;  %v11420_v49 = vcombine.low %v3911_v34, %v3915_v37 }
 0x355   : > { %v11423_v47 = vcombine.high %v3912_v38, %v3916_v19  ;;  %v11422_v52 = vcombine.low %v3912_v38, %v3916_v19  ;;  %v5560_v37 = vld [vmem:[%s16952_s7 + $0x18] sm:$0xff] }
 0x356   : > { %5443 = vmatpush1.bf16.msra.mxu0 %v11364_v33  ;;  %v3919_v33 = vld [vmem:[%s16950_s5 + $0x710] sm:$0xff]  ;;  %v5568_v38 = vld [vmem:[%s16952_s7 + $0x58] sm:$0xff] }
 0x357   : > { %5525 = vmatpush1.bf16.msra.mxu1 %v11366_v45  ;;  %5444 = vmatprep.subr.bf16.mxu0 %v11373_v48  ;;  %v3923_v45 = vld [vmem:[%s16950_s5 + $0x730] sm:$0xff]  ;;  %v3920_v48 = vld [vmem:[%s16950_s5 + $0x718] sm:$0xff] }
 0x358   : > { %5526 = vmatprep.subr.bf16.mxu1 %v11375_v50  ;;  %v3924_v50 = vld [vmem:[%s16950_s5 + $0x738] sm:$0xff]  ;;  %v11429_v53 = vcombine.high %v3919_v33, %v3923_v45  ;;  %v11428_v59 = vcombine.low %v3919_v33, %v3923_v45 }
 0x359   : > { %v11431_v43 = vcombine.high %v3920_v48, %v3924_v50  ;;  %v11430_v60 = vcombine.low %v3920_v48, %v3924_v50 }
 0x35a   : > { %5445 = vmatpush1.bf16.msra.mxu0 %v11372_v54  ;;  %v3927_v54 = vld [vmem:[%s16950_s5 + $0x750] sm:$0xff] }
 0x35b   : > { %5527 = vmatpush1.bf16.msra.mxu1 %v11374_v55  ;;  %5446 = vmatprep.subr.bf16.mxu0 %v11381_v57  ;;  %v3931_v55 = vld [vmem:[%s16950_s5 + $0x770] sm:$0xff]  ;;  %v3928_v57 = vld [vmem:[%s16950_s5 + $0x758] sm:$0xff] }
 0x35c   : > { %5528 = vmatprep.subr.bf16.mxu1 %v11383_v58  ;;  %v3932_v58 = vld [vmem:[%s16950_s5 + $0x778] sm:$0xff]  ;;  %v11437_v61 = vcombine.high %v3927_v54, %v3931_v55  ;;  %v11436_v5 = vcombine.low %v3927_v54, %v3931_v55 }
 0x35d   : > { %v11439_v63 = vcombine.high %v3928_v57, %v3932_v58  ;;  %v11438_v7 = vcombine.low %v3928_v57, %v3932_v58 }
 0x35e   : > { %5447 = vmatpush1.bf16.msra.mxu0 %v11380_v2  ;;  %v3935_v2 = vld [vmem:[%s16950_s5 + $0x790] sm:$0xff] }
 0x35f   : > { %5529 = vmatpush1.bf16.msra.mxu1 %v11382_v3  ;;  %5448 = vmatprep.subr.bf16.mxu0 %v11389_v4  ;;  %v3939_v3 = vld [vmem:[%s16950_s5 + $0x7b0] sm:$0xff]  ;;  %v3936_v4 = vld [vmem:[%s16950_s5 + $0x798] sm:$0xff] }
 0x360   : > { %5530 = vmatprep.subr.bf16.mxu1 %v11391_v44  ;;  %v3940_v44 = vld [vmem:[%s16950_s5 + $0x7b8] sm:$0xff]  ;;  %v11445_v8 = vcombine.high %v3935_v2, %v3939_v3  ;;  %v11444_v14 = vcombine.low %v3935_v2, %v3939_v3  ;;  %v5569_v2 = vld [vmem:[%s16952_s7 + $0x60] sm:$0xff]  ;;  %v5563_v3 = vld [vmem:[%s16952_s7 + $0x30] sm:$0xff] }
 0x361   : > { %v11447_v9 = vcombine.high %v3936_v4, %v3940_v44  ;;  %v11446_v17 = vcombine.low %v3936_v4, %v3940_v44 }
 0x362   : > { %5449 = vmatpush1.bf16.msra.mxu0 %v11388_v11  ;;  %v3943_v11 = vld [vmem:[%s16950_s5 + $0x7d0] sm:$0xff] }
 0x363   : > { %5531 = vmatpush1.bf16.msra.mxu1 %v11390_v0  ;;  %5450 = vmatprep.subr.bf16.mxu0 %v11397_v12  ;;  %v3947_v0 = vld [vmem:[%s16950_s5 + $0x7f0] sm:$0xff]  ;;  %v3944_v12 = vld [vmem:[%s16950_s5 + $0x7d8] sm:$0xff] }
 0x364   : > { %5532 = vmatprep.subr.bf16.mxu1 %v11399_v13  ;;  %v3948_v13 = vld [vmem:[%s16950_s5 + $0x7f8] sm:$0xff]  ;;  %v11453_v18 = vcombine.high %v3943_v11, %v3947_v0 }
 0x365   : > { %v11455_v20 = vcombine.high %v3944_v12, %v3948_v13 }
 0x366   : > { %5451 = vmatpush1.bf16.msra.mxu0 %v11396_v35  ;;  %v11452_v35 = vcombine.low %v3943_v11, %v3947_v0 }
 0x367   : > { %5533 = vmatpush1.bf16.msra.mxu1 %v11398_v21  ;;  %5452 = vmatprep.subr.bf16.mxu0 %v11405_v56  ;;  %v11454_v21 = vcombine.low %v3944_v12, %v3948_v13  ;;  %v5557_v56 = vld [vmem:[%s16952_s7] sm:$0xff]  ;;  %v5564_v13 = vld [vmem:[%s16952_s7 + $0x38] sm:$0xff] }
 0x368   : > { %5534 = vmatprep.subr.bf16.mxu1 %v11407_v22  ;;  %v5565_v22 = vld [vmem:[%s16952_s7 + $0x40] sm:$0xff] }
 0x36a   : > { %5453 = vmatpush1.bf16.msra.mxu0 %v11404_v31 }
 0x36b   : > { %5535 = vmatpush1.bf16.msra.mxu1 %v11406_v32  ;;  %5454 = vmatprep.subr.bf16.mxu0 %v11413_v41 }
 0x36c   : > { %5536 = vmatprep.subr.bf16.mxu1 %v11415_v39  ;;  %v5566_v39 = vld [vmem:[%s16952_s7 + $0x48] sm:$0xff] }
 0x36e   : > { %5455 = vmatpush1.bf16.msra.mxu0 %v11412_v42 }
 0x36f   : > { %5537 = vmatpush1.bf16.msra.mxu1 %v11414_v46  ;;  %5456 = vmatprep.subr.bf16.mxu0 %v11421_v25 }
 0x370   : > { %5538 = vmatprep.subr.bf16.mxu1 %v11423_v47 }
 0x372   : > { %5457 = vmatpush1.bf16.msra.mxu0 %v11420_v49 }
 0x373   : > { %5539 = vmatpush1.bf16.msra.mxu1 %v11422_v52  ;;  %5458 = vmatprep.subr.bf16.mxu0 %v11429_v53 }
 0x374   : > { %5540 = vmatprep.subr.bf16.mxu1 %v11431_v43 }
 0x376   : > { %5459 = vmatpush1.bf16.msra.mxu0 %v11428_v59 }
 0x377   : > { %5541 = vmatpush1.bf16.msra.mxu1 %v11430_v60  ;;  %5460 = vmatprep.subr.bf16.mxu0 %v11437_v61  ;;  %v14969_v60 = vld [vmem:[%s16953_s8] sm:$0xff]  }
 0x378   : > { %5542 = vmatprep.subr.bf16.mxu1 %v11439_v63  ;;  %v5561_v63 = vld [vmem:[%s16952_s7 + $0x20] sm:$0xff] }
 0x37a   : > { %5461 = vmatpush1.bf16.msra.mxu0 %v11436_v5  ;;  %v5571_v5 = vld [vmem:[%s16952_s7 + $0x70] sm:$0xff] }
 0x37b   : > { %5543 = vmatpush1.bf16.msra.mxu1 %v11438_v7  ;;  %5462 = vmatprep.subr.bf16.mxu0 %v11445_v8  ;;  %v5562_v8 = vld [vmem:[%s16952_s7 + $0x28] sm:$0xff] }
 0x37c   : > { %5544 = vmatprep.subr.bf16.mxu1 %v11447_v9  ;;  %v5570_v9 = vld [vmem:[%s16952_s7 + $0x68] sm:$0xff] }
 0x37e   : > { %5463 = vmatpush1.bf16.msra.mxu0 %v11444_v14  ;;  %v5572_v14 = vld [vmem:[%s16952_s7 + $0x78] sm:$0xff] }
 0x37f   : > { %5545 = vmatpush1.bf16.msra.mxu1 %v11446_v17  ;;  %5464 = vmatprep.subr.bf16.mxu0 %v11453_v18 }
 0x380   : > { %5546 = vmatprep.subr.bf16.mxu1 %v11455_v20 }
 0x382   : > { %5465 = vmatpush1.bf16.msra.mxu0 %v11452_v35 }
 0x383   : > { %5547 = vmatpush1.bf16.msra.mxu1 %v11454_v21 }
 0x385   : > { %5467 = vmatmul.mubr.bf16.vlgmr.msra.gmra.mrb[16].mxu0 %v14564_v36 }
 0x386   : > { %5549 = vmatmul.mubr.bf16.vlgmr.msra.gmra.mrb[16].mxu1 %v14564_v36  ;;  %5714 = vmatprep.mubr.bf16.mxu0 %v12721_v6  ;;  %v5567_v36 = vld [vmem:[%s16952_s7 + $0x50] sm:$0xff] }
 0x387   : > { %5757 = vmatprep.mubr.bf16.mxu1 %v12721_v6 }
 0x3d8   : > { %v5304_v1 = vpop.f32.mrb[12].mxu0  ;;  %v5386_v23 = vpop.f32.mrb[12].mxu1 }
 0x3d9   : > { %v5576_v31 = vrot.slane %v5304_v1, %v13012_v62  ;;  %v5584_v32 = vrot.slane %v5386_v23, %v13012_v62  ;;  %v5306_v41 = vpop.f32.mrb[13].mxu0  ;;  %v5388_v34 = vpop.f32.mrb[13].mxu1  ;;  %v5882_v1 = vld [vmem:[%s16954_s9 + $0x20] sm:$0xff] }
 0x3da   : > { %v5580_v19 = vrot.slane %v5306_v41, %v13012_v62  ;;  %v5588_v42 = vrot.slane %v5388_v34, %v13012_v62  ;;  %v5308_v46 = vpop.f32.mrb[14].mxu0  ;;  %v5390_v25 = vpop.f32.mrb[14].mxu1  ;;  %v5883_v41 = vld [vmem:[%s16954_s9 + $0x28] sm:$0xff] }
 0x3db   : > { %v5605_v47 = vadd.f32 %v5576_v31, %v5557_v56  ;;  %v5613_v33 = vadd.f32 %v5576_v31, %v5565_v22  ;;  %v5607_v45 = vadd.f32 %v5584_v32, %v5559_v27  ;;  %v5615_v48 = vadd.f32 %v5584_v32, %v5567_v36  ;;  %v5309_v50 = vpop.f32.mrb[15].mxu0  ;;  %v5391_v49 = vpop.f32.mrb[15].mxu1  ;;  %v5878_v22 = vld [vmem:[%s16954_s9] sm:$0xff]  ;;  %v5879_v32 = vld [vmem:[%s16954_s9 + $0x8] sm:$0xff] }
 0x3dc   : > { %v5606_v52 = vadd.f32 %v5580_v19, %v5558_v28  ;;  %v5614_v53 = vadd.f32 %v5580_v19, %v5566_v39  ;;  %v5608_v43 = vadd.f32 %v5588_v42, %v5560_v37  ;;  %v5616_v54 = vadd.f32 %v5588_v42, %v5568_v38  ;;  %v5886_v25 = vld [vmem:[%s16954_s9 + $0x40] sm:$0xff] }
 0x3dd   : > { %v5623_v58 = vpack.c.bf16 %v5613_v33, %v5605_v47  ;;  %v5625_v59 = vpack.c.bf16 %v5615_v48, %v5607_v45  ;;  %v11462_v38 = vcombine.high %v5878_v22, %v5882_v1  ;;  %v11464_v46 = vcombine.high %v5879_v32, %v5883_v41  ;;  %v5890_v47 = vld [vmem:[%s16954_s9 + $0x60] sm:$0xff]  ;;  %v5887_v45 = vld [vmem:[%s16954_s9 + $0x48] sm:$0xff] }
 0x3de   : > { %v5624_v55 = vpack.c.bf16 %v5614_v53, %v5606_v52  ;;  %v5626_v57 = vpack.c.bf16 %v5616_v54, %v5608_v43  ;;  %v5891_v48 = vld [vmem:[%s16954_s9 + $0x68] sm:$0xff]  ;;  %v11461_v50 = vcombine.low %v5878_v22, %v5882_v1  ;;  %v11463_v49 = vcombine.low %v5879_v32, %v5883_v41  ;;  %v5894_v43 = vld [vmem:[%s16954_s9 + $0x80] sm:$0xff] }
 0x3df   : > { %v11470_v52 = vcombine.high %v5886_v25, %v5890_v47  ;;  %v11472_v53 = vcombine.high %v5887_v45, %v5891_v48  ;;  %v5898_v54 = vld [vmem:[%s16954_s9 + $0xa0] sm:$0xff]  ;;  %v5931_v32 = vld [vmem:[%s16954_s9 + $0x1a8] sm:$0xff] }
 0x3e0   : > { %5682 = vmatprep.subr.bf16.mxu0 %v5624_v55  ;;  %5725 = vmatprep.subr.bf16.mxu1 %v5626_v57  ;;  %v5895_v55 = vld [vmem:[%s16954_s9 + $0x88] sm:$0xff] }
 0x3e1   : > { %5683 = vmatpush1.bf16.msra.mxu0 %v5623_v58  ;;  %5726 = vmatpush1.bf16.msra.mxu1 %v5625_v59  ;;  %v5899_v57 = vld [vmem:[%s16954_s9 + $0xa8] sm:$0xff]  ;;  %v11469_v58 = vcombine.low %v5886_v25, %v5890_v47  ;;  %v11471_v59 = vcombine.low %v5887_v45, %v5891_v48  ;;  %v5942_v48 = vld [vmem:[%s16954_s9 + $0x200] sm:$0xff] }
 0x3e4   : > { %11457 = vmatmul.mubr.msk.bf16.vlgmr.msra.gmra.mrb[20].mxu0 %vm5678_vm4, %v14969_v60  ;;  %11458 = vmatmul.mubr.msk.bf16.vlgmr.msra.gmra.mrb[20].mxu1 %vm5678_vm4, %v14969_v60 }
 0x3e5   : > { %5800 = vmatprep.mubr.bf16.mxu0 %v12721_v6  ;;  %5843 = vmatprep.mubr.bf16.mxu1 %v12721_v6 }
 0x458   : > { %v5468_v61 = vpop.f32.mrb[16].mxu0 }
 0x459   : > { %v5592_v4 = vrot.slane %v5468_v61, %v13012_v62  ;;  %v5550_v44 = vpop.f32.mrb[16].mxu1  ;;  %v5470_v7 = vpop.f32.mrb[17].mxu0  ;;  %v11478_v61 = vcombine.high %v5894_v43, %v5898_v54 }
 0x45a   : > { %v5600_v11 = vrot.slane %v5550_v44, %v13012_v62  ;;  %v5596_v0 = vrot.slane %v5470_v7, %v13012_v62  ;;  %v5552_v12 = vpop.f32.mrb[17].mxu1  ;;  %v5472_v17 = vpop.f32.mrb[18].mxu0  ;;  %v11477_v44 = vcombine.low %v5894_v43, %v5898_v54 }
 0x45b   : > { %v5609_v18 = vadd.f32 %v5592_v4, %v5561_v63  ;;  %v5617_v20 = vadd.f32 %v5592_v4, %v5569_v2  ;;  %v5604_v35 = vrot.slane %v5552_v12, %v13012_v62  ;;  %v5554_v21 = vpop.f32.mrb[18].mxu1  ;;  %v5473_v56 = vpop.f32.mrb[19].mxu0  ;;  %v11480_v63 = vcombine.high %v5895_v55, %v5899_v57  ;;  %v5902_v2 = vld [vmem:[%s16954_s9 + $0xc0] sm:$0xff]  ;;  %v5907_v4 = vld [vmem:[%s16954_s9 + $0xe8] sm:$0xff] }
 0x45c   : > { %v5611_v23 = vadd.f32 %v5600_v11, %v5563_v3  ;;  %v5619_v27 = vadd.f32 %v5600_v11, %v5571_v5  ;;  %v5610_v36 = vadd.f32 %v5596_v0, %v5562_v8  ;;  %v5618_v28 = vadd.f32 %v5596_v0, %v5570_v9  ;;  %v5555_v31 = vpop.f32.mrb[19].mxu1  ;;  %v5906_v3 = vld [vmem:[%s16954_s9 + $0xe0] sm:$0xff]  ;;  %v5911_v0 = vld [vmem:[%s16954_s9 + $0x108] sm:$0xff] }
 0x45d   : > { %v5612_v39 = vadd.f32 %v5604_v35, %v5564_v13  ;;  %v5620_v34 = vadd.f32 %v5604_v35, %v5572_v14  ;;  %v5627_v19 = vpack.c.bf16 %v5617_v20, %v5609_v18  ;;  %v11479_v5 = vcombine.low %v5895_v55, %v5899_v57  ;;  %v5910_v9 = vld [vmem:[%s16954_s9 + $0x100] sm:$0xff]  ;;  %v5915_v12 = vld [vmem:[%s16954_s9 + $0x128] sm:$0xff] }
 0x45e   : > { %v5628_v37 = vpack.c.bf16 %v5618_v28, %v5610_v36  ;;  %v5629_v33 = vpack.c.bf16 %v5619_v27, %v5611_v23  ;;  %v11486_v7 = vcombine.high %v5902_v2, %v5906_v3  ;;  %v5914_v11 = vld [vmem:[%s16954_s9 + $0x120] sm:$0xff]  ;;  %v11485_v13 = vcombine.low %v5902_v2, %v5906_v3  ;;  %v5919_v21 = vld [vmem:[%s16954_s9 + $0x148] sm:$0xff] }
 0x45f   : > { %v5630_v42 = vpack.c.bf16 %v5620_v34, %v5612_v39  ;;  %v11494_v17 = vcombine.high %v5910_v9, %v5914_v11  ;;  %v11496_v18 = vcombine.high %v5911_v0, %v5915_v12  ;;  %v5918_v20 = vld [vmem:[%s16954_s9 + $0x140] sm:$0xff]  ;;  %v5923_v56 = vld [vmem:[%s16954_s9 + $0x168] sm:$0xff]  ;;  %v11493_v22 = vcombine.low %v5910_v9, %v5914_v11 }
 0x460   : > { %5768 = vmatprep.subr.bf16.mxu0 %v5628_v37  ;;  %v5922_v35 = vld [vmem:[%s16954_s9 + $0x160] sm:$0xff]  ;;  %v11495_v1 = vcombine.low %v5911_v0, %v5915_v12  ;;  %v11504_v27 = vcombine.high %v5919_v21, %v5923_v56  ;;  %v5927_v31 = vld [vmem:[%s16954_s9 + $0x188] sm:$0xff]  ;;  %v11503_v39 = vcombine.low %v5919_v21, %v5923_v56 }
 0x461   : > { %5811 = vmatprep.subr.bf16.mxu1 %v5630_v42  ;;  %5769 = vmatpush1.bf16.msra.mxu0 %v5627_v19  ;;  %v11502_v23 = vcombine.high %v5918_v20, %v5922_v35  ;;  %v5926_v36 = vld [vmem:[%s16954_s9 + $0x180] sm:$0xff]  ;;  %v11501_v41 = vcombine.low %v5918_v20, %v5922_v35  ;;  %v11512_v37 = vcombine.high %v5927_v31, %v5931_v32  ;;  %v5935_v42 = vld [vmem:[%s16954_s9 + $0x1c8] sm:$0xff] }
 0x462   : > { %5812 = vmatpush1.bf16.msra.mxu1 %v5629_v33  ;;  %8950 = vmatprep.subr.bf16.mxu0 %v11462_v38  ;;  %v5930_v28 = vld [vmem:[%s16954_s9 + $0x1a0] sm:$0xff]  ;;  %v11511_v47 = vcombine.low %v5927_v31, %v5931_v32 }
 0x463   : > { %9122 = vmatprep.subr.bf16.mxu1 %v11464_v46  ;;  %v11510_v34 = vcombine.high %v5926_v36, %v5930_v28  ;;  %v5934_v38 = vld [vmem:[%s16954_s9 + $0x1c0] sm:$0xff]  ;;  %v5939_v46 = vld [vmem:[%s16954_s9 + $0x1e8] sm:$0xff]  ;;  %v11509_v25 = vcombine.low %v5926_v36, %v5930_v28 }
 0x464   : > { %11459 = vmatmul.mubr.msk.bf16.vlgmr.msra.gmra.mrb[24].mxu0 %vm5678_vm4, %v14969_v60  ;;  %v5938_v19 = vld [vmem:[%s16954_s9 + $0x1e0] sm:$0xff]  ;;  %v11520_v45 = vcombine.high %v5935_v42, %v5939_v46  ;;  %v11519_v43 = vcombine.low %v5935_v42, %v5939_v46 }
 0x465   : > { %11460 = vmatmul.mubr.msk.bf16.vlgmr.msra.gmra.mrb[24].mxu1 %vm5678_vm4, %v14969_v60  ;;  %8951 = vmatpush1.bf16.msra.mxu0 %v11461_v50  ;;  %v5903_v60 = vld [vmem:[%s16954_s9 + $0xc8] sm:$0xff]  ;;  %v11518_v33 = vcombine.high %v5934_v38, %v5938_v19  ;;  %v5946_v50 = vld [vmem:[%s16954_s9 + $0x220] sm:$0xff] }
 0x466   : > { %9123 = vmatpush1.bf16.msra.mxu1 %v11463_v49  ;;  %8952 = vmatprep.subr.bf16.mxu0 %v11470_v52  ;;  %v11488_v8 = vcombine.high %v5903_v60, %v5907_v4  ;;  %v11487_v14 = vcombine.low %v5903_v60, %v5907_v4  ;;  %v5943_v49 = vld [vmem:[%s16954_s9 + $0x208] sm:$0xff]  ;;  %v11526_v54 = vcombine.high %v5942_v48, %v5946_v50  ;;  %v5950_v57 = vld [vmem:[%s16954_s9 + $0x240] sm:$0xff] }
 0x467   : > { %9124 = vmatprep.subr.bf16.mxu1 %v11472_v53  ;;  %v5947_v52 = vld [vmem:[%s16954_s9 + $0x228] sm:$0xff]  ;;  %v11517_v53 = vcombine.low %v5934_v38, %v5938_v19  ;;  %v5958_v4 = vld [vmem:[%s16954_s9 + $0x280] sm:$0xff] }
 0x468   : > { %v11528_v55 = vcombine.high %v5943_v49, %v5947_v52  ;;  %v11527_v2 = vcombine.low %v5943_v49, %v5947_v52  ;;  %v5966_v12 = vld [vmem:[%s16954_s9 + $0x2c0] sm:$0xff] }
 0x469   : > { %8953 = vmatpush1.bf16.msra.mxu0 %v11469_v58  ;;  %v5954_v58 = vld [vmem:[%s16954_s9 + $0x260] sm:$0xff] }
 0x46a   : > { %9125 = vmatpush1.bf16.msra.mxu1 %v11471_v59  ;;  %8954 = vmatprep.subr.bf16.mxu0 %v11478_v61  ;;  %v5951_v59 = vld [vmem:[%s16954_s9 + $0x248] sm:$0xff]  ;;  %v11534_v3 = vcombine.high %v5950_v57, %v5954_v58  ;;  %v5974_v56 = vld [vmem:[%s16954_s9 + $0x300] sm:$0xff] }
 0x46b   : > { %9126 = vmatprep.subr.bf16.mxu1 %v11480_v63  ;;  %v5955_v61 = vld [vmem:[%s16954_s9 + $0x268] sm:$0xff]  ;;  %v11525_v63 = vcombine.low %v5942_v48, %v5946_v50  ;;  %v5982_v32 = vld [vmem:[%s16954_s9 + $0x340] sm:$0xff] }
 0x46c   : > { %v11536_v60 = vcombine.high %v5951_v59, %v5955_v61  ;;  %v11535_v9 = vcombine.low %v5951_v59, %v5955_v61  ;;  %v5990_v46 = vld [vmem:[%s16954_s9 + $0x380] sm:$0xff] }
 0x46d   : > { %8955 = vmatpush1.bf16.msra.mxu0 %v11477_v44  ;;  %v5962_v44 = vld [vmem:[%s16954_s9 + $0x2a0] sm:$0xff] }
 0x46e   : > { %9127 = vmatpush1.bf16.msra.mxu1 %v11479_v5  ;;  %8956 = vmatprep.subr.bf16.mxu0 %v11486_v7  ;;  %v5959_v5 = vld [vmem:[%s16954_s9 + $0x288] sm:$0xff]  ;;  %v11542_v11 = vcombine.high %v5958_v4, %v5962_v44  ;;  %v5998_v52 = vld [vmem:[%s16954_s9 + $0x3c0] sm:$0xff] }
 0x46f   : > { %9128 = vmatprep.subr.bf16.mxu1 %v11488_v8  ;;  %v5963_v7 = vld [vmem:[%s16954_s9 + $0x2a8] sm:$0xff]  ;;  %v11533_v8 = vcombine.low %v5950_v57, %v5954_v58  ;;  %v15204_v61 = vld [vmem:[%s16954_s9 + $0x400] sm:$0xff] }
 0x470   : > { %v11544_v0 = vcombine.high %v5959_v5, %v5963_v7  ;;  %v11543_v20 = vcombine.low %v5959_v5, %v5963_v7  ;;  %v15228_v7 = vld [vmem:[%s16951_s6] sm:$0xff] }
 0x471   : > { %8957 = vmatpush1.bf16.msra.mxu0 %v11485_v13  ;;  %v5970_v13 = vld [vmem:[%s16954_s9 + $0x2e0] sm:$0xff] }
 0x472   : > { %9129 = vmatpush1.bf16.msra.mxu1 %v11487_v14  ;;  %8958 = vmatprep.subr.bf16.mxu0 %v11494_v17  ;;  %v5967_v14 = vld [vmem:[%s16954_s9 + $0x2c8] sm:$0xff]  ;;  %v11550_v35 = vcombine.high %v5966_v12, %v5970_v13 }
 0x473   : > { %9130 = vmatprep.subr.bf16.mxu1 %v11496_v18  ;;  %v5971_v17 = vld [vmem:[%s16954_s9 + $0x2e8] sm:$0xff]  ;;  %v11541_v18 = vcombine.low %v5958_v4, %v5962_v44 }
 0x474   : > { %v11552_v21 = vcombine.high %v5967_v14, %v5971_v17  ;;  %v11551_v36 = vcombine.low %v5967_v14, %v5971_v17 }
 0x475   : > { %8959 = vmatpush1.bf16.msra.mxu0 %v11493_v22  ;;  %v5978_v22 = vld [vmem:[%s16954_s9 + $0x320] sm:$0xff] }
 0x476   : > { %9131 = vmatpush1.bf16.msra.mxu1 %v11495_v1  ;;  %8960 = vmatprep.subr.bf16.mxu0 %v11502_v23  ;;  %v5975_v1 = vld [vmem:[%s16954_s9 + $0x308] sm:$0xff]  ;;  %v11558_v28 = vcombine.high %v5974_v56, %v5978_v22 }
 0x477   : > { %9132 = vmatprep.subr.bf16.mxu1 %v11504_v27  ;;  %v5979_v23 = vld [vmem:[%s16954_s9 + $0x328] sm:$0xff]  ;;  %v11549_v27 = vcombine.low %v5966_v12, %v5970_v13 }
 0x478   : > { %v11560_v31 = vcombine.high %v5975_v1, %v5979_v23  ;;  %v11559_v38 = vcombine.low %v5975_v1, %v5979_v23 }
 0x479   : > { %8961 = vmatpush1.bf16.msra.mxu0 %v11501_v41  ;;  %v5986_v41 = vld [vmem:[%s16954_s9 + $0x360] sm:$0xff] }
 0x47a   : > { %9133 = vmatpush1.bf16.msra.mxu1 %v11503_v39  ;;  %8962 = vmatprep.subr.bf16.mxu0 %v11510_v34  ;;  %v5983_v39 = vld [vmem:[%s16954_s9 + $0x348] sm:$0xff]  ;;  %v11566_v19 = vcombine.high %v5982_v32, %v5986_v41 }
 0x47b   : > { %9134 = vmatprep.subr.bf16.mxu1 %v11512_v37  ;;  %v5987_v34 = vld [vmem:[%s16954_s9 + $0x368] sm:$0xff]  ;;  %v11557_v37 = vcombine.low %v5974_v56, %v5978_v22 }
 0x47c   : > { %v11568_v42 = vcombine.high %v5983_v39, %v5987_v34  ;;  %v11567_v48 = vcombine.low %v5983_v39, %v5987_v34 }
 0x47d   : > { %8963 = vmatpush1.bf16.msra.mxu0 %v11509_v25  ;;  %v5994_v25 = vld [vmem:[%s16954_s9 + $0x3a0] sm:$0xff] }
 0x47e   : > { %9135 = vmatpush1.bf16.msra.mxu1 %v11511_v47  ;;  %8964 = vmatprep.subr.bf16.mxu0 %v11518_v33  ;;  %v5991_v47 = vld [vmem:[%s16954_s9 + $0x388] sm:$0xff]  ;;  %v11574_v50 = vcombine.high %v5990_v46, %v5994_v25 }
 0x47f   : > { %9136 = vmatprep.subr.bf16.mxu1 %v11520_v45  ;;  %v5995_v33 = vld [vmem:[%s16954_s9 + $0x3a8] sm:$0xff]  ;;  %v11565_v45 = vcombine.low %v5982_v32, %v5986_v41 }
 0x480   : > { %v11576_v49 = vcombine.high %v5991_v47, %v5995_v33  ;;  %v11575_v57 = vcombine.low %v5991_v47, %v5995_v33  ;;  %v6019_v47 = vld [vmem:[%s16954_s9 + $0x468] sm:$0xff] }
 0x481   : > { %8965 = vmatpush1.bf16.msra.mxu0 %v11517_v53  ;;  %v6002_v53 = vld [vmem:[%s16954_s9 + $0x3e0] sm:$0xff] }
 0x482   : > { %9137 = vmatpush1.bf16.msra.mxu1 %v11519_v43  ;;  %8966 = vmatprep.subr.bf16.mxu0 %v11526_v54  ;;  %v5999_v43 = vld [vmem:[%s16954_s9 + $0x3c8] sm:$0xff]  ;;  %v11582_v58 = vcombine.high %v5998_v52, %v6002_v53 }
 0x483   : > { %9138 = vmatprep.subr.bf16.mxu1 %v11528_v55  ;;  %v6003_v54 = vld [vmem:[%s16954_s9 + $0x3e8] sm:$0xff]  ;;  %v11573_v55 = vcombine.low %v5990_v46, %v5994_v25  ;;  %v6018_v46 = vld [vmem:[%s16954_s9 + $0x460] sm:$0xff] }
 0x484   : > { %v11584_v59 = vcombine.high %v5999_v43, %v6003_v54  ;;  %v11583_v4 = vcombine.low %v5999_v43, %v6003_v54  ;;  %v6015_v25 = vld [vmem:[%s16954_s9 + $0x448] sm:$0xff] }
 0x485   : > { %8967 = vmatpush1.bf16.msra.mxu0 %v11525_v63  ;;  %v15209_v63 = vld [vmem:[%s16954_s9 + $0x420] sm:$0xff]  ;;  %v11600_v54 = vcombine.high %v6015_v25, %v6019_v47 }
 0x486   : > { %9139 = vmatpush1.bf16.msra.mxu1 %v11527_v2  ;;  %8968 = vmatprep.subr.bf16.mxu0 %v11534_v3  ;;  %v15214_v2 = vld [vmem:[%s16954_s9 + $0x408] sm:$0xff]  ;;  %v11590_v44 = vcombine.high %v15204_v61, %v15209_v63 }
 0x487   : > { %9140 = vmatprep.subr.bf16.mxu1 %v11536_v60  ;;  %v15219_v3 = vld [vmem:[%s16954_s9 + $0x428] sm:$0xff]  ;;  %v11581_v60 = vcombine.low %v5998_v52, %v6002_v53 }
 0x488   : > { %v11592_v5 = vcombine.high %v15214_v2, %v15219_v3  ;;  %v11591_v52 = vcombine.low %v15214_v2, %v15219_v3 }
 0x489   : > { %8969 = vmatpush1.bf16.msra.mxu0 %v11533_v8  ;;  %v5636_v8 = vrot.slane %v15228_v7, %v13012_v62 }
 0x48a   : > { %9141 = vmatpush1.bf16.msra.mxu1 %v11535_v9  ;;  %8970 = vmatprep.subr.bf16.mxu0 %v11542_v11  ;;  %v5644_v9 = vrot.slane %v15228_v7, %v13056_v29  ;;  %v5640_v11 = vrot.slane %v15228_v7, %v12866_v26 }
 0x48b   : > { %9142 = vmatprep.subr.bf16.mxu1 %v11544_v0  ;;  %v5648_v0 = vrot.slane %v15228_v7, %v13538_v51 }
 0x48d   : > { %8971 = vmatpush1.bf16.msra.mxu0 %v11541_v18 }
 0x48e   : > { %9143 = vmatpush1.bf16.msra.mxu1 %v11543_v20  ;;  %8972 = vmatprep.subr.bf16.mxu0 %v11550_v35 }
 0x48f   : > { %9144 = vmatprep.subr.bf16.mxu1 %v11552_v21 }
 0x491   : > { %8973 = vmatpush1.bf16.msra.mxu0 %v11549_v27 }
 0x492   : > { %9145 = vmatpush1.bf16.msra.mxu1 %v11551_v36  ;;  %8974 = vmatprep.subr.bf16.mxu0 %v11558_v28 }
 0x493   : > { %9146 = vmatprep.subr.bf16.mxu1 %v11560_v31 }
 0x495   : > { %8975 = vmatpush1.bf16.msra.mxu0 %v11557_v37  ;;  %v6014_v37 = vld [vmem:[%s16954_s9 + $0x440] sm:$0xff] }
 0x496   : > { %9147 = vmatpush1.bf16.msra.mxu1 %v11559_v38  ;;  %8976 = vmatprep.subr.bf16.mxu0 %v11566_v19  ;;  %v11598_v43 = vcombine.high %v6014_v37, %v6018_v46 }
 0x497   : > { %9148 = vmatprep.subr.bf16.mxu1 %v11568_v42 }
 0x499   : > { %8977 = vmatpush1.bf16.msra.mxu0 %v11565_v45 }
 0x49a   : > { %9149 = vmatpush1.bf16.msra.mxu1 %v11567_v48  ;;  %8978 = vmatprep.subr.bf16.mxu0 %v11574_v50 }
 0x49b   : > { %9150 = vmatprep.subr.bf16.mxu1 %v11576_v49  ;;  %v11589_v49 = vcombine.low %v15204_v61, %v15209_v63  ;;  %v11597_v61 = vcombine.low %v6014_v37, %v6018_v46  ;;  %v11599_v63 = vcombine.low %v6015_v25, %v6019_v47  ;;  %v6062_v46 = vld [vmem:[%s16954_s9 + $0x5c0] sm:$0xff]  ;;  %v6063_v47 = vld [vmem:[%s16954_s9 + $0x5c8] sm:$0xff] }
 0x49c   : > { %v6066_v25 = vld [vmem:[%s16954_s9 + $0x5e0] sm:$0xff] }
 0x49d   : > { %8979 = vmatpush1.bf16.msra.mxu0 %v11573_v55  ;;  %v6022_v55 = vld [vmem:[%s16954_s9 + $0x480] sm:$0xff] }
 0x49e   : > { %9151 = vmatpush1.bf16.msra.mxu1 %v11575_v57  ;;  %8980 = vmatprep.subr.bf16.mxu0 %v11582_v58  ;;  %v6026_v57 = vld [vmem:[%s16954_s9 + $0x4a0] sm:$0xff]  ;;  %v6023_v58 = vld [vmem:[%s16954_s9 + $0x488] sm:$0xff] }
 0x49f   : > { %9152 = vmatprep.subr.bf16.mxu1 %v11584_v59  ;;  %v6027_v59 = vld [vmem:[%s16954_s9 + $0x4a8] sm:$0xff]  ;;  %v11606_v2 = vcombine.high %v6022_v55, %v6026_v57 }
 0x4a0   : > { %v11608_v3 = vcombine.high %v6023_v58, %v6027_v59 }
 0x4a1   : > { %8981 = vmatpush1.bf16.msra.mxu0 %v11581_v60  ;;  %v6030_v60 = vld [vmem:[%s16954_s9 + $0x4c0] sm:$0xff] }
 0x4a2   : > { %9153 = vmatpush1.bf16.msra.mxu1 %v11583_v4  ;;  %8993 = vmatprep.subr.bf16.mxu0 %v11590_v44  ;;  %v6034_v4 = vld [vmem:[%s16954_s9 + $0x4e0] sm:$0xff]  ;;  %v6031_v44 = vld [vmem:[%s16954_s9 + $0x4c8] sm:$0xff] }
 0x4a3   : > { %9165 = vmatprep.subr.bf16.mxu1 %v11592_v5  ;;  %v6035_v5 = vld [vmem:[%s16954_s9 + $0x4e8] sm:$0xff] }
 0x4b7   : > { %v5716_v12 = vpop.f32.mrb[20].mxu0  ;;  %v5759_v13 = vpop.f32.mrb[20].mxu1 }
 0x4b8   : > { %v5717_v14 = vadd.f32 %v5716_v12, %v5636_v8  ;;  %v5718_v17 = vpop.f32.mrb[21].mxu0  ;;  %v5760_v18 = vadd.f32 %v5759_v13, %v5644_v9  ;;  %v5761_v20 = vpop.f32.mrb[21].mxu1  ;;  %v6038_v12 = vld [vmem:[%s16954_s9 + $0x500] sm:$0xff] }
 0x4b9   : > { %v5719_v35 = vadd.f32 %v5718_v17, %v5640_v11  ;;  %v5720_v21 = vpop.f32.mrb[22].mxu0  ;;  %v5762_v56 = vadd.f32 %v5761_v20, %v5648_v0  ;;  %v5763_v22 = vpop.f32.mrb[22].mxu1  ;;  %v6042_v13 = vld [vmem:[%s16954_s9 + $0x520] sm:$0xff]  ;;  %v6043_v17 = vld [vmem:[%s16954_s9 + $0x528] sm:$0xff]  ;;  %v11615_v20 = vcombine.low %v6031_v44, %v6035_v5 }
 0x4ba   : > { %v5721_v1 = vadd.f32 %v5720_v21, %v5636_v8  ;;  %v5722_v23 = vpop.f32.mrb[23].mxu0  ;;  %v5856_v27 = vmax.f32 %v5760_v18, 0.0  ;;  %v5764_v36 = vadd.f32 %v5763_v22, %v5644_v9  ;;  %v5765_v28 = vpop.f32.mrb[23].mxu1  ;;  %v5854_v39 = vmax.f32 %v5717_v14, 0.0  ;;  %v6039_v14 = vld [vmem:[%s16954_s9 + $0x508] sm:$0xff]  ;;  %v6050_v22 = vld [vmem:[%s16954_s9 + $0x560] sm:$0xff] }
 0x4bb   : > { %v5723_v31 = vadd.f32 %v5722_v23, %v5640_v11  ;;  %v5857_v32 = vmax.f32 %v5762_v56, 0.0  ;;  %v5766_v41 = vadd.f32 %v5765_v28, %v5648_v0  ;;  %v5855_v19 = vmax.f32 %v5719_v35, 0.0  ;;  %v6046_v56 = vld [vmem:[%s16954_s9 + $0x540] sm:$0xff]  ;;  %v6051_v23 = vld [vmem:[%s16954_s9 + $0x568] sm:$0xff] }
 0x4bc   : > { %v5862_v34 = vmax.f32 %v5721_v1, 0.0  ;;  %v5864_v38 = vmax.f32 %v5764_v36, 0.0  ;;  %v11605_v8 = vcombine.low %v6022_v55, %v6026_v57  ;;  %v11607_v9 = vcombine.low %v6023_v58, %v6027_v59  ;;  %v6047_v1 = vld [vmem:[%s16954_s9 + $0x548] sm:$0xff]  ;;  %v6070_v55 = vld [vmem:[%s16954_s9 + $0x600] sm:$0xff] }
 0x4bd   : > { %v5863_v42 = vmax.f32 %v5723_v31, 0.0  ;;  %v5865_v33 = vmax.f32 %v5766_v41, 0.0  ;;  %v11614_v11 = vcombine.high %v6030_v60, %v6034_v4  ;;  %v11616_v0 = vcombine.high %v6031_v44, %v6035_v5  ;;  %v6058_v41 = vld [vmem:[%s16954_s9 + $0x5a0] sm:$0xff]  ;;  %v6071_v58 = vld [vmem:[%s16954_s9 + $0x608] sm:$0xff] }
 0x4be   : > { %v15250_v45 = vpack.c.bf16 %v5862_v34, %v5854_v39  ;;  %v15252_v48 = vpack.c.bf16 %v5864_v38, %v5856_v27  ;;  %v11613_v18 = vcombine.low %v6030_v60, %v6034_v4  ;;  %v11622_v35 = vcombine.high %v6038_v12, %v6042_v13  ;;  %v6055_v39 = vld [vmem:[%s16954_s9 + $0x588] sm:$0xff]  ;;  %v6074_v57 = vld [vmem:[%s16954_s9 + $0x620] sm:$0xff] }
 0x4bf   : > { %v15254_v50 = vpack.c.bf16 %v5863_v42, %v5855_v19  ;;  %v15260_v53 = vpack.c.bf16 %v5865_v33, %v5857_v32  ;;  %v11624_v21 = vcombine.high %v6039_v14, %v6043_v17  ;;  %v11621_v27 = vcombine.low %v6038_v12, %v6042_v13  ;;  %v6054_v32 = vld [vmem:[%s16954_s9 + $0x580] sm:$0xff]  ;;  %v6059_v34 = vld [vmem:[%s16954_s9 + $0x5a8] sm:$0xff] }
 0x4c0   : > { %v11623_v36 = vcombine.low %v6039_v14, %v6043_v17  ;;  %v11630_v28 = vcombine.high %v6046_v56, %v6050_v22  ;;  %v11632_v31 = vcombine.high %v6047_v1, %v6051_v23  ;;  %v11629_v37 = vcombine.low %v6046_v56, %v6050_v22  ;;  %v6067_v33 = vld [vmem:[%s16954_s9 + $0x5e8] sm:$0xff]  ;;  %v6078_v60 = vld [vmem:[%s16954_s9 + $0x640] sm:$0xff] }
 0x4c1   : > { %8982 = vmatprep.mubr.bf16.mxu0 %v15254_v50  ;;  %9154 = vmatprep.mubr.bf16.mxu1 %v15254_v50  ;;  %v11631_v38 = vcombine.low %v6047_v1, %v6051_v23  ;;  %v11638_v19 = vcombine.high %v6054_v32, %v6058_v41  ;;  %v11640_v42 = vcombine.high %v6055_v39, %v6059_v34  ;;  %v6075_v59 = vld [vmem:[%s16954_s9 + $0x628] sm:$0xff]  ;;  %v6082_v4 = vld [vmem:[%s16954_s9 + $0x660] sm:$0xff] }
 0x4c2   : > { %8983 = vmatmul.mubr.bf16.vlgmr.msra.gmra.mrb[28].mxu0 %v15250_v45  ;;  %9155 = vmatmul.mubr.bf16.vlgmr.msra.gmra.mrb[28].mxu1 %v15250_v45  ;;  %v6079_v44 = vld [vmem:[%s16954_s9 + $0x648] sm:$0xff]  ;;  %v6086_v12 = vld [vmem:[%s16954_s9 + $0x680] sm:$0xff] }
 0x4c3   : > { %8994 = vmatpush1.bf16.msra.mxu0 %v11589_v49  ;;  %9166 = vmatpush1.bf16.msra.mxu1 %v11591_v52  ;;  %v11637_v49 = vcombine.low %v6054_v32, %v6058_v41  ;;  %v11639_v52 = vcombine.low %v6055_v39, %v6059_v34  ;;  %v6083_v5 = vld [vmem:[%s16954_s9 + $0x668] sm:$0xff]  ;;  %v6090_v13 = vld [vmem:[%s16954_s9 + $0x6a0] sm:$0xff] }
 0x4c4   : > { %8995 = vmatprep.subr.bf16.mxu0 %v11598_v43  ;;  %9167 = vmatprep.subr.bf16.mxu1 %v11600_v54  ;;  %v11646_v43 = vcombine.high %v6062_v46, %v6066_v25  ;;  %v11648_v54 = vcombine.high %v6063_v47, %v6067_v33  ;;  %v6087_v14 = vld [vmem:[%s16954_s9 + $0x688] sm:$0xff]  ;;  %v6094_v56 = vld [vmem:[%s16954_s9 + $0x6c0] sm:$0xff] }
 0x4c5   : > { %9025 = vmatprep.mubr.bf16.mxu0 %v15260_v53  ;;  %9197 = vmatprep.mubr.bf16.mxu1 %v15260_v53  ;;  %v6091_v17 = vld [vmem:[%s16954_s9 + $0x6a8] sm:$0xff]  ;;  %v6098_v22 = vld [vmem:[%s16954_s9 + $0x6e0] sm:$0xff] }
 0x4c6   : > { %v6095_v1 = vld [vmem:[%s16954_s9 + $0x6c8] sm:$0xff]  ;;  %v6102_v32 = vld [vmem:[%s16954_s9 + $0x700] sm:$0xff] }
 0x4c7   : > { %8996 = vmatpush1.bf16.msra.mxu0 %v11597_v61  ;;  %9168 = vmatpush1.bf16.msra.mxu1 %v11599_v63  ;;  %v11645_v61 = vcombine.low %v6062_v46, %v6066_v25  ;;  %v11647_v63 = vcombine.low %v6063_v47, %v6067_v33  ;;  %v6099_v23 = vld [vmem:[%s16954_s9 + $0x6e8] sm:$0xff]  ;;  %v6106_v41 = vld [vmem:[%s16954_s9 + $0x720] sm:$0xff] }
 0x4c8   : > { %8997 = vmatprep.subr.bf16.mxu0 %v11606_v2  ;;  %9169 = vmatprep.subr.bf16.mxu1 %v11608_v3  ;;  %v11654_v2 = vcombine.high %v6070_v55, %v6074_v57  ;;  %v11656_v3 = vcombine.high %v6071_v58, %v6075_v59  ;;  %v6103_v39 = vld [vmem:[%s16954_s9 + $0x708] sm:$0xff]  ;;  %v6110_v46 = vld [vmem:[%s16954_s9 + $0x740] sm:$0xff] }
 0x4c9   : > { %v6107_v34 = vld [vmem:[%s16954_s9 + $0x728] sm:$0xff]  ;;  %v6114_v25 = vld [vmem:[%s16954_s9 + $0x760] sm:$0xff] }
 0x4ca   : > { %v6111_v47 = vld [vmem:[%s16954_s9 + $0x748] sm:$0xff] }
 0x4cb   : > { %8998 = vmatpush1.bf16.msra.mxu0 %v11605_v8  ;;  %9170 = vmatpush1.bf16.msra.mxu1 %v11607_v9  ;;  %v11653_v8 = vcombine.low %v6070_v55, %v6074_v57  ;;  %v11655_v9 = vcombine.low %v6071_v58, %v6075_v59  ;;  %v6115_v33 = vld [vmem:[%s16954_s9 + $0x768] sm:$0xff]  ;;  %v6118_v55 = vld [vmem:[%s16954_s9 + $0x780] sm:$0xff] }
 0x4cc   : > { %8999 = vmatprep.subr.bf16.mxu0 %v11614_v11  ;;  %9171 = vmatprep.subr.bf16.mxu1 %v11616_v0  ;;  %v11662_v11 = vcombine.high %v6078_v60, %v6082_v4  ;;  %v11664_v0 = vcombine.high %v6079_v44, %v6083_v5  ;;  %v6122_v57 = vld [vmem:[%s16954_s9 + $0x7a0] sm:$0xff]  ;;  %v6119_v58 = vld [vmem:[%s16954_s9 + $0x788] sm:$0xff] }
 0x4cd   : > { %v6123_v59 = vld [vmem:[%s16954_s9 + $0x7a8] sm:$0xff] }
 0x4cf   : > { %9000 = vmatpush1.bf16.msra.mxu0 %v11613_v18  ;;  %9172 = vmatpush1.bf16.msra.mxu1 %v11615_v20  ;;  %v11661_v18 = vcombine.low %v6078_v60, %v6082_v4  ;;  %v11663_v20 = vcombine.low %v6079_v44, %v6083_v5  ;;  %v6126_v60 = vld [vmem:[%s16954_s9 + $0x7c0] sm:$0xff]  ;;  %v6127_v44 = vld [vmem:[%s16954_s9 + $0x7c8] sm:$0xff] }
 0x4d0   : > { %9001 = vmatprep.subr.bf16.mxu0 %v11622_v35  ;;  %9173 = vmatprep.subr.bf16.mxu1 %v11624_v21  ;;  %v11670_v35 = vcombine.high %v6086_v12, %v6090_v13  ;;  %v11672_v21 = vcombine.high %v6087_v14, %v6091_v17  ;;  %v6130_v4 = vld [vmem:[%s16954_s9 + $0x7e0] sm:$0xff]  ;;  %v6131_v5 = vld [vmem:[%s16954_s9 + $0x7e8] sm:$0xff] }
 0x4d3   : > { %9002 = vmatpush1.bf16.msra.mxu0 %v11621_v27  ;;  %9174 = vmatpush1.bf16.msra.mxu1 %v11623_v36  ;;  %v11669_v27 = vcombine.low %v6086_v12, %v6090_v13  ;;  %v11671_v36 = vcombine.low %v6087_v14, %v6091_v17  ;;  %v6134_v12 = vld [vmem:[%s16954_s9 + $0x800] sm:$0xff]  ;;  %v6135_v14 = vld [vmem:[%s16954_s9 + $0x808] sm:$0xff] }
 0x4d4   : > { %9003 = vmatprep.subr.bf16.mxu0 %v11630_v28  ;;  %9175 = vmatprep.subr.bf16.mxu1 %v11632_v31  ;;  %v11678_v28 = vcombine.high %v6094_v56, %v6098_v22  ;;  %v11680_v31 = vcombine.high %v6095_v1, %v6099_v23  ;;  %v6138_v13 = vld [vmem:[%s16954_s9 + $0x820] sm:$0xff]  ;;  %v6139_v17 = vld [vmem:[%s16954_s9 + $0x828] sm:$0xff] }
 0x4d7   : > { %9004 = vmatpush1.bf16.msra.mxu0 %v11629_v37  ;;  %9176 = vmatpush1.bf16.msra.mxu1 %v11631_v38  ;;  %v11677_v37 = vcombine.low %v6094_v56, %v6098_v22  ;;  %v11679_v38 = vcombine.low %v6095_v1, %v6099_v23  ;;  %v6142_v56 = vld [vmem:[%s16954_s9 + $0x840] sm:$0xff]  ;;  %v6143_v1 = vld [vmem:[%s16954_s9 + $0x848] sm:$0xff] }
 0x4d8   : > { %9005 = vmatprep.subr.bf16.mxu0 %v11638_v19  ;;  %9177 = vmatprep.subr.bf16.mxu1 %v11640_v42  ;;  %v11686_v19 = vcombine.high %v6102_v32, %v6106_v41  ;;  %v11688_v42 = vcombine.high %v6103_v39, %v6107_v34  ;;  %v6146_v22 = vld [vmem:[%s16954_s9 + $0x860] sm:$0xff]  ;;  %v6147_v23 = vld [vmem:[%s16954_s9 + $0x868] sm:$0xff] }
 0x4db   : > { %9006 = vmatpush1.bf16.msra.mxu0 %v11637_v49  ;;  %9178 = vmatpush1.bf16.msra.mxu1 %v11639_v52  ;;  %v11685_v49 = vcombine.low %v6102_v32, %v6106_v41  ;;  %v11687_v52 = vcombine.low %v6103_v39, %v6107_v34  ;;  %v6150_v32 = vld [vmem:[%s16954_s9 + $0x880] sm:$0xff]  ;;  %v6151_v39 = vld [vmem:[%s16954_s9 + $0x888] sm:$0xff] }
 0x4dc   : > { %9007 = vmatprep.subr.bf16.mxu0 %v11646_v43  ;;  %9179 = vmatprep.subr.bf16.mxu1 %v11648_v54  ;;  %v11694_v43 = vcombine.high %v6110_v46, %v6114_v25  ;;  %v11696_v54 = vcombine.high %v6111_v47, %v6115_v33  ;;  %v6154_v41 = vld [vmem:[%s16954_s9 + $0x8a0] sm:$0xff]  ;;  %v6155_v34 = vld [vmem:[%s16954_s9 + $0x8a8] sm:$0xff] }
 0x4df   : > { %9008 = vmatpush1.bf16.msra.mxu0 %v11645_v61  ;;  %9180 = vmatpush1.bf16.msra.mxu1 %v11647_v63  ;;  %v11693_v61 = vcombine.low %v6110_v46, %v6114_v25  ;;  %v11695_v63 = vcombine.low %v6111_v47, %v6115_v33  ;;  %v6158_v46 = vld [vmem:[%s16954_s9 + $0x8c0] sm:$0xff]  ;;  %v6159_v47 = vld [vmem:[%s16954_s9 + $0x8c8] sm:$0xff] }
 0x4e0   : > { %9009 = vmatprep.subr.bf16.mxu0 %v11654_v2  ;;  %9181 = vmatprep.subr.bf16.mxu1 %v11656_v3  ;;  %v11702_v2 = vcombine.high %v6118_v55, %v6122_v57  ;;  %v11704_v3 = vcombine.high %v6119_v58, %v6123_v59  ;;  %v6162_v25 = vld [vmem:[%s16954_s9 + $0x8e0] sm:$0xff]  ;;  %v6163_v33 = vld [vmem:[%s16954_s9 + $0x8e8] sm:$0xff] }
 0x4e3   : > { %9010 = vmatpush1.bf16.msra.mxu0 %v11653_v8  ;;  %9182 = vmatpush1.bf16.msra.mxu1 %v11655_v9  ;;  %v11701_v8 = vcombine.low %v6118_v55, %v6122_v57  ;;  %v11703_v9 = vcombine.low %v6119_v58, %v6123_v59  ;;  %v6166_v55 = vld [vmem:[%s16954_s9 + $0x900] sm:$0xff]  ;;  %v6167_v58 = vld [vmem:[%s16954_s9 + $0x908] sm:$0xff] }
 0x4e4   : > { %9011 = vmatprep.subr.bf16.mxu0 %v11662_v11  ;;  %9183 = vmatprep.subr.bf16.mxu1 %v11664_v0  ;;  %v11710_v11 = vcombine.high %v6126_v60, %v6130_v4  ;;  %v11712_v0 = vcombine.high %v6127_v44, %v6131_v5  ;;  %v6170_v57 = vld [vmem:[%s16954_s9 + $0x920] sm:$0xff]  ;;  %v6171_v59 = vld [vmem:[%s16954_s9 + $0x928] sm:$0xff] }
 0x4e7   : > { %9012 = vmatpush1.bf16.msra.mxu0 %v11661_v18  ;;  %9184 = vmatpush1.bf16.msra.mxu1 %v11663_v20  ;;  %v11709_v18 = vcombine.low %v6126_v60, %v6130_v4  ;;  %v11711_v20 = vcombine.low %v6127_v44, %v6131_v5  ;;  %v6174_v60 = vld [vmem:[%s16954_s9 + $0x940] sm:$0xff]  ;;  %v6175_v44 = vld [vmem:[%s16954_s9 + $0x948] sm:$0xff] }
 0x4e8   : > { %9013 = vmatprep.subr.bf16.mxu0 %v11670_v35  ;;  %9185 = vmatprep.subr.bf16.mxu1 %v11672_v21  ;;  %v11718_v35 = vcombine.high %v6134_v12, %v6138_v13  ;;  %v11720_v21 = vcombine.high %v6135_v14, %v6139_v17  ;;  %v6178_v4 = vld [vmem:[%s16954_s9 + $0x960] sm:$0xff]  ;;  %v6179_v5 = vld [vmem:[%s16954_s9 + $0x968] sm:$0xff] }
 0x4eb   : > { %9014 = vmatpush1.bf16.msra.mxu0 %v11669_v27  ;;  %9186 = vmatpush1.bf16.msra.mxu1 %v11671_v36  ;;  %v11717_v27 = vcombine.low %v6134_v12, %v6138_v13  ;;  %v11719_v36 = vcombine.low %v6135_v14, %v6139_v17  ;;  %v6182_v12 = vld [vmem:[%s16954_s9 + $0x980] sm:$0xff]  ;;  %v6183_v14 = vld [vmem:[%s16954_s9 + $0x988] sm:$0xff] }
 0x4ec   : > { %9015 = vmatprep.subr.bf16.mxu0 %v11678_v28  ;;  %9187 = vmatprep.subr.bf16.mxu1 %v11680_v31  ;;  %v11726_v28 = vcombine.high %v6142_v56, %v6146_v22  ;;  %v11728_v31 = vcombine.high %v6143_v1, %v6147_v23  ;;  %v6186_v13 = vld [vmem:[%s16954_s9 + $0x9a0] sm:$0xff]  ;;  %v6187_v17 = vld [vmem:[%s16954_s9 + $0x9a8] sm:$0xff] }
 0x4ef   : > { %9016 = vmatpush1.bf16.msra.mxu0 %v11677_v37  ;;  %9188 = vmatpush1.bf16.msra.mxu1 %v11679_v38  ;;  %v11725_v37 = vcombine.low %v6142_v56, %v6146_v22  ;;  %v11727_v38 = vcombine.low %v6143_v1, %v6147_v23  ;;  %v6190_v56 = vld [vmem:[%s16954_s9 + $0x9c0] sm:$0xff]  ;;  %v6191_v1 = vld [vmem:[%s16954_s9 + $0x9c8] sm:$0xff] }
 0x4f0   : > { %9017 = vmatprep.subr.bf16.mxu0 %v11686_v19  ;;  %9189 = vmatprep.subr.bf16.mxu1 %v11688_v42  ;;  %v11734_v19 = vcombine.high %v6150_v32, %v6154_v41  ;;  %v11736_v42 = vcombine.high %v6151_v39, %v6155_v34  ;;  %v6194_v22 = vld [vmem:[%s16954_s9 + $0x9e0] sm:$0xff]  ;;  %v6195_v23 = vld [vmem:[%s16954_s9 + $0x9e8] sm:$0xff] }
 0x4f3   : > { %9018 = vmatpush1.bf16.msra.mxu0 %v11685_v49  ;;  %9190 = vmatpush1.bf16.msra.mxu1 %v11687_v52  ;;  %v11733_v49 = vcombine.low %v6150_v32, %v6154_v41  ;;  %v11735_v52 = vcombine.low %v6151_v39, %v6155_v34  ;;  %v6198_v32 = vld [vmem:[%s16954_s9 + $0xa00] sm:$0xff]  ;;  %v6199_v39 = vld [vmem:[%s16954_s9 + $0xa08] sm:$0xff] }
 0x4f4   : > { %9019 = vmatprep.subr.bf16.mxu0 %v11694_v43  ;;  %9191 = vmatprep.subr.bf16.mxu1 %v11696_v54  ;;  %v11742_v43 = vcombine.high %v6158_v46, %v6162_v25  ;;  %v11744_v54 = vcombine.high %v6159_v47, %v6163_v33  ;;  %v6202_v41 = vld [vmem:[%s16954_s9 + $0xa20] sm:$0xff]  ;;  %v6203_v34 = vld [vmem:[%s16954_s9 + $0xa28] sm:$0xff] }
 0x4f7   : > { %9020 = vmatpush1.bf16.msra.mxu0 %v11693_v61  ;;  %9192 = vmatpush1.bf16.msra.mxu1 %v11695_v63  ;;  %v11741_v61 = vcombine.low %v6158_v46, %v6162_v25  ;;  %v11743_v63 = vcombine.low %v6159_v47, %v6163_v33  ;;  %v6206_v46 = vld [vmem:[%s16954_s9 + $0xa40] sm:$0xff]  ;;  %v6207_v47 = vld [vmem:[%s16954_s9 + $0xa48] sm:$0xff] }
 0x4f8   : > { %9021 = vmatprep.subr.bf16.mxu0 %v11702_v2  ;;  %9193 = vmatprep.subr.bf16.mxu1 %v11704_v3  ;;  %v11750_v2 = vcombine.high %v6166_v55, %v6170_v57  ;;  %v11752_v3 = vcombine.high %v6167_v58, %v6171_v59  ;;  %v6210_v25 = vld [vmem:[%s16954_s9 + $0xa60] sm:$0xff]  ;;  %v6211_v33 = vld [vmem:[%s16954_s9 + $0xa68] sm:$0xff] }
 0x4fb   : > { %9022 = vmatpush1.bf16.msra.mxu0 %v11701_v8  ;;  %9194 = vmatpush1.bf16.msra.mxu1 %v11703_v9  ;;  %v11749_v8 = vcombine.low %v6166_v55, %v6170_v57  ;;  %v11751_v9 = vcombine.low %v6167_v58, %v6171_v59  ;;  %v6214_v55 = vld [vmem:[%s16954_s9 + $0xa80] sm:$0xff]  ;;  %v6215_v58 = vld [vmem:[%s16954_s9 + $0xa88] sm:$0xff] }
 0x4fc   : > { %9023 = vmatprep.subr.bf16.mxu0 %v11710_v11  ;;  %9195 = vmatprep.subr.bf16.mxu1 %v11712_v0  ;;  %v11758_v11 = vcombine.high %v6174_v60, %v6178_v4  ;;  %v11760_v0 = vcombine.high %v6175_v44, %v6179_v5  ;;  %v6218_v57 = vld [vmem:[%s16954_s9 + $0xaa0] sm:$0xff]  ;;  %v6219_v59 = vld [vmem:[%s16954_s9 + $0xaa8] sm:$0xff] }
 0x4ff   : > { %9024 = vmatpush1.bf16.msra.mxu0 %v11709_v18  ;;  %9196 = vmatpush1.bf16.msra.mxu1 %v11711_v20  ;;  %v11757_v18 = vcombine.low %v6174_v60, %v6178_v4  ;;  %v11759_v20 = vcombine.low %v6175_v44, %v6179_v5  ;;  %v6222_v60 = vld [vmem:[%s16954_s9 + $0xac0] sm:$0xff]  ;;  %v6223_v44 = vld [vmem:[%s16954_s9 + $0xac8] sm:$0xff] }
 0x500   : > { %9036 = vmatprep.subr.bf16.mxu0 %v11718_v35  ;;  %9208 = vmatprep.subr.bf16.mxu1 %v11720_v21  ;;  %v11766_v35 = vcombine.high %v6182_v12, %v6186_v13  ;;  %v11768_v21 = vcombine.high %v6183_v14, %v6187_v17  ;;  %v6226_v4 = vld [vmem:[%s16954_s9 + $0xae0] sm:$0xff]  ;;  %v6227_v5 = vld [vmem:[%s16954_s9 + $0xae8] sm:$0xff] }
 0x502   : > { %9026 = vmatmul.mubr.bf16.vlgmr.msra.gmra.mrb[28].mxu0 %v15252_v48  ;;  %9198 = vmatmul.mubr.bf16.vlgmr.msra.gmra.mrb[28].mxu1 %v15252_v48 }
 0x503   : > { %9037 = vmatpush1.bf16.msra.mxu0 %v11717_v27  ;;  %9209 = vmatpush1.bf16.msra.mxu1 %v11719_v36  ;;  %v11765_v27 = vcombine.low %v6182_v12, %v6186_v13  ;;  %v11767_v36 = vcombine.low %v6183_v14, %v6187_v17  ;;  %v6230_v12 = vld [vmem:[%s16954_s9 + $0xb00] sm:$0xff]  ;;  %v6231_v14 = vld [vmem:[%s16954_s9 + $0xb08] sm:$0xff] }
 0x504   : > { %9038 = vmatprep.subr.bf16.mxu0 %v11726_v28  ;;  %9210 = vmatprep.subr.bf16.mxu1 %v11728_v31  ;;  %v11774_v28 = vcombine.high %v6190_v56, %v6194_v22  ;;  %v11776_v31 = vcombine.high %v6191_v1, %v6195_v23  ;;  %v6234_v13 = vld [vmem:[%s16954_s9 + $0xb20] sm:$0xff]  ;;  %v6235_v17 = vld [vmem:[%s16954_s9 + $0xb28] sm:$0xff] }
 0x507   : > { %9039 = vmatpush1.bf16.msra.mxu0 %v11725_v37  ;;  %9211 = vmatpush1.bf16.msra.mxu1 %v11727_v38  ;;  %v11773_v37 = vcombine.low %v6190_v56, %v6194_v22  ;;  %v11775_v38 = vcombine.low %v6191_v1, %v6195_v23  ;;  %v6238_v56 = vld [vmem:[%s16954_s9 + $0xb40] sm:$0xff]  ;;  %v6239_v1 = vld [vmem:[%s16954_s9 + $0xb48] sm:$0xff] }
 0x508   : > { %9040 = vmatprep.subr.bf16.mxu0 %v11734_v19  ;;  %9212 = vmatprep.subr.bf16.mxu1 %v11736_v42  ;;  %v11782_v19 = vcombine.high %v6198_v32, %v6202_v41  ;;  %v11784_v42 = vcombine.high %v6199_v39, %v6203_v34  ;;  %v6242_v22 = vld [vmem:[%s16954_s9 + $0xb60] sm:$0xff]  ;;  %v6243_v23 = vld [vmem:[%s16954_s9 + $0xb68] sm:$0xff] }
 0x50b   : > { %9041 = vmatpush1.bf16.msra.mxu0 %v11733_v49  ;;  %9213 = vmatpush1.bf16.msra.mxu1 %v11735_v52  ;;  %v11781_v49 = vcombine.low %v6198_v32, %v6202_v41  ;;  %v11783_v52 = vcombine.low %v6199_v39, %v6203_v34  ;;  %v6246_v32 = vld [vmem:[%s16954_s9 + $0xb80] sm:$0xff]  ;;  %v6247_v39 = vld [vmem:[%s16954_s9 + $0xb88] sm:$0xff] }
 0x50c   : > { %9042 = vmatprep.subr.bf16.mxu0 %v11742_v43  ;;  %9214 = vmatprep.subr.bf16.mxu1 %v11744_v54  ;;  %v11790_v43 = vcombine.high %v6206_v46, %v6210_v25  ;;  %v11792_v54 = vcombine.high %v6207_v47, %v6211_v33  ;;  %v6250_v41 = vld [vmem:[%s16954_s9 + $0xba0] sm:$0xff]  ;;  %v6251_v34 = vld [vmem:[%s16954_s9 + $0xba8] sm:$0xff] }
 0x50f   : > { %9043 = vmatpush1.bf16.msra.mxu0 %v11741_v61  ;;  %9215 = vmatpush1.bf16.msra.mxu1 %v11743_v63  ;;  %v11789_v61 = vcombine.low %v6206_v46, %v6210_v25  ;;  %v11791_v63 = vcombine.low %v6207_v47, %v6211_v33  ;;  %v11832_v46 = vcombine.high %v6247_v39, %v6251_v34  ;;  %v6254_v25 = vld [vmem:[%s16954_s9 + $0xbc0] sm:$0xff] }
 0x510   : > { %9044 = vmatprep.subr.bf16.mxu0 %v11750_v2  ;;  %9216 = vmatprep.subr.bf16.mxu1 %v11752_v3  ;;  %v11798_v2 = vcombine.high %v6214_v55, %v6218_v57  ;;  %v11800_v3 = vcombine.high %v6215_v58, %v6219_v59  ;;  %v5656_v47 = vrot.slane %v15228_v7, %v13752_v16  ;;  %v6258_v33 = vld [vmem:[%s16954_s9 + $0xbe0] sm:$0xff] }
 0x513   : > { %9045 = vmatpush1.bf16.msra.mxu0 %v11749_v8  ;;  %9217 = vmatpush1.bf16.msra.mxu1 %v11751_v9  ;;  %v11797_v8 = vcombine.low %v6214_v55, %v6218_v57  ;;  %v11799_v9 = vcombine.low %v6215_v58, %v6219_v59  ;;  %v11829_v57 = vcombine.low %v6246_v32, %v6250_v41  ;;  %v15641_v59 = vld [vmem:[%s16954_s9 + $0xc00] sm:$0xff] }
 0x514   : > { %9046 = vmatprep.subr.bf16.mxu0 %v11758_v11  ;;  %9218 = vmatprep.subr.bf16.mxu1 %v11760_v0  ;;  %v11806_v11 = vcombine.high %v6222_v60, %v6226_v4  ;;  %v11808_v0 = vcombine.high %v6223_v44, %v6227_v5  ;;  %v11831_v58 = vcombine.low %v6247_v39, %v6251_v34  ;;  %v6274_v39 = vld [vmem:[%s16954_s9 + $0xc60] sm:$0xff]  ;;  %v6271_v34 = vld [vmem:[%s16954_s9 + $0xc48] sm:$0xff] }
 0x517   : > { %9047 = vmatpush1.bf16.msra.mxu0 %v11757_v18  ;;  %9219 = vmatpush1.bf16.msra.mxu1 %v11759_v20  ;;  %v11805_v18 = vcombine.low %v6222_v60, %v6226_v4  ;;  %v11807_v20 = vcombine.low %v6223_v44, %v6227_v5  ;;  %v6263_v60 = vld [vmem:[%s16954_s9 + $0xc08] sm:$0xff] }
 0x518   : > { %9048 = vmatprep.subr.bf16.mxu0 %v11766_v35  ;;  %9220 = vmatprep.subr.bf16.mxu1 %v11768_v21  ;;  %v11814_v35 = vcombine.high %v6230_v12, %v6234_v13  ;;  %v11816_v21 = vcombine.high %v6231_v14, %v6235_v17  ;;  %v6267_v4 = vld [vmem:[%s16954_s9 + $0xc28] sm:$0xff] }
 0x51b   : > { %9049 = vmatpush1.bf16.msra.mxu0 %v11765_v27  ;;  %9221 = vmatpush1.bf16.msra.mxu1 %v11767_v36  ;;  %v11813_v27 = vcombine.low %v6230_v12, %v6234_v13  ;;  %v11815_v36 = vcombine.low %v6231_v14, %v6235_v17 }
 0x51c   : > { %9050 = vmatprep.subr.bf16.mxu0 %v11774_v28  ;;  %9222 = vmatprep.subr.bf16.mxu1 %v11776_v31  ;;  %v11822_v28 = vcombine.high %v6238_v56, %v6242_v22  ;;  %v11824_v31 = vcombine.high %v6239_v1, %v6243_v23 }
 0x51f   : > { %9051 = vmatpush1.bf16.msra.mxu0 %v11773_v37  ;;  %9223 = vmatpush1.bf16.msra.mxu1 %v11775_v38  ;;  %v11821_v37 = vcombine.low %v6238_v56, %v6242_v22  ;;  %v11823_v38 = vcombine.low %v6239_v1, %v6243_v23 }
 0x520   : > { %9052 = vmatprep.subr.bf16.mxu0 %v11782_v19  ;;  %9224 = vmatprep.subr.bf16.mxu1 %v11784_v42  ;;  %v5652_v19 = vrot.slane %v15228_v7, %v13913_v24  ;;  %v11830_v42 = vcombine.high %v6246_v32, %v6250_v41 }
 0x523   : > { %9053 = vmatpush1.bf16.msra.mxu0 %v11781_v49  ;;  %9225 = vmatpush1.bf16.msra.mxu1 %v11783_v52  ;;  %v6255_v49 = vld [vmem:[%s16954_s9 + $0xbc8] sm:$0xff] }
 0x524   : > { %9054 = vmatprep.subr.bf16.mxu0 %v11790_v43  ;;  %9226 = vmatprep.subr.bf16.mxu1 %v11792_v54  ;;  %v6259_v52 = vld [vmem:[%s16954_s9 + $0xbe8] sm:$0xff]  ;;  %v5660_v43 = vrot.slane %v15228_v7, %v14099_v40  ;;  %v5664_v54 = vrot.slane %v15228_v7, %v13922_v30 }
 0x525   : > { %v11840_v7 = vcombine.high %v6255_v49, %v6259_v52  ;;  %v11839_v14 = vcombine.low %v6255_v49, %v6259_v52 }
 0x527   : > { %9055 = vmatpush1.bf16.msra.mxu0 %v11789_v61  ;;  %9227 = vmatpush1.bf16.msra.mxu1 %v11791_v63  ;;  %v6266_v61 = vld [vmem:[%s16954_s9 + $0xc20] sm:$0xff] }
 0x528   : > { %9056 = vmatprep.subr.bf16.mxu0 %v11798_v2  ;;  %9228 = vmatprep.subr.bf16.mxu1 %v11800_v3  ;;  %v11838_v3 = vcombine.high %v6254_v25, %v6258_v33  ;;  %v11846_v17 = vcombine.high %v15641_v59, %v6266_v61 }
 0x52b   : > { %9057 = vmatpush1.bf16.msra.mxu0 %v11797_v8  ;;  %9229 = vmatpush1.bf16.msra.mxu1 %v11799_v9  ;;  %v11837_v9 = vcombine.low %v6254_v25, %v6258_v33 }
 0x52c   : > { %9058 = vmatprep.subr.bf16.mxu0 %v11806_v11  ;;  %9230 = vmatprep.subr.bf16.mxu1 %v11808_v0 }
 0x52f   : > { %9059 = vmatpush1.bf16.msra.mxu0 %v11805_v18  ;;  %9231 = vmatpush1.bf16.msra.mxu1 %v11807_v20 }
 0x530   : > { %9060 = vmatprep.subr.bf16.mxu0 %v11814_v35  ;;  %9232 = vmatprep.subr.bf16.mxu1 %v11816_v21  ;;  %v11848_v21 = vcombine.high %v6263_v60, %v6267_v4 }
 0x533   : > { %9061 = vmatpush1.bf16.msra.mxu0 %v11813_v27  ;;  %9233 = vmatpush1.bf16.msra.mxu1 %v11815_v36  ;;  %v6270_v36 = vld [vmem:[%s16954_s9 + $0xc40] sm:$0xff] }
 0x534   : > { %9062 = vmatprep.subr.bf16.mxu0 %v11822_v28  ;;  %9234 = vmatprep.subr.bf16.mxu1 %v11824_v31  ;;  %v11854_v49 = vcombine.high %v6270_v36, %v6274_v39 }
 0x537   : > { %9063 = vmatpush1.bf16.msra.mxu0 %v11821_v37  ;;  %9235 = vmatpush1.bf16.msra.mxu1 %v11823_v38  ;;  %v5802_v55 = vpop.f32.mrb[24].mxu0  ;;  %v6275_v37 = vld [vmem:[%s16954_s9 + $0xc68] sm:$0xff] }
 0x538   : > { %v5803_v63 = vadd.f32 %v5802_v55, %v5652_v19  ;;  %v5804_v2 = vpop.f32.mrb[25].mxu0  ;;  %9064 = vmatprep.subr.bf16.mxu0 %v11830_v42  ;;  %9236 = vmatprep.subr.bf16.mxu1 %v11832_v46  ;;  %v5845_v44 = vpop.f32.mrb[24].mxu1  ;;  %v11845_v42 = vcombine.low %v15641_v59, %v6266_v61  ;;  %v11856_v52 = vcombine.high %v6271_v34, %v6275_v37  ;;  %v6282_v55 = vld [vmem:[%s16954_s9 + $0xca0] sm:$0xff] }
 0x539   : > { %v5805_v5 = vadd.f32 %v5804_v2, %v5656_v47  ;;  %v5806_v8 = vpop.f32.mrb[26].mxu0  ;;  %v5846_v11 = vadd.f32 %v5845_v44, %v5660_v43  ;;  %v5847_v0 = vpop.f32.mrb[25].mxu1  ;;  %v11853_v59 = vcombine.low %v6270_v36, %v6274_v39  ;;  %v11855_v61 = vcombine.low %v6271_v34, %v6275_v37 }
 0x53a   : > { %v5807_v12 = vadd.f32 %v5806_v8, %v5652_v19  ;;  %v5808_v13 = vpop.f32.mrb[27].mxu0  ;;  %v5848_v18 = vadd.f32 %v5847_v0, %v5664_v54  ;;  %v5849_v20 = vpop.f32.mrb[26].mxu1  ;;  %v5858_v23 = vmax.f32 %v5803_v63, 0.0  ;;  %v6298_v0 = vld [vmem:[%s16954_s9 + $0xd20] sm:$0xff] }
 0x53b   : > { %v5809_v35 = vadd.f32 %v5808_v13, %v5656_v47  ;;  %9065 = vmatpush1.bf16.msra.mxu0 %v11829_v57  ;;  %9237 = vmatpush1.bf16.msra.mxu1 %v11831_v58  ;;  %v5860_v56 = vmax.f32 %v5846_v11, 0.0  ;;  %v5850_v22 = vadd.f32 %v5849_v20, %v5660_v43  ;;  %v5851_v1 = vpop.f32.mrb[27].mxu1  ;;  %v5859_v32 = vmax.f32 %v5805_v5, 0.0  ;;  %v6278_v43 = vld [vmem:[%s16954_s9 + $0xc80] sm:$0xff]  ;;  %v6279_v57 = vld [vmem:[%s16954_s9 + $0xc88] sm:$0xff] }
 0x53c   : > { %v5866_v27 = vmax.f32 %v5807_v12, 0.0  ;;  %9066 = vmatprep.subr.bf16.mxu0 %v11838_v3  ;;  %9238 = vmatprep.subr.bf16.mxu1 %v11840_v7  ;;  %v5861_v28 = vmax.f32 %v5848_v18, 0.0  ;;  %v5852_v31 = vadd.f32 %v5851_v1, %v5664_v54  ;;  %v11847_v47 = vcombine.low %v6263_v60, %v6267_v4  ;;  %v6283_v58 = vld [vmem:[%s16954_s9 + $0xca8] sm:$0xff]  ;;  %v6286_v3 = vld [vmem:[%s16954_s9 + $0xcc0] sm:$0xff] }
 0x53d   : > { %v5867_v41 = vmax.f32 %v5809_v35, 0.0  ;;  %v5868_v38 = vmax.f32 %v5850_v22, 0.0  ;;  %v11862_v63 = vcombine.high %v6278_v43, %v6282_v55  ;;  %v11864_v2 = vcombine.high %v6279_v57, %v6283_v58  ;;  %v6290_v7 = vld [vmem:[%s16954_s9 + $0xce0] sm:$0xff]  ;;  %v6287_v60 = vld [vmem:[%s16954_s9 + $0xcc8] sm:$0xff] }
 0x53e   : > { %v15665_v19 = vpack.c.bf16 %v5866_v27, %v5858_v23  ;;  %v5869_v46 = vmax.f32 %v5852_v31, 0.0  ;;  %v6291_v4 = vld [vmem:[%s16954_s9 + $0xce8] sm:$0xff]  ;;  %v11861_v44 = vcombine.low %v6278_v43, %v6282_v55  ;;  %v11863_v5 = vcombine.low %v6279_v57, %v6283_v58  ;;  %v6294_v11 = vld [vmem:[%s16954_s9 + $0xd00] sm:$0xff] }
 0x53f   : > { %v15668_v25 = vpack.c.bf16 %v5867_v41, %v5859_v32  ;;  %9067 = vmatpush1.bf16.msra.mxu0 %v11837_v9  ;;  %9239 = vmatpush1.bf16.msra.mxu1 %v11839_v14  ;;  %v15670_v33 = vpack.c.bf16 %v5868_v38, %v5860_v56  ;;  %v11870_v8 = vcombine.high %v6286_v3, %v6290_v7  ;;  %v6295_v12 = vld [vmem:[%s16954_s9 + $0xd08] sm:$0xff]  ;;  %v6302_v35 = vld [vmem:[%s16954_s9 + $0xd40] sm:$0xff] }
 0x540   : > { %9079 = vmatprep.subr.bf16.mxu0 %v11846_v17  ;;  %9251 = vmatprep.subr.bf16.mxu1 %v11848_v21  ;;  %v15675_v54 = vpack.c.bf16 %v5869_v46, %v5861_v28  ;;  %v11872_v9 = vcombine.high %v6287_v60, %v6291_v4  ;;  %v6299_v13 = vld [vmem:[%s16954_s9 + $0xd28] sm:$0xff]  ;;  %v11869_v14 = vcombine.low %v6286_v3, %v6290_v7  ;;  %v6306_v21 = vld [vmem:[%s16954_s9 + $0xd60] sm:$0xff] }
 0x541   : > { %9068 = vmatprep.mubr.bf16.mxu0 %v15668_v25  ;;  %9240 = vmatprep.mubr.bf16.mxu1 %v15668_v25  ;;  %v11871_v17 = vcombine.low %v6287_v60, %v6291_v4  ;;  %v11878_v18 = vcombine.high %v6294_v11, %v6298_v0  ;;  %v11880_v20 = vcombine.high %v6295_v12, %v6299_v13  ;;  %v6303_v56 = vld [vmem:[%s16954_s9 + $0xd48] sm:$0xff]  ;;  %v6310_v28 = vld [vmem:[%s16954_s9 + $0xd80] sm:$0xff] }
 0x542   : > { %9069 = vmatmul.mubr.bf16.vlgmr.msra.gmra.mrb[28].mxu0 %v15665_v19  ;;  %9241 = vmatmul.mubr.bf16.vlgmr.msra.gmra.mrb[28].mxu1 %v15665_v19  ;;  %v6307_v22 = vld [vmem:[%s16954_s9 + $0xd68] sm:$0xff]  ;;  %v11877_v1 = vcombine.low %v6294_v11, %v6298_v0  ;;  %v11879_v23 = vcombine.low %v6295_v12, %v6299_v13  ;;  %v11886_v27 = vcombine.high %v6302_v35, %v6306_v21  ;;  %v6314_v31 = vld [vmem:[%s16954_s9 + $0xda0] sm:$0xff] }
 0x543   : > { %9080 = vmatpush1.bf16.msra.mxu0 %v11845_v42  ;;  %9252 = vmatpush1.bf16.msra.mxu1 %v11847_v47  ;;  %v11888_v36 = vcombine.high %v6303_v56, %v6307_v22  ;;  %v6311_v32 = vld [vmem:[%s16954_s9 + $0xd88] sm:$0xff]  ;;  %v11885_v39 = vcombine.low %v6302_v35, %v6306_v21  ;;  %v11887_v34 = vcombine.low %v6303_v56, %v6307_v22  ;;  %v6318_v42 = vld [vmem:[%s16954_s9 + $0xdc0] sm:$0xff] }
 0x544   : > { %9081 = vmatprep.subr.bf16.mxu0 %v11854_v49  ;;  %9253 = vmatprep.subr.bf16.mxu1 %v11856_v52  ;;  %v6315_v41 = vld [vmem:[%s16954_s9 + $0xda8] sm:$0xff]  ;;  %v11894_v37 = vcombine.high %v6310_v28, %v6314_v31  ;;  %v6322_v46 = vld [vmem:[%s16954_s9 + $0xde0] sm:$0xff]  ;;  %v11893_v52 = vcombine.low %v6310_v28, %v6314_v31 }
 0x545   : > { %9111 = vmatprep.mubr.bf16.mxu0 %v15675_v54  ;;  %9283 = vmatprep.mubr.bf16.mxu1 %v15675_v54  ;;  %v11896_v38 = vcombine.high %v6311_v32, %v6315_v41  ;;  %v6319_v47 = vld [vmem:[%s16954_s9 + $0xdc8] sm:$0xff]  ;;  %v11895_v43 = vcombine.low %v6311_v32, %v6315_v41  ;;  %v11902_v55 = vcombine.high %v6318_v42, %v6322_v46  ;;  %v6326_v58 = vld [vmem:[%s16954_s9 + $0xe00] sm:$0xff] }
 0x546   : > { %v6323_v49 = vld [vmem:[%s16954_s9 + $0xde8] sm:$0xff]  ;;  %v6334_v4 = vld [vmem:[%s16954_s9 + $0xe40] sm:$0xff] }
 0x547   : > { %9082 = vmatpush1.bf16.msra.mxu0 %v11853_v59  ;;  %9254 = vmatpush1.bf16.msra.mxu1 %v11855_v61  ;;  %v11904_v57 = vcombine.high %v6319_v47, %v6323_v49  ;;  %v6330_v59 = vld [vmem:[%s16954_s9 + $0xe20] sm:$0xff]  ;;  %v6327_v61 = vld [vmem:[%s16954_s9 + $0xe08] sm:$0xff]  ;;  %v11903_v3 = vcombine.low %v6319_v47, %v6323_v49 }
 0x548   : > { %9083 = vmatprep.subr.bf16.mxu0 %v11862_v63  ;;  %9255 = vmatprep.subr.bf16.mxu1 %v11864_v2  ;;  %v6331_v63 = vld [vmem:[%s16954_s9 + $0xe28] sm:$0xff]  ;;  %v11901_v2 = vcombine.low %v6318_v42, %v6322_v46  ;;  %v11910_v7 = vcombine.high %v6326_v58, %v6330_v59  ;;  %v6342_v13 = vld [vmem:[%s16954_s9 + $0xe80] sm:$0xff] }
 0x549   : > { %v11912_v60 = vcombine.high %v6327_v61, %v6331_v63  ;;  %v11911_v11 = vcombine.low %v6327_v61, %v6331_v63  ;;  %v6350_v22 = vld [vmem:[%s16954_s9 + $0xec0] sm:$0xff] }
 0x54a   : > { %v6358_v41 = vld [vmem:[%s16954_s9 + $0xf00] sm:$0xff] }
 0x54b   : > { %9084 = vmatpush1.bf16.msra.mxu0 %v11861_v44  ;;  %9256 = vmatpush1.bf16.msra.mxu1 %v11863_v5  ;;  %v6338_v44 = vld [vmem:[%s16954_s9 + $0xe60] sm:$0xff]  ;;  %v6335_v5 = vld [vmem:[%s16954_s9 + $0xe48] sm:$0xff] }
 0x54c   : > { %9085 = vmatprep.subr.bf16.mxu0 %v11870_v8  ;;  %9257 = vmatprep.subr.bf16.mxu1 %v11872_v9  ;;  %v6339_v8 = vld [vmem:[%s16954_s9 + $0xe68] sm:$0xff]  ;;  %v11909_v9 = vcombine.low %v6326_v58, %v6330_v59  ;;  %v11918_v0 = vcombine.high %v6334_v4, %v6338_v44  ;;  %v6366_v49 = vld [vmem:[%s16954_s9 + $0xf40] sm:$0xff] }
 0x54d   : > { %v11920_v12 = vcombine.high %v6335_v5, %v6339_v8  ;;  %v11919_v35 = vcombine.low %v6335_v5, %v6339_v8  ;;  %v6374_v63 = vld [vmem:[%s16954_s9 + $0xf80] sm:$0xff] }
 0x54e   : > { %v6382_v8 = vld [vmem:[%s16954_s9 + $0xfc0] sm:$0xff] }
 0x54f   : > { %9086 = vmatpush1.bf16.msra.mxu0 %v11869_v14  ;;  %9258 = vmatpush1.bf16.msra.mxu1 %v11871_v17  ;;  %v6346_v14 = vld [vmem:[%s16954_s9 + $0xea0] sm:$0xff]  ;;  %v6343_v17 = vld [vmem:[%s16954_s9 + $0xe88] sm:$0xff] }
 0x550   : > { %9087 = vmatprep.subr.bf16.mxu0 %v11878_v18  ;;  %9259 = vmatprep.subr.bf16.mxu1 %v11880_v20  ;;  %v6347_v18 = vld [vmem:[%s16954_s9 + $0xea8] sm:$0xff]  ;;  %v11917_v20 = vcombine.low %v6334_v4, %v6338_v44  ;;  %v11926_v21 = vcombine.high %v6342_v13, %v6346_v14 }
 0x551   : > { %v11928_v56 = vcombine.high %v6343_v17, %v6347_v18  ;;  %v11927_v28 = vcombine.low %v6343_v17, %v6347_v18  ;;  %v5880_v18 = vld [vmem:[%s16954_s9 + $0x10] sm:$0xff] }
 0x553   : > { %9088 = vmatpush1.bf16.msra.mxu0 %v11877_v1  ;;  %9260 = vmatpush1.bf16.msra.mxu1 %v11879_v23  ;;  %v6354_v1 = vld [vmem:[%s16954_s9 + $0xee0] sm:$0xff]  ;;  %v6351_v23 = vld [vmem:[%s16954_s9 + $0xec8] sm:$0xff] }
 0x554   : > { %9089 = vmatprep.subr.bf16.mxu0 %v11886_v27  ;;  %9261 = vmatprep.subr.bf16.mxu1 %v11888_v36  ;;  %v6355_v27 = vld [vmem:[%s16954_s9 + $0xee8] sm:$0xff]  ;;  %v11925_v36 = vcombine.low %v6342_v13, %v6346_v14  ;;  %v11934_v31 = vcombine.high %v6350_v22, %v6354_v1 }
 0x555   : > { %v11936_v32 = vcombine.high %v6351_v23, %v6355_v27  ;;  %v11935_v42 = vcombine.low %v6351_v23, %v6355_v27  ;;  %v5888_v27 = vld [vmem:[%s16954_s9 + $0x50] sm:$0xff] }
 0x557   : > { %9090 = vmatpush1.bf16.msra.mxu0 %v11885_v39  ;;  %9262 = vmatpush1.bf16.msra.mxu1 %v11887_v34  ;;  %v6362_v39 = vld [vmem:[%s16954_s9 + $0xf20] sm:$0xff]  ;;  %v6359_v34 = vld [vmem:[%s16954_s9 + $0xf08] sm:$0xff] }
 0x558   : > { %9091 = vmatprep.subr.bf16.mxu0 %v11894_v37  ;;  %9263 = vmatprep.subr.bf16.mxu1 %v11896_v38  ;;  %v6363_v37 = vld [vmem:[%s16954_s9 + $0xf28] sm:$0xff]  ;;  %v11933_v38 = vcombine.low %v6350_v22, %v6354_v1  ;;  %v11942_v46 = vcombine.high %v6358_v41, %v6362_v39 }
 0x559   : > { %v11944_v47 = vcombine.high %v6359_v34, %v6363_v37  ;;  %v11943_v58 = vcombine.low %v6359_v34, %v6363_v37  ;;  %v5896_v37 = vld [vmem:[%s16954_s9 + $0x90] sm:$0xff] }
 0x55b   : > { %9092 = vmatpush1.bf16.msra.mxu0 %v11893_v52  ;;  %9264 = vmatpush1.bf16.msra.mxu1 %v11895_v43  ;;  %v6370_v52 = vld [vmem:[%s16954_s9 + $0xf60] sm:$0xff]  ;;  %v6367_v43 = vld [vmem:[%s16954_s9 + $0xf48] sm:$0xff] }
 0x55c   : > { %9093 = vmatprep.subr.bf16.mxu0 %v11902_v55  ;;  %9265 = vmatprep.subr.bf16.mxu1 %v11904_v57  ;;  %v6371_v55 = vld [vmem:[%s16954_s9 + $0xf68] sm:$0xff]  ;;  %v11941_v57 = vcombine.low %v6358_v41, %v6362_v39  ;;  %v11950_v59 = vcombine.high %v6366_v49, %v6370_v52 }
 0x55d   : > { %v11952_v61 = vcombine.high %v6367_v43, %v6371_v55  ;;  %v11951_v4 = vcombine.low %v6367_v43, %v6371_v55  ;;  %v5904_v55 = vld [vmem:[%s16954_s9 + $0xd0] sm:$0xff] }
 0x55f   : > { %9094 = vmatpush1.bf16.msra.mxu0 %v11901_v2  ;;  %9266 = vmatpush1.bf16.msra.mxu1 %v11903_v3  ;;  %v6378_v2 = vld [vmem:[%s16954_s9 + $0xfa0] sm:$0xff]  ;;  %v6375_v3 = vld [vmem:[%s16954_s9 + $0xf88] sm:$0xff] }
 0x560   : > { %9095 = vmatprep.subr.bf16.mxu0 %v11910_v7  ;;  %9267 = vmatprep.subr.bf16.mxu1 %v11912_v60  ;;  %v6379_v7 = vld [vmem:[%s16954_s9 + $0xfa8] sm:$0xff]  ;;  %v11949_v60 = vcombine.low %v6366_v49, %v6370_v52  ;;  %v11958_v44 = vcombine.high %v6374_v63, %v6378_v2 }
 0x561   : > { %v11960_v5 = vcombine.high %v6375_v3, %v6379_v7  ;;  %v11959_v13 = vcombine.low %v6375_v3, %v6379_v7  ;;  %v5912_v3 = vld [vmem:[%s16954_s9 + $0x110] sm:$0xff] }
 0x562   : > { %v5916_v7 = vld [vmem:[%s16954_s9 + $0x130] sm:$0xff] }
 0x563   : > { %9096 = vmatpush1.bf16.msra.mxu0 %v11909_v9  ;;  %9268 = vmatpush1.bf16.msra.mxu1 %v11911_v11  ;;  %v6386_v9 = vld [vmem:[%s16954_s9 + $0xfe0] sm:$0xff]  ;;  %v6383_v11 = vld [vmem:[%s16954_s9 + $0xfc8] sm:$0xff] }
 0x564   : > { %9097 = vmatprep.subr.bf16.mxu0 %v11918_v0  ;;  %9269 = vmatprep.subr.bf16.mxu1 %v11920_v12  ;;  %v6387_v0 = vld [vmem:[%s16954_s9 + $0xfe8] sm:$0xff]  ;;  %v11957_v12 = vcombine.low %v6374_v63, %v6378_v2  ;;  %v11966_v14 = vcombine.high %v6382_v8, %v6386_v9 }
 0x565   : > { %v11968_v17 = vcombine.high %v6383_v11, %v6387_v0  ;;  %v11967_v22 = vcombine.low %v6383_v11, %v6387_v0  ;;  %v5920_v11 = vld [vmem:[%s16954_s9 + $0x150] sm:$0xff] }
 0x566   : > { %v5924_v0 = vld [vmem:[%s16954_s9 + $0x170] sm:$0xff] }
 0x567   : > { %9098 = vmatpush1.bf16.msra.mxu0 %v11917_v20  ;;  %9270 = vmatpush1.bf16.msra.mxu1 %v11919_v35  ;;  %v5884_v20 = vld [vmem:[%s16954_s9 + $0x30] sm:$0xff]  ;;  %v5881_v35 = vld [vmem:[%s16954_s9 + $0x18] sm:$0xff] }
 0x568   : > { %9099 = vmatprep.subr.bf16.mxu0 %v11926_v21  ;;  %9271 = vmatprep.subr.bf16.mxu1 %v11928_v56  ;;  %v5885_v21 = vld [vmem:[%s16954_s9 + $0x38] sm:$0xff]  ;;  %v11965_v56 = vcombine.low %v6382_v8, %v6386_v9  ;;  %v11466_v1 = vcombine.high %v5880_v18, %v5884_v20  ;;  %v11498_v8 = vcombine.high %v5912_v3, %v5916_v7 }
 0x569   : > { %v11468_v23 = vcombine.high %v5881_v35, %v5885_v21  ;;  %v11467_v41 = vcombine.low %v5881_v35, %v5885_v21  ;;  %v5928_v35 = vld [vmem:[%s16954_s9 + $0x190] sm:$0xff] }
 0x56a   : > { %v5932_v21 = vld [vmem:[%s16954_s9 + $0x1b0] sm:$0xff] }
 0x56b   : > { %9100 = vmatpush1.bf16.msra.mxu0 %v11925_v36  ;;  %9272 = vmatpush1.bf16.msra.mxu1 %v11927_v28  ;;  %v5892_v36 = vld [vmem:[%s16954_s9 + $0x70] sm:$0xff]  ;;  %v5889_v28 = vld [vmem:[%s16954_s9 + $0x58] sm:$0xff] }
 0x56c   : > { %9101 = vmatprep.subr.bf16.mxu0 %v11934_v31  ;;  %9273 = vmatprep.subr.bf16.mxu1 %v11936_v32  ;;  %v5893_v31 = vld [vmem:[%s16954_s9 + $0x78] sm:$0xff]  ;;  %v11465_v32 = vcombine.low %v5880_v18, %v5884_v20  ;;  %v11474_v39 = vcombine.high %v5888_v27, %v5892_v36  ;;  %v11506_v18 = vcombine.high %v5920_v11, %v5924_v0 }
 0x56d   : > { %v11476_v34 = vcombine.high %v5889_v28, %v5893_v31  ;;  %v11475_v49 = vcombine.low %v5889_v28, %v5893_v31  ;;  %v5936_v28 = vld [vmem:[%s16954_s9 + $0x1d0] sm:$0xff] }
 0x56e   : > { %v5940_v31 = vld [vmem:[%s16954_s9 + $0x1f0] sm:$0xff] }
 0x56f   : > { %9102 = vmatpush1.bf16.msra.mxu0 %v11933_v38  ;;  %9274 = vmatpush1.bf16.msra.mxu1 %v11935_v42  ;;  %v5900_v38 = vld [vmem:[%s16954_s9 + $0xb0] sm:$0xff]  ;;  %v5897_v42 = vld [vmem:[%s16954_s9 + $0x98] sm:$0xff] }
 0x570   : > { %9103 = vmatprep.subr.bf16.mxu0 %v11942_v46  ;;  %9275 = vmatprep.subr.bf16.mxu1 %v11944_v47  ;;  %v5901_v46 = vld [vmem:[%s16954_s9 + $0xb8] sm:$0xff]  ;;  %v11473_v47 = vcombine.low %v5888_v27, %v5892_v36  ;;  %v11482_v52 = vcombine.high %v5896_v37, %v5900_v38  ;;  %v11514_v27 = vcombine.high %v5928_v35, %v5932_v21 }
 0x571   : > { %v11484_v43 = vcombine.high %v5897_v42, %v5901_v46 }
 0x573   : > { %9104 = vmatpush1.bf16.msra.mxu0 %v11941_v57  ;;  %9276 = vmatpush1.bf16.msra.mxu1 %v11943_v58  ;;  %v5908_v57 = vld [vmem:[%s16954_s9 + $0xf0] sm:$0xff]  ;;  %v5905_v58 = vld [vmem:[%s16954_s9 + $0xd8] sm:$0xff] }
 0x574   : > { %9105 = vmatprep.subr.bf16.mxu0 %v11950_v59  ;;  %9277 = vmatprep.subr.bf16.mxu1 %v11952_v61  ;;  %v11481_v59 = vcombine.low %v5896_v37, %v5900_v38  ;;  %v11483_v61 = vcombine.low %v5897_v42, %v5901_v46  ;;  %v11490_v63 = vcombine.high %v5904_v55, %v5908_v57  ;;  %v5944_v42 = vld [vmem:[%s16954_s9 + $0x210] sm:$0xff] }
 0x575   : > { %v11522_v37 = vcombine.high %v5936_v28, %v5940_v31  ;;  %v5948_v46 = vld [vmem:[%s16954_s9 + $0x230] sm:$0xff] }
 0x577   : > { %9106 = vmatpush1.bf16.msra.mxu0 %v11949_v60  ;;  %9278 = vmatpush1.bf16.msra.mxu1 %v11951_v4  ;;  %v5913_v60 = vld [vmem:[%s16954_s9 + $0x118] sm:$0xff] }
 0x578   : > { %9107 = vmatprep.subr.bf16.mxu0 %v11958_v44  ;;  %9279 = vmatprep.subr.bf16.mxu1 %v11960_v5  ;;  %v5917_v4 = vld [vmem:[%s16954_s9 + $0x138] sm:$0xff]  ;;  %v11489_v44 = vcombine.low %v5904_v55, %v5908_v57  ;;  %v11530_v55 = vcombine.high %v5944_v42, %v5948_v46 }
 0x579   : > { %v11500_v9 = vcombine.high %v5913_v60, %v5917_v4 }
 0x57b   : > { %9108 = vmatpush1.bf16.msra.mxu0 %v11957_v12  ;;  %9280 = vmatpush1.bf16.msra.mxu1 %v11959_v13  ;;  %v5921_v12 = vld [vmem:[%s16954_s9 + $0x158] sm:$0xff] }
 0x57c   : > { %9109 = vmatprep.subr.bf16.mxu0 %v11966_v14  ;;  %9281 = vmatprep.subr.bf16.mxu1 %v11968_v17  ;;  %v5925_v13 = vld [vmem:[%s16954_s9 + $0x178] sm:$0xff]  ;;  %v11497_v14 = vcombine.low %v5912_v3, %v5916_v7  ;;  %v11499_v17 = vcombine.low %v5913_v60, %v5917_v4  ;;  %v5960_v60 = vld [vmem:[%s16954_s9 + $0x290] sm:$0xff] }
 0x57d   : > { %v11508_v20 = vcombine.high %v5921_v12, %v5925_v13  ;;  %v5964_v4 = vld [vmem:[%s16954_s9 + $0x2b0] sm:$0xff] }
 0x57f   : > { %9110 = vmatpush1.bf16.msra.mxu0 %v11965_v56  ;;  %9282 = vmatpush1.bf16.msra.mxu1 %v11967_v22  ;;  %v5929_v56 = vld [vmem:[%s16954_s9 + $0x198] sm:$0xff] }
 0x580   : > { %9294 = vmatprep.subr.bf16.mxu0 %v11466_v1  ;;  %9466 = vmatprep.subr.bf16.mxu1 %v11468_v23  ;;  %v5933_v22 = vld [vmem:[%s16954_s9 + $0x1b8] sm:$0xff]  ;;  %v11505_v1 = vcombine.low %v5920_v11, %v5924_v0  ;;  %v11507_v23 = vcombine.low %v5921_v12, %v5925_v13  ;;  %v11546_v11 = vcombine.high %v5960_v60, %v5964_v4  ;;  %v5968_v12 = vld [vmem:[%s16954_s9 + $0x2d0] sm:$0xff] }
 0x581   : > { %v11516_v36 = vcombine.high %v5929_v56, %v5933_v22  ;;  %v5972_v13 = vld [vmem:[%s16954_s9 + $0x2f0] sm:$0xff] }
 0x582   : > { %9112 = vmatmul.mubr.bf16.vlgmr.msra.gmra.mrb[28].mxu0 %v15670_v33  ;;  %9284 = vmatmul.mubr.bf16.vlgmr.msra.gmra.mrb[28].mxu1 %v15670_v33 }
 0x583   : > { %9295 = vmatpush1.bf16.msra.mxu0 %v11465_v32  ;;  %9326 = vmatprep.mubr.bf16.mxu0 %v15254_v50  ;;  %v5937_v32 = vld [vmem:[%s16954_s9 + $0x1d8] sm:$0xff] }
 0x584   : > { %9467 = vmatpush1.bf16.msra.mxu1 %v11467_v41  ;;  %9498 = vmatprep.mubr.bf16.mxu1 %v15254_v50  ;;  %v5909_v50 = vld [vmem:[%s16954_s9 + $0xf8] sm:$0xff] }
 0x585   : > { %9296 = vmatprep.subr.bf16.mxu0 %v11474_v39  ;;  %9468 = vmatprep.subr.bf16.mxu1 %v11476_v34  ;;  %v11492_v2 = vcombine.high %v5905_v58, %v5909_v50  ;;  %v11491_v5 = vcombine.low %v5905_v58, %v5909_v50  ;;  %v5941_v41 = vld [vmem:[%s16954_s9 + $0x1f8] sm:$0xff]  ;;  %v11513_v39 = vcombine.low %v5928_v35, %v5932_v21  ;;  %v5952_v58 = vld [vmem:[%s16954_s9 + $0x250] sm:$0xff] }
 0x586   : > { %v11515_v34 = vcombine.low %v5929_v56, %v5933_v22  ;;  %v11524_v38 = vcombine.high %v5937_v32, %v5941_v41  ;;  %v5956_v50 = vld [vmem:[%s16954_s9 + $0x270] sm:$0xff]  ;;  %v11554_v35 = vcombine.high %v5968_v12, %v5972_v13 }
 0x587   : > { %9297 = vmatpush1.bf16.msra.mxu0 %v11473_v47  ;;  %v5945_v47 = vld [vmem:[%s16954_s9 + $0x218] sm:$0xff]  ;;  %v11538_v3 = vcombine.high %v5952_v58, %v5956_v50  ;;  %v5976_v56 = vld [vmem:[%s16954_s9 + $0x310] sm:$0xff] }
 0x588   : > { %9469 = vmatpush1.bf16.msra.mxu1 %v11475_v49  ;;  %9298 = vmatprep.subr.bf16.mxu0 %v11482_v52  ;;  %v5949_v49 = vld [vmem:[%s16954_s9 + $0x238] sm:$0xff]  ;;  %v11521_v52 = vcombine.low %v5936_v28, %v5940_v31  ;;  %v5980_v22 = vld [vmem:[%s16954_s9 + $0x330] sm:$0xff] }
 0x589   : > { %9470 = vmatprep.subr.bf16.mxu1 %v11484_v43  ;;  %v11523_v43 = vcombine.low %v5937_v32, %v5941_v41  ;;  %v11532_v57 = vcombine.high %v5945_v47, %v5949_v49  ;;  %v11562_v28 = vcombine.high %v5976_v56, %v5980_v22  ;;  %v5984_v32 = vld [vmem:[%s16954_s9 + $0x350] sm:$0xff] }
 0x58a   : > { %v5988_v41 = vld [vmem:[%s16954_s9 + $0x370] sm:$0xff] }
 0x58b   : > { %9299 = vmatpush1.bf16.msra.mxu0 %v11481_v59  ;;  %v5953_v59 = vld [vmem:[%s16954_s9 + $0x258] sm:$0xff] }
 0x58c   : > { %9471 = vmatpush1.bf16.msra.mxu1 %v11483_v61  ;;  %9300 = vmatprep.subr.bf16.mxu0 %v11490_v63  ;;  %v5957_v61 = vld [vmem:[%s16954_s9 + $0x278] sm:$0xff]  ;;  %v11529_v63 = vcombine.low %v5944_v42, %v5948_v46  ;;  %v11570_v42 = vcombine.high %v5984_v32, %v5988_v41 }
 0x58d   : > { %9472 = vmatprep.subr.bf16.mxu1 %v11492_v2  ;;  %v11531_v2 = vcombine.low %v5945_v47, %v5949_v49  ;;  %v11540_v7 = vcombine.high %v5953_v59, %v5957_v61  ;;  %v5992_v47 = vld [vmem:[%s16954_s9 + $0x390] sm:$0xff] }
 0x58e   : > { %v5996_v49 = vld [vmem:[%s16954_s9 + $0x3b0] sm:$0xff] }
 0x58f   : > { %9301 = vmatpush1.bf16.msra.mxu0 %v11489_v44  ;;  %v5961_v44 = vld [vmem:[%s16954_s9 + $0x298] sm:$0xff] }
 0x590   : > { %9473 = vmatpush1.bf16.msra.mxu1 %v11491_v5  ;;  %9302 = vmatprep.subr.bf16.mxu0 %v11498_v8  ;;  %v5965_v5 = vld [vmem:[%s16954_s9 + $0x2b8] sm:$0xff]  ;;  %v11537_v8 = vcombine.low %v5952_v58, %v5956_v50  ;;  %v11578_v58 = vcombine.high %v5992_v47, %v5996_v49 }
 0x591   : > { %9474 = vmatprep.subr.bf16.mxu1 %v11500_v9  ;;  %v11539_v9 = vcombine.low %v5953_v59, %v5957_v61  ;;  %v11548_v0 = vcombine.high %v5961_v44, %v5965_v5  ;;  %v6000_v59 = vld [vmem:[%s16954_s9 + $0x3d0] sm:$0xff] }
 0x592   : > { %v6004_v61 = vld [vmem:[%s16954_s9 + $0x3f0] sm:$0xff] }
 0x593   : > { %9303 = vmatpush1.bf16.msra.mxu0 %v11497_v14  ;;  %v5969_v14 = vld [vmem:[%s16954_s9 + $0x2d8] sm:$0xff] }
 0x594   : > { %9475 = vmatpush1.bf16.msra.mxu1 %v11499_v17  ;;  %9304 = vmatprep.subr.bf16.mxu0 %v11506_v18  ;;  %v5973_v17 = vld [vmem:[%s16954_s9 + $0x2f8] sm:$0xff]  ;;  %v11545_v18 = vcombine.low %v5960_v60, %v5964_v4  ;;  %v11586_v60 = vcombine.high %v6000_v59, %v6004_v61 }
 0x595   : > { %9476 = vmatprep.subr.bf16.mxu1 %v11508_v20  ;;  %v11547_v20 = vcombine.low %v5961_v44, %v5965_v5  ;;  %v11556_v21 = vcombine.high %v5969_v14, %v5973_v17  ;;  %v6008_v44 = vld [vmem:[%s16954_s9 + $0x410] sm:$0xff] }
 0x596   : > { %v6012_v5 = vld [vmem:[%s16954_s9 + $0x430] sm:$0xff] }
 0x597   : > { %9305 = vmatpush1.bf16.msra.mxu0 %v11505_v1  ;;  %v5977_v1 = vld [vmem:[%s16954_s9 + $0x318] sm:$0xff] }
 0x598   : > { %9477 = vmatpush1.bf16.msra.mxu1 %v11507_v23  ;;  %9306 = vmatprep.subr.bf16.mxu0 %v11514_v27  ;;  %v5981_v23 = vld [vmem:[%s16954_s9 + $0x338] sm:$0xff]  ;;  %v11553_v27 = vcombine.low %v5968_v12, %v5972_v13  ;;  %v11594_v12 = vcombine.high %v6008_v44, %v6012_v5 }
 0x599   : > { %9478 = vmatprep.subr.bf16.mxu1 %v11516_v36  ;;  %v11555_v36 = vcombine.low %v5969_v14, %v5973_v17  ;;  %v11564_v31 = vcombine.high %v5977_v1, %v5981_v23  ;;  %v6016_v14 = vld [vmem:[%s16954_s9 + $0x450] sm:$0xff] }
 0x59a   : > { %v6020_v17 = vld [vmem:[%s16954_s9 + $0x470] sm:$0xff] }
 0x59b   : > { %9307 = vmatpush1.bf16.msra.mxu0 %v11513_v39  ;;  %v5985_v39 = vld [vmem:[%s16954_s9 + $0x358] sm:$0xff] }
 0x59c   : > { %9479 = vmatpush1.bf16.msra.mxu1 %v11515_v34  ;;  %9308 = vmatprep.subr.bf16.mxu0 %v11522_v37  ;;  %v5989_v34 = vld [vmem:[%s16954_s9 + $0x378] sm:$0xff]  ;;  %v11561_v37 = vcombine.low %v5976_v56, %v5980_v22  ;;  %v11602_v56 = vcombine.high %v6016_v14, %v6020_v17  ;;  %v6024_v22 = vld [vmem:[%s16954_s9 + $0x490] sm:$0xff] }
 0x59d   : > { %9480 = vmatprep.subr.bf16.mxu1 %v11524_v38  ;;  %v11563_v38 = vcombine.low %v5977_v1, %v5981_v23  ;;  %v11572_v46 = vcombine.high %v5985_v39, %v5989_v34  ;;  %v6028_v1 = vld [vmem:[%s16954_s9 + $0x4b0] sm:$0xff] }
 0x59f   : > { %9309 = vmatpush1.bf16.msra.mxu0 %v11521_v52  ;;  %v5993_v52 = vld [vmem:[%s16954_s9 + $0x398] sm:$0xff] }
 0x5a0   : > { %9481 = vmatpush1.bf16.msra.mxu1 %v11523_v43  ;;  %9310 = vmatprep.subr.bf16.mxu0 %v11530_v55  ;;  %v5997_v43 = vld [vmem:[%s16954_s9 + $0x3b8] sm:$0xff]  ;;  %v11569_v55 = vcombine.low %v5984_v32, %v5988_v41  ;;  %v11610_v32 = vcombine.high %v6024_v22, %v6028_v1 }
 0x5a1   : > { %9482 = vmatprep.subr.bf16.mxu1 %v11532_v57  ;;  %v11571_v57 = vcombine.low %v5985_v39, %v5989_v34  ;;  %v11580_v50 = vcombine.high %v5993_v52, %v5997_v43  ;;  %v6032_v39 = vld [vmem:[%s16954_s9 + $0x4d0] sm:$0xff] }
 0x5a2   : > { %v6036_v34 = vld [vmem:[%s16954_s9 + $0x4f0] sm:$0xff] }
 0x5a3   : > { %9311 = vmatpush1.bf16.msra.mxu0 %v11529_v63  ;;  %v6001_v63 = vld [vmem:[%s16954_s9 + $0x3d8] sm:$0xff] }
 0x5a4   : > { %9483 = vmatpush1.bf16.msra.mxu1 %v11531_v2  ;;  %9312 = vmatprep.subr.bf16.mxu0 %v11538_v3  ;;  %v6005_v2 = vld [vmem:[%s16954_s9 + $0x3f8] sm:$0xff]  ;;  %v11577_v3 = vcombine.low %v5992_v47, %v5996_v49  ;;  %v6040_v47 = vld [vmem:[%s16954_s9 + $0x510] sm:$0xff] }
 0x5a5   : > { %9484 = vmatprep.subr.bf16.mxu1 %v11540_v7  ;;  %v11579_v7 = vcombine.low %v5993_v52, %v5997_v43  ;;  %v11588_v4 = vcombine.high %v6001_v63, %v6005_v2  ;;  %v6044_v49 = vld [vmem:[%s16954_s9 + $0x530] sm:$0xff]  ;;  %v6041_v52 = vld [vmem:[%s16954_s9 + $0x518] sm:$0xff] }
 0x5a6   : > { %v6045_v43 = vld [vmem:[%s16954_s9 + $0x538] sm:$0xff] }
 0x5a7   : > { %9313 = vmatpush1.bf16.msra.mxu0 %v11537_v8  ;;  %v6009_v8 = vld [vmem:[%s16954_s9 + $0x418] sm:$0xff] }
 0x5a8   : > { %9485 = vmatpush1.bf16.msra.mxu1 %v11539_v9  ;;  %9314 = vmatprep.subr.bf16.mxu0 %v11546_v11  ;;  %v6013_v9 = vld [vmem:[%s16954_s9 + $0x438] sm:$0xff]  ;;  %v11585_v11 = vcombine.low %v6000_v59, %v6004_v61  ;;  %v6048_v59 = vld [vmem:[%s16954_s9 + $0x550] sm:$0xff] }
 0x5a9   : > { %9486 = vmatprep.subr.bf16.mxu1 %v11548_v0  ;;  %v11587_v0 = vcombine.low %v6001_v63, %v6005_v2  ;;  %v11596_v13 = vcombine.high %v6009_v8, %v6013_v9  ;;  %v6052_v61 = vld [vmem:[%s16954_s9 + $0x570] sm:$0xff]  ;;  %v6049_v63 = vld [vmem:[%s16954_s9 + $0x558] sm:$0xff] }
 0x5aa   : > { %v6053_v2 = vld [vmem:[%s16954_s9 + $0x578] sm:$0xff] }
 0x5ab   : > { %9315 = vmatpush1.bf16.msra.mxu0 %v11545_v18  ;;  %v11593_v18 = vcombine.low %v6008_v44, %v6012_v5  ;;  %v6056_v44 = vld [vmem:[%s16954_s9 + $0x590] sm:$0xff] }
 0x5ac   : > { %9487 = vmatpush1.bf16.msra.mxu1 %v11547_v20  ;;  %9316 = vmatprep.subr.bf16.mxu0 %v11554_v35  ;;  %v6017_v20 = vld [vmem:[%s16954_s9 + $0x458] sm:$0xff]  ;;  %v6060_v5 = vld [vmem:[%s16954_s9 + $0x5b0] sm:$0xff] }
 0x5ad   : > { %9488 = vmatprep.subr.bf16.mxu1 %v11556_v21  ;;  %v6021_v35 = vld [vmem:[%s16954_s9 + $0x478] sm:$0xff]  ;;  %v11595_v21 = vcombine.low %v6009_v8, %v6013_v9 }
 0x5ae   : > { %v11604_v23 = vcombine.high %v6017_v20, %v6021_v35  ;;  %v6057_v8 = vld [vmem:[%s16954_s9 + $0x598] sm:$0xff] }
 0x5af   : > { %9317 = vmatpush1.bf16.msra.mxu0 %v11553_v27  ;;  %v6025_v27 = vld [vmem:[%s16954_s9 + $0x498] sm:$0xff] }
 0x5b0   : > { %9489 = vmatpush1.bf16.msra.mxu1 %v11555_v36  ;;  %9318 = vmatprep.subr.bf16.mxu0 %v11562_v28  ;;  %v6029_v36 = vld [vmem:[%s16954_s9 + $0x4b8] sm:$0xff]  ;;  %v11601_v28 = vcombine.low %v6016_v14, %v6020_v17  ;;  %v6064_v14 = vld [vmem:[%s16954_s9 + $0x5d0] sm:$0xff] }
 0x5b1   : > { %9490 = vmatprep.subr.bf16.mxu1 %v11564_v31  ;;  %v11603_v31 = vcombine.low %v6017_v20, %v6021_v35  ;;  %v11612_v41 = vcombine.high %v6025_v27, %v6029_v36  ;;  %v6061_v9 = vld [vmem:[%s16954_s9 + $0x5b8] sm:$0xff]  ;;  %v6068_v17 = vld [vmem:[%s16954_s9 + $0x5f0] sm:$0xff]  ;;  %v11641_v35 = vcombine.low %v6056_v44, %v6060_v5 }
 0x5b2   : > { %v6069_v20 = vld [vmem:[%s16954_s9 + $0x5f8] sm:$0xff] }
 0x5b3   : > { %9319 = vmatpush1.bf16.msra.mxu0 %v11561_v37  ;;  %v6037_v37 = vld [vmem:[%s16954_s9 + $0x4f8] sm:$0xff] }
 0x5b4   : > { %9491 = vmatpush1.bf16.msra.mxu1 %v11563_v38  ;;  %9320 = vmatprep.subr.bf16.mxu0 %v11570_v42  ;;  %v11611_v38 = vcombine.low %v6025_v27, %v6029_v36  ;;  %v11618_v42 = vcombine.high %v6032_v39, %v6036_v34  ;;  %v6073_v27 = vld [vmem:[%s16954_s9 + $0x618] sm:$0xff] }
 0x5b5   : > { %9492 = vmatprep.subr.bf16.mxu1 %v11572_v46  ;;  %v6077_v36 = vld [vmem:[%s16954_s9 + $0x638] sm:$0xff] }
 0x5b7   : > { %9321 = vmatpush1.bf16.msra.mxu0 %v11569_v55  ;;  %v11617_v55 = vcombine.low %v6032_v39, %v6036_v34  ;;  %v6080_v39 = vld [vmem:[%s16954_s9 + $0x650] sm:$0xff] }
 0x5b8   : > { %9493 = vmatpush1.bf16.msra.mxu1 %v11571_v57  ;;  %9322 = vmatprep.subr.bf16.mxu0 %v11578_v58  ;;  %v11626_v58 = vcombine.high %v6040_v47, %v6044_v49  ;;  %v6084_v34 = vld [vmem:[%s16954_s9 + $0x670] sm:$0xff] }
 0x5b9   : > { %9494 = vmatprep.subr.bf16.mxu1 %v11580_v50  ;;  %v11628_v50 = vcombine.high %v6041_v52, %v6045_v43 }
 0x5bb   : > { %9323 = vmatpush1.bf16.msra.mxu0 %v11577_v3  ;;  %v11625_v3 = vcombine.low %v6040_v47, %v6044_v49  ;;  %v6088_v47 = vld [vmem:[%s16954_s9 + $0x690] sm:$0xff] }
 0x5bc   : > { %9495 = vmatpush1.bf16.msra.mxu1 %v11579_v7  ;;  %9324 = vmatprep.subr.bf16.mxu0 %v11586_v60  ;;  %v11627_v7 = vcombine.low %v6041_v52, %v6045_v43  ;;  %v11634_v60 = vcombine.high %v6048_v59, %v6052_v61  ;;  %v6092_v49 = vld [vmem:[%s16954_s9 + $0x6b0] sm:$0xff]  ;;  %v6089_v52 = vld [vmem:[%s16954_s9 + $0x698] sm:$0xff] }
 0x5bd   : > { %9496 = vmatprep.subr.bf16.mxu1 %v11588_v4  ;;  %v11636_v4 = vcombine.high %v6049_v63, %v6053_v2  ;;  %v6093_v43 = vld [vmem:[%s16954_s9 + $0x6b8] sm:$0xff] }
 0x5bf   : > { %9325 = vmatpush1.bf16.msra.mxu0 %v11585_v11  ;;  %v11633_v11 = vcombine.low %v6048_v59, %v6052_v61  ;;  %v6096_v59 = vld [vmem:[%s16954_s9 + $0x6d0] sm:$0xff] }
 0x5c0   : > { %9497 = vmatpush1.bf16.msra.mxu1 %v11587_v0  ;;  %9337 = vmatprep.subr.bf16.mxu0 %v11594_v12  ;;  %v11635_v0 = vcombine.low %v6049_v63, %v6053_v2  ;;  %v11642_v12 = vcombine.high %v6056_v44, %v6060_v5  ;;  %v6100_v61 = vld [vmem:[%s16954_s9 + $0x6f0] sm:$0xff]  ;;  %v6097_v63 = vld [vmem:[%s16954_s9 + $0x6d8] sm:$0xff] }
 0x5c1   : > { %9509 = vmatprep.subr.bf16.mxu1 %v11596_v13  ;;  %v11644_v13 = vcombine.high %v6057_v8, %v6061_v9  ;;  %v6101_v2 = vld [vmem:[%s16954_s9 + $0x6f8] sm:$0xff]  ;;  %v6104_v44 = vld [vmem:[%s16954_s9 + $0x710] sm:$0xff] }
 0x5c2   : > { %9327 = vmatmul.mubr.bf16.vlgmr.msra.gmra.mrb[32].mxu0 %v15250_v45  ;;  %v6108_v5 = vld [vmem:[%s16954_s9 + $0x730] sm:$0xff] }
 0x5c3   : > { %9499 = vmatmul.mubr.bf16.vlgmr.msra.gmra.mrb[32].mxu1 %v15250_v45  ;;  %9338 = vmatpush1.bf16.msra.mxu0 %v11593_v18  ;;  %v6033_v45 = vld [vmem:[%s16954_s9 + $0x4d8] sm:$0xff] }
 0x5c4   : > { %9369 = vmatprep.mubr.bf16.mxu0 %v15260_v53  ;;  %9510 = vmatpush1.bf16.msra.mxu1 %v11595_v21  ;;  %v11620_v46 = vcombine.high %v6033_v45, %v6037_v37  ;;  %v11619_v57 = vcombine.low %v6033_v45, %v6037_v37  ;;  %v6065_v18 = vld [vmem:[%s16954_s9 + $0x5d8] sm:$0xff]  ;;  %v11643_v21 = vcombine.low %v6057_v8, %v6061_v9 }
 0x5c5   : > { %9541 = vmatprep.mubr.bf16.mxu1 %v15260_v53  ;;  %9339 = vmatprep.subr.bf16.mxu0 %v11602_v56  ;;  %v11609_v53 = vcombine.low %v6024_v22, %v6028_v1  ;;  %v11650_v56 = vcombine.high %v6064_v14, %v6068_v17  ;;  %v11652_v22 = vcombine.high %v6065_v18, %v6069_v20  ;;  %v6072_v1 = vld [vmem:[%s16954_s9 + $0x610] sm:$0xff]  ;;  %v6081_v45 = vld [vmem:[%s16954_s9 + $0x658] sm:$0xff] }
 0x5c6   : > { %9511 = vmatprep.subr.bf16.mxu1 %v11604_v23  ;;  %v6076_v23 = vld [vmem:[%s16954_s9 + $0x630] sm:$0xff]  ;;  %v6085_v37 = vld [vmem:[%s16954_s9 + $0x678] sm:$0xff] }
 0x5c7   : > { %9340 = vmatpush1.bf16.msra.mxu0 %v11601_v28  ;;  %v11649_v28 = vcombine.low %v6064_v14, %v6068_v17  ;;  %v6105_v8 = vld [vmem:[%s16954_s9 + $0x718] sm:$0xff]  ;;  %v6112_v14 = vld [vmem:[%s16954_s9 + $0x750] sm:$0xff] }
 0x5c8   : > { %9512 = vmatpush1.bf16.msra.mxu1 %v11603_v31  ;;  %9341 = vmatprep.subr.bf16.mxu0 %v11610_v32  ;;  %v11651_v31 = vcombine.low %v6065_v18, %v6069_v20  ;;  %v11658_v32 = vcombine.high %v6072_v1, %v6076_v23  ;;  %v6109_v9 = vld [vmem:[%s16954_s9 + $0x738] sm:$0xff]  ;;  %v6116_v17 = vld [vmem:[%s16954_s9 + $0x770] sm:$0xff] }
 0x5c9   : > { %9513 = vmatprep.subr.bf16.mxu1 %v11612_v41  ;;  %v11660_v41 = vcombine.high %v6073_v27, %v6077_v36  ;;  %v6113_v18 = vld [vmem:[%s16954_s9 + $0x758] sm:$0xff] }
 0x5ca   : > { %v6117_v20 = vld [vmem:[%s16954_s9 + $0x778] sm:$0xff] }
 0x5cb   : > { %9342 = vmatpush1.bf16.msra.mxu0 %v11609_v53  ;;  %v11657_v53 = vcombine.low %v6072_v1, %v6076_v23  ;;  %v6120_v1 = vld [vmem:[%s16954_s9 + $0x790] sm:$0xff] }
 0x5cc   : > { %9514 = vmatpush1.bf16.msra.mxu1 %v11611_v38  ;;  %9343 = vmatprep.subr.bf16.mxu0 %v11618_v42  ;;  %v11659_v38 = vcombine.low %v6073_v27, %v6077_v36  ;;  %v11666_v42 = vcombine.high %v6080_v39, %v6084_v34  ;;  %v6124_v23 = vld [vmem:[%s16954_s9 + $0x7b0] sm:$0xff]  ;;  %v6121_v27 = vld [vmem:[%s16954_s9 + $0x798] sm:$0xff] }
 0x5cd   : > { %9515 = vmatprep.subr.bf16.mxu1 %v11620_v46  ;;  %v11668_v46 = vcombine.high %v6081_v45, %v6085_v37  ;;  %v6125_v36 = vld [vmem:[%s16954_s9 + $0x7b8] sm:$0xff] }
 0x5cf   : > { %9344 = vmatpush1.bf16.msra.mxu0 %v11617_v55  ;;  %v11665_v55 = vcombine.low %v6080_v39, %v6084_v34  ;;  %v6128_v39 = vld [vmem:[%s16954_s9 + $0x7d0] sm:$0xff] }
 0x5d0   : > { %9516 = vmatpush1.bf16.msra.mxu1 %v11619_v57  ;;  %9345 = vmatprep.subr.bf16.mxu0 %v11626_v58  ;;  %v11667_v57 = vcombine.low %v6081_v45, %v6085_v37  ;;  %v11674_v58 = vcombine.high %v6088_v47, %v6092_v49  ;;  %v6132_v34 = vld [vmem:[%s16954_s9 + $0x7f0] sm:$0xff]  ;;  %v6129_v45 = vld [vmem:[%s16954_s9 + $0x7d8] sm:$0xff] }
 0x5d1   : > { %9517 = vmatprep.subr.bf16.mxu1 %v11628_v50  ;;  %v11676_v50 = vcombine.high %v6089_v52, %v6093_v43  ;;  %v6133_v37 = vld [vmem:[%s16954_s9 + $0x7f8] sm:$0xff] }
 0x5d3   : > { %9346 = vmatpush1.bf16.msra.mxu0 %v11625_v3  ;;  %v11673_v3 = vcombine.low %v6088_v47, %v6092_v49  ;;  %v6136_v47 = vld [vmem:[%s16954_s9 + $0x810] sm:$0xff] }
 0x5d4   : > { %9518 = vmatpush1.bf16.msra.mxu1 %v11627_v7  ;;  %9347 = vmatprep.subr.bf16.mxu0 %v11634_v60  ;;  %v11675_v7 = vcombine.low %v6089_v52, %v6093_v43  ;;  %v11682_v60 = vcombine.high %v6096_v59, %v6100_v61  ;;  %v6140_v49 = vld [vmem:[%s16954_s9 + $0x830] sm:$0xff]  ;;  %v6137_v52 = vld [vmem:[%s16954_s9 + $0x818] sm:$0xff] }
 0x5d5   : > { %9519 = vmatprep.subr.bf16.mxu1 %v11636_v4  ;;  %v11684_v4 = vcombine.high %v6097_v63, %v6101_v2  ;;  %v6141_v43 = vld [vmem:[%s16954_s9 + $0x838] sm:$0xff] }
 0x5d7   : > { %9348 = vmatpush1.bf16.msra.mxu0 %v11633_v11  ;;  %v11681_v11 = vcombine.low %v6096_v59, %v6100_v61  ;;  %v6144_v59 = vld [vmem:[%s16954_s9 + $0x850] sm:$0xff] }
 0x5d8   : > { %9520 = vmatpush1.bf16.msra.mxu1 %v11635_v0  ;;  %9349 = vmatprep.subr.bf16.mxu0 %v11642_v12  ;;  %v11683_v0 = vcombine.low %v6097_v63, %v6101_v2  ;;  %v11690_v12 = vcombine.high %v6104_v44, %v6108_v5  ;;  %v6148_v61 = vld [vmem:[%s16954_s9 + $0x870] sm:$0xff]  ;;  %v11721_v63 = vcombine.low %v6136_v47, %v6140_v49  ;;  %v6145_v2 = vld [vmem:[%s16954_s9 + $0x858] sm:$0xff] }
 0x5d9   : > { %9521 = vmatprep.subr.bf16.mxu1 %v11644_v13  ;;  %v11692_v13 = vcombine.high %v6105_v8, %v6109_v9 }
 0x5db   : > { %9350 = vmatpush1.bf16.msra.mxu0 %v11641_v35  ;;  %v11689_v35 = vcombine.low %v6104_v44, %v6108_v5  ;;  %v6156_v44 = vld [vmem:[%s16954_s9 + $0x8b0] sm:$0xff] }
 0x5dc   : > { %9522 = vmatpush1.bf16.msra.mxu1 %v11643_v21  ;;  %9351 = vmatprep.subr.bf16.mxu0 %v11650_v56  ;;  %v11691_v21 = vcombine.low %v6105_v8, %v6109_v9  ;;  %v11698_v56 = vcombine.high %v6112_v14, %v6116_v17  ;;  %v6153_v8 = vld [vmem:[%s16954_s9 + $0x898] sm:$0xff] }
 0x5dd   : > { %9523 = vmatprep.subr.bf16.mxu1 %v11652_v22  ;;  %v11700_v22 = vcombine.high %v6113_v18, %v6117_v20  ;;  %v6157_v9 = vld [vmem:[%s16954_s9 + $0x8b8] sm:$0xff] }
 0x5df   : > { %9352 = vmatpush1.bf16.msra.mxu0 %v11649_v28  ;;  %v11697_v28 = vcombine.low %v6112_v14, %v6116_v17  ;;  %v6160_v14 = vld [vmem:[%s16954_s9 + $0x8d0] sm:$0xff] }
 0x5e0   : > { %9524 = vmatpush1.bf16.msra.mxu1 %v11651_v31  ;;  %9353 = vmatprep.subr.bf16.mxu0 %v11658_v32  ;;  %v11699_v31 = vcombine.low %v6113_v18, %v6117_v20  ;;  %v11706_v32 = vcombine.high %v6120_v1, %v6124_v23  ;;  %v6164_v17 = vld [vmem:[%s16954_s9 + $0x8f0] sm:$0xff]  ;;  %v6165_v18 = vld [vmem:[%s16954_s9 + $0x8f8] sm:$0xff]  ;;  %v11739_v20 = vcombine.low %v6153_v8, %v6157_v9 }
 0x5e1   : > { %9525 = vmatprep.subr.bf16.mxu1 %v11660_v41  ;;  %v11708_v41 = vcombine.high %v6121_v27, %v6125_v36 }
 0x5e3   : > { %9354 = vmatpush1.bf16.msra.mxu0 %v11657_v53  ;;  %v11705_v53 = vcombine.low %v6120_v1, %v6124_v23  ;;  %v6169_v1 = vld [vmem:[%s16954_s9 + $0x918] sm:$0xff] }
 0x5e4   : > { %9526 = vmatpush1.bf16.msra.mxu1 %v11659_v38  ;;  %9355 = vmatprep.subr.bf16.mxu0 %v11666_v42  ;;  %v11707_v38 = vcombine.low %v6121_v27, %v6125_v36  ;;  %v11714_v42 = vcombine.high %v6128_v39, %v6132_v34  ;;  %v6173_v23 = vld [vmem:[%s16954_s9 + $0x938] sm:$0xff]  ;;  %v11745_v27 = vcombine.low %v6160_v14, %v6164_v17 }
 0x5e5   : > { %9527 = vmatprep.subr.bf16.mxu1 %v11668_v46  ;;  %v11716_v46 = vcombine.high %v6129_v45, %v6133_v37 }
 0x5e7   : > { %9356 = vmatpush1.bf16.msra.mxu0 %v11665_v55  ;;  %v11713_v55 = vcombine.low %v6128_v39, %v6132_v34  ;;  %v6177_v39 = vld [vmem:[%s16954_s9 + $0x958] sm:$0xff] }
 0x5e8   : > { %9528 = vmatpush1.bf16.msra.mxu1 %v11667_v57  ;;  %9357 = vmatprep.subr.bf16.mxu0 %v11674_v58  ;;  %v11715_v57 = vcombine.low %v6129_v45, %v6133_v37  ;;  %v11722_v58 = vcombine.high %v6136_v47, %v6140_v49  ;;  %v6181_v34 = vld [vmem:[%s16954_s9 + $0x978] sm:$0xff]  ;;  %v11755_v37 = vcombine.low %v6169_v1, %v6173_v23 }
 0x5e9   : > { %9529 = vmatprep.subr.bf16.mxu1 %v11676_v50  ;;  %v11724_v50 = vcombine.high %v6137_v52, %v6141_v43  ;;  %v6185_v47 = vld [vmem:[%s16954_s9 + $0x998] sm:$0xff] }
 0x5ea   : > { %v6189_v49 = vld [vmem:[%s16954_s9 + $0x9b8] sm:$0xff] }
 0x5eb   : > { %9358 = vmatpush1.bf16.msra.mxu0 %v11673_v3  ;;  %v6149_v3 = vld [vmem:[%s16954_s9 + $0x878] sm:$0xff] }
 0x5ec   : > { %9530 = vmatpush1.bf16.msra.mxu1 %v11675_v7  ;;  %9359 = vmatprep.subr.bf16.mxu0 %v11682_v60  ;;  %v11723_v7 = vcombine.low %v6137_v52, %v6141_v43  ;;  %v11730_v60 = vcombine.high %v6144_v59, %v6148_v61  ;;  %v11732_v5 = vcombine.high %v6145_v2, %v6149_v3 }
 0x5ed   : > { %9531 = vmatprep.subr.bf16.mxu1 %v11684_v4  ;;  %v6152_v4 = vld [vmem:[%s16954_s9 + $0x890] sm:$0xff]  ;;  %v11763_v43 = vcombine.low %v6177_v39, %v6181_v34 }
 0x5ef   : > { %9360 = vmatpush1.bf16.msra.mxu0 %v11681_v11  ;;  %v11729_v11 = vcombine.low %v6144_v59, %v6148_v61  ;;  %v6193_v59 = vld [vmem:[%s16954_s9 + $0x9d8] sm:$0xff] }
 0x5f0   : > { %9532 = vmatpush1.bf16.msra.mxu1 %v11683_v0  ;;  %9361 = vmatprep.subr.bf16.mxu0 %v11690_v12  ;;  %v11731_v0 = vcombine.low %v6145_v2, %v6149_v3  ;;  %v11738_v12 = vcombine.high %v6152_v4, %v6156_v44  ;;  %v6197_v61 = vld [vmem:[%s16954_s9 + $0x9f8] sm:$0xff]  ;;  %v11771_v2 = vcombine.low %v6185_v47, %v6189_v49 }
 0x5f1   : > { %9533 = vmatprep.subr.bf16.mxu1 %v11692_v13  ;;  %v11740_v13 = vcombine.high %v6153_v8, %v6157_v9  ;;  %v11779_v9 = vcombine.low %v6193_v59, %v6197_v61 }
 0x5f3   : > { %9362 = vmatpush1.bf16.msra.mxu0 %v11689_v35  ;;  %v11746_v35 = vcombine.high %v6160_v14, %v6164_v17  ;;  %v6209_v14 = vld [vmem:[%s16954_s9 + $0xa58] sm:$0xff] }
 0x5f4   : > { %9534 = vmatpush1.bf16.msra.mxu1 %v11691_v21  ;;  %9363 = vmatprep.subr.bf16.mxu0 %v11698_v56  ;;  %v6168_v56 = vld [vmem:[%s16954_s9 + $0x910] sm:$0xff]  ;;  %v6213_v17 = vld [vmem:[%s16954_s9 + $0xa78] sm:$0xff] }
 0x5f5   : > { %9535 = vmatprep.subr.bf16.mxu1 %v11700_v22  ;;  %v6172_v22 = vld [vmem:[%s16954_s9 + $0x930] sm:$0xff] }
 0x5f6   : > { %v11753_v45 = vcombine.low %v6168_v56, %v6172_v22 }
 0x5f7   : > { %9364 = vmatpush1.bf16.msra.mxu0 %v11697_v28  ;;  %v11754_v28 = vcombine.high %v6168_v56, %v6172_v22  ;;  %v6217_v56 = vld [vmem:[%s16954_s9 + $0xa98] sm:$0xff] }
 0x5f8   : > { %9536 = vmatpush1.bf16.msra.mxu1 %v11699_v31  ;;  %9365 = vmatprep.subr.bf16.mxu0 %v11706_v32  ;;  %v11756_v31 = vcombine.high %v6169_v1, %v6173_v23  ;;  %v6176_v32 = vld [vmem:[%s16954_s9 + $0x950] sm:$0xff]  ;;  %v6221_v22 = vld [vmem:[%s16954_s9 + $0xab8] sm:$0xff]  ;;  %v11795_v23 = vcombine.low %v6209_v14, %v6213_v17 }
 0x5f9   : > { %9537 = vmatprep.subr.bf16.mxu1 %v11708_v41  ;;  %v6180_v41 = vld [vmem:[%s16954_s9 + $0x970] sm:$0xff] }
 0x5fa   : > { %v11761_v52 = vcombine.low %v6176_v32, %v6180_v41 }
 0x5fb   : > { %9366 = vmatpush1.bf16.msra.mxu0 %v11705_v53  ;;  %v11762_v53 = vcombine.high %v6176_v32, %v6180_v41  ;;  %v6225_v32 = vld [vmem:[%s16954_s9 + $0xad8] sm:$0xff] }
 0x5fc   : > { %9538 = vmatpush1.bf16.msra.mxu1 %v11707_v38  ;;  %9367 = vmatprep.subr.bf16.mxu0 %v11714_v42  ;;  %v11764_v38 = vcombine.high %v6177_v39, %v6181_v34  ;;  %v6184_v42 = vld [vmem:[%s16954_s9 + $0x990] sm:$0xff]  ;;  %v6229_v41 = vld [vmem:[%s16954_s9 + $0xaf8] sm:$0xff]  ;;  %v11803_v34 = vcombine.low %v6217_v56, %v6221_v22 }
 0x5fd   : > { %9539 = vmatprep.subr.bf16.mxu1 %v11716_v46  ;;  %v6188_v46 = vld [vmem:[%s16954_s9 + $0x9b0] sm:$0xff] }
 0x5ff   : > { %9368 = vmatpush1.bf16.msra.mxu0 %v11713_v55  ;;  %v11770_v55 = vcombine.high %v6184_v42, %v6188_v46 }
 0x600   : > { %9540 = vmatpush1.bf16.msra.mxu1 %v11715_v57  ;;  %9380 = vmatprep.subr.bf16.mxu0 %v11722_v58  ;;  %v11772_v57 = vcombine.high %v6185_v47, %v6189_v49  ;;  %v6192_v58 = vld [vmem:[%s16954_s9 + $0x9d0] sm:$0xff]  ;;  %v11811_v49 = vcombine.low %v6225_v32, %v6229_v41 }
 0x601   : > { %9552 = vmatprep.subr.bf16.mxu1 %v11724_v50  ;;  %v6196_v50 = vld [vmem:[%s16954_s9 + $0x9f0] sm:$0xff] }
 0x602   : > { %9370 = vmatmul.mubr.bf16.vlgmr.msra.gmra.mrb[32].mxu0 %v15252_v48  ;;  %v11778_v3 = vcombine.high %v6192_v58, %v6196_v50  ;;  %v11777_v8 = vcombine.low %v6192_v58, %v6196_v50  ;;  %v6241_v58 = vld [vmem:[%s16954_s9 + $0xb58] sm:$0xff] }
 0x603   : > { %9542 = vmatmul.mubr.bf16.vlgmr.msra.gmra.mrb[32].mxu1 %v15252_v48  ;;  %9381 = vmatpush1.bf16.msra.mxu0 %v11721_v63  ;;  %v6161_v48 = vld [vmem:[%s16954_s9 + $0x8d8] sm:$0xff]  ;;  %v11769_v63 = vcombine.low %v6184_v42, %v6188_v46 }
 0x604   : > { %9412 = vmatprep.mubr.bf16.mxu0 %v15668_v25  ;;  %9553 = vmatpush1.bf16.msra.mxu1 %v11723_v7  ;;  %v11748_v21 = vcombine.high %v6161_v48, %v6165_v18  ;;  %v11747_v36 = vcombine.low %v6161_v48, %v6165_v18  ;;  %v11780_v7 = vcombine.high %v6193_v59, %v6197_v61  ;;  %v6233_v42 = vld [vmem:[%s16954_s9 + $0xb18] sm:$0xff] }
 0x605   : > { %9584 = vmatprep.mubr.bf16.mxu1 %v15668_v25  ;;  %9382 = vmatprep.subr.bf16.mxu0 %v11730_v60  ;;  %v11737_v25 = vcombine.low %v6152_v4, %v6156_v44  ;;  %v6200_v60 = vld [vmem:[%s16954_s9 + $0xa10] sm:$0xff]  ;;  %v6201_v44 = vld [vmem:[%s16954_s9 + $0xa18] sm:$0xff] }
 0x606   : > { %9554 = vmatprep.subr.bf16.mxu1 %v11732_v5  ;;  %v6204_v4 = vld [vmem:[%s16954_s9 + $0xa30] sm:$0xff]  ;;  %v6205_v5 = vld [vmem:[%s16954_s9 + $0xa38] sm:$0xff] }
 0x607   : > { %9383 = vmatpush1.bf16.msra.mxu0 %v11729_v11  ;;  %v11786_v11 = vcombine.high %v6200_v60, %v6204_v4  ;;  %v11785_v48 = vcombine.low %v6200_v60, %v6204_v4  ;;  %v11787_v18 = vcombine.low %v6201_v44, %v6205_v5  ;;  %v6237_v46 = vld [vmem:[%s16954_s9 + $0xb38] sm:$0xff] }
 0x608   : > { %9555 = vmatpush1.bf16.msra.mxu1 %v11731_v0  ;;  %9384 = vmatprep.subr.bf16.mxu0 %v11738_v12  ;;  %v11788_v0 = vcombine.high %v6201_v44, %v6205_v5  ;;  %v6208_v12 = vld [vmem:[%s16954_s9 + $0xa50] sm:$0xff]  ;;  %v6245_v50 = vld [vmem:[%s16954_s9 + $0xb78] sm:$0xff]  ;;  %v11819_v61 = vcombine.low %v6233_v42, %v6237_v46 }
 0x609   : > { %9556 = vmatprep.subr.bf16.mxu1 %v11740_v13  ;;  %v6212_v13 = vld [vmem:[%s16954_s9 + $0xa70] sm:$0xff]  ;;  %v6249_v60 = vld [vmem:[%s16954_s9 + $0xb98] sm:$0xff]  ;;  %v11827_v5 = vcombine.low %v6241_v58, %v6245_v50 }
 0x60a   : > { %v11793_v1 = vcombine.low %v6208_v12, %v6212_v13  ;;  %v6253_v4 = vld [vmem:[%s16954_s9 + $0xbb8] sm:$0xff] }
 0x60b   : > { %9385 = vmatpush1.bf16.msra.mxu0 %v11737_v25  ;;  %v11794_v25 = vcombine.high %v6208_v12, %v6212_v13  ;;  %v6257_v12 = vld [vmem:[%s16954_s9 + $0xbd8] sm:$0xff] }
 0x60c   : > { %9557 = vmatpush1.bf16.msra.mxu1 %v11739_v20  ;;  %9386 = vmatprep.subr.bf16.mxu0 %v11746_v35  ;;  %v11796_v20 = vcombine.high %v6209_v14, %v6213_v17  ;;  %v6216_v35 = vld [vmem:[%s16954_s9 + $0xa90] sm:$0xff]  ;;  %v6261_v13 = vld [vmem:[%s16954_s9 + $0xbf8] sm:$0xff]  ;;  %v11835_v17 = vcombine.low %v6249_v60, %v6253_v4 }
 0x60d   : > { %9558 = vmatprep.subr.bf16.mxu1 %v11748_v21  ;;  %v6220_v21 = vld [vmem:[%s16954_s9 + $0xab0] sm:$0xff] }
 0x60e   : > { %v11801_v39 = vcombine.low %v6216_v35, %v6220_v21 }
 0x60f   : > { %9387 = vmatpush1.bf16.msra.mxu0 %v11745_v27  ;;  %v11802_v27 = vcombine.high %v6216_v35, %v6220_v21  ;;  %v6265_v35 = vld [vmem:[%s16954_s9 + $0xc18] sm:$0xff] }
 0x610   : > { %9559 = vmatpush1.bf16.msra.mxu1 %v11747_v36  ;;  %9388 = vmatprep.subr.bf16.mxu0 %v11754_v28  ;;  %v11804_v36 = vcombine.high %v6217_v56, %v6221_v22  ;;  %v6224_v28 = vld [vmem:[%s16954_s9 + $0xad0] sm:$0xff]  ;;  %v6269_v21 = vld [vmem:[%s16954_s9 + $0xc38] sm:$0xff]  ;;  %v11843_v22 = vcombine.low %v6257_v12, %v6261_v13 }
 0x611   : > { %9560 = vmatprep.subr.bf16.mxu1 %v11756_v31  ;;  %v6228_v31 = vld [vmem:[%s16954_s9 + $0xaf0] sm:$0xff] }
 0x612   : > { %v11809_v47 = vcombine.low %v6224_v28, %v6228_v31 }
 0x613   : > { %9389 = vmatpush1.bf16.msra.mxu0 %v11753_v45  ;;  %v11810_v45 = vcombine.high %v6224_v28, %v6228_v31  ;;  %v6273_v31 = vld [vmem:[%s16954_s9 + $0xc58] sm:$0xff] }
 0x614   : > { %9561 = vmatpush1.bf16.msra.mxu1 %v11755_v37  ;;  %9390 = vmatprep.subr.bf16.mxu0 %v11762_v53  ;;  %v11812_v37 = vcombine.high %v6225_v32, %v6229_v41  ;;  %v6232_v53 = vld [vmem:[%s16954_s9 + $0xb10] sm:$0xff]  ;;  %v6277_v32 = vld [vmem:[%s16954_s9 + $0xc78] sm:$0xff]  ;;  %v11851_v41 = vcombine.low %v6265_v35, %v6269_v21 }
 0x615   : > { %9562 = vmatprep.subr.bf16.mxu1 %v11764_v38  ;;  %v6236_v38 = vld [vmem:[%s16954_s9 + $0xb30] sm:$0xff] }
 0x616   : > { %v11817_v59 = vcombine.low %v6232_v53, %v6236_v38 }
 0x617   : > { %9391 = vmatpush1.bf16.msra.mxu0 %v11761_v52  ;;  %v11818_v52 = vcombine.high %v6232_v53, %v6236_v38  ;;  %v6281_v53 = vld [vmem:[%s16954_s9 + $0xc98] sm:$0xff] }
 0x618   : > { %9563 = vmatpush1.bf16.msra.mxu1 %v11763_v43  ;;  %9392 = vmatprep.subr.bf16.mxu0 %v11770_v55  ;;  %v11820_v43 = vcombine.high %v6233_v42, %v6237_v46  ;;  %v6240_v55 = vld [vmem:[%s16954_s9 + $0xb50] sm:$0xff]  ;;  %v6285_v38 = vld [vmem:[%s16954_s9 + $0xcb8] sm:$0xff]  ;;  %v11859_v46 = vcombine.low %v6273_v31, %v6277_v32 }
 0x619   : > { %9564 = vmatprep.subr.bf16.mxu1 %v11772_v57  ;;  %v6244_v57 = vld [vmem:[%s16954_s9 + $0xb70] sm:$0xff] }
 0x61a   : > { %v11825_v44 = vcombine.low %v6240_v55, %v6244_v57 }
 0x61b   : > { %9393 = vmatpush1.bf16.msra.mxu0 %v11769_v63  ;;  %v11826_v63 = vcombine.high %v6240_v55, %v6244_v57  ;;  %v6293_v55 = vld [vmem:[%s16954_s9 + $0xcf8] sm:$0xff]  ;;  %v11867_v57 = vcombine.low %v6281_v53, %v6285_v38 }
 0x61c   : > { %9565 = vmatpush1.bf16.msra.mxu1 %v11771_v2  ;;  %9394 = vmatprep.subr.bf16.mxu0 %v11778_v3  ;;  %v11828_v2 = vcombine.high %v6241_v58, %v6245_v50  ;;  %v6248_v3 = vld [vmem:[%s16954_s9 + $0xb90] sm:$0xff] }
 0x61d   : > { %9566 = vmatprep.subr.bf16.mxu1 %v11780_v7  ;;  %v6252_v7 = vld [vmem:[%s16954_s9 + $0xbb0] sm:$0xff] }
 0x61e   : > { %v11833_v14 = vcombine.low %v6248_v3, %v6252_v7 }
 0x61f   : > { %9395 = vmatpush1.bf16.msra.mxu0 %v11777_v8  ;;  %v11834_v8 = vcombine.high %v6248_v3, %v6252_v7 }
 0x620   : > { %9567 = vmatpush1.bf16.msra.mxu1 %v11779_v9  ;;  %9396 = vmatprep.subr.bf16.mxu0 %v11786_v11  ;;  %v11836_v9 = vcombine.high %v6249_v60, %v6253_v4  ;;  %v6256_v11 = vld [vmem:[%s16954_s9 + $0xbd0] sm:$0xff] }
 0x621   : > { %9568 = vmatprep.subr.bf16.mxu1 %v11788_v0  ;;  %v6260_v0 = vld [vmem:[%s16954_s9 + $0xbf0] sm:$0xff] }
 0x622   : > { %v11841_v56 = vcombine.low %v6256_v11, %v6260_v0 }
 0x623   : > { %9397 = vmatpush1.bf16.msra.mxu0 %v11785_v48  ;;  %v11842_v48 = vcombine.high %v6256_v11, %v6260_v0 }
 0x624   : > { %9569 = vmatpush1.bf16.msra.mxu1 %v11787_v18  ;;  %9398 = vmatprep.subr.bf16.mxu0 %v11794_v25  ;;  %v11844_v18 = vcombine.high %v6257_v12, %v6261_v13  ;;  %v6264_v25 = vld [vmem:[%s16954_s9 + $0xc10] sm:$0xff] }
 0x625   : > { %9570 = vmatprep.subr.bf16.mxu1 %v11796_v20  ;;  %v6268_v20 = vld [vmem:[%s16954_s9 + $0xc30] sm:$0xff] }
 0x626   : > { %v11849_v28 = vcombine.low %v6264_v25, %v6268_v20 }
 0x627   : > { %9399 = vmatpush1.bf16.msra.mxu0 %v11793_v1  ;;  %v11850_v1 = vcombine.high %v6264_v25, %v6268_v20 }
 0x628   : > { %9571 = vmatpush1.bf16.msra.mxu1 %v11795_v23  ;;  %9400 = vmatprep.subr.bf16.mxu0 %v11802_v27  ;;  %v11852_v23 = vcombine.high %v6265_v35, %v6269_v21  ;;  %v6272_v27 = vld [vmem:[%s16954_s9 + $0xc50] sm:$0xff] }
 0x629   : > { %9572 = vmatprep.subr.bf16.mxu1 %v11804_v36  ;;  %v6276_v36 = vld [vmem:[%s16954_s9 + $0xc70] sm:$0xff] }
 0x62a   : > { %v11857_v42 = vcombine.low %v6272_v27, %v6276_v36 }
 0x62b   : > { %9401 = vmatpush1.bf16.msra.mxu0 %v11801_v39  ;;  %v11858_v39 = vcombine.high %v6272_v27, %v6276_v36 }
 0x62c   : > { %9573 = vmatpush1.bf16.msra.mxu1 %v11803_v34  ;;  %9402 = vmatprep.subr.bf16.mxu0 %v11810_v45  ;;  %v6280_v34 = vld [vmem:[%s16954_s9 + $0xc90] sm:$0xff] }
 0x62d   : > { %9574 = vmatprep.subr.bf16.mxu1 %v11812_v37  ;;  %v6284_v45 = vld [vmem:[%s16954_s9 + $0xcb0] sm:$0xff]  ;;  %v11860_v37 = vcombine.high %v6273_v31, %v6277_v32  ;;  %v6325_v31 = vld [vmem:[%s16954_s9 + $0xdf8] sm:$0xff] }
 0x62f   : > { %9403 = vmatpush1.bf16.msra.mxu0 %v11809_v47  ;;  %v11866_v47 = vcombine.high %v6280_v34, %v6284_v45 }
 0x630   : > { %9575 = vmatpush1.bf16.msra.mxu1 %v11811_v49  ;;  %9404 = vmatprep.subr.bf16.mxu0 %v11818_v52  ;;  %v11868_v49 = vcombine.high %v6281_v53, %v6285_v38  ;;  %v6288_v52 = vld [vmem:[%s16954_s9 + $0xcd0] sm:$0xff] }
 0x631   : > { %9576 = vmatprep.subr.bf16.mxu1 %v11820_v43  ;;  %v6292_v43 = vld [vmem:[%s16954_s9 + $0xcf0] sm:$0xff] }
 0x632   : > { %v11874_v58 = vcombine.high %v6288_v52, %v6292_v43  ;;  %v11873_v3 = vcombine.low %v6288_v52, %v6292_v43  ;;  %v6328_v52 = vld [vmem:[%s16954_s9 + $0xe10] sm:$0xff] }
 0x633   : > { %9405 = vmatpush1.bf16.msra.mxu0 %v11817_v59  ;;  %v6296_v59 = vld [vmem:[%s16954_s9 + $0xd10] sm:$0xff] }
 0x634   : > { %9577 = vmatpush1.bf16.msra.mxu1 %v11819_v61  ;;  %9406 = vmatprep.subr.bf16.mxu0 %v11826_v63  ;;  %v6300_v61 = vld [vmem:[%s16954_s9 + $0xd30] sm:$0xff]  ;;  %v6297_v63 = vld [vmem:[%s16954_s9 + $0xd18] sm:$0xff] }
 0x635   : > { %9578 = vmatprep.subr.bf16.mxu1 %v11828_v2  ;;  %v6301_v2 = vld [vmem:[%s16954_s9 + $0xd38] sm:$0xff]  ;;  %v11882_v60 = vcombine.high %v6296_v59, %v6300_v61  ;;  %v11881_v11 = vcombine.low %v6296_v59, %v6300_v61  ;;  %v6332_v43 = vld [vmem:[%s16954_s9 + $0xe30] sm:$0xff] }
 0x636   : > { %v11884_v4 = vcombine.high %v6297_v63, %v6301_v2  ;;  %v11883_v0 = vcombine.low %v6297_v63, %v6301_v2  ;;  %v6336_v59 = vld [vmem:[%s16954_s9 + $0xe50] sm:$0xff]  ;;  %v6337_v63 = vld [vmem:[%s16954_s9 + $0xe58] sm:$0xff] }
 0x637   : > { %9407 = vmatpush1.bf16.msra.mxu0 %v11825_v44  ;;  %v6304_v44 = vld [vmem:[%s16954_s9 + $0xd50] sm:$0xff]  ;;  %v6341_v2 = vld [vmem:[%s16954_s9 + $0xe78] sm:$0xff] }
 0x638   : > { %9579 = vmatpush1.bf16.msra.mxu1 %v11827_v5  ;;  %9408 = vmatprep.subr.bf16.mxu0 %v11834_v8  ;;  %v6308_v5 = vld [vmem:[%s16954_s9 + $0xd70] sm:$0xff]  ;;  %v6305_v8 = vld [vmem:[%s16954_s9 + $0xd58] sm:$0xff] }
 0x639   : > { %9580 = vmatprep.subr.bf16.mxu1 %v11836_v9  ;;  %v6309_v9 = vld [vmem:[%s16954_s9 + $0xd78] sm:$0xff]  ;;  %v11890_v12 = vcombine.high %v6304_v44, %v6308_v5  ;;  %v11889_v25 = vcombine.low %v6304_v44, %v6308_v5  ;;  %v6340_v61 = vld [vmem:[%s16954_s9 + $0xe70] sm:$0xff] }
 0x63a   : > { %v11892_v13 = vcombine.high %v6305_v8, %v6309_v9  ;;  %v11891_v20 = vcombine.low %v6305_v8, %v6309_v9  ;;  %v6344_v44 = vld [vmem:[%s16954_s9 + $0xe90] sm:$0xff]  ;;  %v6345_v8 = vld [vmem:[%s16954_s9 + $0xe98] sm:$0xff] }
 0x63b   : > { %9409 = vmatpush1.bf16.msra.mxu0 %v11833_v14  ;;  %v6312_v14 = vld [vmem:[%s16954_s9 + $0xd90] sm:$0xff]  ;;  %v6349_v9 = vld [vmem:[%s16954_s9 + $0xeb8] sm:$0xff] }
 0x63c   : > { %9581 = vmatpush1.bf16.msra.mxu1 %v11835_v17  ;;  %9410 = vmatprep.subr.bf16.mxu0 %v11842_v48  ;;  %v6316_v17 = vld [vmem:[%s16954_s9 + $0xdb0] sm:$0xff]  ;;  %v6313_v48 = vld [vmem:[%s16954_s9 + $0xd98] sm:$0xff] }
 0x63d   : > { %9582 = vmatprep.subr.bf16.mxu1 %v11844_v18  ;;  %v6317_v18 = vld [vmem:[%s16954_s9 + $0xdb8] sm:$0xff]  ;;  %v11898_v35 = vcombine.high %v6312_v14, %v6316_v17  ;;  %v6348_v5 = vld [vmem:[%s16954_s9 + $0xeb0] sm:$0xff] }
 0x63f   : > { %9411 = vmatpush1.bf16.msra.mxu0 %v11841_v56 }
 0x640   : > { %9583 = vmatpush1.bf16.msra.mxu1 %v11843_v22  ;;  %9423 = vmatprep.subr.bf16.mxu0 %v11850_v1  ;;  %v11900_v22 = vcombine.high %v6313_v48, %v6317_v18  ;;  %v6320_v1 = vld [vmem:[%s16954_s9 + $0xdd0] sm:$0xff] }
 0x641   : > { %9595 = vmatprep.subr.bf16.mxu1 %v11852_v23  ;;  %v6324_v23 = vld [vmem:[%s16954_s9 + $0xdf0] sm:$0xff] }
 0x642   : > { %9413 = vmatmul.mubr.bf16.vlgmr.msra.gmra.mrb[32].mxu0 %v15665_v19 }
 0x643   : > { %9585 = vmatmul.mubr.bf16.vlgmr.msra.gmra.mrb[32].mxu1 %v15665_v19  ;;  %9424 = vmatpush1.bf16.msra.mxu0 %v11849_v28  ;;  %v6289_v19 = vld [vmem:[%s16954_s9 + $0xcd8] sm:$0xff] }
 0x644   : > { %9455 = vmatprep.mubr.bf16.mxu0 %v15675_v54  ;;  %9596 = vmatpush1.bf16.msra.mxu1 %v11851_v41  ;;  %v11876_v50 = vcombine.high %v6289_v19, %v6293_v55  ;;  %v11875_v7 = vcombine.low %v6289_v19, %v6293_v55  ;;  %v6321_v28 = vld [vmem:[%s16954_s9 + $0xdd8] sm:$0xff] }
 0x645   : > { %9627 = vmatprep.mubr.bf16.mxu1 %v15675_v54  ;;  %9425 = vmatprep.subr.bf16.mxu0 %v11858_v39  ;;  %v11865_v54 = vcombine.low %v6280_v34, %v6284_v45  ;;  %v11897_v39 = vcombine.low %v6312_v14, %v6316_v17  ;;  %v11899_v34 = vcombine.low %v6313_v48, %v6317_v18  ;;  %v6329_v19 = vld [vmem:[%s16954_s9 + $0xe18] sm:$0xff]  ;;  %v6352_v14 = vld [vmem:[%s16954_s9 + $0xed0] sm:$0xff] }
 0x646   : > { %9597 = vmatprep.subr.bf16.mxu1 %v11860_v37  ;;  %v6333_v55 = vld [vmem:[%s16954_s9 + $0xe38] sm:$0xff]  ;;  %v6356_v17 = vld [vmem:[%s16954_s9 + $0xef0] sm:$0xff] }
 0x647   : > { %9426 = vmatpush1.bf16.msra.mxu0 %v11857_v42  ;;  %v11906_v42 = vcombine.high %v6320_v1, %v6324_v23  ;;  %v6353_v48 = vld [vmem:[%s16954_s9 + $0xed8] sm:$0xff] }
 0x648   : > { %9598 = vmatpush1.bf16.msra.mxu1 %v11859_v46  ;;  %9427 = vmatprep.subr.bf16.mxu0 %v11866_v47  ;;  %v6357_v18 = vld [vmem:[%s16954_s9 + $0xef8] sm:$0xff] }
 0x649   : > { %9599 = vmatprep.subr.bf16.mxu1 %v11868_v49  ;;  %v11908_v49 = vcombine.high %v6321_v28, %v6325_v31 }
 0x64b   : > { %9428 = vmatpush1.bf16.msra.mxu0 %v11865_v54  ;;  %v11905_v54 = vcombine.low %v6320_v1, %v6324_v23  ;;  %v6360_v1 = vld [vmem:[%s16954_s9 + $0xf10] sm:$0xff] }
 0x64c   : > { %9600 = vmatpush1.bf16.msra.mxu1 %v11867_v57  ;;  %9429 = vmatprep.subr.bf16.mxu0 %v11874_v58  ;;  %v11907_v57 = vcombine.low %v6321_v28, %v6325_v31  ;;  %v11914_v58 = vcombine.high %v6328_v52, %v6332_v43  ;;  %v6364_v23 = vld [vmem:[%s16954_s9 + $0xf30] sm:$0xff]  ;;  %v6361_v28 = vld [vmem:[%s16954_s9 + $0xf18] sm:$0xff] }
 0x64d   : > { %9601 = vmatprep.subr.bf16.mxu1 %v11876_v50  ;;  %v11916_v50 = vcombine.high %v6329_v19, %v6333_v55  ;;  %v6365_v31 = vld [vmem:[%s16954_s9 + $0xf38] sm:$0xff] }
 0x64f   : > { %9430 = vmatpush1.bf16.msra.mxu0 %v11873_v3  ;;  %v11913_v3 = vcombine.low %v6328_v52, %v6332_v43  ;;  %v6368_v52 = vld [vmem:[%s16954_s9 + $0xf50] sm:$0xff] }
 0x650   : > { %9602 = vmatpush1.bf16.msra.mxu1 %v11875_v7  ;;  %9431 = vmatprep.subr.bf16.mxu0 %v11882_v60  ;;  %v11915_v7 = vcombine.low %v6329_v19, %v6333_v55  ;;  %v11922_v60 = vcombine.high %v6336_v59, %v6340_v61  ;;  %v6372_v43 = vld [vmem:[%s16954_s9 + $0xf70] sm:$0xff]  ;;  %v6369_v19 = vld [vmem:[%s16954_s9 + $0xf58] sm:$0xff] }
 0x651   : > { %9603 = vmatprep.subr.bf16.mxu1 %v11884_v4  ;;  %v11924_v4 = vcombine.high %v6337_v63, %v6341_v2  ;;  %v6373_v55 = vld [vmem:[%s16954_s9 + $0xf78] sm:$0xff] }
 0x653   : > { %9432 = vmatpush1.bf16.msra.mxu0 %v11881_v11  ;;  %v11921_v11 = vcombine.low %v6336_v59, %v6340_v61  ;;  %v6376_v59 = vld [vmem:[%s16954_s9 + $0xf90] sm:$0xff] }
 0x654   : > { %9604 = vmatpush1.bf16.msra.mxu1 %v11883_v0  ;;  %9433 = vmatprep.subr.bf16.mxu0 %v11890_v12  ;;  %v11923_v0 = vcombine.low %v6337_v63, %v6341_v2  ;;  %v11930_v12 = vcombine.high %v6344_v44, %v6348_v5  ;;  %v6380_v61 = vld [vmem:[%s16954_s9 + $0xfb0] sm:$0xff]  ;;  %v6377_v63 = vld [vmem:[%s16954_s9 + $0xf98] sm:$0xff] }
 0x655   : > { %v16524_v21 = vpop.f32.mrb[28].mxu0  ;;  %v16526_v56 = vpop.f32.mrb[28].mxu1  ;;  %9605 = vmatprep.subr.bf16.mxu1 %v11892_v13  ;;  %v11932_v13 = vcombine.high %v6345_v8, %v6349_v9  ;;  %v6381_v2 = vld [vmem:[%s16954_s9 + $0xfb8] sm:$0xff] }
 0x656   : > { %v16534_v27 = vpop.f32.mrb[29].mxu0  ;;  %v16536_v36 = vpop.f32.mrb[29].mxu1 }
 0x657   : > { %v16544_v32 = vpop.f32.mrb[30].mxu0  ;;  %v16546_v41 = vpop.f32.mrb[30].mxu1  ;;  %9434 = vmatpush1.bf16.msra.mxu0 %v11889_v25  ;;  %v11929_v25 = vcombine.low %v6344_v44, %v6348_v5  ;;  %v6384_v44 = vld [vmem:[%s16954_s9 + $0xfd0] sm:$0xff] }
 0x658   : > { %v9638_v45 = vpack.c.bf16 %v16544_v32, %v16524_v21  ;;  %v9640_v37 = vpack.c.bf16 %v16546_v41, %v16526_v56  ;;  %9606 = vmatpush1.bf16.msra.mxu1 %v11891_v20  ;;  %v16552_v53 = vpop.f32.mrb[31].mxu0  ;;  %v16554_v38 = vpop.f32.mrb[31].mxu1  ;;  %9435 = vmatprep.subr.bf16.mxu0 %v11898_v35  ;;  %v11931_v20 = vcombine.low %v6345_v8, %v6349_v9  ;;  %v6388_v5 = vld [vmem:[%s16954_s9 + $0xff0] sm:$0xff]  ;;  %v6385_v8 = vld [vmem:[%s16954_s9 + $0xfd8] sm:$0xff]  ;;  %v16686_v41 = vld [vmem:[%s16955_s10] sm:$0xff] }
 0x659   : > { %v9639_v46 = vpack.c.bf16 %v16552_v53, %v16534_v27  ;;  %v9641_v47 = vpack.c.bf16 %v16554_v38, %v16536_v36  ;;  %9607 = vmatprep.subr.bf16.mxu1 %v11900_v22  ;;  %v11938_v35 = vcombine.high %v6352_v14, %v6356_v17  ;;  %v11940_v22 = vcombine.high %v6353_v48, %v6357_v18  ;;  %v6389_v9 = vld [vmem:[%s16954_s9 + $0xff8] sm:$0xff]  ;;  %v16675_v27 = vld [vmem:[%s16953_s8] sm:$0xff]  }
 0x65b   : > { %9436 = vmatpush1.bf16.msra.mxu0 %v11897_v39  ;;  %v11937_v39 = vcombine.low %v6352_v14, %v6356_v17  ;;  %v11969_v14 = vcombine.low %v6384_v44, %v6388_v5  ;;  %v11971_v17 = vcombine.low %v6385_v8, %v6389_v9 }
 0x65c   : > { %9608 = vmatpush1.bf16.msra.mxu1 %v11899_v34  ;;  %9437 = vmatprep.subr.bf16.mxu0 %v11906_v42  ;;  %v11939_v34 = vcombine.low %v6353_v48, %v6357_v18  ;;  %v11946_v42 = vcombine.high %v6360_v1, %v6364_v23  ;;  %v12649_v18 = vld [vmem:[%s16956_s11 + $0xc0] sm:$0xff]  }
 0x65d   : > { %9609 = vmatprep.subr.bf16.mxu1 %v11908_v49  ;;  %v11948_v49 = vcombine.high %v6361_v28, %v6365_v31 }
 0x65f   : > { %9438 = vmatpush1.bf16.msra.mxu0 %v11905_v54  ;;  %v11945_v54 = vcombine.low %v6360_v1, %v6364_v23  ;;  %v9663_v1 = vrot.slane %v16686_v41, %v13538_v51  ;;  %v12651_v23 = vld [vmem:[%s16956_s11 + $0x80] sm:$0xff]  }
 0x660   : > { %9610 = vmatpush1.bf16.msra.mxu1 %v11907_v57  ;;  %9439 = vmatprep.subr.bf16.mxu0 %v11914_v58  ;;  %v11947_v57 = vcombine.low %v6361_v28, %v6365_v31  ;;  %v11954_v58 = vcombine.high %v6368_v52, %v6372_v43  ;;  %v12652_v28 = vld [vmem:[%s16956_s11 + $0x48] sm:$0xff]  }
 0x661   : > { %9611 = vmatprep.subr.bf16.mxu1 %v11916_v50  ;;  %v11956_v50 = vcombine.high %v6369_v19, %v6373_v55 }
 0x663   : > { %9440 = vmatpush1.bf16.msra.mxu0 %v11913_v3  ;;  %v11953_v3 = vcombine.low %v6368_v52, %v6372_v43 }
 0x664   : > { %9612 = vmatpush1.bf16.msra.mxu1 %v11915_v7  ;;  %9441 = vmatprep.subr.bf16.mxu0 %v11922_v60  ;;  %v11955_v7 = vcombine.low %v6369_v19, %v6373_v55  ;;  %v11962_v60 = vcombine.high %v6376_v59, %v6380_v61 }
 0x665   : > { %9613 = vmatprep.subr.bf16.mxu1 %v11924_v4  ;;  %v11964_v4 = vcombine.high %v6377_v63, %v6381_v2 }
 0x667   : > { %9442 = vmatpush1.bf16.msra.mxu0 %v11921_v11  ;;  %v11961_v11 = vcombine.low %v6376_v59, %v6380_v61 }
 0x668   : > { %9614 = vmatpush1.bf16.msra.mxu1 %v11923_v0  ;;  %9443 = vmatprep.subr.bf16.mxu0 %v11930_v12  ;;  %v11963_v0 = vcombine.low %v6377_v63, %v6381_v2  ;;  %v11970_v12 = vcombine.high %v6384_v44, %v6388_v5  ;;  %v12655_v63 = vld [vmem:[%s16956_s11 + $0x88] sm:$0xff]   ;;  %v12656_v2 = vld [vmem:[%s16956_s11 + $0x50] sm:$0xff]  }
 0x669   : > { %9615 = vmatprep.subr.bf16.mxu1 %v11932_v13  ;;  %v11972_v13 = vcombine.high %v6385_v8, %v6389_v9  ;;  %v12657_v5 = vld [vmem:[%s16956_s11 + $0xd0] sm:$0xff]  }
 0x66b   : > { %9444 = vmatpush1.bf16.msra.mxu0 %v11929_v25  ;;  %v9651_v25 = vrot.slane %v16686_v41, %v13012_v62 }
 0x66c   : > { %9616 = vmatpush1.bf16.msra.mxu1 %v11931_v20  ;;  %9445 = vmatprep.subr.bf16.mxu0 %v11938_v35  ;;  %v9659_v20 = vrot.slane %v16686_v41, %v13056_v29  ;;  %v9655_v35 = vrot.slane %v16686_v41, %v12866_v26 }
 0x66d   : > { %9617 = vmatprep.subr.bf16.mxu1 %v11940_v22  ;;  %v12650_v22 = vld [vmem:[%s16956_s11] sm:$0xff]  }
 0x66f   : > { %9446 = vmatpush1.bf16.msra.mxu0 %v11937_v39  ;;  %v12653_v39 = vld [vmem:[%s16956_s11 + $0xc8] sm:$0xff]  }
 0x670   : > { %9618 = vmatpush1.bf16.msra.mxu1 %v11939_v34  ;;  %9447 = vmatprep.subr.bf16.mxu0 %v11946_v42 }
 0x671   : > { %9619 = vmatprep.subr.bf16.mxu1 %v11948_v49 }
 0x673   : > { %9448 = vmatpush1.bf16.msra.mxu0 %v11945_v54  ;;  %v12654_v54 = vld [vmem:[%s16956_s11 + $0x8] sm:$0xff]  }
 0x674   : > { %9620 = vmatpush1.bf16.msra.mxu1 %v11947_v57  ;;  %9449 = vmatprep.subr.bf16.mxu0 %v11954_v58 }
 0x675   : > { %9621 = vmatprep.subr.bf16.mxu1 %v11956_v50 }
 0x677   : > { %9450 = vmatpush1.bf16.msra.mxu0 %v11953_v3 }
 0x678   : > { %9622 = vmatpush1.bf16.msra.mxu1 %v11955_v7  ;;  %9451 = vmatprep.subr.bf16.mxu0 %v11962_v60 }
 0x679   : > { %9623 = vmatprep.subr.bf16.mxu1 %v11964_v4 }
 0x67b   : > { %9452 = vmatpush1.bf16.msra.mxu0 %v11961_v11 }
 0x67c   : > { %9624 = vmatpush1.bf16.msra.mxu1 %v11963_v0  ;;  %9453 = vmatprep.subr.bf16.mxu0 %v11970_v12 }
 0x67d   : > { %9625 = vmatprep.subr.bf16.mxu1 %v11972_v13  ;;  %v12658_v13 = vld [vmem:[%s16956_s11 + $0x10] sm:$0xff]  }
 0x67f   : > { %9454 = vmatpush1.bf16.msra.mxu0 %v11969_v14 }
 0x680   : > { %9626 = vmatpush1.bf16.msra.mxu1 %v11971_v17  ;;  %9688 = vmatprep.subr.bf16.mxu0 %v9639_v46 }
 0x681   : > { %9731 = vmatprep.subr.bf16.mxu1 %v9641_v47 }
 0x682   : > { %9456 = vmatmul.mubr.bf16.vlgmr.msra.gmra.mrb[32].mxu0 %v15670_v33 }
 0x683   : > { %9628 = vmatmul.mubr.bf16.vlgmr.msra.gmra.mrb[32].mxu1 %v15670_v33  ;;  %9689 = vmatpush1.bf16.msra.mxu0 %v9638_v45 }
 0x684   : > { %9732 = vmatpush1.bf16.msra.mxu1 %v9640_v37  ;;  %9720 = vmatprep.mubr.bf16.mxu0 %v12721_v6 }
 0x685   : > { %9763 = vmatprep.mubr.bf16.mxu1 %v12721_v6 }
 0x68a   : > { %11973 = vmatmul.mubr.msk.bf16.vlgmr.msra.gmra.mrb[36].mxu0 %vm5678_vm4, %v16675_v27 }
 0x68b   : > { %11974 = vmatmul.mubr.msk.bf16.vlgmr.msra.gmra.mrb[36].mxu1 %vm5678_vm4, %v16675_v27  ;;  %9806 = vmatprep.mubr.bf16.mxu0 %v12721_v6 }
 0x68c   : > { %9849 = vmatprep.mubr.bf16.mxu1 %v12721_v6  ;;  %v12648_v6 = vld [vmem:[%s16956_s11 + $0x40] sm:$0xff]  }
 0x755   : > { %v9457_v33 = vpop.f32.mrb[32].mxu0 }
 0x756   : > { %v9629_v21 = vpop.f32.mrb[32].mxu1  ;;  %v9459_v56 = vpop.f32.mrb[33].mxu0 }
 0x757   : > { %v9631_v36 = vpop.f32.mrb[33].mxu1  ;;  %v9461_v32 = vpop.f32.mrb[34].mxu0 }
 0x758   : > { %v9642_v45 = vpack.c.bf16 %v9461_v32, %v9457_v33  ;;  %v9633_v37 = vpop.f32.mrb[34].mxu1  ;;  %v9463_v53 = vpop.f32.mrb[35].mxu0  ;;  %v12659_v33 = vld [vmem:[%s16956_s11 + $0x90] sm:$0xff]   ;;  %v12661_v32 = vld [vmem:[%s16956_s11 + $0xd8] sm:$0xff]  }
 0x759   : > { %v9644_v38 = vpack.c.bf16 %v9633_v37, %v9629_v21  ;;  %v9643_v46 = vpack.c.bf16 %v9463_v53, %v9459_v56  ;;  %v9635_v47 = vpop.f32.mrb[35].mxu1  ;;  %v12660_v21 = vld [vmem:[%s16956_s11 + $0x58] sm:$0xff]  }
 0x75a   : > { %v9645_v48 = vpack.c.bf16 %v9635_v47, %v9631_v36  ;;  %v12662_v37 = vld [vmem:[%s16956_s11 + $0x18] sm:$0xff]   ;;  %v12666_v47 = vld [vmem:[%s16956_s11 + $0x20] sm:$0xff]  }
 0x75b   : > { %9774 = vmatprep.subr.bf16.mxu0 %v9643_v46  ;;  %v12663_v53 = vld [vmem:[%s16956_s11 + $0x98] sm:$0xff]   ;;  %v12665_v46 = vld [vmem:[%s16956_s11 + $0xe0] sm:$0xff]  }
 0x75c   : > { %9817 = vmatprep.subr.bf16.mxu1 %v9645_v48  ;;  %9775 = vmatpush1.bf16.msra.mxu0 %v9642_v45  ;;  %v12668_v48 = vld [vmem:[%s16956_s11 + $0x68] sm:$0xff]  }
 0x75d   : > { %9818 = vmatpush1.bf16.msra.mxu1 %v9644_v38  ;;  %12045 = vmatprep.subr.bf16.mxu0 %v12648_v6  ;;  %v9722_v31 = vpop.f32.mrb[36].mxu0  ;;  %v12664_v38 = vld [vmem:[%s16956_s11 + $0x60] sm:$0xff]  }
 0x75e   : > { %12067 = vmatprep.subr.bf16.mxu1 %v12649_v18  ;;  %v9723_v34 = vadd.f32 %v9722_v31, %v9651_v25  ;;  %v9765_v42 = vpop.f32.mrb[36].mxu1  ;;  %v9724_v49 = vpop.f32.mrb[37].mxu0  ;;  %v12667_v6 = vld [vmem:[%s16956_s11 + $0xa0] sm:$0xff]   ;;  %v12669_v18 = vld [vmem:[%s16956_s11 + $0xe8] sm:$0xff]   ;;  %v12677_v31 = vld [vmem:[%s16956_s11 + $0xf8] sm:$0xff]  }
 0x75f   : > { %11975 = vmatmul.mubr.msk.bf16.vlgmr.msra.gmra.mrb[40].mxu0 %vm5678_vm4, %v16675_v27  ;;  %v9766_v52 = vadd.f32 %v9765_v42, %v9659_v20  ;;  %v9725_v43 = vadd.f32 %v9724_v49, %v9655_v35  ;;  %v9767_v19 = vpop.f32.mrb[37].mxu1  ;;  %v9726_v55 = vpop.f32.mrb[38].mxu0  ;;  %v12680_v42 = vld [vmem:[%s16956_s11 + $0x140] sm:$0xff]  }
 0x760   : > { %11976 = vmatmul.mubr.msk.bf16.vlgmr.msra.gmra.mrb[40].mxu1 %vm5678_vm4, %v16675_v27  ;;  %12046 = vmatpush3.bf16.msra.mxu0 %v12650_v22  ;;  %v9860_v57 = vmax.f32 %v9723_v34, 0.0  ;;  %v9768_v58 = vadd.f32 %v9767_v19, %v9663_v1  ;;  %v9727_v50 = vadd.f32 %v9726_v55, %v9651_v25  ;;  %v9769_v59 = vpop.f32.mrb[38].mxu1  ;;  %v9728_v61 = vpop.f32.mrb[39].mxu0  ;;  %v12670_v25 = vld [vmem:[%s16956_s11 + $0x28] sm:$0xff]   ;;  %v12673_v22 = vld [vmem:[%s16956_s11 + $0xf0] sm:$0xff]   ;;  %v12679_v34 = vld [vmem:[%s16956_s11 + $0xb8] sm:$0xff]  }
 0x761   : > { %12068 = vmatpush3.bf16.msra.mxu1 %v12651_v23  ;;  %12047 = vmatprep.subr.bf16.mxu0 %v12652_v28  ;;  %v9862_v3 = vmax.f32 %v9766_v52, 0.0  ;;  %v9861_v7 = vmax.f32 %v9725_v43, 0.0  ;;  %v9770_v60 = vadd.f32 %v9769_v59, %v9659_v20  ;;  %v9729_v4 = vadd.f32 %v9728_v61, %v9655_v35  ;;  %v9771_v44 = vpop.f32.mrb[39].mxu1  ;;  %v12671_v20 = vld [vmem:[%s16956_s11 + $0xa8] sm:$0xff]   ;;  %v12672_v35 = vld [vmem:[%s16956_s11 + $0x70] sm:$0xff]   ;;  %v12676_v28 = vld [vmem:[%s16956_s11 + $0x78] sm:$0xff]  }
 0x762   : > { %12069 = vmatprep.subr.bf16.mxu1 %v12653_v39  ;;  %v9863_v8 = vmax.f32 %v9768_v58, 0.0  ;;  %v9868_v9 = vmax.f32 %v9727_v50, 0.0  ;;  %v9772_v11 = vadd.f32 %v9771_v44, %v9663_v1  ;;  %v12674_v1 = vld [vmem:[%s16956_s11 + $0x30] sm:$0xff]   ;;  %v12678_v39 = vld [vmem:[%s16956_s11 + $0x38] sm:$0xff]   ;;  %v12681_v49 = vld [vmem:[%s16956_s11 + $0x1c0] sm:$0xff]  }
 0x763   : > { %v9870_v0 = vmax.f32 %v9770_v60, 0.0  ;;  %v9869_v12 = vmax.f32 %v9729_v4, 0.0  ;;  %v12675_v23 = vld [vmem:[%s16956_s11 + $0xb0] sm:$0xff]   ;;  %v12682_v52 = vld [vmem:[%s16956_s11 + $0x100] sm:$0xff]   ;;  %v12684_v19 = vld [vmem:[%s16956_s11 + $0x148] sm:$0xff]  }
 0x764   : > { %12048 = vmatpush3.bf16.msra.mxu0 %v12654_v54  ;;  %v9876_v14 = vpack.c.bf16 %v9868_v9, %v9860_v57  ;;  %v9871_v17 = vmax.f32 %v9772_v11, 0.0  ;;  %v12683_v43 = vld [vmem:[%s16956_s11 + $0x180] sm:$0xff]   ;;  %v12685_v55 = vld [vmem:[%s16956_s11 + $0x1c8] sm:$0xff]   ;;  %v12688_v58 = vld [vmem:[%s16956_s11 + $0x150] sm:$0xff]  }
 0x765   : > { %12070 = vmatpush3.bf16.msra.mxu1 %v12655_v63  ;;  %12049 = vmatprep.subr.bf16.mxu0 %v12656_v2  ;;  %v9878_v56 = vpack.c.bf16 %v9870_v0, %v9862_v3  ;;  %v9877_v36 = vpack.c.bf16 %v9869_v12, %v9861_v7  ;;  %v12686_v54 = vld [vmem:[%s16956_s11 + $0x108] sm:$0xff]   ;;  %v12689_v50 = vld [vmem:[%s16956_s11 + $0x1d0] sm:$0xff]   ;;  %v12692_v63 = vld [vmem:[%s16956_s11 + $0x158] sm:$0xff]  }
 0x766   : > { %12071 = vmatprep.subr.bf16.mxu1 %v12657_v5  ;;  %v9879_v45 = vpack.c.bf16 %v9871_v17, %v9863_v8  ;;  %v12687_v57 = vld [vmem:[%s16956_s11 + $0x188] sm:$0xff]   ;;  %v12690_v59 = vld [vmem:[%s16956_s11 + $0x110] sm:$0xff]   ;;  %v12693_v2 = vld [vmem:[%s16956_s11 + $0x1d8] sm:$0xff]  }
 0x767   : > { %10428 = vmatprep.mubr.bf16.mxu0 %v9877_v36  ;;  %v12691_v61 = vld [vmem:[%s16956_s11 + $0x190] sm:$0xff]   ;;  %v12694_v3 = vld [vmem:[%s16956_s11 + $0x118] sm:$0xff]   ;;  %v12696_v60 = vld [vmem:[%s16956_s11 + $0x160] sm:$0xff]  }
 0x768   : > { %12050 = vmatpush3.bf16.msra.mxu0 %v12658_v13  ;;  %10469 = vmatprep.mubr.bf16.mxu1 %v9879_v45  ;;  %v12695_v7 = vld [vmem:[%s16956_s11 + $0x198] sm:$0xff]   ;;  %v12697_v4 = vld [vmem:[%s16956_s11 + $0x1e0] sm:$0xff]   ;;  %v12700_v8 = vld [vmem:[%s16956_s11 + $0x168] sm:$0xff]   ;;  %v9675_v45 = vrot.slane %v16686_v41, %v14099_v40 }
 0x769   : > { %12072 = vmatpush3.bf16.msra.mxu1 %v12659_v33  ;;  %12051 = vmatprep.subr.bf16.mxu0 %v12660_v21  ;;  %v12698_v44 = vld [vmem:[%s16956_s11 + $0x120] sm:$0xff]   ;;  %v12701_v9 = vld [vmem:[%s16956_s11 + $0x1e8] sm:$0xff]   ;;  %v12704_v12 = vld [vmem:[%s16956_s11 + $0x170] sm:$0xff]  }
 0x76a   : > { %12073 = vmatprep.subr.bf16.mxu1 %v12661_v32  ;;  %v12699_v5 = vld [vmem:[%s16956_s11 + $0x1a0] sm:$0xff]   ;;  %v12702_v11 = vld [vmem:[%s16956_s11 + $0x128] sm:$0xff]   ;;  %v12705_v13 = vld [vmem:[%s16956_s11 + $0x1f0] sm:$0xff]   ;;  %v9667_v32 = vrot.slane %v16686_v41, %v13913_v24 }
 0x76b   : > { %v12703_v0 = vld [vmem:[%s16956_s11 + $0x1a8] sm:$0xff]   ;;  %v12707_v17 = vld [vmem:[%s16956_s11 + $0x1b0] sm:$0xff]   ;;  %v12708_v33 = vld [vmem:[%s16956_s11 + $0x178] sm:$0xff]  }
 0x76c   : > { %12052 = vmatpush3.bf16.msra.mxu0 %v12662_v37  ;;  %v12709_v21 = vld [vmem:[%s16956_s11 + $0x1f8] sm:$0xff]   ;;  %v9671_v37 = vrot.slane %v16686_v41, %v13752_v16 }
 0x76d   : > { %12074 = vmatpush3.bf16.msra.mxu1 %v12663_v53  ;;  %12053 = vmatprep.subr.bf16.mxu0 %v12664_v38  ;;  %v12711_v36 = vld [vmem:[%s16956_s11 + $0x1b8] sm:$0xff]   ;;  %v9679_v53 = vrot.slane %v16686_v41, %v13922_v30 }
 0x76e   : > { %12075 = vmatprep.subr.bf16.mxu1 %v12665_v46 }
 0x770   : > { %12054 = vmatpush3.bf16.msra.mxu0 %v12666_v47 }
 0x771   : > { %12076 = vmatpush3.bf16.msra.mxu1 %v12667_v6  ;;  %12055 = vmatprep.subr.bf16.mxu0 %v12668_v48 }
 0x772   : > { %12077 = vmatprep.subr.bf16.mxu1 %v12669_v18 }
 0x774   : > { %12056 = vmatpush3.bf16.msra.mxu0 %v12670_v25 }
 0x775   : > { %12078 = vmatpush3.bf16.msra.mxu1 %v12671_v20  ;;  %12057 = vmatprep.subr.bf16.mxu0 %v12672_v35 }
 0x776   : > { %12079 = vmatprep.subr.bf16.mxu1 %v12673_v22 }
 0x778   : > { %12058 = vmatpush3.bf16.msra.mxu0 %v12674_v1 }
 0x779   : > { %12080 = vmatpush3.bf16.msra.mxu1 %v12675_v23  ;;  %12059 = vmatprep.subr.bf16.mxu0 %v12676_v28 }
 0x77a   : > { %12081 = vmatprep.subr.bf16.mxu1 %v12677_v31 }
 0x77c   : > { %12060 = vmatpush3.bf16.msra.mxu0 %v12678_v39 }
 0x77d   : > { %12082 = vmatpush3.bf16.msra.mxu1 %v12679_v34  ;;  %12089 = vmatprep.subr.bf16.mxu0 %v12680_v42 }
 0x77e   : > { %12111 = vmatprep.subr.bf16.mxu1 %v12681_v49 }
 0x77f   : > { %10429 = vmatmul.mubr.bf16.vlgmr.msra.gmra.mrb[44].mxu0 %v9876_v14  ;;  %v12706_v14 = vld [vmem:[%s16956_s11 + $0x130] sm:$0xff]  }
 0x780   : > { %10470 = vmatmul.mubr.bf16.vlgmr.msra.gmra.mrb[44].mxu1 %v9878_v56  ;;  %12090 = vmatpush3.bf16.msra.mxu0 %v12682_v52  ;;  %v12710_v56 = vld [vmem:[%s16956_s11 + $0x138] sm:$0xff]  }
 0x781   : > { %12112 = vmatpush3.bf16.msra.mxu1 %v12683_v43  ;;  %12091 = vmatprep.subr.bf16.mxu0 %v12684_v19 }
 0x782   : > { %12113 = vmatprep.subr.bf16.mxu1 %v12685_v55 }
 0x784   : > { %12092 = vmatpush3.bf16.msra.mxu0 %v12686_v54 }
 0x785   : > { %12114 = vmatpush3.bf16.msra.mxu1 %v12687_v57  ;;  %12093 = vmatprep.subr.bf16.mxu0 %v12688_v58 }
 0x786   : > { %12115 = vmatprep.subr.bf16.mxu1 %v12689_v50 }
 0x788   : > { %12094 = vmatpush3.bf16.msra.mxu0 %v12690_v59 }
 0x789   : > { %12116 = vmatpush3.bf16.msra.mxu1 %v12691_v61  ;;  %12095 = vmatprep.subr.bf16.mxu0 %v12692_v63 }
 0x78a   : > { %12117 = vmatprep.subr.bf16.mxu1 %v12693_v2 }
 0x78c   : > { %12096 = vmatpush3.bf16.msra.mxu0 %v12694_v3 }
 0x78d   : > { %12118 = vmatpush3.bf16.msra.mxu1 %v12695_v7  ;;  %12097 = vmatprep.subr.bf16.mxu0 %v12696_v60 }
 0x78e   : > { %12119 = vmatprep.subr.bf16.mxu1 %v12697_v4 }
 0x790   : > { %12098 = vmatpush3.bf16.msra.mxu0 %v12698_v44 }
 0x791   : > { %12120 = vmatpush3.bf16.msra.mxu1 %v12699_v5  ;;  %12099 = vmatprep.subr.bf16.mxu0 %v12700_v8 }
 0x792   : > { %12121 = vmatprep.subr.bf16.mxu1 %v12701_v9  ;;  %v12722_v9 = vmov 0.0  }
 0x794   : > { %12100 = vmatpush3.bf16.msra.mxu0 %v12702_v11 }
 0x795   : > { %12122 = vmatpush3.bf16.msra.mxu1 %v12703_v0  ;;  %12101 = vmatprep.subr.bf16.mxu0 %v12704_v12 }
 0x796   : > { %12123 = vmatprep.subr.bf16.mxu1 %v12705_v13 }
 0x798   : > { %12102 = vmatpush3.bf16.msra.mxu0 %v12706_v14 }
 0x799   : > { %12124 = vmatpush3.bf16.msra.mxu1 %v12707_v17  ;;  %12103 = vmatprep.subr.bf16.mxu0 %v12708_v33 }
 0x79a   : > { %12125 = vmatprep.subr.bf16.mxu1 %v12709_v21 }
 0x79c   : > { %12104 = vmatpush3.bf16.msra.mxu0 %v12710_v56 }
 0x79d   : > { %12126 = vmatpush3.bf16.msra.mxu1 %v12711_v36  ;;  %12135 = vmatprep.subr.bf16.mxu0 %v12722_v9 }
 0x832   : > { %v9808_v38 = vpop.f32.mrb[40].mxu0 }
 0x833   : > { %v9809_v46 = vadd.f32 %v9808_v38, %v9667_v32  ;;  %v9851_v47 = vpop.f32.mrb[40].mxu1  ;;  %v9810_v6 = vpop.f32.mrb[41].mxu0 }
 0x834   : > { %v9852_v48 = vadd.f32 %v9851_v47, %v9675_v45  ;;  %v9811_v18 = vadd.f32 %v9810_v6, %v9671_v37  ;;  %v9853_v25 = vpop.f32.mrb[41].mxu1  ;;  %v9812_v20 = vpop.f32.mrb[42].mxu0  ;;  %v12041_v6 = vld [vmem:[%s16957_s12] ss:$0 sm:$0xff] }
 0x835   : > { %v9854_v35 = vadd.f32 %v9853_v25, %v9679_v53  ;;  %v9813_v22 = vadd.f32 %v9812_v20, %v9667_v32  ;;  %v9855_v24 = vpop.f32.mrb[42].mxu1  ;;  %v9814_v1 = vpop.f32.mrb[43].mxu0  ;;  %v9864_v16 = vmax.f32 %v9809_v46, 0.0 }
 0x836   : > { %v9866_v23 = vmax.f32 %v9852_v48, 0.0  ;;  %v9856_v40 = vadd.f32 %v9855_v24, %v9675_v45  ;;  %v9815_v28 = vadd.f32 %v9814_v1, %v9671_v37  ;;  %v9857_v31 = vpop.f32.mrb[43].mxu1  ;;  %v9865_v41 = vmax.f32 %v9811_v18, 0.0 }
 0x837   : > { %v9867_v39 = vmax.f32 %v9854_v35, 0.0  ;;  %v9872_v34 = vmax.f32 %v9813_v22, 0.0  ;;  %v9858_v30 = vadd.f32 %v9857_v31, %v9679_v53  ;;  %v10614_v31 = vld [vmem:[%s16958_s13 + $0x18] sm:$0xff] }
 0x838   : > { %v9874_v42 = vmax.f32 %v9856_v40, 0.0  ;;  %v9873_v49 = vmax.f32 %v9815_v28, 0.0  ;;  %v10613_v28 = vld [vmem:[%s16958_s13 + $0x10] sm:$0xff] }
 0x839   : > { %v9880_v52 = vpack.c.bf16 %v9872_v34, %v9864_v16  ;;  %v9875_v43 = vmax.f32 %v9858_v30, 0.0  ;;  %v10615_v16 = vld [vmem:[%s16958_s13 + $0x20] sm:$0xff]  ;;  %v10617_v34 = vld [vmem:[%s16958_s13 + $0x30] sm:$0xff]  ;;  %v10618_v30 = vld [vmem:[%s16958_s13 + $0x38] sm:$0xff] }
 0x83a   : > { %v9882_v19 = vpack.c.bf16 %v9874_v42, %v9866_v23  ;;  %v9881_v55 = vpack.c.bf16 %v9873_v49, %v9865_v41  ;;  %v10611_v23 = vld [vmem:[%s16958_s13] sm:$0xff] }
 0x83b   : > { %v9883_v54 = vpack.c.bf16 %v9875_v43, %v9867_v39  ;;  %v10616_v39 = vld [vmem:[%s16958_s13 + $0x28] sm:$0xff] }
 0x83c   : > { %10510 = vmatprep.mubr.bf16.mxu0 %v9881_v55 }
 0x83d   : > { %10551 = vmatprep.mubr.bf16.mxu1 %v9883_v54  ;;  %10511 = vmatmul.mubr.bf16.vlgmr.msra.gmra.mrb[48].mxu0 %v9880_v52 }
 0x83e   : > { %10552 = vmatmul.mubr.bf16.vlgmr.msra.gmra.mrb[48].mxu1 %v9882_v19  ;;  %12137 = vmatprep.mubr.msk.bf16.mxu0 %vm12723_vm5, %v12722_v9  ;;  %v12724_v9 = vmov 1966171168  }
 0x852   : > { %v12061_v57 = vpop.f32.mrb[44].mxu0 }
 0x853   : > { %v12083_v58 = vpop.f32.mrb[44].mxu1  ;;  %v12062_v50 = vpop.f32.mrb[45].mxu0 }
 0x854   : > { %v12063_v59 = vadd.f32 %v12062_v50, %v12061_v57  ;;  %v12084_v61 = vpop.f32.mrb[45].mxu1  ;;  %v12064_v63 = vpop.f32.mrb[46].mxu0 }
 0x855   : > { %v12085_v2 = vadd.f32 %v12084_v61, %v12083_v58  ;;  %v12086_v3 = vpop.f32.mrb[46].mxu1  ;;  %v12065_v7 = vpop.f32.mrb[47].mxu0 }
 0x856   : > { %v12066_v60 = vadd.f32 %v12065_v7, %v12064_v63  ;;  %v12087_v4 = vpop.f32.mrb[47].mxu1 }
 0x857   : > { %v10472_v44 = vadd.f32 %v12085_v2, %v12063_v59  ;;  %v12088_v5 = vadd.f32 %v12087_v4, %v12086_v3 }
 0x859   : > { %v10475_v8 = vadd.f32 %v12088_v5, %v12066_v60  ;;  %v10665_v60 = vld [vmem:[%s16959_s14] sm:$0xf] }
 0x910   : > { %v12105_v11 = vpop.f32.mrb[48].mxu0 }
 0x911   : > { %v12127_v0 = vpop.f32.mrb[48].mxu1  ;;  %v12106_v12 = vpop.f32.mrb[49].mxu0 }
 0x912   : > { %v12107_v13 = vadd.f32 %v12106_v12, %v12105_v11  ;;  %v12128_v14 = vpop.f32.mrb[49].mxu1  ;;  %v12108_v17 = vpop.f32.mrb[50].mxu0  ;;  %v10698_v11 = vunpack.c.l.s4 %v12724_v9 }
 0x913   : > { %v12129_v33 = vadd.f32 %v12128_v14, %v12127_v0  ;;  %v12130_v21 = vpop.f32.mrb[50].mxu1  ;;  %v12109_v56 = vpop.f32.mrb[51].mxu0 }
 0x914   : > { %v10513_v36 = vadd.f32 %v12107_v13, %v10472_v44  ;;  %v12110_v32 = vadd.f32 %v12109_v56, %v12108_v17  ;;  %v12131_v45 = vpop.f32.mrb[51].mxu1  ;;  %v10670_v17 = vrot.slane %v10665_v60, %v13012_v62 }
 0x915   : > { %v12132_v37 = vadd.f32 %v12131_v45, %v12130_v21  ;;  %v10678_v45 = vrot.slane %v10665_v60, %v13056_v29 }
 0x916   : > { %v10554_v53 = vadd.f32 %v12129_v33, %v10513_v36  ;;  %v10516_v38 = vadd.f32 %v12110_v32, %v10475_v8  ;;  %v10674_v32 = vrot.slane %v10665_v60, %v12866_v26 }
 0x918   : > { %v10557_v46 = vadd.f32 %v12132_v37, %v10516_v38  ;;  %v10682_v37 = vrot.slane %v10665_v60, %v13538_v51 }
 0x91a   : > { %v10560_v47 = vpack.c.bf16 %v10557_v46, %v10554_v53  ;;  %v10699_v53 = vunpack.c.0.s8 %v10698_v11 }
 0x91c   : > { %12136 = vmatpush3.bf16.msra.mxu0 %v10560_v47 }
 0x91f   : > { %12138 = vmatmul.mubr.msk.bf16.vlgmr.msra.gmra.mrb[52].mxu0 %vm5678_vm4, %v16675_v27  ;;  %v10612_v27 = vld [vmem:[%s16958_s13 + $0x8] sm:$0xff] }
 0x9f2   : > { %v10602_v48 = vpop.f32.mrb[52].mxu0 }
 0x9f3   : > { %v10603_v18 = vadd.f32 %v12041_v6, %v10602_v48  ;;  %v12139_v25 = vpop.f32.mrb[53].mxu0 }
 0x9f4   : > { %v10605_v20 = vpop.f32.mrb[54].mxu0 }
 0x9f5   : > { %v10609_v35 = vmax.f32 %v10603_v18, 0.0  ;;  %v10606_v22 = vadd.f32 %v12041_v6, %v10605_v20  ;;  %v12140_v24 = vpop.f32.mrb[55].mxu0  ;;  %v10702_v20 = vsub.s32 %v10699_v53, %v12842_v15 }
 0x9f7   : > { %10621 = vperm.xlu0 %12270, %v10609_v35   ;;  %v10610_v1 = vmax.f32 %v10606_v22, 0.0 }
 0x9fb   : > { %10626 = vperm.xlu0 %12270, %v10610_v1  }
 0xa76   : > { %v10622_v40 = vpop.permute.xlu0 %10621 }
 0xa77   : > { %v10629_v41 = vmul.f32 %v10622_v40, %v10611_v23  ;;  %v10630_v42 = vmul.f32 %v10622_v40, %v10612_v27  ;;  %v10631_v49 = vmul.f32 %v10622_v40, %v10613_v28  ;;  %v10632_v52 = vmul.f32 %v10622_v40, %v10614_v31 }
 0xa7a   : > { %v10627_v43 = vpop.permute.xlu0 %10626 }
 0xa7b   : > { %v10633_v19 = vmul.f32 %v10627_v43, %v10615_v16  ;;  %v10634_v55 = vmul.f32 %v10627_v43, %v10616_v39  ;;  %v10635_v54 = vmul.f32 %v10627_v43, %v10617_v34  ;;  %v10636_v57 = vmul.f32 %v10627_v43, %v10618_v30 }
 0xa7d   : > { %v10637_v58 = vadd.f32 %v10633_v19, %v10629_v41  ;;  %v10644_v50 = vadd.f32 %v10634_v55, %v10630_v42  ;;  %v10651_v59 = vadd.f32 %v10635_v54, %v10631_v49  ;;  %v10658_v61 = vadd.f32 %v10636_v57, %v10632_v52 }
 0xa7f   : > { %v10638_v63 = vrot.slane %v10637_v58, 4  ;;  %v10645_v2 = vrot.slane %v10644_v50, 4  ;;  %v10652_v3 = vrot.slane %v10651_v59, 4  ;;  %v10659_v7 = vrot.slane %v10658_v61, 4 }
 0xa81   : > { %v10639_v4 = vadd.f32 %v10638_v63, %v10637_v58  ;;  %v10646_v44 = vadd.f32 %v10645_v2, %v10644_v50  ;;  %v10653_v5 = vadd.f32 %v10652_v3, %v10651_v59  ;;  %v10660_v8 = vadd.f32 %v10659_v7, %v10658_v61 }
 0xa83   : > { %v10640_v0 = vrot.slane %v10639_v4, 2  ;;  %v10647_v12 = vrot.slane %v10646_v44, 2  ;;  %v10654_v13 = vrot.slane %v10653_v5, 2  ;;  %v10661_v14 = vrot.slane %v10660_v8, 2 }
 0xa85   : > { %v10641_v33 = vadd.f32 %v10640_v0, %v10639_v4  ;;  %v10648_v21 = vadd.f32 %v10647_v12, %v10646_v44  ;;  %v10655_v56 = vadd.f32 %v10654_v13, %v10653_v5  ;;  %v10662_v36 = vadd.f32 %v10661_v14, %v10660_v8 }
 0xa87   : > { %v10642_v38 = vrot.slane %v10641_v33, 1  ;;  %v10649_v46 = vrot.slane %v10648_v21, 1  ;;  %v10656_v47 = vrot.slane %v10655_v56, 1  ;;  %v10663_v6 = vrot.slane %v10662_v36, 1 }
 0xa89   : > { %v10643_v48 = vadd.f32 %v10642_v38, %v10641_v33  ;;  %v10650_v18 = vadd.f32 %v10649_v46, %v10648_v21  ;;  %v10657_v25 = vadd.f32 %v10656_v47, %v10655_v56  ;;  %v10664_v62 = vadd.f32 %v10663_v6, %v10662_v36 }
 0xa8b   : > { %v10687_v35 = vadd.f32 %v10670_v17, %v10643_v48  ;;  %v10688_v22 = vadd.f32 %v10674_v32, %v10650_v18  ;;  %v10689_v24 = vadd.f32 %v10678_v45, %v10657_v25  ;;  %v10690_v26 = vadd.f32 %v10682_v37, %v10664_v62 }
 0xa8d   : > { %v10695_v1 = vcombine.low %v10687_v35, %v10688_v22  ;;  %v10696_v29 = vcombine.low %v10689_v24, %v10690_v26 }
 0xa8f   : > { %v10703_v51 = vrot.slane %v10695_v1, %v10702_v20  ;;  %v10710_v23 = vrot.slane %v10696_v29, %v10702_v20 }
 0xa91   : > { %v10711_v27 = vcombine.low %v10703_v51, %v10710_v23 }
 0xa93   : > { %v10718_v40 = vrot.slane %v10711_v27, %v10702_v20 }
 0xa95   : > { %10724 = vst.msk [vmem:[%s489_s25] sm:$0xf] %vm10722_vm6, %v10718_v40 }
 0xa96 PF: > { %s25_s18 = sadd.s32 1, %s12719_s18  }
 0xa97   : > { %p22_p4 = scmp.ge.s32.totalorder %s25_s18, 10  }
 0xa99   :  { %24 = sbr.rel (!%p22_p4) target bundleno = 1 (0x1), region = 110 }

</bundles_post_ra>
